<compile_context>
chip_gen: v5e
topology: v5e:2x2
jax: 0.10.0
libtpu: 0.0.40
codegen_flags: <defaults>
</compile_context>

<pallas_src>
import jax
import jax.numpy as jnp
from jax import lax
from jax.experimental import pallas as pl
from jax.experimental.pallas import tpu as pltpu


def _round_up(x, m):
    return (x + m - 1) // m * m


def _row_tile(r, cap=512):
    for t in (512, 256, 128, 64, 32, 16, 8):
        if t <= cap and r % t == 0:
            return t
    return r


def _apply_act(v, mode):
    if mode is None:
        return v
    if mode == "relu":
        return jnp.maximum(v, 0.0)
    if mode == "tanh":
        return jnp.tanh(v)
    raise ValueError(mode)


# --------------------------------------------------------------------------------------
# Batched GEMM kernel: (P, M, K) x (P, K, N); bf16 operands on the MXU, f32 accumulation,
# FULL-K blocks (no K grid axis, no scratch, no pl.when).  Output is bf16.  Optionally:
#   * stats=True  -> per-M-tile BN partials (sum, sum_sq) computed from the f32 result,
#   * bias/act    -> fused bias-add + activation in the finalize (non-BN layers).
# --------------------------------------------------------------------------------------

def _make_gemm_kernel(stats, has_bias, act):
    if stats:
        def kernel(a_ref, b_ref, y_ref, part_ref):
            acc = jnp.dot(a_ref[...], b_ref[...], preferred_element_type=jnp.float32)
            y_ref[...] = acc.astype(y_ref.dtype)
            # Two row stores; rows 2..7 of the partials block are never read host-side.
            part_ref[0:1, :] = jnp.sum(acc, axis=0, keepdims=True)
            part_ref[1:2, :] = jnp.sum(acc * acc, axis=0, keepdims=True)
        return kernel
    if has_bias:
        def kernel(a_ref, b_ref, bias_ref, y_ref):
            acc = jnp.dot(a_ref[...], b_ref[...], preferred_element_type=jnp.float32)
            y_ref[...] = _apply_act(acc + bias_ref[...], act).astype(y_ref.dtype)
        return kernel

    def kernel(a_ref, b_ref, y_ref):
        acc = jnp.dot(a_ref[...], b_ref[...], preferred_element_type=jnp.float32)
        y_ref[...] = _apply_act(acc, act).astype(y_ref.dtype)
    return kernel


def pallas_gemm(a, b, *, stats=False, bias=None, act=None):
    """a: (P, M, K), b: (P, K, N) -> (y (P, Mp, Np) bf16, partials (P, mt, 8, Np) f32 | None)."""
    P, M, K = a.shape
    _, _, N = b.shape
    Kp = _round_up(K, 128)
    Np = _round_up(N, 128)
    TN = 256 if Np % 256 == 0 else 128
    # Full-K A tile capped at ~4 MiB; for this model Kp <= 1024 so the cap never binds at TM=512.
    tm_cap = max(8, min(512, ((4 * 1024 * 1024) // (Kp * 2)) // 8 * 8))
    TM = min(tm_cap, _round_up(M, 8))
    Mp = _round_up(M, TM)
    mt, nt = Mp // TM, Np // TN

    a_p = jnp.pad(a.astype(jnp.bfloat16), ((0, 0), (0, Mp - M), (0, Kp - K)))
    b_p = jnp.pad(b.astype(jnp.bfloat16), ((0, 0), (0, Kp - K), (0, Np - N)))

    in_arrays = [a_p, b_p]
    in_specs = [pl.BlockSpec((None, TM, Kp), lambda p, i, j: (p, i, 0)),
                pl.BlockSpec((None, Kp, TN), lambda p, i, j: (p, 0, j))]
    if bias is not None:
        bias_p = jnp.pad(bias.astype(jnp.float32), (0, Np - bias.shape[0])).reshape(1, Np)
        in_arrays.append(bias_p)
        in_specs.append(pl.BlockSpec((1, TN), lambda p, i, j: (0, j)))

    out_shapes = [jax.ShapeDtypeStruct((P, Mp, Np), jnp.bfloat16)]
    out_specs = [pl.BlockSpec((None, TM, TN), lambda p, i, j: (p, i, j))]
    if stats:
        out_shapes.append(jax.ShapeDtypeStruct((P, mt, 8, Np), jnp.float32))
        out_specs.append(pl.BlockSpec((None, None, 8, TN), lambda p, i, j: (p, i, 0, j)))

    # vmem limit derived from the real tile footprint (double-buffered) + headroom.
    a_t, b_t, y_t = TM * Kp * 2, Kp * TN * 2, TM * TN * 2
    extra = (8 * TN * 4 if stats else 0) + (TN * 4 if bias is not None else 0)
    vmem = min(max(4 * (a_t + b_t + y_t + extra) + 2 * 1024 * 1024, 8 * 1024 * 1024),
               100 * 1024 * 1024)

    outs = pl.pallas_call(
        _make_gemm_kernel(stats, bias is not None, act),
        out_shape=tuple(out_shapes),
        grid=(P, mt, nt),
        in_specs=in_specs,
        out_specs=tuple(out_specs),
        compiler_params=pltpu.CompilerParams(
            dimension_semantics=("parallel", "parallel", "parallel"),
            vmem_limit_bytes=int(vmem)),
    )(*in_arrays)
    if stats:
        return outs[0], outs[1]
    return outs[0], None


# --------------------------------------------------------------------------------------
# Fused BN epilogue: out = act(y * scale + shift); bf16 in/out, f32 compute inside.
# --------------------------------------------------------------------------------------

def pallas_affine_act(y2d, scale, shift, mode):
    R, Cp = y2d.shape
    TR = _row_tile(R)

    def kernel(y_ref, s_ref, t_ref, o_ref):
        v = y_ref[...].astype(jnp.float32) * s_ref[...] + t_ref[...]
        o_ref[...] = _apply_act(v, mode).astype(o_ref.dtype)

    return pl.pallas_call(
        kernel,
        out_shape=jax.ShapeDtypeStruct((R, Cp), jnp.bfloat16),
        grid=(R // TR,),
        in_specs=[pl.BlockSpec((TR, Cp), lambda i: (i, 0)),
                  pl.BlockSpec((1, Cp), lambda i: (0, 0)),
                  pl.BlockSpec((1, Cp), lambda i: (0, 0))],
        out_specs=pl.BlockSpec((TR, Cp), lambda i: (i, 0)),
        compiler_params=pltpu.CompilerParams(dimension_semantics=("parallel",)),
    )(y2d, scale.reshape(1, Cp).astype(jnp.float32),
      shift.reshape(1, Cp).astype(jnp.float32))


def _bn_scale_shift(partials, count, gamma, beta, eps=1e-5):
    """Reduce per-tile (sum, sum_sq) partials -> per-channel affine scale/shift (tiny arrays)."""
    s = jnp.sum(partials[:, :, 0, :], axis=(0, 1))
    ss = jnp.sum(partials[:, :, 1, :], axis=(0, 1))
    Np = s.shape[0]
    mean = s / count
    # Single-pass E[x^2]-E[x]^2 from the f32 MXU accumulator; clamp guards cancellation.
    var = jnp.maximum(ss / count - mean * mean, 0.0)
    g = jnp.pad(gamma.astype(jnp.float32), (0, Np - gamma.shape[0]))
    b = jnp.pad(beta.astype(jnp.float32), (0, Np - beta.shape[0]))
    scale = g * lax.rsqrt(var + eps)
    shift = b - mean * scale
    return scale, shift


# --------------------------------------------------------------------------------------
# Conv lowerings (bf16 im2col / parity decomposition, GEMM + fused epilogues)
# --------------------------------------------------------------------------------------

def conv4x4_s2(x, w, *, gamma=None, beta=None):
    """Conv2d(k=4, s=2, p=1, bias=False) [+ train-mode BN].  x: NHWC."""
    n, h, wd, c = x.shape
    cout = w.shape[0]
    ho, wo = h // 2, wd // 2
    m = n * ho * wo
    xp = jnp.pad(x.astype(jnp.bfloat16), ((0, 0), (1, 1), (1, 1), (0, 0)))
    cols = []
    for di in range(4):
        for dj in range(4):
            cols.append(xp[:, di:di + 2 * (ho - 1) + 1:2, dj:dj + 2 * (wo - 1) + 1:2, :])
    a = jnp.concatenate(cols, axis=3).reshape(m, 16 * c)[None]
    bmat = jnp.transpose(w, (2, 3, 1, 0)).reshape(16 * c, cout)[None]
    if gamma is not None:
        y, part = pallas_gemm(a, bmat, stats=True)
        scale, shift = _bn_scale_shift(part, float(m), gamma, beta)
        y2d = pallas_affine_act(y[0], scale, shift, None)
    else:
        y, _ = pallas_gemm(a, bmat)               # plain conv: no epilogue kernel at all
        y2d = y[0]
    return y2d[:m, :cout].reshape(n, ho, wo, cout)


def conv1x1(x, cat2d, w, *, gamma, beta, act):
    """1x1 conv (bias=False) over channel-concat of x (NHWC) and cat2d (M, cat_nc) + BN + act."""
    n, h, wd, c = x.shape
    cout = w.shape[0]
    m = n * h * wd
    a = jnp.concatenate([x.reshape(m, c).astype(jnp.bfloat16),
                         cat2d.astype(jnp.bfloat16)], axis=1)[None]
    bmat = jnp.transpose(w[:, :, 0, 0], (1, 0))[None]
    y, part = pallas_gemm(a, bmat, stats=True)
    scale, shift = _bn_scale_shift(part, float(m), gamma, beta)
    y2d = pallas_affine_act(y[0], scale, shift, act)
    return y2d[:m, :cout].reshape(n, h, wd, cout)


def conv_transpose4x4_s2(xs, w, *, gamma=None, beta=None, bias=None, act=None):
    """ConvTranspose2d(k=4, s=2, p=1) over the channel-concatenation of `xs` (list of NHWC),
    via 4 output-parity 2x2 sub-convolutions batched in one GEMM.  The concat is never
    materialized: im2col columns are built per source and the weight rows are ordered to match.
    BN layers use the two-pass affine epilogue; bias/act (dec_last) are fused in the GEMM.
    w: (Cin_total, Cout, 4, 4) torch layout."""
    n, h, wd = xs[0].shape[:3]
    cs = [int(t.shape[3]) for t in xs]
    cout = w.shape[1]
    m = n * h * wd
    xps = [jnp.pad(t.astype(jnp.bfloat16), ((0, 0), (1, 1), (1, 1), (0, 0))) for t in xs]
    offs, off = [], 0
    for ci in cs:
        offs.append(off)
        off += ci

    a_par, b_par = [], []
    for ph in range(2):
        for pw in range(2):
            cols, wrows = [], []
            for dr in range(2):
                for dc in range(2):
                    kh, kw = 3 - ph - 2 * dr, 3 - pw - 2 * dc
                    for o, ci, xp in zip(offs, cs, xps):
                        # output row 2m+ph gets tap kh = 3-ph-2*dr from input row m-1+ph+dr
                        cols.append(xp[:, dr + ph:dr + ph + h, dc + pw:dc + pw + wd, :])
                        wrows.append(w[o:o + ci, :, kh, kw])
            a_par.append(jnp.concatenate(cols, axis=3).reshape(m, 4 * sum(cs)))
            b_par.append(jnp.concatenate(wrows, axis=0))
    a = jnp.stack(a_par, axis=0)                                   # (4, M, 4*Cin) bf16
    bmat = jnp.stack(b_par, axis=0)                                # (4, 4*Cin, Cout)

    if gamma is not None:
        y, part = pallas_gemm(a, bmat, stats=True)
        mp, npad = y.shape[1], y.shape[2]
        scale, shift = _bn_scale_shift(part, 4.0 * m, gamma, beta)
        y2d = pallas_affine_act(y.reshape(4 * mp, npad), scale, shift, act)
    else:
        y, _ = pallas_gemm(a, bmat, bias=bias, act=act)            # dec_last: bias+tanh fused
        mp, npad = y.shape[1], y.shape[2]
        y2d = y.reshape(4 * mp, npad)

    o = y2d.reshape(4, mp, npad)[:, :m, :cout].reshape(2, 2, n, h, wd, cout)
    # interleave parities: out[:, 2i+ph, 2j+pw, :] = parity (ph, pw)
    return jnp.transpose(o, (2, 3, 0, 4, 1, 5)).reshape(n, 2 * h, 2 * wd, cout)


# --------------------------------------------------------------------------------------
# Parameters
# --------------------------------------------------------------------------------------

def _conv_w(key, cout, cin, k):
    return jax.random.normal(key, (cout, cin, k, k), jnp.float32) * 0.05


def _convT_w(key, cin, cout, k):
    return jax.random.normal(key, (cin, cout, k, k), jnp.float32) * 0.05


def _bn_params(key, c):
    k1, k2 = jax.random.split(key)
    gamma = 1.0 + 0.1 * jax.random.normal(k1, (c,), jnp.float32)
    beta = 0.1 * jax.random.normal(k2, (c,), jnp.float32)
    return gamma, beta


def init_params(key, input_nc, output_nc, num_downs, cat_nc, ngf):
    # norm_layer = BatchNorm2d (default) => use_bias=False for every conv except the final
    # ConvTranspose2d of last_decoder_layer (PyTorch default bias=True).
    ks = iter(jax.random.split(key, 128))
    p = {}
    p["enc_top_w"] = _conv_w(next(ks), ngf, input_nc, 4)
    down_dims = [(ngf, ngf * 2), (ngf * 2, ngf * 4), (ngf * 4, ngf * 8)]
    for i, (ci, co) in enumerate(down_dims, start=1):
        p[f"enc_{i}_w"] = _conv_w(next(ks), co, ci, 4)
        p[f"enc_{i}_gamma"], p[f"enc_{i}_beta"] = _bn_params(next(ks), co)
    for i in range(num_downs - 5):
        p[f"enc_inter_{i}_w"] = _conv_w(next(ks), ngf * 8, ngf * 8, 4)
        p[f"enc_inter_{i}_gamma"], p[f"enc_inter_{i}_beta"] = _bn_params(next(ks), ngf * 8)
    p["enc_last_w"] = _conv_w(next(ks), ngf * 8, ngf * 8, 4)
    p["cat_w"] = _conv_w(next(ks), ngf * 8, ngf * 8 + cat_nc, 1)
    p["cat_gamma"], p["cat_beta"] = _bn_params(next(ks), ngf * 8)
    p["dec_first_w"] = _convT_w(next(ks), ngf * 8, ngf * 8, 4)
    p["dec_first_gamma"], p["dec_first_beta"] = _bn_params(next(ks), ngf * 8)
    for i in range(num_downs - 5):
        p[f"dec_inter_{i}_w"] = _convT_w(next(ks), ngf * 16, ngf * 8, 4)
        p[f"dec_inter_{i}_gamma"], p[f"dec_inter_{i}_beta"] = _bn_params(next(ks), ngf * 8)
    up_dims = [(ngf * 16, ngf * 4), (ngf * 8, ngf * 2), (ngf * 4, ngf)]
    for j, (ci, co) in enumerate(up_dims, start=1):
        p[f"dec_up_{j}_w"] = _convT_w(next(ks), ci, co, 4)
        p[f"dec_up_{j}_gamma"], p[f"dec_up_{j}_beta"] = _bn_params(next(ks), co)
    p["dec_last_w"] = _convT_w(next(ks), ngf * 2, output_nc, 4)
    p["dec_last_b"] = 0.05 * jax.random.normal(next(ks), (output_nc,), jnp.float32)
    return p


# --------------------------------------------------------------------------------------
# FontUNetGenerator forward
# --------------------------------------------------------------------------------------

def font_unet_forward(params, x_nchw, cat_embedding, num_downs, ngf, output_nc):
    x = jnp.transpose(x_nchw, (0, 2, 3, 1)).astype(jnp.float32)    # NCHW -> NHWC

    # Plain-JAX activations (XLA fuses these into the pad/slice/concat producers of im2col).
    def lrelu(t):
        tf = t.astype(jnp.float32)
        return jnp.where(tf >= 0.0, tf, 0.2 * tf).astype(jnp.bfloat16)

    def relu(t):
        return jnp.maximum(t, 0).astype(jnp.bfloat16)

    # -------- EncoderNetwork --------
    e1 = conv4x4_s2(x, params["enc_top_w"])                        # top_layer (conv only)
    feats = [e1]
    cur = e1
    for i in range(1, 4):                                          # encode_layer_1..3
        cur = conv4x4_s2(lrelu(cur), params[f"enc_{i}_w"],
                         gamma=params[f"enc_{i}_gamma"], beta=params[f"enc_{i}_beta"])
        feats.append(cur)
    for i in range(num_downs - 5):                                 # encoder_inter_i
        cur = conv4x4_s2(lrelu(cur), params[f"enc_inter_{i}_w"],
                         gamma=params[f"enc_inter_{i}_gamma"],
                         beta=params[f"enc_inter_{i}_beta"])
        feats.append(cur)
    final = conv4x4_s2(lrelu(cur), params["enc_last_w"])           # last_encode_layer
    feats.append(final)

    # -------- DecoderNetwork --------
    n, hc, wc, _ = final.shape
    cat_nc = cat_embedding.shape[1]
    cat2d = jnp.broadcast_to(cat_embedding.astype(jnp.float32)[:, None, :],
                             (n, hc * wc, cat_nc)).reshape(n * hc * wc, cat_nc)
    # cat_aware_layer (1x1 conv + BN); the ReLU of first_decoder_layer is fused in its epilogue.
    h = conv1x1(final, cat2d, params["cat_w"],
                gamma=params["cat_gamma"], beta=params["cat_beta"], act="relu")
    # first_decoder_layer (ConvT + BN); the ReLU consumed by the next stage is fused.
    d = conv_transpose4x4_s2([h], params["dec_first_w"], gamma=params["dec_first_gamma"],
                             beta=params["dec_first_beta"], act="relu")

    for i in range(num_downs - 5):                                 # decoder_inter_i
        skip = relu(feats[-(2 + i)])                               # ReLU(cat) = cat(ReLU, ReLU)
        d = conv_transpose4x4_s2([d, skip], params[f"dec_inter_{i}_w"],
                                 gamma=params[f"dec_inter_{i}_gamma"],
                                 beta=params[f"dec_inter_{i}_beta"], act="relu")

    for j, skip_idx in ((1, 3), (2, 2), (3, 1)):                   # decoder_up_1..3
        skip = relu(feats[skip_idx])
        d = conv_transpose4x4_s2([d, skip], params[f"dec_up_{j}_w"],
                                 gamma=params[f"dec_up_{j}_gamma"],
                                 beta=params[f"dec_up_{j}_beta"], act="relu")

    skip = relu(feats[0])                                          # last_decoder_layer
    out = conv_transpose4x4_s2([d, skip], params["dec_last_w"],
                               bias=params["dec_last_b"], act="tanh")

    out_nchw = jnp.transpose(out, (0, 3, 1, 2)).astype(jnp.float32)
    enc_list_nchw = [jnp.transpose(f, (0, 3, 1, 2)).astype(jnp.float32) for f in feats]
    return out_nchw, enc_list_nchw


if __name__ == "__main__":
    # Small but structurally faithful config: num_downs=6 needs 64x64 input.
    input_nc, output_nc = 1, 1
    num_downs = 6
    ngf = 8
    cat_nc = 16
    n, h, w = 2, 64, 64

    key = jax.random.PRNGKey(0)
    kp, kx, kc = jax.random.split(key, 3)
    params = init_params(kp, input_nc, output_nc, num_downs, cat_nc, ngf)
    x = jax.random.normal(kx, (n, input_nc, h, w), jnp.float32)
    cat_emb = jax.random.normal(kc, (n, cat_nc), jnp.float32)

    fwd = jax.jit(font_unet_forward, static_argnums=(3, 4, 5))
    out, enc_list = fwd(params, x, cat_emb, num_downs, ngf, output_nc)
    out = jax.block_until_ready(out)
    for e in enc_list:
        jax.block_until_ready(e)

    assert out.shape == (n, output_nc, h, w)
    assert len(enc_list) == num_downs      # [e1..e4] + inters + final
    print("KERNEL_OK")
</pallas_src>

<mosaic_0001>
module attributes {stable_mosaic.version = 11 : i64} {
  func.func @kernel(%arg0: i32, %arg1: i32, %arg2: i32, %arg3: memref<1x512x128xbf16, #tpu.memory_space<vmem>>, %arg4: memref<1x128x128xbf16, #tpu.memory_space<vmem>>, %arg5: memref<1x512x128xbf16, #tpu.memory_space<vmem>>) attributes {dimension_semantics = [#tpu.dimension_semantics<parallel>, #tpu.dimension_semantics<parallel>, #tpu.dimension_semantics<parallel>], iteration_bounds = array<i64: 1, 4, 1>, scalar_prefetch = 0 : i64, scratch_operands = 0 : i64, tpu.core_type = #tpu.core_type<tc>, window_params = [{transform_indices = @transform_0, window_bounds = array<i64: 1, 512, 128>}, {transform_indices = @transform_1, window_bounds = array<i64: 1, 128, 128>}, {transform_indices = @transform_2, window_bounds = array<i64: 1, 512, 128>}]} {
    %c0 = arith.constant 0 : index
    %c0_0 = arith.constant 0 : index
    %c0_1 = arith.constant 0 : index
    %0 = vector.load %arg3[%c0, %c0_0, %c0_1] : memref<1x512x128xbf16, #tpu.memory_space<vmem>>, vector<1x512x128xbf16>
    %1 = vector.shape_cast %0 : vector<1x512x128xbf16> to vector<512x128xbf16>
    %c0_2 = arith.constant 0 : index
    %c0_3 = arith.constant 0 : index
    %c0_4 = arith.constant 0 : index
    %2 = vector.load %arg4[%c0_2, %c0_3, %c0_4] : memref<1x128x128xbf16, #tpu.memory_space<vmem>>, vector<1x128x128xbf16>
    %3 = vector.shape_cast %2 : vector<1x128x128xbf16> to vector<128x128xbf16>
    %cst = arith.constant dense<0.000000e+00> : vector<512x128xf32>
    %4 = tpu.matmul %1, %3, %cst {dimension_numbers = #tpu.dot_dimension_numbers<[1], [0], [0], [1], [0, 0, 1, 1], [], []>} : vector<512x128xbf16>, vector<128x128xbf16>, vector<512x128xf32> -> vector<512x128xf32>
    %5 = arith.truncf %4 : vector<512x128xf32> to vector<512x128xbf16>
    %c0_5 = arith.constant 0 : index
    %c0_6 = arith.constant 0 : index
    %c0_7 = arith.constant 0 : index
    %6 = vector.load %arg5[%c0_5, %c0_6, %c0_7] : memref<1x512x128xbf16, #tpu.memory_space<vmem>>, vector<1x512x128xbf16>
    %7 = vector.shape_cast %6 : vector<1x512x128xbf16> to vector<512x128xbf16>
    %8 = vector.shape_cast %5 : vector<512x128xbf16> to vector<1x512x128xbf16>
    tpu.vector_store %arg5[%c0_5, %c0_6, %c0_7], %8 {strides = array<i32>} : memref<1x512x128xbf16, #tpu.memory_space<vmem>>, vector<1x512x128xbf16>,
    return
  }
  func.func @transform_0(%arg0: i32, %arg1: i32, %arg2: i32) -> (i32, i32, i32) {
    %c0_i32 = arith.constant 0 : i32
    %c0_i32_0 = arith.constant 0 : i32
    return %arg0, %arg1, %c0_i32 : i32, i32, i32
  }
  func.func @transform_1(%arg0: i32, %arg1: i32, %arg2: i32) -> (i32, i32, i32) {
    %c0_i32 = arith.constant 0 : i32
    %c0_i32_0 = arith.constant 0 : i32
    return %arg0, %c0_i32, %arg2 : i32, i32, i32
  }
  func.func @transform_2(%arg0: i32, %arg1: i32, %arg2: i32) -> (i32, i32, i32) {
    %c0_i32 = arith.constant 0 : i32
    return %arg0, %arg1, %arg2 : i32, i32, i32
  }
}

module attributes {stable_mosaic.version = 11 : i64} {
  func.func @kernel(%arg0: i32, %arg1: i32, %arg2: i32, %arg3: memref<1x512x128xbf16, #tpu.memory_space<vmem>>, %arg4: memref<1x128x128xbf16, #tpu.memory_space<vmem>>, %arg5: memref<1x512x128xbf16, #tpu.memory_space<vmem>>, %arg6: memref<1x1x8x128xf32, #tpu.memory_space<vmem>>) attributes {dimension_semantics = [#tpu.dimension_semantics<parallel>, #tpu.dimension_semantics<parallel>, #tpu.dimension_semantics<parallel>], iteration_bounds = array<i64: 1, 1, 1>, scalar_prefetch = 0 : i64, scratch_operands = 0 : i64, tpu.core_type = #tpu.core_type<tc>, window_params = [{transform_indices = @transform_0, window_bounds = array<i64: 1, 512, 128>}, {transform_indices = @transform_1, window_bounds = array<i64: 1, 128, 128>}, {transform_indices = @transform_2, window_bounds = array<i64: 1, 512, 128>}, {transform_indices = @transform_3, window_bounds = array<i64: 1, 1, 8, 128>}]} {
    %c0 = arith.constant 0 : index
    %c0_0 = arith.constant 0 : index
    %c0_1 = arith.constant 0 : index
    %0 = vector.load %arg3[%c0, %c0_0, %c0_1] : memref<1x512x128xbf16, #tpu.memory_space<vmem>>, vector<1x512x128xbf16>
    %1 = vector.shape_cast %0 : vector<1x512x128xbf16> to vector<512x128xbf16>
    %c0_2 = arith.constant 0 : index
    %c0_3 = arith.constant 0 : index
    %c0_4 = arith.constant 0 : index
    %2 = vector.load %arg4[%c0_2, %c0_3, %c0_4] : memref<1x128x128xbf16, #tpu.memory_space<vmem>>, vector<1x128x128xbf16>
    %3 = vector.shape_cast %2 : vector<1x128x128xbf16> to vector<128x128xbf16>
    %cst = arith.constant dense<0.000000e+00> : vector<512x128xf32>
    %4 = tpu.matmul %1, %3, %cst {dimension_numbers = #tpu.dot_dimension_numbers<[1], [0], [0], [1], [0, 0, 1, 1], [], []>} : vector<512x128xbf16>, vector<128x128xbf16>, vector<512x128xf32> -> vector<512x128xf32>
    %5 = arith.truncf %4 : vector<512x128xf32> to vector<512x128xbf16>
    %c0_5 = arith.constant 0 : index
    %c0_6 = arith.constant 0 : index
    %c0_7 = arith.constant 0 : index
    %6 = vector.load %arg5[%c0_5, %c0_6, %c0_7] : memref<1x512x128xbf16, #tpu.memory_space<vmem>>, vector<1x512x128xbf16>
    %7 = vector.shape_cast %6 : vector<1x512x128xbf16> to vector<512x128xbf16>
    %8 = vector.shape_cast %5 : vector<512x128xbf16> to vector<1x512x128xbf16>
    tpu.vector_store %arg5[%c0_5, %c0_6, %c0_7], %8 {strides = array<i32>} : memref<1x512x128xbf16, #tpu.memory_space<vmem>>, vector<1x512x128xbf16>,
    %cst_8 = arith.constant dense<0.000000e+00> : vector<128xf32>
    %9 = vector.multi_reduction <add>, %4, %cst_8 [0] : vector<512x128xf32> to vector<128xf32>
    %10 = vector.shape_cast %9 : vector<128xf32> to vector<1x128xf32>
    %c0_9 = arith.constant 0 : index
    %c0_10 = arith.constant 0 : index
    %c0_11 = arith.constant 0 : index
    %c0_12 = arith.constant 0 : index
    %11 = vector.load %arg6[%c0_9, %c0_10, %c0_11, %c0_12] : memref<1x1x8x128xf32, #tpu.memory_space<vmem>>, vector<1x1x1x128xf32>
    %12 = vector.shape_cast %11 : vector<1x1x1x128xf32> to vector<1x128xf32>
    %13 = vector.shape_cast %10 : vector<1x128xf32> to vector<1x1x1x128xf32>
    tpu.vector_store %arg6[%c0_9, %c0_10, %c0_11, %c0_12], %13 {strides = array<i32>} : memref<1x1x8x128xf32, #tpu.memory_space<vmem>>, vector<1x1x1x128xf32>,
    %14 = arith.mulf %4, %4 : vector<512x128xf32>
    %cst_13 = arith.constant dense<0.000000e+00> : vector<128xf32>
    %15 = vector.multi_reduction <add>, %14, %cst_13 [0] : vector<512x128xf32> to vector<128xf32>
    %16 = vector.shape_cast %15 : vector<128xf32> to vector<1x128xf32>
    %c0_14 = arith.constant 0 : index
    %c0_15 = arith.constant 0 : index
    %c1 = arith.constant 1 : index
    %c0_16 = arith.constant 0 : index
    %17 = vector.load %arg6[%c0_14, %c0_15, %c1, %c0_16] : memref<1x1x8x128xf32, #tpu.memory_space<vmem>>, vector<1x1x1x128xf32>
    %18 = vector.shape_cast %17 : vector<1x1x1x128xf32> to vector<1x128xf32>
    %19 = vector.shape_cast %16 : vector<1x128xf32> to vector<1x1x1x128xf32>
    tpu.vector_store %arg6[%c0_14, %c0_15, %c1, %c0_16], %19 {strides = array<i32>} : memref<1x1x8x128xf32, #tpu.memory_space<vmem>>, vector<1x1x1x128xf32>,
    return
  }
  func.func @transform_0(%arg0: i32, %arg1: i32, %arg2: i32) -> (i32, i32, i32) {
    %c0_i32 = arith.constant 0 : i32
    %c0_i32_0 = arith.constant 0 : i32
    return %arg0, %arg1, %c0_i32 : i32, i32, i32
  }
  func.func @transform_1(%arg0: i32, %arg1: i32, %arg2: i32) -> (i32, i32, i32) {
    %c0_i32 = arith.constant 0 : i32
    %c0_i32_0 = arith.constant 0 : i32
    return %arg0, %c0_i32, %arg2 : i32, i32, i32
  }
  func.func @transform_2(%arg0: i32, %arg1: i32, %arg2: i32) -> (i32, i32, i32) {
    %c0_i32 = arith.constant 0 : i32
    return %arg0, %arg1, %arg2 : i32, i32, i32
  }
  func.func @transform_3(%arg0: i32, %arg1: i32, %arg2: i32) -> (i32, i32, i32, i32) {
    %c0_i32 = arith.constant 0 : i32
    %c0_i32_0 = arith.constant 0 : i32
    return %arg0, %arg1, %c0_i32, %arg2 : i32, i32, i32, i32
  }
}

module attributes {stable_mosaic.version = 11 : i64} {
  func.func @kernel(%arg0: i32, %arg1: memref<512x128xbf16, #tpu.memory_space<vmem>>, %arg2: memref<1x128xf32, #tpu.memory_space<vmem>>, %arg3: memref<1x128xf32, #tpu.memory_space<vmem>>, %arg4: memref<512x128xbf16, #tpu.memory_space<vmem>>) attributes {dimension_semantics = [#tpu.dimension_semantics<parallel>], iteration_bounds = array<i64: 1>, scalar_prefetch = 0 : i64, scratch_operands = 0 : i64, tpu.core_type = #tpu.core_type<tc>, window_params = [{transform_indices = @transform_0, window_bounds = array<i64: 512, 128>}, {pipeline_mode = #tpu.pipeline_mode<synchronous>, transform_indices = @transform_1, window_bounds = array<i64: 1, 128>}, {pipeline_mode = #tpu.pipeline_mode<synchronous>, transform_indices = @transform_2, window_bounds = array<i64: 1, 128>}, {transform_indices = @transform_3, window_bounds = array<i64: 512, 128>}]} {
    %c0 = arith.constant 0 : index
    %c0_0 = arith.constant 0 : index
    %0 = vector.load %arg1[%c0, %c0_0] : memref<512x128xbf16, #tpu.memory_space<vmem>>, vector<512x128xbf16>
    %1 = arith.extf %0 : vector<512x128xbf16> to vector<512x128xf32>
    %c0_1 = arith.constant 0 : index
    %c0_2 = arith.constant 0 : index
    %2 = vector.load %arg2[%c0_1, %c0_2] : memref<1x128xf32, #tpu.memory_space<vmem>>, vector<1x128xf32>
    %3 = vector.broadcast %2 : vector<1x128xf32> to vector<512x128xf32>
    %4 = arith.mulf %1, %3 : vector<512x128xf32>
    %c0_3 = arith.constant 0 : index
    %c0_4 = arith.constant 0 : index
    %5 = vector.load %arg3[%c0_3, %c0_4] : memref<1x128xf32, #tpu.memory_space<vmem>>, vector<1x128xf32>
    %6 = vector.broadcast %5 : vector<1x128xf32> to vector<512x128xf32>
    %7 = arith.addf %4, %6 : vector<512x128xf32>
    %8 = arith.truncf %7 : vector<512x128xf32> to vector<512x128xbf16>
    %c0_5 = arith.constant 0 : index
    %c0_6 = arith.constant 0 : index
    %9 = vector.load %arg4[%c0_5, %c0_6] : memref<512x128xbf16, #tpu.memory_space<vmem>>, vector<512x128xbf16>
    tpu.vector_store %arg4[%c0_5, %c0_6], %8 {strides = array<i32>} : memref<512x128xbf16, #tpu.memory_space<vmem>>, vector<512x128xbf16>,
    return
  }
  func.func @transform_0(%arg0: i32) -> (i32, i32) {
    %c0_i32 = arith.constant 0 : i32
    %c0_i32_0 = arith.constant 0 : i32
    return %arg0, %c0_i32 : i32, i32
  }
  func.func @transform_1(%arg0: i32) -> (i32, i32) {
    %c0_i32 = arith.constant 0 : i32
    %c0_i32_0 = arith.constant 0 : i32
    %c0_i32_1 = arith.constant 0 : i32
    return %c0_i32, %c0_i32_0 : i32, i32
  }
  func.func @transform_2(%arg0: i32) -> (i32, i32) {
    %c0_i32 = arith.constant 0 : i32
    %c0_i32_0 = arith.constant 0 : i32
    %c0_i32_1 = arith.constant 0 : i32
    return %c0_i32, %c0_i32_0 : i32, i32
  }
  func.func @transform_3(%arg0: i32) -> (i32, i32) {
    %c0_i32 = arith.constant 0 : i32
    %c0_i32_0 = arith.constant 0 : i32
    return %arg0, %c0_i32 : i32, i32
  }
}

module attributes {stable_mosaic.version = 11 : i64} {
  func.func @kernel(%arg0: i32, %arg1: i32, %arg2: i32, %arg3: memref<1x128x256xbf16, #tpu.memory_space<vmem>>, %arg4: memref<1x256x128xbf16, #tpu.memory_space<vmem>>, %arg5: memref<1x128x128xbf16, #tpu.memory_space<vmem>>, %arg6: memref<1x1x8x128xf32, #tpu.memory_space<vmem>>) attributes {dimension_semantics = [#tpu.dimension_semantics<parallel>, #tpu.dimension_semantics<parallel>, #tpu.dimension_semantics<parallel>], iteration_bounds = array<i64: 1, 1, 1>, scalar_prefetch = 0 : i64, scratch_operands = 0 : i64, tpu.core_type = #tpu.core_type<tc>, window_params = [{transform_indices = @transform_0, window_bounds = array<i64: 1, 128, 256>}, {transform_indices = @transform_1, window_bounds = array<i64: 1, 256, 128>}, {transform_indices = @transform_2, window_bounds = array<i64: 1, 128, 128>}, {transform_indices = @transform_3, window_bounds = array<i64: 1, 1, 8, 128>}]} {
    %c0 = arith.constant 0 : index
    %c0_0 = arith.constant 0 : index
    %c0_1 = arith.constant 0 : index
    %0 = vector.load %arg3[%c0, %c0_0, %c0_1] : memref<1x128x256xbf16, #tpu.memory_space<vmem>>, vector<1x128x256xbf16>
    %1 = vector.shape_cast %0 : vector<1x128x256xbf16> to vector<128x256xbf16>
    %c0_2 = arith.constant 0 : index
    %c0_3 = arith.constant 0 : index
    %c0_4 = arith.constant 0 : index
    %2 = vector.load %arg4[%c0_2, %c0_3, %c0_4] : memref<1x256x128xbf16, #tpu.memory_space<vmem>>, vector<1x256x128xbf16>
    %3 = vector.shape_cast %2 : vector<1x256x128xbf16> to vector<256x128xbf16>
    %cst = arith.constant dense<0.000000e+00> : vector<128x128xf32>
    %4 = tpu.matmul %1, %3, %cst {dimension_numbers = #tpu.dot_dimension_numbers<[1], [0], [0], [1], [0, 0, 1, 1], [], []>} : vector<128x256xbf16>, vector<256x128xbf16>, vector<128x128xf32> -> vector<128x128xf32>
    %5 = arith.truncf %4 : vector<128x128xf32> to vector<128x128xbf16>
    %c0_5 = arith.constant 0 : index
    %c0_6 = arith.constant 0 : index
    %c0_7 = arith.constant 0 : index
    %6 = vector.load %arg5[%c0_5, %c0_6, %c0_7] : memref<1x128x128xbf16, #tpu.memory_space<vmem>>, vector<1x128x128xbf16>
    %7 = vector.shape_cast %6 : vector<1x128x128xbf16> to vector<128x128xbf16>
    %8 = vector.shape_cast %5 : vector<128x128xbf16> to vector<1x128x128xbf16>
    tpu.vector_store %arg5[%c0_5, %c0_6, %c0_7], %8 {strides = array<i32>} : memref<1x128x128xbf16, #tpu.memory_space<vmem>>, vector<1x128x128xbf16>,
    %cst_8 = arith.constant dense<0.000000e+00> : vector<128xf32>
    %9 = vector.multi_reduction <add>, %4, %cst_8 [0] : vector<128x128xf32> to vector<128xf32>
    %10 = vector.shape_cast %9 : vector<128xf32> to vector<1x128xf32>
    %c0_9 = arith.constant 0 : index
    %c0_10 = arith.constant 0 : index
    %c0_11 = arith.constant 0 : index
    %c0_12 = arith.constant 0 : index
    %11 = vector.load %arg6[%c0_9, %c0_10, %c0_11, %c0_12] : memref<1x1x8x128xf32, #tpu.memory_space<vmem>>, vector<1x1x1x128xf32>
    %12 = vector.shape_cast %11 : vector<1x1x1x128xf32> to vector<1x128xf32>
    %13 = vector.shape_cast %10 : vector<1x128xf32> to vector<1x1x1x128xf32>
    tpu.vector_store %arg6[%c0_9, %c0_10, %c0_11, %c0_12], %13 {strides = array<i32>} : memref<1x1x8x128xf32, #tpu.memory_space<vmem>>, vector<1x1x1x128xf32>,
    %14 = arith.mulf %4, %4 : vector<128x128xf32>
    %cst_13 = arith.constant dense<0.000000e+00> : vector<128xf32>
    %15 = vector.multi_reduction <add>, %14, %cst_13 [0] : vector<128x128xf32> to vector<128xf32>
    %16 = vector.shape_cast %15 : vector<128xf32> to vector<1x128xf32>
    %c0_14 = arith.constant 0 : index
    %c0_15 = arith.constant 0 : index
    %c1 = arith.constant 1 : index
    %c0_16 = arith.constant 0 : index
    %17 = vector.load %arg6[%c0_14, %c0_15, %c1, %c0_16] : memref<1x1x8x128xf32, #tpu.memory_space<vmem>>, vector<1x1x1x128xf32>
    %18 = vector.shape_cast %17 : vector<1x1x1x128xf32> to vector<1x128xf32>
    %19 = vector.shape_cast %16 : vector<1x128xf32> to vector<1x1x1x128xf32>
    tpu.vector_store %arg6[%c0_14, %c0_15, %c1, %c0_16], %19 {strides = array<i32>} : memref<1x1x8x128xf32, #tpu.memory_space<vmem>>, vector<1x1x1x128xf32>,
    return
  }
  func.func @transform_0(%arg0: i32, %arg1: i32, %arg2: i32) -> (i32, i32, i32) {
    %c0_i32 = arith.constant 0 : i32
    %c0_i32_0 = arith.constant 0 : i32
    return %arg0, %arg1, %c0_i32 : i32, i32, i32
  }
  func.func @transform_1(%arg0: i32, %arg1: i32, %arg2: i32) -> (i32, i32, i32) {
    %c0_i32 = arith.constant 0 : i32
    %c0_i32_0 = arith.constant 0 : i32
    return %arg0, %c0_i32, %arg2 : i32, i32, i32
  }
  func.func @transform_2(%arg0: i32, %arg1: i32, %arg2: i32) -> (i32, i32, i32) {
    %c0_i32 = arith.constant 0 : i32
    return %arg0, %arg1, %arg2 : i32, i32, i32
  }
  func.func @transform_3(%arg0: i32, %arg1: i32, %arg2: i32) -> (i32, i32, i32, i32) {
    %c0_i32 = arith.constant 0 : i32
    %c0_i32_0 = arith.constant 0 : i32
    return %arg0, %arg1, %c0_i32, %arg2 : i32, i32, i32, i32
  }
}

module attributes {stable_mosaic.version = 11 : i64} {
  func.func @kernel(%arg0: i32, %arg1: memref<128x128xbf16, #tpu.memory_space<vmem>>, %arg2: memref<1x128xf32, #tpu.memory_space<vmem>>, %arg3: memref<1x128xf32, #tpu.memory_space<vmem>>, %arg4: memref<128x128xbf16, #tpu.memory_space<vmem>>) attributes {dimension_semantics = [#tpu.dimension_semantics<parallel>], iteration_bounds = array<i64: 1>, scalar_prefetch = 0 : i64, scratch_operands = 0 : i64, tpu.core_type = #tpu.core_type<tc>, window_params = [{transform_indices = @transform_0, window_bounds = array<i64: 128, 128>}, {pipeline_mode = #tpu.pipeline_mode<synchronous>, transform_indices = @transform_1, window_bounds = array<i64: 1, 128>}, {pipeline_mode = #tpu.pipeline_mode<synchronous>, transform_indices = @transform_2, window_bounds = array<i64: 1, 128>}, {transform_indices = @transform_3, window_bounds = array<i64: 128, 128>}]} {
    %c0 = arith.constant 0 : index
    %c0_0 = arith.constant 0 : index
    %0 = vector.load %arg1[%c0, %c0_0] : memref<128x128xbf16, #tpu.memory_space<vmem>>, vector<128x128xbf16>
    %1 = arith.extf %0 : vector<128x128xbf16> to vector<128x128xf32>
    %c0_1 = arith.constant 0 : index
    %c0_2 = arith.constant 0 : index
    %2 = vector.load %arg2[%c0_1, %c0_2] : memref<1x128xf32, #tpu.memory_space<vmem>>, vector<1x128xf32>
    %3 = vector.broadcast %2 : vector<1x128xf32> to vector<128x128xf32>
    %4 = arith.mulf %1, %3 : vector<128x128xf32>
    %c0_3 = arith.constant 0 : index
    %c0_4 = arith.constant 0 : index
    %5 = vector.load %arg3[%c0_3, %c0_4] : memref<1x128xf32, #tpu.memory_space<vmem>>, vector<1x128xf32>
    %6 = vector.broadcast %5 : vector<1x128xf32> to vector<128x128xf32>
    %7 = arith.addf %4, %6 : vector<128x128xf32>
    %8 = arith.truncf %7 : vector<128x128xf32> to vector<128x128xbf16>
    %c0_5 = arith.constant 0 : index
    %c0_6 = arith.constant 0 : index
    %9 = vector.load %arg4[%c0_5, %c0_6] : memref<128x128xbf16, #tpu.memory_space<vmem>>, vector<128x128xbf16>
    tpu.vector_store %arg4[%c0_5, %c0_6], %8 {strides = array<i32>} : memref<128x128xbf16, #tpu.memory_space<vmem>>, vector<128x128xbf16>,
    return
  }
  func.func @transform_0(%arg0: i32) -> (i32, i32) {
    %c0_i32 = arith.constant 0 : i32
    %c0_i32_0 = arith.constant 0 : i32
    return %arg0, %c0_i32 : i32, i32
  }
  func.func @transform_1(%arg0: i32) -> (i32, i32) {
    %c0_i32 = arith.constant 0 : i32
    %c0_i32_0 = arith.constant 0 : i32
    %c0_i32_1 = arith.constant 0 : i32
    return %c0_i32, %c0_i32_0 : i32, i32
  }
  func.func @transform_2(%arg0: i32) -> (i32, i32) {
    %c0_i32 = arith.constant 0 : i32
    %c0_i32_0 = arith.constant 0 : i32
    %c0_i32_1 = arith.constant 0 : i32
    return %c0_i32, %c0_i32_0 : i32, i32
  }
  func.func @transform_3(%arg0: i32) -> (i32, i32) {
    %c0_i32 = arith.constant 0 : i32
    %c0_i32_0 = arith.constant 0 : i32
    return %arg0, %c0_i32 : i32, i32
  }
}

module attributes {stable_mosaic.version = 11 : i64} {
  func.func @kernel(%arg0: i32, %arg1: i32, %arg2: i32, %arg3: memref<1x32x512xbf16, #tpu.memory_space<vmem>>, %arg4: memref<1x512x128xbf16, #tpu.memory_space<vmem>>, %arg5: memref<1x32x128xbf16, #tpu.memory_space<vmem>>, %arg6: memref<1x1x8x128xf32, #tpu.memory_space<vmem>>) attributes {dimension_semantics = [#tpu.dimension_semantics<parallel>, #tpu.dimension_semantics<parallel>, #tpu.dimension_semantics<parallel>], iteration_bounds = array<i64: 1, 1, 1>, scalar_prefetch = 0 : i64, scratch_operands = 0 : i64, tpu.core_type = #tpu.core_type<tc>, window_params = [{transform_indices = @transform_0, window_bounds = array<i64: 1, 32, 512>}, {transform_indices = @transform_1, window_bounds = array<i64: 1, 512, 128>}, {transform_indices = @transform_2, window_bounds = array<i64: 1, 32, 128>}, {transform_indices = @transform_3, window_bounds = array<i64: 1, 1, 8, 128>}]} {
    %c0 = arith.constant 0 : index
    %c0_0 = arith.constant 0 : index
    %c0_1 = arith.constant 0 : index
    %0 = vector.load %arg3[%c0, %c0_0, %c0_1] : memref<1x32x512xbf16, #tpu.memory_space<vmem>>, vector<1x32x512xbf16>
    %1 = vector.shape_cast %0 : vector<1x32x512xbf16> to vector<32x512xbf16>
    %c0_2 = arith.constant 0 : index
    %c0_3 = arith.constant 0 : index
    %c0_4 = arith.constant 0 : index
    %2 = vector.load %arg4[%c0_2, %c0_3, %c0_4] : memref<1x512x128xbf16, #tpu.memory_space<vmem>>, vector<1x512x128xbf16>
    %3 = vector.shape_cast %2 : vector<1x512x128xbf16> to vector<512x128xbf16>
    %cst = arith.constant dense<0.000000e+00> : vector<32x128xf32>
    %4 = tpu.matmul %1, %3, %cst {dimension_numbers = #tpu.dot_dimension_numbers<[1], [0], [0], [1], [0, 0, 1, 1], [], []>} : vector<32x512xbf16>, vector<512x128xbf16>, vector<32x128xf32> -> vector<32x128xf32>
    %5 = arith.truncf %4 : vector<32x128xf32> to vector<32x128xbf16>
    %c0_5 = arith.constant 0 : index
    %c0_6 = arith.constant 0 : index
    %c0_7 = arith.constant 0 : index
    %6 = vector.load %arg5[%c0_5, %c0_6, %c0_7] : memref<1x32x128xbf16, #tpu.memory_space<vmem>>, vector<1x32x128xbf16>
    %7 = vector.shape_cast %6 : vector<1x32x128xbf16> to vector<32x128xbf16>
    %8 = vector.shape_cast %5 : vector<32x128xbf16> to vector<1x32x128xbf16>
    tpu.vector_store %arg5[%c0_5, %c0_6, %c0_7], %8 {strides = array<i32>} : memref<1x32x128xbf16, #tpu.memory_space<vmem>>, vector<1x32x128xbf16>,
    %cst_8 = arith.constant dense<0.000000e+00> : vector<128xf32>
    %9 = vector.multi_reduction <add>, %4, %cst_8 [0] : vector<32x128xf32> to vector<128xf32>
    %10 = vector.shape_cast %9 : vector<128xf32> to vector<1x128xf32>
    %c0_9 = arith.constant 0 : index
    %c0_10 = arith.constant 0 : index
    %c0_11 = arith.constant 0 : index
    %c0_12 = arith.constant 0 : index
    %11 = vector.load %arg6[%c0_9, %c0_10, %c0_11, %c0_12] : memref<1x1x8x128xf32, #tpu.memory_space<vmem>>, vector<1x1x1x128xf32>
    %12 = vector.shape_cast %11 : vector<1x1x1x128xf32> to vector<1x128xf32>
    %13 = vector.shape_cast %10 : vector<1x128xf32> to vector<1x1x1x128xf32>
    tpu.vector_store %arg6[%c0_9, %c0_10, %c0_11, %c0_12], %13 {strides = array<i32>} : memref<1x1x8x128xf32, #tpu.memory_space<vmem>>, vector<1x1x1x128xf32>,
    %14 = arith.mulf %4, %4 : vector<32x128xf32>
    %cst_13 = arith.constant dense<0.000000e+00> : vector<128xf32>
    %15 = vector.multi_reduction <add>, %14, %cst_13 [0] : vector<32x128xf32> to vector<128xf32>
    %16 = vector.shape_cast %15 : vector<128xf32> to vector<1x128xf32>
    %c0_14 = arith.constant 0 : index
    %c0_15 = arith.constant 0 : index
    %c1 = arith.constant 1 : index
    %c0_16 = arith.constant 0 : index
    %17 = vector.load %arg6[%c0_14, %c0_15, %c1, %c0_16] : memref<1x1x8x128xf32, #tpu.memory_space<vmem>>, vector<1x1x1x128xf32>
    %18 = vector.shape_cast %17 : vector<1x1x1x128xf32> to vector<1x128xf32>
    %19 = vector.shape_cast %16 : vector<1x128xf32> to vector<1x1x1x128xf32>
    tpu.vector_store %arg6[%c0_14, %c0_15, %c1, %c0_16], %19 {strides = array<i32>} : memref<1x1x8x128xf32, #tpu.memory_space<vmem>>, vector<1x1x1x128xf32>,
    return
  }
  func.func @transform_0(%arg0: i32, %arg1: i32, %arg2: i32) -> (i32, i32, i32) {
    %c0_i32 = arith.constant 0 : i32
    %c0_i32_0 = arith.constant 0 : i32
    return %arg0, %arg1, %c0_i32 : i32, i32, i32
  }
  func.func @transform_1(%arg0: i32, %arg1: i32, %arg2: i32) -> (i32, i32, i32) {
    %c0_i32 = arith.constant 0 : i32
    %c0_i32_0 = arith.constant 0 : i32
    return %arg0, %c0_i32, %arg2 : i32, i32, i32
  }
  func.func @transform_2(%arg0: i32, %arg1: i32, %arg2: i32) -> (i32, i32, i32) {
    %c0_i32 = arith.constant 0 : i32
    return %arg0, %arg1, %arg2 : i32, i32, i32
  }
  func.func @transform_3(%arg0: i32, %arg1: i32, %arg2: i32) -> (i32, i32, i32, i32) {
    %c0_i32 = arith.constant 0 : i32
    %c0_i32_0 = arith.constant 0 : i32
    return %arg0, %arg1, %c0_i32, %arg2 : i32, i32, i32, i32
  }
}

module attributes {stable_mosaic.version = 11 : i64} {
  func.func @kernel(%arg0: i32, %arg1: memref<32x128xbf16, #tpu.memory_space<vmem>>, %arg2: memref<1x128xf32, #tpu.memory_space<vmem>>, %arg3: memref<1x128xf32, #tpu.memory_space<vmem>>, %arg4: memref<32x128xbf16, #tpu.memory_space<vmem>>) attributes {dimension_semantics = [#tpu.dimension_semantics<parallel>], iteration_bounds = array<i64: 1>, scalar_prefetch = 0 : i64, scratch_operands = 0 : i64, tpu.core_type = #tpu.core_type<tc>, window_params = [{transform_indices = @transform_0, window_bounds = array<i64: 32, 128>}, {pipeline_mode = #tpu.pipeline_mode<synchronous>, transform_indices = @transform_1, window_bounds = array<i64: 1, 128>}, {pipeline_mode = #tpu.pipeline_mode<synchronous>, transform_indices = @transform_2, window_bounds = array<i64: 1, 128>}, {transform_indices = @transform_3, window_bounds = array<i64: 32, 128>}]} {
    %c0 = arith.constant 0 : index
    %c0_0 = arith.constant 0 : index
    %0 = vector.load %arg1[%c0, %c0_0] : memref<32x128xbf16, #tpu.memory_space<vmem>>, vector<32x128xbf16>
    %1 = arith.extf %0 : vector<32x128xbf16> to vector<32x128xf32>
    %c0_1 = arith.constant 0 : index
    %c0_2 = arith.constant 0 : index
    %2 = vector.load %arg2[%c0_1, %c0_2] : memref<1x128xf32, #tpu.memory_space<vmem>>, vector<1x128xf32>
    %3 = vector.broadcast %2 : vector<1x128xf32> to vector<32x128xf32>
    %4 = arith.mulf %1, %3 : vector<32x128xf32>
    %c0_3 = arith.constant 0 : index
    %c0_4 = arith.constant 0 : index
    %5 = vector.load %arg3[%c0_3, %c0_4] : memref<1x128xf32, #tpu.memory_space<vmem>>, vector<1x128xf32>
    %6 = vector.broadcast %5 : vector<1x128xf32> to vector<32x128xf32>
    %7 = arith.addf %4, %6 : vector<32x128xf32>
    %8 = arith.truncf %7 : vector<32x128xf32> to vector<32x128xbf16>
    %c0_5 = arith.constant 0 : index
    %c0_6 = arith.constant 0 : index
    %9 = vector.load %arg4[%c0_5, %c0_6] : memref<32x128xbf16, #tpu.memory_space<vmem>>, vector<32x128xbf16>
    tpu.vector_store %arg4[%c0_5, %c0_6], %8 {strides = array<i32>} : memref<32x128xbf16, #tpu.memory_space<vmem>>, vector<32x128xbf16>,
    return
  }
  func.func @transform_0(%arg0: i32) -> (i32, i32) {
    %c0_i32 = arith.constant 0 : i32
    %c0_i32_0 = arith.constant 0 : i32
    return %arg0, %c0_i32 : i32, i32
  }
  func.func @transform_1(%arg0: i32) -> (i32, i32) {
    %c0_i32 = arith.constant 0 : i32
    %c0_i32_0 = arith.constant 0 : i32
    %c0_i32_1 = arith.constant 0 : i32
    return %c0_i32, %c0_i32_0 : i32, i32
  }
  func.func @transform_2(%arg0: i32) -> (i32, i32) {
    %c0_i32 = arith.constant 0 : i32
    %c0_i32_0 = arith.constant 0 : i32
    %c0_i32_1 = arith.constant 0 : i32
    return %c0_i32, %c0_i32_0 : i32, i32
  }
  func.func @transform_3(%arg0: i32) -> (i32, i32) {
    %c0_i32 = arith.constant 0 : i32
    %c0_i32_0 = arith.constant 0 : i32
    return %arg0, %c0_i32 : i32, i32
  }
}

module attributes {stable_mosaic.version = 11 : i64} {
  func.func @kernel(%arg0: i32, %arg1: i32, %arg2: i32, %arg3: memref<1x8x1024xbf16, #tpu.memory_space<vmem>>, %arg4: memref<1x1024x128xbf16, #tpu.memory_space<vmem>>, %arg5: memref<1x8x128xbf16, #tpu.memory_space<vmem>>, %arg6: memref<1x1x8x128xf32, #tpu.memory_space<vmem>>) attributes {dimension_semantics = [#tpu.dimension_semantics<parallel>, #tpu.dimension_semantics<parallel>, #tpu.dimension_semantics<parallel>], iteration_bounds = array<i64: 1, 1, 1>, scalar_prefetch = 0 : i64, scratch_operands = 0 : i64, tpu.core_type = #tpu.core_type<tc>, window_params = [{transform_indices = @transform_0, window_bounds = array<i64: 1, 8, 1024>}, {transform_indices = @transform_1, window_bounds = array<i64: 1, 1024, 128>}, {transform_indices = @transform_2, window_bounds = array<i64: 1, 8, 128>}, {transform_indices = @transform_3, window_bounds = array<i64: 1, 1, 8, 128>}]} {
    %c0 = arith.constant 0 : index
    %c0_0 = arith.constant 0 : index
    %c0_1 = arith.constant 0 : index
    %0 = vector.load %arg3[%c0, %c0_0, %c0_1] : memref<1x8x1024xbf16, #tpu.memory_space<vmem>>, vector<1x8x1024xbf16>
    %1 = vector.shape_cast %0 : vector<1x8x1024xbf16> to vector<8x1024xbf16>
    %c0_2 = arith.constant 0 : index
    %c0_3 = arith.constant 0 : index
    %c0_4 = arith.constant 0 : index
    %2 = vector.load %arg4[%c0_2, %c0_3, %c0_4] : memref<1x1024x128xbf16, #tpu.memory_space<vmem>>, vector<1x1024x128xbf16>
    %3 = vector.shape_cast %2 : vector<1x1024x128xbf16> to vector<1024x128xbf16>
    %cst = arith.constant dense<0.000000e+00> : vector<8x128xf32>
    %4 = tpu.matmul %1, %3, %cst {dimension_numbers = #tpu.dot_dimension_numbers<[1], [0], [0], [1], [0, 0, 1, 1], [], []>} : vector<8x1024xbf16>, vector<1024x128xbf16>, vector<8x128xf32> -> vector<8x128xf32>
    %5 = arith.truncf %4 : vector<8x128xf32> to vector<8x128xbf16>
    %c0_5 = arith.constant 0 : index
    %c0_6 = arith.constant 0 : index
    %c0_7 = arith.constant 0 : index
    %6 = vector.load %arg5[%c0_5, %c0_6, %c0_7] : memref<1x8x128xbf16, #tpu.memory_space<vmem>>, vector<1x8x128xbf16>
    %7 = vector.shape_cast %6 : vector<1x8x128xbf16> to vector<8x128xbf16>
    %8 = vector.shape_cast %5 : vector<8x128xbf16> to vector<1x8x128xbf16>
    tpu.vector_store %arg5[%c0_5, %c0_6, %c0_7], %8 {strides = array<i32>} : memref<1x8x128xbf16, #tpu.memory_space<vmem>>, vector<1x8x128xbf16>,
    %cst_8 = arith.constant dense<0.000000e+00> : vector<128xf32>
    %9 = vector.multi_reduction <add>, %4, %cst_8 [0] : vector<8x128xf32> to vector<128xf32>
    %10 = vector.shape_cast %9 : vector<128xf32> to vector<1x128xf32>
    %c0_9 = arith.constant 0 : index
    %c0_10 = arith.constant 0 : index
    %c0_11 = arith.constant 0 : index
    %c0_12 = arith.constant 0 : index
    %11 = vector.load %arg6[%c0_9, %c0_10, %c0_11, %c0_12] : memref<1x1x8x128xf32, #tpu.memory_space<vmem>>, vector<1x1x1x128xf32>
    %12 = vector.shape_cast %11 : vector<1x1x1x128xf32> to vector<1x128xf32>
    %13 = vector.shape_cast %10 : vector<1x128xf32> to vector<1x1x1x128xf32>
    tpu.vector_store %arg6[%c0_9, %c0_10, %c0_11, %c0_12], %13 {strides = array<i32>} : memref<1x1x8x128xf32, #tpu.memory_space<vmem>>, vector<1x1x1x128xf32>,
    %14 = arith.mulf %4, %4 : vector<8x128xf32>
    %cst_13 = arith.constant dense<0.000000e+00> : vector<128xf32>
    %15 = vector.multi_reduction <add>, %14, %cst_13 [0] : vector<8x128xf32> to vector<128xf32>
    %16 = vector.shape_cast %15 : vector<128xf32> to vector<1x128xf32>
    %c0_14 = arith.constant 0 : index
    %c0_15 = arith.constant 0 : index
    %c1 = arith.constant 1 : index
    %c0_16 = arith.constant 0 : index
    %17 = vector.load %arg6[%c0_14, %c0_15, %c1, %c0_16] : memref<1x1x8x128xf32, #tpu.memory_space<vmem>>, vector<1x1x1x128xf32>
    %18 = vector.shape_cast %17 : vector<1x1x1x128xf32> to vector<1x128xf32>
    %19 = vector.shape_cast %16 : vector<1x128xf32> to vector<1x1x1x128xf32>
    tpu.vector_store %arg6[%c0_14, %c0_15, %c1, %c0_16], %19 {strides = array<i32>} : memref<1x1x8x128xf32, #tpu.memory_space<vmem>>, vector<1x1x1x128xf32>,
    return
  }
  func.func @transform_0(%arg0: i32, %arg1: i32, %arg2: i32) -> (i32, i32, i32) {
    %c0_i32 = arith.constant 0 : i32
    %c0_i32_0 = arith.constant 0 : i32
    return %arg0, %arg1, %c0_i32 : i32, i32, i32
  }
  func.func @transform_1(%arg0: i32, %arg1: i32, %arg2: i32) -> (i32, i32, i32) {
    %c0_i32 = arith.constant 0 : i32
    %c0_i32_0 = arith.constant 0 : i32
    return %arg0, %c0_i32, %arg2 : i32, i32, i32
  }
  func.func @transform_2(%arg0: i32, %arg1: i32, %arg2: i32) -> (i32, i32, i32) {
    %c0_i32 = arith.constant 0 : i32
    return %arg0, %arg1, %arg2 : i32, i32, i32
  }
  func.func @transform_3(%arg0: i32, %arg1: i32, %arg2: i32) -> (i32, i32, i32, i32) {
    %c0_i32 = arith.constant 0 : i32
    %c0_i32_0 = arith.constant 0 : i32
    return %arg0, %arg1, %c0_i32, %arg2 : i32, i32, i32, i32
  }
}

module attributes {stable_mosaic.version = 11 : i64} {
  func.func @kernel(%arg0: i32, %arg1: memref<8x128xbf16, #tpu.memory_space<vmem>>, %arg2: memref<1x128xf32, #tpu.memory_space<vmem>>, %arg3: memref<1x128xf32, #tpu.memory_space<vmem>>, %arg4: memref<8x128xbf16, #tpu.memory_space<vmem>>) attributes {dimension_semantics = [#tpu.dimension_semantics<parallel>], iteration_bounds = array<i64: 1>, scalar_prefetch = 0 : i64, scratch_operands = 0 : i64, tpu.core_type = #tpu.core_type<tc>, window_params = [{transform_indices = @transform_0, window_bounds = array<i64: 8, 128>}, {pipeline_mode = #tpu.pipeline_mode<synchronous>, transform_indices = @transform_1, window_bounds = array<i64: 1, 128>}, {pipeline_mode = #tpu.pipeline_mode<synchronous>, transform_indices = @transform_2, window_bounds = array<i64: 1, 128>}, {transform_indices = @transform_3, window_bounds = array<i64: 8, 128>}]} {
    %c0 = arith.constant 0 : index
    %c0_0 = arith.constant 0 : index
    %0 = vector.load %arg1[%c0, %c0_0] : memref<8x128xbf16, #tpu.memory_space<vmem>>, vector<8x128xbf16>
    %1 = arith.extf %0 : vector<8x128xbf16> to vector<8x128xf32>
    %c0_1 = arith.constant 0 : index
    %c0_2 = arith.constant 0 : index
    %2 = vector.load %arg2[%c0_1, %c0_2] : memref<1x128xf32, #tpu.memory_space<vmem>>, vector<1x128xf32>
    %3 = vector.broadcast %2 : vector<1x128xf32> to vector<8x128xf32>
    %4 = arith.mulf %1, %3 : vector<8x128xf32>
    %c0_3 = arith.constant 0 : index
    %c0_4 = arith.constant 0 : index
    %5 = vector.load %arg3[%c0_3, %c0_4] : memref<1x128xf32, #tpu.memory_space<vmem>>, vector<1x128xf32>
    %6 = vector.broadcast %5 : vector<1x128xf32> to vector<8x128xf32>
    %7 = arith.addf %4, %6 : vector<8x128xf32>
    %8 = arith.truncf %7 : vector<8x128xf32> to vector<8x128xbf16>
    %c0_5 = arith.constant 0 : index
    %c0_6 = arith.constant 0 : index
    %9 = vector.load %arg4[%c0_5, %c0_6] : memref<8x128xbf16, #tpu.memory_space<vmem>>, vector<8x128xbf16>
    tpu.vector_store %arg4[%c0_5, %c0_6], %8 {strides = array<i32>} : memref<8x128xbf16, #tpu.memory_space<vmem>>, vector<8x128xbf16>,
    return
  }
  func.func @transform_0(%arg0: i32) -> (i32, i32) {
    %c0_i32 = arith.constant 0 : i32
    %c0_i32_0 = arith.constant 0 : i32
    return %arg0, %c0_i32 : i32, i32
  }
  func.func @transform_1(%arg0: i32) -> (i32, i32) {
    %c0_i32 = arith.constant 0 : i32
    %c0_i32_0 = arith.constant 0 : i32
    %c0_i32_1 = arith.constant 0 : i32
    return %c0_i32, %c0_i32_0 : i32, i32
  }
  func.func @transform_2(%arg0: i32) -> (i32, i32) {
    %c0_i32 = arith.constant 0 : i32
    %c0_i32_0 = arith.constant 0 : i32
    %c0_i32_1 = arith.constant 0 : i32
    return %c0_i32, %c0_i32_0 : i32, i32
  }
  func.func @transform_3(%arg0: i32) -> (i32, i32) {
    %c0_i32 = arith.constant 0 : i32
    %c0_i32_0 = arith.constant 0 : i32
    return %arg0, %c0_i32 : i32, i32
  }
}

module attributes {stable_mosaic.version = 11 : i64} {
  func.func @kernel(%arg0: i32, %arg1: i32, %arg2: i32, %arg3: memref<1x8x1024xbf16, #tpu.memory_space<vmem>>, %arg4: memref<1x1024x128xbf16, #tpu.memory_space<vmem>>, %arg5: memref<1x8x128xbf16, #tpu.memory_space<vmem>>) attributes {dimension_semantics = [#tpu.dimension_semantics<parallel>, #tpu.dimension_semantics<parallel>, #tpu.dimension_semantics<parallel>], iteration_bounds = array<i64: 1, 1, 1>, scalar_prefetch = 0 : i64, scratch_operands = 0 : i64, tpu.core_type = #tpu.core_type<tc>, window_params = [{transform_indices = @transform_0, window_bounds = array<i64: 1, 8, 1024>}, {transform_indices = @transform_1, window_bounds = array<i64: 1, 1024, 128>}, {transform_indices = @transform_2, window_bounds = array<i64: 1, 8, 128>}]} {
    %c0 = arith.constant 0 : index
    %c0_0 = arith.constant 0 : index
    %c0_1 = arith.constant 0 : index
    %0 = vector.load %arg3[%c0, %c0_0, %c0_1] : memref<1x8x1024xbf16, #tpu.memory_space<vmem>>, vector<1x8x1024xbf16>
    %1 = vector.shape_cast %0 : vector<1x8x1024xbf16> to vector<8x1024xbf16>
    %c0_2 = arith.constant 0 : index
    %c0_3 = arith.constant 0 : index
    %c0_4 = arith.constant 0 : index
    %2 = vector.load %arg4[%c0_2, %c0_3, %c0_4] : memref<1x1024x128xbf16, #tpu.memory_space<vmem>>, vector<1x1024x128xbf16>
    %3 = vector.shape_cast %2 : vector<1x1024x128xbf16> to vector<1024x128xbf16>
    %cst = arith.constant dense<0.000000e+00> : vector<8x128xf32>
    %4 = tpu.matmul %1, %3, %cst {dimension_numbers = #tpu.dot_dimension_numbers<[1], [0], [0], [1], [0, 0, 1, 1], [], []>} : vector<8x1024xbf16>, vector<1024x128xbf16>, vector<8x128xf32> -> vector<8x128xf32>
    %5 = arith.truncf %4 : vector<8x128xf32> to vector<8x128xbf16>
    %c0_5 = arith.constant 0 : index
    %c0_6 = arith.constant 0 : index
    %c0_7 = arith.constant 0 : index
    %6 = vector.load %arg5[%c0_5, %c0_6, %c0_7] : memref<1x8x128xbf16, #tpu.memory_space<vmem>>, vector<1x8x128xbf16>
    %7 = vector.shape_cast %6 : vector<1x8x128xbf16> to vector<8x128xbf16>
    %8 = vector.shape_cast %5 : vector<8x128xbf16> to vector<1x8x128xbf16>
    tpu.vector_store %arg5[%c0_5, %c0_6, %c0_7], %8 {strides = array<i32>} : memref<1x8x128xbf16, #tpu.memory_space<vmem>>, vector<1x8x128xbf16>,
    return
  }
  func.func @transform_0(%arg0: i32, %arg1: i32, %arg2: i32) -> (i32, i32, i32) {
    %c0_i32 = arith.constant 0 : i32
    %c0_i32_0 = arith.constant 0 : i32
    return %arg0, %arg1, %c0_i32 : i32, i32, i32
  }
  func.func @transform_1(%arg0: i32, %arg1: i32, %arg2: i32) -> (i32, i32, i32) {
    %c0_i32 = arith.constant 0 : i32
    %c0_i32_0 = arith.constant 0 : i32
    return %arg0, %c0_i32, %arg2 : i32, i32, i32
  }
  func.func @transform_2(%arg0: i32, %arg1: i32, %arg2: i32) -> (i32, i32, i32) {
    %c0_i32 = arith.constant 0 : i32
    return %arg0, %arg1, %arg2 : i32, i32, i32
  }
}

module attributes {stable_mosaic.version = 11 : i64} {
  func.func @kernel(%arg0: i32, %arg1: i32, %arg2: i32, %arg3: memref<1x8x128xbf16, #tpu.memory_space<vmem>>, %arg4: memref<1x128x128xbf16, #tpu.memory_space<vmem>>, %arg5: memref<1x8x128xbf16, #tpu.memory_space<vmem>>, %arg6: memref<1x1x8x128xf32, #tpu.memory_space<vmem>>) attributes {dimension_semantics = [#tpu.dimension_semantics<parallel>, #tpu.dimension_semantics<parallel>, #tpu.dimension_semantics<parallel>], iteration_bounds = array<i64: 1, 1, 1>, scalar_prefetch = 0 : i64, scratch_operands = 0 : i64, tpu.core_type = #tpu.core_type<tc>, window_params = [{transform_indices = @transform_0, window_bounds = array<i64: 1, 8, 128>}, {transform_indices = @transform_1, window_bounds = array<i64: 1, 128, 128>}, {transform_indices = @transform_2, window_bounds = array<i64: 1, 8, 128>}, {transform_indices = @transform_3, window_bounds = array<i64: 1, 1, 8, 128>}]} {
    %c0 = arith.constant 0 : index
    %c0_0 = arith.constant 0 : index
    %c0_1 = arith.constant 0 : index
    %0 = vector.load %arg3[%c0, %c0_0, %c0_1] : memref<1x8x128xbf16, #tpu.memory_space<vmem>>, vector<1x8x128xbf16>
    %1 = vector.shape_cast %0 : vector<1x8x128xbf16> to vector<8x128xbf16>
    %c0_2 = arith.constant 0 : index
    %c0_3 = arith.constant 0 : index
    %c0_4 = arith.constant 0 : index
    %2 = vector.load %arg4[%c0_2, %c0_3, %c0_4] : memref<1x128x128xbf16, #tpu.memory_space<vmem>>, vector<1x128x128xbf16>
    %3 = vector.shape_cast %2 : vector<1x128x128xbf16> to vector<128x128xbf16>
    %cst = arith.constant dense<0.000000e+00> : vector<8x128xf32>
    %4 = tpu.matmul %1, %3, %cst {dimension_numbers = #tpu.dot_dimension_numbers<[1], [0], [0], [1], [0, 0, 1, 1], [], []>} : vector<8x128xbf16>, vector<128x128xbf16>, vector<8x128xf32> -> vector<8x128xf32>
    %5 = arith.truncf %4 : vector<8x128xf32> to vector<8x128xbf16>
    %c0_5 = arith.constant 0 : index
    %c0_6 = arith.constant 0 : index
    %c0_7 = arith.constant 0 : index
    %6 = vector.load %arg5[%c0_5, %c0_6, %c0_7] : memref<1x8x128xbf16, #tpu.memory_space<vmem>>, vector<1x8x128xbf16>
    %7 = vector.shape_cast %6 : vector<1x8x128xbf16> to vector<8x128xbf16>
    %8 = vector.shape_cast %5 : vector<8x128xbf16> to vector<1x8x128xbf16>
    tpu.vector_store %arg5[%c0_5, %c0_6, %c0_7], %8 {strides = array<i32>} : memref<1x8x128xbf16, #tpu.memory_space<vmem>>, vector<1x8x128xbf16>,
    %cst_8 = arith.constant dense<0.000000e+00> : vector<128xf32>
    %9 = vector.multi_reduction <add>, %4, %cst_8 [0] : vector<8x128xf32> to vector<128xf32>
    %10 = vector.shape_cast %9 : vector<128xf32> to vector<1x128xf32>
    %c0_9 = arith.constant 0 : index
    %c0_10 = arith.constant 0 : index
    %c0_11 = arith.constant 0 : index
    %c0_12 = arith.constant 0 : index
    %11 = vector.load %arg6[%c0_9, %c0_10, %c0_11, %c0_12] : memref<1x1x8x128xf32, #tpu.memory_space<vmem>>, vector<1x1x1x128xf32>
    %12 = vector.shape_cast %11 : vector<1x1x1x128xf32> to vector<1x128xf32>
    %13 = vector.shape_cast %10 : vector<1x128xf32> to vector<1x1x1x128xf32>
    tpu.vector_store %arg6[%c0_9, %c0_10, %c0_11, %c0_12], %13 {strides = array<i32>} : memref<1x1x8x128xf32, #tpu.memory_space<vmem>>, vector<1x1x1x128xf32>,
    %14 = arith.mulf %4, %4 : vector<8x128xf32>
    %cst_13 = arith.constant dense<0.000000e+00> : vector<128xf32>
    %15 = vector.multi_reduction <add>, %14, %cst_13 [0] : vector<8x128xf32> to vector<128xf32>
    %16 = vector.shape_cast %15 : vector<128xf32> to vector<1x128xf32>
    %c0_14 = arith.constant 0 : index
    %c0_15 = arith.constant 0 : index
    %c1 = arith.constant 1 : index
    %c0_16 = arith.constant 0 : index
    %17 = vector.load %arg6[%c0_14, %c0_15, %c1, %c0_16] : memref<1x1x8x128xf32, #tpu.memory_space<vmem>>, vector<1x1x1x128xf32>
    %18 = vector.shape_cast %17 : vector<1x1x1x128xf32> to vector<1x128xf32>
    %19 = vector.shape_cast %16 : vector<1x128xf32> to vector<1x1x1x128xf32>
    tpu.vector_store %arg6[%c0_14, %c0_15, %c1, %c0_16], %19 {strides = array<i32>} : memref<1x1x8x128xf32, #tpu.memory_space<vmem>>, vector<1x1x1x128xf32>,
    return
  }
  func.func @transform_0(%arg0: i32, %arg1: i32, %arg2: i32) -> (i32, i32, i32) {
    %c0_i32 = arith.constant 0 : i32
    %c0_i32_0 = arith.constant 0 : i32
    return %arg0, %arg1, %c0_i32 : i32, i32, i32
  }
  func.func @transform_1(%arg0: i32, %arg1: i32, %arg2: i32) -> (i32, i32, i32) {
    %c0_i32 = arith.constant 0 : i32
    %c0_i32_0 = arith.constant 0 : i32
    return %arg0, %c0_i32, %arg2 : i32, i32, i32
  }
  func.func @transform_2(%arg0: i32, %arg1: i32, %arg2: i32) -> (i32, i32, i32) {
    %c0_i32 = arith.constant 0 : i32
    return %arg0, %arg1, %arg2 : i32, i32, i32
  }
  func.func @transform_3(%arg0: i32, %arg1: i32, %arg2: i32) -> (i32, i32, i32, i32) {
    %c0_i32 = arith.constant 0 : i32
    %c0_i32_0 = arith.constant 0 : i32
    return %arg0, %arg1, %c0_i32, %arg2 : i32, i32, i32, i32
  }
}

module attributes {stable_mosaic.version = 11 : i64} {
  func.func @kernel(%arg0: i32, %arg1: memref<8x128xbf16, #tpu.memory_space<vmem>>, %arg2: memref<1x128xf32, #tpu.memory_space<vmem>>, %arg3: memref<1x128xf32, #tpu.memory_space<vmem>>, %arg4: memref<8x128xbf16, #tpu.memory_space<vmem>>) attributes {dimension_semantics = [#tpu.dimension_semantics<parallel>], iteration_bounds = array<i64: 1>, scalar_prefetch = 0 : i64, scratch_operands = 0 : i64, tpu.core_type = #tpu.core_type<tc>, window_params = [{transform_indices = @transform_0, window_bounds = array<i64: 8, 128>}, {pipeline_mode = #tpu.pipeline_mode<synchronous>, transform_indices = @transform_1, window_bounds = array<i64: 1, 128>}, {pipeline_mode = #tpu.pipeline_mode<synchronous>, transform_indices = @transform_2, window_bounds = array<i64: 1, 128>}, {transform_indices = @transform_3, window_bounds = array<i64: 8, 128>}]} {
    %c0 = arith.constant 0 : index
    %c0_0 = arith.constant 0 : index
    %0 = vector.load %arg1[%c0, %c0_0] : memref<8x128xbf16, #tpu.memory_space<vmem>>, vector<8x128xbf16>
    %1 = arith.extf %0 : vector<8x128xbf16> to vector<8x128xf32>
    %c0_1 = arith.constant 0 : index
    %c0_2 = arith.constant 0 : index
    %2 = vector.load %arg2[%c0_1, %c0_2] : memref<1x128xf32, #tpu.memory_space<vmem>>, vector<1x128xf32>
    %3 = vector.broadcast %2 : vector<1x128xf32> to vector<8x128xf32>
    %4 = arith.mulf %1, %3 : vector<8x128xf32>
    %c0_3 = arith.constant 0 : index
    %c0_4 = arith.constant 0 : index
    %5 = vector.load %arg3[%c0_3, %c0_4] : memref<1x128xf32, #tpu.memory_space<vmem>>, vector<1x128xf32>
    %6 = vector.broadcast %5 : vector<1x128xf32> to vector<8x128xf32>
    %7 = arith.addf %4, %6 : vector<8x128xf32>
    %cst = arith.constant 0.000000e+00 : f32
    %8 = vector.broadcast %cst : f32 to vector<8x128xf32>
    %9 = arith.maximumf %7, %8 : vector<8x128xf32>
    %10 = arith.truncf %9 : vector<8x128xf32> to vector<8x128xbf16>
    %c0_5 = arith.constant 0 : index
    %c0_6 = arith.constant 0 : index
    %11 = vector.load %arg4[%c0_5, %c0_6] : memref<8x128xbf16, #tpu.memory_space<vmem>>, vector<8x128xbf16>
    tpu.vector_store %arg4[%c0_5, %c0_6], %10 {strides = array<i32>} : memref<8x128xbf16, #tpu.memory_space<vmem>>, vector<8x128xbf16>,
    return
  }
  func.func @transform_0(%arg0: i32) -> (i32, i32) {
    %c0_i32 = arith.constant 0 : i32
    %c0_i32_0 = arith.constant 0 : i32
    return %arg0, %c0_i32 : i32, i32
  }
  func.func @transform_1(%arg0: i32) -> (i32, i32) {
    %c0_i32 = arith.constant 0 : i32
    %c0_i32_0 = arith.constant 0 : i32
    %c0_i32_1 = arith.constant 0 : i32
    return %c0_i32, %c0_i32_0 : i32, i32
  }
  func.func @transform_2(%arg0: i32) -> (i32, i32) {
    %c0_i32 = arith.constant 0 : i32
    %c0_i32_0 = arith.constant 0 : i32
    %c0_i32_1 = arith.constant 0 : i32
    return %c0_i32, %c0_i32_0 : i32, i32
  }
  func.func @transform_3(%arg0: i32) -> (i32, i32) {
    %c0_i32 = arith.constant 0 : i32
    %c0_i32_0 = arith.constant 0 : i32
    return %arg0, %c0_i32 : i32, i32
  }
}

module attributes {stable_mosaic.version = 11 : i64} {
  func.func @kernel(%arg0: i32, %arg1: i32, %arg2: i32, %arg3: memref<1x8x256xbf16, #tpu.memory_space<vmem>>, %arg4: memref<1x256x128xbf16, #tpu.memory_space<vmem>>, %arg5: memref<1x8x128xbf16, #tpu.memory_space<vmem>>, %arg6: memref<1x1x8x128xf32, #tpu.memory_space<vmem>>) attributes {dimension_semantics = [#tpu.dimension_semantics<parallel>, #tpu.dimension_semantics<parallel>, #tpu.dimension_semantics<parallel>], iteration_bounds = array<i64: 4, 1, 1>, scalar_prefetch = 0 : i64, scratch_operands = 0 : i64, tpu.core_type = #tpu.core_type<tc>, window_params = [{transform_indices = @transform_0, window_bounds = array<i64: 1, 8, 256>}, {transform_indices = @transform_1, window_bounds = array<i64: 1, 256, 128>}, {transform_indices = @transform_2, window_bounds = array<i64: 1, 8, 128>}, {transform_indices = @transform_3, window_bounds = array<i64: 1, 1, 8, 128>}]} {
    %c0 = arith.constant 0 : index
    %c0_0 = arith.constant 0 : index
    %c0_1 = arith.constant 0 : index
    %0 = vector.load %arg3[%c0, %c0_0, %c0_1] : memref<1x8x256xbf16, #tpu.memory_space<vmem>>, vector<1x8x256xbf16>
    %1 = vector.shape_cast %0 : vector<1x8x256xbf16> to vector<8x256xbf16>
    %c0_2 = arith.constant 0 : index
    %c0_3 = arith.constant 0 : index
    %c0_4 = arith.constant 0 : index
    %2 = vector.load %arg4[%c0_2, %c0_3, %c0_4] : memref<1x256x128xbf16, #tpu.memory_space<vmem>>, vector<1x256x128xbf16>
    %3 = vector.shape_cast %2 : vector<1x256x128xbf16> to vector<256x128xbf16>
    %cst = arith.constant dense<0.000000e+00> : vector<8x128xf32>
    %4 = tpu.matmul %1, %3, %cst {dimension_numbers = #tpu.dot_dimension_numbers<[1], [0], [0], [1], [0, 0, 1, 1], [], []>} : vector<8x256xbf16>, vector<256x128xbf16>, vector<8x128xf32> -> vector<8x128xf32>
    %5 = arith.truncf %4 : vector<8x128xf32> to vector<8x128xbf16>
    %c0_5 = arith.constant 0 : index
    %c0_6 = arith.constant 0 : index
    %c0_7 = arith.constant 0 : index
    %6 = vector.load %arg5[%c0_5, %c0_6, %c0_7] : memref<1x8x128xbf16, #tpu.memory_space<vmem>>, vector<1x8x128xbf16>
    %7 = vector.shape_cast %6 : vector<1x8x128xbf16> to vector<8x128xbf16>
    %8 = vector.shape_cast %5 : vector<8x128xbf16> to vector<1x8x128xbf16>
    tpu.vector_store %arg5[%c0_5, %c0_6, %c0_7], %8 {strides = array<i32>} : memref<1x8x128xbf16, #tpu.memory_space<vmem>>, vector<1x8x128xbf16>,
    %cst_8 = arith.constant dense<0.000000e+00> : vector<128xf32>
    %9 = vector.multi_reduction <add>, %4, %cst_8 [0] : vector<8x128xf32> to vector<128xf32>
    %10 = vector.shape_cast %9 : vector<128xf32> to vector<1x128xf32>
    %c0_9 = arith.constant 0 : index
    %c0_10 = arith.constant 0 : index
    %c0_11 = arith.constant 0 : index
    %c0_12 = arith.constant 0 : index
    %11 = vector.load %arg6[%c0_9, %c0_10, %c0_11, %c0_12] : memref<1x1x8x128xf32, #tpu.memory_space<vmem>>, vector<1x1x1x128xf32>
    %12 = vector.shape_cast %11 : vector<1x1x1x128xf32> to vector<1x128xf32>
    %13 = vector.shape_cast %10 : vector<1x128xf32> to vector<1x1x1x128xf32>
    tpu.vector_store %arg6[%c0_9, %c0_10, %c0_11, %c0_12], %13 {strides = array<i32>} : memref<1x1x8x128xf32, #tpu.memory_space<vmem>>, vector<1x1x1x128xf32>,
    %14 = arith.mulf %4, %4 : vector<8x128xf32>
    %cst_13 = arith.constant dense<0.000000e+00> : vector<128xf32>
    %15 = vector.multi_reduction <add>, %14, %cst_13 [0] : vector<8x128xf32> to vector<128xf32>
    %16 = vector.shape_cast %15 : vector<128xf32> to vector<1x128xf32>
    %c0_14 = arith.constant 0 : index
    %c0_15 = arith.constant 0 : index
    %c1 = arith.constant 1 : index
    %c0_16 = arith.constant 0 : index
    %17 = vector.load %arg6[%c0_14, %c0_15, %c1, %c0_16] : memref<1x1x8x128xf32, #tpu.memory_space<vmem>>, vector<1x1x1x128xf32>
    %18 = vector.shape_cast %17 : vector<1x1x1x128xf32> to vector<1x128xf32>
    %19 = vector.shape_cast %16 : vector<1x128xf32> to vector<1x1x1x128xf32>
    tpu.vector_store %arg6[%c0_14, %c0_15, %c1, %c0_16], %19 {strides = array<i32>} : memref<1x1x8x128xf32, #tpu.memory_space<vmem>>, vector<1x1x1x128xf32>,
    return
  }
  func.func @transform_0(%arg0: i32, %arg1: i32, %arg2: i32) -> (i32, i32, i32) {
    %c0_i32 = arith.constant 0 : i32
    %c0_i32_0 = arith.constant 0 : i32
    return %arg0, %arg1, %c0_i32 : i32, i32, i32
  }
  func.func @transform_1(%arg0: i32, %arg1: i32, %arg2: i32) -> (i32, i32, i32) {
    %c0_i32 = arith.constant 0 : i32
    %c0_i32_0 = arith.constant 0 : i32
    return %arg0, %c0_i32, %arg2 : i32, i32, i32
  }
  func.func @transform_2(%arg0: i32, %arg1: i32, %arg2: i32) -> (i32, i32, i32) {
    %c0_i32 = arith.constant 0 : i32
    return %arg0, %arg1, %arg2 : i32, i32, i32
  }
  func.func @transform_3(%arg0: i32, %arg1: i32, %arg2: i32) -> (i32, i32, i32, i32) {
    %c0_i32 = arith.constant 0 : i32
    %c0_i32_0 = arith.constant 0 : i32
    return %arg0, %arg1, %c0_i32, %arg2 : i32, i32, i32, i32
  }
}

module attributes {stable_mosaic.version = 11 : i64} {
  func.func @kernel(%arg0: i32, %arg1: memref<32x128xbf16, #tpu.memory_space<vmem>>, %arg2: memref<1x128xf32, #tpu.memory_space<vmem>>, %arg3: memref<1x128xf32, #tpu.memory_space<vmem>>, %arg4: memref<32x128xbf16, #tpu.memory_space<vmem>>) attributes {dimension_semantics = [#tpu.dimension_semantics<parallel>], iteration_bounds = array<i64: 1>, scalar_prefetch = 0 : i64, scratch_operands = 0 : i64, tpu.core_type = #tpu.core_type<tc>, window_params = [{transform_indices = @transform_0, window_bounds = array<i64: 32, 128>}, {pipeline_mode = #tpu.pipeline_mode<synchronous>, transform_indices = @transform_1, window_bounds = array<i64: 1, 128>}, {pipeline_mode = #tpu.pipeline_mode<synchronous>, transform_indices = @transform_2, window_bounds = array<i64: 1, 128>}, {transform_indices = @transform_3, window_bounds = array<i64: 32, 128>}]} {
    %c0 = arith.constant 0 : index
    %c0_0 = arith.constant 0 : index
    %0 = vector.load %arg1[%c0, %c0_0] : memref<32x128xbf16, #tpu.memory_space<vmem>>, vector<32x128xbf16>
    %1 = arith.extf %0 : vector<32x128xbf16> to vector<32x128xf32>
    %c0_1 = arith.constant 0 : index
    %c0_2 = arith.constant 0 : index
    %2 = vector.load %arg2[%c0_1, %c0_2] : memref<1x128xf32, #tpu.memory_space<vmem>>, vector<1x128xf32>
    %3 = vector.broadcast %2 : vector<1x128xf32> to vector<32x128xf32>
    %4 = arith.mulf %1, %3 : vector<32x128xf32>
    %c0_3 = arith.constant 0 : index
    %c0_4 = arith.constant 0 : index
    %5 = vector.load %arg3[%c0_3, %c0_4] : memref<1x128xf32, #tpu.memory_space<vmem>>, vector<1x128xf32>
    %6 = vector.broadcast %5 : vector<1x128xf32> to vector<32x128xf32>
    %7 = arith.addf %4, %6 : vector<32x128xf32>
    %cst = arith.constant 0.000000e+00 : f32
    %8 = vector.broadcast %cst : f32 to vector<32x128xf32>
    %9 = arith.maximumf %7, %8 : vector<32x128xf32>
    %10 = arith.truncf %9 : vector<32x128xf32> to vector<32x128xbf16>
    %c0_5 = arith.constant 0 : index
    %c0_6 = arith.constant 0 : index
    %11 = vector.load %arg4[%c0_5, %c0_6] : memref<32x128xbf16, #tpu.memory_space<vmem>>, vector<32x128xbf16>
    tpu.vector_store %arg4[%c0_5, %c0_6], %10 {strides = array<i32>} : memref<32x128xbf16, #tpu.memory_space<vmem>>, vector<32x128xbf16>,
    return
  }
  func.func @transform_0(%arg0: i32) -> (i32, i32) {
    %c0_i32 = arith.constant 0 : i32
    %c0_i32_0 = arith.constant 0 : i32
    return %arg0, %c0_i32 : i32, i32
  }
  func.func @transform_1(%arg0: i32) -> (i32, i32) {
    %c0_i32 = arith.constant 0 : i32
    %c0_i32_0 = arith.constant 0 : i32
    %c0_i32_1 = arith.constant 0 : i32
    return %c0_i32, %c0_i32_0 : i32, i32
  }
  func.func @transform_2(%arg0: i32) -> (i32, i32) {
    %c0_i32 = arith.constant 0 : i32
    %c0_i32_0 = arith.constant 0 : i32
    %c0_i32_1 = arith.constant 0 : i32
    return %c0_i32, %c0_i32_0 : i32, i32
  }
  func.func @transform_3(%arg0: i32) -> (i32, i32) {
    %c0_i32 = arith.constant 0 : i32
    %c0_i32_0 = arith.constant 0 : i32
    return %arg0, %c0_i32 : i32, i32
  }
}

module attributes {stable_mosaic.version = 11 : i64} {
  func.func @kernel(%arg0: i32, %arg1: i32, %arg2: i32, %arg3: memref<1x8x512xbf16, #tpu.memory_space<vmem>>, %arg4: memref<1x512x128xbf16, #tpu.memory_space<vmem>>, %arg5: memref<1x8x128xbf16, #tpu.memory_space<vmem>>, %arg6: memref<1x1x8x128xf32, #tpu.memory_space<vmem>>) attributes {dimension_semantics = [#tpu.dimension_semantics<parallel>, #tpu.dimension_semantics<parallel>, #tpu.dimension_semantics<parallel>], iteration_bounds = array<i64: 4, 1, 1>, scalar_prefetch = 0 : i64, scratch_operands = 0 : i64, tpu.core_type = #tpu.core_type<tc>, window_params = [{transform_indices = @transform_0, window_bounds = array<i64: 1, 8, 512>}, {transform_indices = @transform_1, window_bounds = array<i64: 1, 512, 128>}, {transform_indices = @transform_2, window_bounds = array<i64: 1, 8, 128>}, {transform_indices = @transform_3, window_bounds = array<i64: 1, 1, 8, 128>}]} {
    %c0 = arith.constant 0 : index
    %c0_0 = arith.constant 0 : index
    %c0_1 = arith.constant 0 : index
    %0 = vector.load %arg3[%c0, %c0_0, %c0_1] : memref<1x8x512xbf16, #tpu.memory_space<vmem>>, vector<1x8x512xbf16>
    %1 = vector.shape_cast %0 : vector<1x8x512xbf16> to vector<8x512xbf16>
    %c0_2 = arith.constant 0 : index
    %c0_3 = arith.constant 0 : index
    %c0_4 = arith.constant 0 : index
    %2 = vector.load %arg4[%c0_2, %c0_3, %c0_4] : memref<1x512x128xbf16, #tpu.memory_space<vmem>>, vector<1x512x128xbf16>
    %3 = vector.shape_cast %2 : vector<1x512x128xbf16> to vector<512x128xbf16>
    %cst = arith.constant dense<0.000000e+00> : vector<8x128xf32>
    %4 = tpu.matmul %1, %3, %cst {dimension_numbers = #tpu.dot_dimension_numbers<[1], [0], [0], [1], [0, 0, 1, 1], [], []>} : vector<8x512xbf16>, vector<512x128xbf16>, vector<8x128xf32> -> vector<8x128xf32>
    %5 = arith.truncf %4 : vector<8x128xf32> to vector<8x128xbf16>
    %c0_5 = arith.constant 0 : index
    %c0_6 = arith.constant 0 : index
    %c0_7 = arith.constant 0 : index
    %6 = vector.load %arg5[%c0_5, %c0_6, %c0_7] : memref<1x8x128xbf16, #tpu.memory_space<vmem>>, vector<1x8x128xbf16>
    %7 = vector.shape_cast %6 : vector<1x8x128xbf16> to vector<8x128xbf16>
    %8 = vector.shape_cast %5 : vector<8x128xbf16> to vector<1x8x128xbf16>
    tpu.vector_store %arg5[%c0_5, %c0_6, %c0_7], %8 {strides = array<i32>} : memref<1x8x128xbf16, #tpu.memory_space<vmem>>, vector<1x8x128xbf16>,
    %cst_8 = arith.constant dense<0.000000e+00> : vector<128xf32>
    %9 = vector.multi_reduction <add>, %4, %cst_8 [0] : vector<8x128xf32> to vector<128xf32>
    %10 = vector.shape_cast %9 : vector<128xf32> to vector<1x128xf32>
    %c0_9 = arith.constant 0 : index
    %c0_10 = arith.constant 0 : index
    %c0_11 = arith.constant 0 : index
    %c0_12 = arith.constant 0 : index
    %11 = vector.load %arg6[%c0_9, %c0_10, %c0_11, %c0_12] : memref<1x1x8x128xf32, #tpu.memory_space<vmem>>, vector<1x1x1x128xf32>
    %12 = vector.shape_cast %11 : vector<1x1x1x128xf32> to vector<1x128xf32>
    %13 = vector.shape_cast %10 : vector<1x128xf32> to vector<1x1x1x128xf32>
    tpu.vector_store %arg6[%c0_9, %c0_10, %c0_11, %c0_12], %13 {strides = array<i32>} : memref<1x1x8x128xf32, #tpu.memory_space<vmem>>, vector<1x1x1x128xf32>,
    %14 = arith.mulf %4, %4 : vector<8x128xf32>
    %cst_13 = arith.constant dense<0.000000e+00> : vector<128xf32>
    %15 = vector.multi_reduction <add>, %14, %cst_13 [0] : vector<8x128xf32> to vector<128xf32>
    %16 = vector.shape_cast %15 : vector<128xf32> to vector<1x128xf32>
    %c0_14 = arith.constant 0 : index
    %c0_15 = arith.constant 0 : index
    %c1 = arith.constant 1 : index
    %c0_16 = arith.constant 0 : index
    %17 = vector.load %arg6[%c0_14, %c0_15, %c1, %c0_16] : memref<1x1x8x128xf32, #tpu.memory_space<vmem>>, vector<1x1x1x128xf32>
    %18 = vector.shape_cast %17 : vector<1x1x1x128xf32> to vector<1x128xf32>
    %19 = vector.shape_cast %16 : vector<1x128xf32> to vector<1x1x1x128xf32>
    tpu.vector_store %arg6[%c0_14, %c0_15, %c1, %c0_16], %19 {strides = array<i32>} : memref<1x1x8x128xf32, #tpu.memory_space<vmem>>, vector<1x1x1x128xf32>,
    return
  }
  func.func @transform_0(%arg0: i32, %arg1: i32, %arg2: i32) -> (i32, i32, i32) {
    %c0_i32 = arith.constant 0 : i32
    %c0_i32_0 = arith.constant 0 : i32
    return %arg0, %arg1, %c0_i32 : i32, i32, i32
  }
  func.func @transform_1(%arg0: i32, %arg1: i32, %arg2: i32) -> (i32, i32, i32) {
    %c0_i32 = arith.constant 0 : i32
    %c0_i32_0 = arith.constant 0 : i32
    return %arg0, %c0_i32, %arg2 : i32, i32, i32
  }
  func.func @transform_2(%arg0: i32, %arg1: i32, %arg2: i32) -> (i32, i32, i32) {
    %c0_i32 = arith.constant 0 : i32
    return %arg0, %arg1, %arg2 : i32, i32, i32
  }
  func.func @transform_3(%arg0: i32, %arg1: i32, %arg2: i32) -> (i32, i32, i32, i32) {
    %c0_i32 = arith.constant 0 : i32
    %c0_i32_0 = arith.constant 0 : i32
    return %arg0, %arg1, %c0_i32, %arg2 : i32, i32, i32, i32
  }
}

module attributes {stable_mosaic.version = 11 : i64} {
  func.func @kernel(%arg0: i32, %arg1: i32, %arg2: i32, %arg3: memref<1x32x512xbf16, #tpu.memory_space<vmem>>, %arg4: memref<1x512x128xbf16, #tpu.memory_space<vmem>>, %arg5: memref<1x32x128xbf16, #tpu.memory_space<vmem>>, %arg6: memref<1x1x8x128xf32, #tpu.memory_space<vmem>>) attributes {dimension_semantics = [#tpu.dimension_semantics<parallel>, #tpu.dimension_semantics<parallel>, #tpu.dimension_semantics<parallel>], iteration_bounds = array<i64: 4, 1, 1>, scalar_prefetch = 0 : i64, scratch_operands = 0 : i64, tpu.core_type = #tpu.core_type<tc>, window_params = [{transform_indices = @transform_0, window_bounds = array<i64: 1, 32, 512>}, {transform_indices = @transform_1, window_bounds = array<i64: 1, 512, 128>}, {transform_indices = @transform_2, window_bounds = array<i64: 1, 32, 128>}, {transform_indices = @transform_3, window_bounds = array<i64: 1, 1, 8, 128>}]} {
    %c0 = arith.constant 0 : index
    %c0_0 = arith.constant 0 : index
    %c0_1 = arith.constant 0 : index
    %0 = vector.load %arg3[%c0, %c0_0, %c0_1] : memref<1x32x512xbf16, #tpu.memory_space<vmem>>, vector<1x32x512xbf16>
    %1 = vector.shape_cast %0 : vector<1x32x512xbf16> to vector<32x512xbf16>
    %c0_2 = arith.constant 0 : index
    %c0_3 = arith.constant 0 : index
    %c0_4 = arith.constant 0 : index
    %2 = vector.load %arg4[%c0_2, %c0_3, %c0_4] : memref<1x512x128xbf16, #tpu.memory_space<vmem>>, vector<1x512x128xbf16>
    %3 = vector.shape_cast %2 : vector<1x512x128xbf16> to vector<512x128xbf16>
    %cst = arith.constant dense<0.000000e+00> : vector<32x128xf32>
    %4 = tpu.matmul %1, %3, %cst {dimension_numbers = #tpu.dot_dimension_numbers<[1], [0], [0], [1], [0, 0, 1, 1], [], []>} : vector<32x512xbf16>, vector<512x128xbf16>, vector<32x128xf32> -> vector<32x128xf32>
    %5 = arith.truncf %4 : vector<32x128xf32> to vector<32x128xbf16>
    %c0_5 = arith.constant 0 : index
    %c0_6 = arith.constant 0 : index
    %c0_7 = arith.constant 0 : index
    %6 = vector.load %arg5[%c0_5, %c0_6, %c0_7] : memref<1x32x128xbf16, #tpu.memory_space<vmem>>, vector<1x32x128xbf16>
    %7 = vector.shape_cast %6 : vector<1x32x128xbf16> to vector<32x128xbf16>
    %8 = vector.shape_cast %5 : vector<32x128xbf16> to vector<1x32x128xbf16>
    tpu.vector_store %arg5[%c0_5, %c0_6, %c0_7], %8 {strides = array<i32>} : memref<1x32x128xbf16, #tpu.memory_space<vmem>>, vector<1x32x128xbf16>,
    %cst_8 = arith.constant dense<0.000000e+00> : vector<128xf32>
    %9 = vector.multi_reduction <add>, %4, %cst_8 [0] : vector<32x128xf32> to vector<128xf32>
    %10 = vector.shape_cast %9 : vector<128xf32> to vector<1x128xf32>
    %c0_9 = arith.constant 0 : index
    %c0_10 = arith.constant 0 : index
    %c0_11 = arith.constant 0 : index
    %c0_12 = arith.constant 0 : index
    %11 = vector.load %arg6[%c0_9, %c0_10, %c0_11, %c0_12] : memref<1x1x8x128xf32, #tpu.memory_space<vmem>>, vector<1x1x1x128xf32>
    %12 = vector.shape_cast %11 : vector<1x1x1x128xf32> to vector<1x128xf32>
    %13 = vector.shape_cast %10 : vector<1x128xf32> to vector<1x1x1x128xf32>
    tpu.vector_store %arg6[%c0_9, %c0_10, %c0_11, %c0_12], %13 {strides = array<i32>} : memref<1x1x8x128xf32, #tpu.memory_space<vmem>>, vector<1x1x1x128xf32>,
    %14 = arith.mulf %4, %4 : vector<32x128xf32>
    %cst_13 = arith.constant dense<0.000000e+00> : vector<128xf32>
    %15 = vector.multi_reduction <add>, %14, %cst_13 [0] : vector<32x128xf32> to vector<128xf32>
    %16 = vector.shape_cast %15 : vector<128xf32> to vector<1x128xf32>
    %c0_14 = arith.constant 0 : index
    %c0_15 = arith.constant 0 : index
    %c1 = arith.constant 1 : index
    %c0_16 = arith.constant 0 : index
    %17 = vector.load %arg6[%c0_14, %c0_15, %c1, %c0_16] : memref<1x1x8x128xf32, #tpu.memory_space<vmem>>, vector<1x1x1x128xf32>
    %18 = vector.shape_cast %17 : vector<1x1x1x128xf32> to vector<1x128xf32>
    %19 = vector.shape_cast %16 : vector<1x128xf32> to vector<1x1x1x128xf32>
    tpu.vector_store %arg6[%c0_14, %c0_15, %c1, %c0_16], %19 {strides = array<i32>} : memref<1x1x8x128xf32, #tpu.memory_space<vmem>>, vector<1x1x1x128xf32>,
    return
  }
  func.func @transform_0(%arg0: i32, %arg1: i32, %arg2: i32) -> (i32, i32, i32) {
    %c0_i32 = arith.constant 0 : i32
    %c0_i32_0 = arith.constant 0 : i32
    return %arg0, %arg1, %c0_i32 : i32, i32, i32
  }
  func.func @transform_1(%arg0: i32, %arg1: i32, %arg2: i32) -> (i32, i32, i32) {
    %c0_i32 = arith.constant 0 : i32
    %c0_i32_0 = arith.constant 0 : i32
    return %arg0, %c0_i32, %arg2 : i32, i32, i32
  }
  func.func @transform_2(%arg0: i32, %arg1: i32, %arg2: i32) -> (i32, i32, i32) {
    %c0_i32 = arith.constant 0 : i32
    return %arg0, %arg1, %arg2 : i32, i32, i32
  }
  func.func @transform_3(%arg0: i32, %arg1: i32, %arg2: i32) -> (i32, i32, i32, i32) {
    %c0_i32 = arith.constant 0 : i32
    %c0_i32_0 = arith.constant 0 : i32
    return %arg0, %arg1, %c0_i32, %arg2 : i32, i32, i32, i32
  }
}

module attributes {stable_mosaic.version = 11 : i64} {
  func.func @kernel(%arg0: i32, %arg1: memref<128x128xbf16, #tpu.memory_space<vmem>>, %arg2: memref<1x128xf32, #tpu.memory_space<vmem>>, %arg3: memref<1x128xf32, #tpu.memory_space<vmem>>, %arg4: memref<128x128xbf16, #tpu.memory_space<vmem>>) attributes {dimension_semantics = [#tpu.dimension_semantics<parallel>], iteration_bounds = array<i64: 1>, scalar_prefetch = 0 : i64, scratch_operands = 0 : i64, tpu.core_type = #tpu.core_type<tc>, window_params = [{transform_indices = @transform_0, window_bounds = array<i64: 128, 128>}, {pipeline_mode = #tpu.pipeline_mode<synchronous>, transform_indices = @transform_1, window_bounds = array<i64: 1, 128>}, {pipeline_mode = #tpu.pipeline_mode<synchronous>, transform_indices = @transform_2, window_bounds = array<i64: 1, 128>}, {transform_indices = @transform_3, window_bounds = array<i64: 128, 128>}]} {
    %c0 = arith.constant 0 : index
    %c0_0 = arith.constant 0 : index
    %0 = vector.load %arg1[%c0, %c0_0] : memref<128x128xbf16, #tpu.memory_space<vmem>>, vector<128x128xbf16>
    %1 = arith.extf %0 : vector<128x128xbf16> to vector<128x128xf32>
    %c0_1 = arith.constant 0 : index
    %c0_2 = arith.constant 0 : index
    %2 = vector.load %arg2[%c0_1, %c0_2] : memref<1x128xf32, #tpu.memory_space<vmem>>, vector<1x128xf32>
    %3 = vector.broadcast %2 : vector<1x128xf32> to vector<128x128xf32>
    %4 = arith.mulf %1, %3 : vector<128x128xf32>
    %c0_3 = arith.constant 0 : index
    %c0_4 = arith.constant 0 : index
    %5 = vector.load %arg3[%c0_3, %c0_4] : memref<1x128xf32, #tpu.memory_space<vmem>>, vector<1x128xf32>
    %6 = vector.broadcast %5 : vector<1x128xf32> to vector<128x128xf32>
    %7 = arith.addf %4, %6 : vector<128x128xf32>
    %cst = arith.constant 0.000000e+00 : f32
    %8 = vector.broadcast %cst : f32 to vector<128x128xf32>
    %9 = arith.maximumf %7, %8 : vector<128x128xf32>
    %10 = arith.truncf %9 : vector<128x128xf32> to vector<128x128xbf16>
    %c0_5 = arith.constant 0 : index
    %c0_6 = arith.constant 0 : index
    %11 = vector.load %arg4[%c0_5, %c0_6] : memref<128x128xbf16, #tpu.memory_space<vmem>>, vector<128x128xbf16>
    tpu.vector_store %arg4[%c0_5, %c0_6], %10 {strides = array<i32>} : memref<128x128xbf16, #tpu.memory_space<vmem>>, vector<128x128xbf16>,
    return
  }
  func.func @transform_0(%arg0: i32) -> (i32, i32) {
    %c0_i32 = arith.constant 0 : i32
    %c0_i32_0 = arith.constant 0 : i32
    return %arg0, %c0_i32 : i32, i32
  }
  func.func @transform_1(%arg0: i32) -> (i32, i32) {
    %c0_i32 = arith.constant 0 : i32
    %c0_i32_0 = arith.constant 0 : i32
    %c0_i32_1 = arith.constant 0 : i32
    return %c0_i32, %c0_i32_0 : i32, i32
  }
  func.func @transform_2(%arg0: i32) -> (i32, i32) {
    %c0_i32 = arith.constant 0 : i32
    %c0_i32_0 = arith.constant 0 : i32
    %c0_i32_1 = arith.constant 0 : i32
    return %c0_i32, %c0_i32_0 : i32, i32
  }
  func.func @transform_3(%arg0: i32) -> (i32, i32) {
    %c0_i32 = arith.constant 0 : i32
    %c0_i32_0 = arith.constant 0 : i32
    return %arg0, %c0_i32 : i32, i32
  }
}

module attributes {stable_mosaic.version = 11 : i64} {
  func.func @kernel(%arg0: i32, %arg1: i32, %arg2: i32, %arg3: memref<1x128x256xbf16, #tpu.memory_space<vmem>>, %arg4: memref<1x256x128xbf16, #tpu.memory_space<vmem>>, %arg5: memref<1x128x128xbf16, #tpu.memory_space<vmem>>, %arg6: memref<1x1x8x128xf32, #tpu.memory_space<vmem>>) attributes {dimension_semantics = [#tpu.dimension_semantics<parallel>, #tpu.dimension_semantics<parallel>, #tpu.dimension_semantics<parallel>], iteration_bounds = array<i64: 4, 1, 1>, scalar_prefetch = 0 : i64, scratch_operands = 0 : i64, tpu.core_type = #tpu.core_type<tc>, window_params = [{transform_indices = @transform_0, window_bounds = array<i64: 1, 128, 256>}, {transform_indices = @transform_1, window_bounds = array<i64: 1, 256, 128>}, {transform_indices = @transform_2, window_bounds = array<i64: 1, 128, 128>}, {transform_indices = @transform_3, window_bounds = array<i64: 1, 1, 8, 128>}]} {
    %c0 = arith.constant 0 : index
    %c0_0 = arith.constant 0 : index
    %c0_1 = arith.constant 0 : index
    %0 = vector.load %arg3[%c0, %c0_0, %c0_1] : memref<1x128x256xbf16, #tpu.memory_space<vmem>>, vector<1x128x256xbf16>
    %1 = vector.shape_cast %0 : vector<1x128x256xbf16> to vector<128x256xbf16>
    %c0_2 = arith.constant 0 : index
    %c0_3 = arith.constant 0 : index
    %c0_4 = arith.constant 0 : index
    %2 = vector.load %arg4[%c0_2, %c0_3, %c0_4] : memref<1x256x128xbf16, #tpu.memory_space<vmem>>, vector<1x256x128xbf16>
    %3 = vector.shape_cast %2 : vector<1x256x128xbf16> to vector<256x128xbf16>
    %cst = arith.constant dense<0.000000e+00> : vector<128x128xf32>
    %4 = tpu.matmul %1, %3, %cst {dimension_numbers = #tpu.dot_dimension_numbers<[1], [0], [0], [1], [0, 0, 1, 1], [], []>} : vector<128x256xbf16>, vector<256x128xbf16>, vector<128x128xf32> -> vector<128x128xf32>
    %5 = arith.truncf %4 : vector<128x128xf32> to vector<128x128xbf16>
    %c0_5 = arith.constant 0 : index
    %c0_6 = arith.constant 0 : index
    %c0_7 = arith.constant 0 : index
    %6 = vector.load %arg5[%c0_5, %c0_6, %c0_7] : memref<1x128x128xbf16, #tpu.memory_space<vmem>>, vector<1x128x128xbf16>
    %7 = vector.shape_cast %6 : vector<1x128x128xbf16> to vector<128x128xbf16>
    %8 = vector.shape_cast %5 : vector<128x128xbf16> to vector<1x128x128xbf16>
    tpu.vector_store %arg5[%c0_5, %c0_6, %c0_7], %8 {strides = array<i32>} : memref<1x128x128xbf16, #tpu.memory_space<vmem>>, vector<1x128x128xbf16>,
    %cst_8 = arith.constant dense<0.000000e+00> : vector<128xf32>
    %9 = vector.multi_reduction <add>, %4, %cst_8 [0] : vector<128x128xf32> to vector<128xf32>
    %10 = vector.shape_cast %9 : vector<128xf32> to vector<1x128xf32>
    %c0_9 = arith.constant 0 : index
    %c0_10 = arith.constant 0 : index
    %c0_11 = arith.constant 0 : index
    %c0_12 = arith.constant 0 : index
    %11 = vector.load %arg6[%c0_9, %c0_10, %c0_11, %c0_12] : memref<1x1x8x128xf32, #tpu.memory_space<vmem>>, vector<1x1x1x128xf32>
    %12 = vector.shape_cast %11 : vector<1x1x1x128xf32> to vector<1x128xf32>
    %13 = vector.shape_cast %10 : vector<1x128xf32> to vector<1x1x1x128xf32>
    tpu.vector_store %arg6[%c0_9, %c0_10, %c0_11, %c0_12], %13 {strides = array<i32>} : memref<1x1x8x128xf32, #tpu.memory_space<vmem>>, vector<1x1x1x128xf32>,
    %14 = arith.mulf %4, %4 : vector<128x128xf32>
    %cst_13 = arith.constant dense<0.000000e+00> : vector<128xf32>
    %15 = vector.multi_reduction <add>, %14, %cst_13 [0] : vector<128x128xf32> to vector<128xf32>
    %16 = vector.shape_cast %15 : vector<128xf32> to vector<1x128xf32>
    %c0_14 = arith.constant 0 : index
    %c0_15 = arith.constant 0 : index
    %c1 = arith.constant 1 : index
    %c0_16 = arith.constant 0 : index
    %17 = vector.load %arg6[%c0_14, %c0_15, %c1, %c0_16] : memref<1x1x8x128xf32, #tpu.memory_space<vmem>>, vector<1x1x1x128xf32>
    %18 = vector.shape_cast %17 : vector<1x1x1x128xf32> to vector<1x128xf32>
    %19 = vector.shape_cast %16 : vector<1x128xf32> to vector<1x1x1x128xf32>
    tpu.vector_store %arg6[%c0_14, %c0_15, %c1, %c0_16], %19 {strides = array<i32>} : memref<1x1x8x128xf32, #tpu.memory_space<vmem>>, vector<1x1x1x128xf32>,
    return
  }
  func.func @transform_0(%arg0: i32, %arg1: i32, %arg2: i32) -> (i32, i32, i32) {
    %c0_i32 = arith.constant 0 : i32
    %c0_i32_0 = arith.constant 0 : i32
    return %arg0, %arg1, %c0_i32 : i32, i32, i32
  }
  func.func @transform_1(%arg0: i32, %arg1: i32, %arg2: i32) -> (i32, i32, i32) {
    %c0_i32 = arith.constant 0 : i32
    %c0_i32_0 = arith.constant 0 : i32
    return %arg0, %c0_i32, %arg2 : i32, i32, i32
  }
  func.func @transform_2(%arg0: i32, %arg1: i32, %arg2: i32) -> (i32, i32, i32) {
    %c0_i32 = arith.constant 0 : i32
    return %arg0, %arg1, %arg2 : i32, i32, i32
  }
  func.func @transform_3(%arg0: i32, %arg1: i32, %arg2: i32) -> (i32, i32, i32, i32) {
    %c0_i32 = arith.constant 0 : i32
    %c0_i32_0 = arith.constant 0 : i32
    return %arg0, %arg1, %c0_i32, %arg2 : i32, i32, i32, i32
  }
}

module attributes {stable_mosaic.version = 11 : i64} {
  func.func @kernel(%arg0: i32, %arg1: memref<512x128xbf16, #tpu.memory_space<vmem>>, %arg2: memref<1x128xf32, #tpu.memory_space<vmem>>, %arg3: memref<1x128xf32, #tpu.memory_space<vmem>>, %arg4: memref<512x128xbf16, #tpu.memory_space<vmem>>) attributes {dimension_semantics = [#tpu.dimension_semantics<parallel>], iteration_bounds = array<i64: 1>, scalar_prefetch = 0 : i64, scratch_operands = 0 : i64, tpu.core_type = #tpu.core_type<tc>, window_params = [{transform_indices = @transform_0, window_bounds = array<i64: 512, 128>}, {pipeline_mode = #tpu.pipeline_mode<synchronous>, transform_indices = @transform_1, window_bounds = array<i64: 1, 128>}, {pipeline_mode = #tpu.pipeline_mode<synchronous>, transform_indices = @transform_2, window_bounds = array<i64: 1, 128>}, {transform_indices = @transform_3, window_bounds = array<i64: 512, 128>}]} {
    %c0 = arith.constant 0 : index
    %c0_0 = arith.constant 0 : index
    %0 = vector.load %arg1[%c0, %c0_0] : memref<512x128xbf16, #tpu.memory_space<vmem>>, vector<512x128xbf16>
    %1 = arith.extf %0 : vector<512x128xbf16> to vector<512x128xf32>
    %c0_1 = arith.constant 0 : index
    %c0_2 = arith.constant 0 : index
    %2 = vector.load %arg2[%c0_1, %c0_2] : memref<1x128xf32, #tpu.memory_space<vmem>>, vector<1x128xf32>
    %3 = vector.broadcast %2 : vector<1x128xf32> to vector<512x128xf32>
    %4 = arith.mulf %1, %3 : vector<512x128xf32>
    %c0_3 = arith.constant 0 : index
    %c0_4 = arith.constant 0 : index
    %5 = vector.load %arg3[%c0_3, %c0_4] : memref<1x128xf32, #tpu.memory_space<vmem>>, vector<1x128xf32>
    %6 = vector.broadcast %5 : vector<1x128xf32> to vector<512x128xf32>
    %7 = arith.addf %4, %6 : vector<512x128xf32>
    %cst = arith.constant 0.000000e+00 : f32
    %8 = vector.broadcast %cst : f32 to vector<512x128xf32>
    %9 = arith.maximumf %7, %8 : vector<512x128xf32>
    %10 = arith.truncf %9 : vector<512x128xf32> to vector<512x128xbf16>
    %c0_5 = arith.constant 0 : index
    %c0_6 = arith.constant 0 : index
    %11 = vector.load %arg4[%c0_5, %c0_6] : memref<512x128xbf16, #tpu.memory_space<vmem>>, vector<512x128xbf16>
    tpu.vector_store %arg4[%c0_5, %c0_6], %10 {strides = array<i32>} : memref<512x128xbf16, #tpu.memory_space<vmem>>, vector<512x128xbf16>,
    return
  }
  func.func @transform_0(%arg0: i32) -> (i32, i32) {
    %c0_i32 = arith.constant 0 : i32
    %c0_i32_0 = arith.constant 0 : i32
    return %arg0, %c0_i32 : i32, i32
  }
  func.func @transform_1(%arg0: i32) -> (i32, i32) {
    %c0_i32 = arith.constant 0 : i32
    %c0_i32_0 = arith.constant 0 : i32
    %c0_i32_1 = arith.constant 0 : i32
    return %c0_i32, %c0_i32_0 : i32, i32
  }
  func.func @transform_2(%arg0: i32) -> (i32, i32) {
    %c0_i32 = arith.constant 0 : i32
    %c0_i32_0 = arith.constant 0 : i32
    %c0_i32_1 = arith.constant 0 : i32
    return %c0_i32, %c0_i32_0 : i32, i32
  }
  func.func @transform_3(%arg0: i32) -> (i32, i32) {
    %c0_i32 = arith.constant 0 : i32
    %c0_i32_0 = arith.constant 0 : i32
    return %arg0, %c0_i32 : i32, i32
  }
}

module attributes {stable_mosaic.version = 11 : i64} {
  func.func @kernel(%arg0: i32, %arg1: i32, %arg2: i32, %arg3: memref<1x512x128xbf16, #tpu.memory_space<vmem>>, %arg4: memref<1x128x128xbf16, #tpu.memory_space<vmem>>, %arg5: memref<1x512x128xbf16, #tpu.memory_space<vmem>>, %arg6: memref<1x1x8x128xf32, #tpu.memory_space<vmem>>) attributes {dimension_semantics = [#tpu.dimension_semantics<parallel>, #tpu.dimension_semantics<parallel>, #tpu.dimension_semantics<parallel>], iteration_bounds = array<i64: 4, 1, 1>, scalar_prefetch = 0 : i64, scratch_operands = 0 : i64, tpu.core_type = #tpu.core_type<tc>, window_params = [{transform_indices = @transform_0, window_bounds = array<i64: 1, 512, 128>}, {transform_indices = @transform_1, window_bounds = array<i64: 1, 128, 128>}, {transform_indices = @transform_2, window_bounds = array<i64: 1, 512, 128>}, {transform_indices = @transform_3, window_bounds = array<i64: 1, 1, 8, 128>}]} {
    %c0 = arith.constant 0 : index
    %c0_0 = arith.constant 0 : index
    %c0_1 = arith.constant 0 : index
    %0 = vector.load %arg3[%c0, %c0_0, %c0_1] : memref<1x512x128xbf16, #tpu.memory_space<vmem>>, vector<1x512x128xbf16>
    %1 = vector.shape_cast %0 : vector<1x512x128xbf16> to vector<512x128xbf16>
    %c0_2 = arith.constant 0 : index
    %c0_3 = arith.constant 0 : index
    %c0_4 = arith.constant 0 : index
    %2 = vector.load %arg4[%c0_2, %c0_3, %c0_4] : memref<1x128x128xbf16, #tpu.memory_space<vmem>>, vector<1x128x128xbf16>
    %3 = vector.shape_cast %2 : vector<1x128x128xbf16> to vector<128x128xbf16>
    %cst = arith.constant dense<0.000000e+00> : vector<512x128xf32>
    %4 = tpu.matmul %1, %3, %cst {dimension_numbers = #tpu.dot_dimension_numbers<[1], [0], [0], [1], [0, 0, 1, 1], [], []>} : vector<512x128xbf16>, vector<128x128xbf16>, vector<512x128xf32> -> vector<512x128xf32>
    %5 = arith.truncf %4 : vector<512x128xf32> to vector<512x128xbf16>
    %c0_5 = arith.constant 0 : index
    %c0_6 = arith.constant 0 : index
    %c0_7 = arith.constant 0 : index
    %6 = vector.load %arg5[%c0_5, %c0_6, %c0_7] : memref<1x512x128xbf16, #tpu.memory_space<vmem>>, vector<1x512x128xbf16>
    %7 = vector.shape_cast %6 : vector<1x512x128xbf16> to vector<512x128xbf16>
    %8 = vector.shape_cast %5 : vector<512x128xbf16> to vector<1x512x128xbf16>
    tpu.vector_store %arg5[%c0_5, %c0_6, %c0_7], %8 {strides = array<i32>} : memref<1x512x128xbf16, #tpu.memory_space<vmem>>, vector<1x512x128xbf16>,
    %cst_8 = arith.constant dense<0.000000e+00> : vector<128xf32>
    %9 = vector.multi_reduction <add>, %4, %cst_8 [0] : vector<512x128xf32> to vector<128xf32>
    %10 = vector.shape_cast %9 : vector<128xf32> to vector<1x128xf32>
    %c0_9 = arith.constant 0 : index
    %c0_10 = arith.constant 0 : index
    %c0_11 = arith.constant 0 : index
    %c0_12 = arith.constant 0 : index
    %11 = vector.load %arg6[%c0_9, %c0_10, %c0_11, %c0_12] : memref<1x1x8x128xf32, #tpu.memory_space<vmem>>, vector<1x1x1x128xf32>
    %12 = vector.shape_cast %11 : vector<1x1x1x128xf32> to vector<1x128xf32>
    %13 = vector.shape_cast %10 : vector<1x128xf32> to vector<1x1x1x128xf32>
    tpu.vector_store %arg6[%c0_9, %c0_10, %c0_11, %c0_12], %13 {strides = array<i32>} : memref<1x1x8x128xf32, #tpu.memory_space<vmem>>, vector<1x1x1x128xf32>,
    %14 = arith.mulf %4, %4 : vector<512x128xf32>
    %cst_13 = arith.constant dense<0.000000e+00> : vector<128xf32>
    %15 = vector.multi_reduction <add>, %14, %cst_13 [0] : vector<512x128xf32> to vector<128xf32>
    %16 = vector.shape_cast %15 : vector<128xf32> to vector<1x128xf32>
    %c0_14 = arith.constant 0 : index
    %c0_15 = arith.constant 0 : index
    %c1 = arith.constant 1 : index
    %c0_16 = arith.constant 0 : index
    %17 = vector.load %arg6[%c0_14, %c0_15, %c1, %c0_16] : memref<1x1x8x128xf32, #tpu.memory_space<vmem>>, vector<1x1x1x128xf32>
    %18 = vector.shape_cast %17 : vector<1x1x1x128xf32> to vector<1x128xf32>
    %19 = vector.shape_cast %16 : vector<1x128xf32> to vector<1x1x1x128xf32>
    tpu.vector_store %arg6[%c0_14, %c0_15, %c1, %c0_16], %19 {strides = array<i32>} : memref<1x1x8x128xf32, #tpu.memory_space<vmem>>, vector<1x1x1x128xf32>,
    return
  }
  func.func @transform_0(%arg0: i32, %arg1: i32, %arg2: i32) -> (i32, i32, i32) {
    %c0_i32 = arith.constant 0 : i32
    %c0_i32_0 = arith.constant 0 : i32
    return %arg0, %arg1, %c0_i32 : i32, i32, i32
  }
  func.func @transform_1(%arg0: i32, %arg1: i32, %arg2: i32) -> (i32, i32, i32) {
    %c0_i32 = arith.constant 0 : i32
    %c0_i32_0 = arith.constant 0 : i32
    return %arg0, %c0_i32, %arg2 : i32, i32, i32
  }
  func.func @transform_2(%arg0: i32, %arg1: i32, %arg2: i32) -> (i32, i32, i32) {
    %c0_i32 = arith.constant 0 : i32
    return %arg0, %arg1, %arg2 : i32, i32, i32
  }
  func.func @transform_3(%arg0: i32, %arg1: i32, %arg2: i32) -> (i32, i32, i32, i32) {
    %c0_i32 = arith.constant 0 : i32
    %c0_i32_0 = arith.constant 0 : i32
    return %arg0, %arg1, %c0_i32, %arg2 : i32, i32, i32, i32
  }
}

module attributes {stable_mosaic.version = 11 : i64} {
  func.func @kernel(%arg0: i32, %arg1: memref<512x128xbf16, #tpu.memory_space<vmem>>, %arg2: memref<1x128xf32, #tpu.memory_space<vmem>>, %arg3: memref<1x128xf32, #tpu.memory_space<vmem>>, %arg4: memref<512x128xbf16, #tpu.memory_space<vmem>>) attributes {dimension_semantics = [#tpu.dimension_semantics<parallel>], iteration_bounds = array<i64: 4>, scalar_prefetch = 0 : i64, scratch_operands = 0 : i64, tpu.core_type = #tpu.core_type<tc>, window_params = [{transform_indices = @transform_0, window_bounds = array<i64: 512, 128>}, {pipeline_mode = #tpu.pipeline_mode<synchronous>, transform_indices = @transform_1, window_bounds = array<i64: 1, 128>}, {pipeline_mode = #tpu.pipeline_mode<synchronous>, transform_indices = @transform_2, window_bounds = array<i64: 1, 128>}, {transform_indices = @transform_3, window_bounds = array<i64: 512, 128>}]} {
    %c0 = arith.constant 0 : index
    %c0_0 = arith.constant 0 : index
    %0 = vector.load %arg1[%c0, %c0_0] : memref<512x128xbf16, #tpu.memory_space<vmem>>, vector<512x128xbf16>
    %1 = arith.extf %0 : vector<512x128xbf16> to vector<512x128xf32>
    %c0_1 = arith.constant 0 : index
    %c0_2 = arith.constant 0 : index
    %2 = vector.load %arg2[%c0_1, %c0_2] : memref<1x128xf32, #tpu.memory_space<vmem>>, vector<1x128xf32>
    %3 = vector.broadcast %2 : vector<1x128xf32> to vector<512x128xf32>
    %4 = arith.mulf %1, %3 : vector<512x128xf32>
    %c0_3 = arith.constant 0 : index
    %c0_4 = arith.constant 0 : index
    %5 = vector.load %arg3[%c0_3, %c0_4] : memref<1x128xf32, #tpu.memory_space<vmem>>, vector<1x128xf32>
    %6 = vector.broadcast %5 : vector<1x128xf32> to vector<512x128xf32>
    %7 = arith.addf %4, %6 : vector<512x128xf32>
    %cst = arith.constant 0.000000e+00 : f32
    %8 = vector.broadcast %cst : f32 to vector<512x128xf32>
    %9 = arith.maximumf %7, %8 : vector<512x128xf32>
    %10 = arith.truncf %9 : vector<512x128xf32> to vector<512x128xbf16>
    %c0_5 = arith.constant 0 : index
    %c0_6 = arith.constant 0 : index
    %11 = vector.load %arg4[%c0_5, %c0_6] : memref<512x128xbf16, #tpu.memory_space<vmem>>, vector<512x128xbf16>
    tpu.vector_store %arg4[%c0_5, %c0_6], %10 {strides = array<i32>} : memref<512x128xbf16, #tpu.memory_space<vmem>>, vector<512x128xbf16>,
    return
  }
  func.func @transform_0(%arg0: i32) -> (i32, i32) {
    %c0_i32 = arith.constant 0 : i32
    %c0_i32_0 = arith.constant 0 : i32
    return %arg0, %c0_i32 : i32, i32
  }
  func.func @transform_1(%arg0: i32) -> (i32, i32) {
    %c0_i32 = arith.constant 0 : i32
    %c0_i32_0 = arith.constant 0 : i32
    %c0_i32_1 = arith.constant 0 : i32
    return %c0_i32, %c0_i32_0 : i32, i32
  }
  func.func @transform_2(%arg0: i32) -> (i32, i32) {
    %c0_i32 = arith.constant 0 : i32
    %c0_i32_0 = arith.constant 0 : i32
    %c0_i32_1 = arith.constant 0 : i32
    return %c0_i32, %c0_i32_0 : i32, i32
  }
  func.func @transform_3(%arg0: i32) -> (i32, i32) {
    %c0_i32 = arith.constant 0 : i32
    %c0_i32_0 = arith.constant 0 : i32
    return %arg0, %c0_i32 : i32, i32
  }
}

module attributes {stable_mosaic.version = 11 : i64} {
  func.func @kernel(%arg0: i32, %arg1: i32, %arg2: i32, %arg3: memref<1x512x128xbf16, #tpu.memory_space<vmem>>, %arg4: memref<1x128x128xbf16, #tpu.memory_space<vmem>>, %arg5: memref<1x128xf32, #tpu.memory_space<vmem>>, %arg6: memref<1x512x128xbf16, #tpu.memory_space<vmem>>) attributes {dimension_semantics = [#tpu.dimension_semantics<parallel>, #tpu.dimension_semantics<parallel>, #tpu.dimension_semantics<parallel>], iteration_bounds = array<i64: 4, 4, 1>, scalar_prefetch = 0 : i64, scratch_operands = 0 : i64, tpu.core_type = #tpu.core_type<tc>, window_params = [{transform_indices = @transform_0, window_bounds = array<i64: 1, 512, 128>}, {transform_indices = @transform_1, window_bounds = array<i64: 1, 128, 128>}, {transform_indices = @transform_2, window_bounds = array<i64: 1, 128>}, {transform_indices = @transform_3, window_bounds = array<i64: 1, 512, 128>}]} {
    %c0 = arith.constant 0 : index
    %c0_0 = arith.constant 0 : index
    %c0_1 = arith.constant 0 : index
    %0 = vector.load %arg3[%c0, %c0_0, %c0_1] : memref<1x512x128xbf16, #tpu.memory_space<vmem>>, vector<1x512x128xbf16>
    %1 = vector.shape_cast %0 : vector<1x512x128xbf16> to vector<512x128xbf16>
    %c0_2 = arith.constant 0 : index
    %c0_3 = arith.constant 0 : index
    %c0_4 = arith.constant 0 : index
    %2 = vector.load %arg4[%c0_2, %c0_3, %c0_4] : memref<1x128x128xbf16, #tpu.memory_space<vmem>>, vector<1x128x128xbf16>
    %3 = vector.shape_cast %2 : vector<1x128x128xbf16> to vector<128x128xbf16>
    %cst = arith.constant dense<0.000000e+00> : vector<512x128xf32>
    %4 = tpu.matmul %1, %3, %cst {dimension_numbers = #tpu.dot_dimension_numbers<[1], [0], [0], [1], [0, 0, 1, 1], [], []>} : vector<512x128xbf16>, vector<128x128xbf16>, vector<512x128xf32> -> vector<512x128xf32>
    %c0_5 = arith.constant 0 : index
    %c0_6 = arith.constant 0 : index
    %5 = vector.load %arg5[%c0_5, %c0_6] : memref<1x128xf32, #tpu.memory_space<vmem>>, vector<1x128xf32>
    %6 = vector.broadcast %5 : vector<1x128xf32> to vector<512x128xf32>
    %7 = arith.addf %4, %6 : vector<512x128xf32>
    %8 = math.tanh %7 : vector<512x128xf32>
    %9 = arith.truncf %8 : vector<512x128xf32> to vector<512x128xbf16>
    %c0_7 = arith.constant 0 : index
    %c0_8 = arith.constant 0 : index
    %c0_9 = arith.constant 0 : index
    %10 = vector.load %arg6[%c0_7, %c0_8, %c0_9] : memref<1x512x128xbf16, #tpu.memory_space<vmem>>, vector<1x512x128xbf16>
    %11 = vector.shape_cast %10 : vector<1x512x128xbf16> to vector<512x128xbf16>
    %12 = vector.shape_cast %9 : vector<512x128xbf16> to vector<1x512x128xbf16>
    tpu.vector_store %arg6[%c0_7, %c0_8, %c0_9], %12 {strides = array<i32>} : memref<1x512x128xbf16, #tpu.memory_space<vmem>>, vector<1x512x128xbf16>,
    return
  }
  func.func @transform_0(%arg0: i32, %arg1: i32, %arg2: i32) -> (i32, i32, i32) {
    %c0_i32 = arith.constant 0 : i32
    %c0_i32_0 = arith.constant 0 : i32
    return %arg0, %arg1, %c0_i32 : i32, i32, i32
  }
  func.func @transform_1(%arg0: i32, %arg1: i32, %arg2: i32) -> (i32, i32, i32) {
    %c0_i32 = arith.constant 0 : i32
    %c0_i32_0 = arith.constant 0 : i32
    return %arg0, %c0_i32, %arg2 : i32, i32, i32
  }
  func.func @transform_2(%arg0: i32, %arg1: i32, %arg2: i32) -> (i32, i32) {
    %c0_i32 = arith.constant 0 : i32
    %c0_i32_0 = arith.constant 0 : i32
    return %c0_i32, %arg2 : i32, i32
  }
  func.func @transform_3(%arg0: i32, %arg1: i32, %arg2: i32) -> (i32, i32, i32) {
    %c0_i32 = arith.constant 0 : i32
    return %arg0, %arg1, %arg2 : i32, i32, i32
  }
}

</mosaic_0001>

<bundles_post_ra>
// kernel: font_unet_forward.23
= control target key start
LH: loop header
LB: loop body
LE: loop exit
PB: predicated region body
PF: predicated region fallthrough
CT: control target
= control target key end

     0   :  { %s1457_s9 = smov 0   ;;  %s1459_s10 = smov 0   ;;  %s1592_s0 = inlined_call_operand.vmem [shape: bf16[1,2048,128], index: 0, kind: input, shape index: {}]   ;;  %s1593_s1 = inlined_call_operand.vmem [shape: bf16[1,128,128], index: 1, kind: input, shape index: {}]   ;;  %s1594_s2 = inlined_call_operand.vmem [shape: bf16[1,2048,128], index: 2, kind: output, shape index: {}]  }
   0x1   :  { %s1461_s11 = smov 0  }
   0x2 LB: > { %s27_s12 = sadd.s32 1, %s1436_s10  ;;  %p972_p0 = scmp.ge.s32.totalorder %s1440_s11, 1  ;;  %s1440_s11 = sphi %s1461_s11, %s12_s11   ;;  %s1436_s10 = sphi %s1459_s10, %s1596_s10   ;;  %s1432_s9 = sphi %s1457_s9, %s1595_s9  }
   0x3   : > { %p29_p1 = scmp.ge.s32.totalorder %s27_s12, 4  ;;  %p157_p2 = scmp.lt.s32.totalorder %s1440_s11, 5 }
   0x5   : > { %s1598_s12 = smov (%p29_p1, %s27_s12), 0  ;;  %p158_p3 = pnand %p972_p0, %p157_p2 }
   0x6   : > { %s973_s21 = sshll.u32 (!%p158_p3), %s1432_s9, 6 }
   0x7   : > { %161 = sbr.rel (%p158_p3) target bundleno = 301 (0x12d), region = 28  ;;  %p201_p4 = scmp.lt.s32.totalorder (!%p158_p3), %s973_s21, 255 }
   0xc   : > { %v1178_v0 = vld [vmem:[%s1593_s1 + $0x38] sm:$0xff]  ;;  %v1177_v1 = vld [vmem:[%s1593_s1 + $0x30] sm:$0xff]  ;;  %v1176_v2 = vld [vmem:[%s1593_s1 + $0x28] sm:$0xff]  ;;  %s1600_s21 = smov (!%p201_p4, %s973_s21), 255 }
   0xd   : > { %549 = vmatpush.bf16.msra.mxu0 %v1178_v0  ;;  %1370 = vmatpush.bf16.msra.mxu1 %v1178_v0  ;;  %v1175_v3 = vld [vmem:[%s1593_s1 + $0x20] sm:$0xff]  ;;  %v1174_v4 = vld [vmem:[%s1593_s1 + $0x18] sm:$0xff]  ;;  %v1173_v5 = vld [vmem:[%s1593_s1 + $0x10] sm:$0xff]  ;;  %s974_s28 = sshll.u32 %s1600_s21, 2 }
   0xe   : > { %1371 = vmatpush.bf16.msra.mxu2 %v1178_v0  ;;  %1372 = vmatpush.bf16.msra.mxu3 %v1178_v0  ;;  %v1172_v6 = vld [vmem:[%s1593_s1 + $0x8] sm:$0xff]  ;;  %v1171_v7 = vld [vmem:[%s1593_s1] sm:$0xff]  ;;  %s1510_s5 = scalar_lea.vmem %s1592_s0, %s974_s28  ;;  %s1549_s8 = scalar_lea.vmem %s1594_s2, %s974_s28 }
   0xf   : > { %v1139_v8 = vld [vmem:[%s1510_s5] sm:$0xff]  ;;  %v1140_v12 = vld [vmem:[%s1510_s5 + $0x8] sm:$0xff]  ;;  %v1141_v16 = vld [vmem:[%s1510_s5 + $0x10] sm:$0xff] }
  0x10   : > { %v1147_v9 = vld [vmem:[%s1510_s5 + $0x40] sm:$0xff]  ;;  %v1148_v13 = vld [vmem:[%s1510_s5 + $0x48] sm:$0xff]  ;;  %v1149_v17 = vld [vmem:[%s1510_s5 + $0x50] sm:$0xff] }
  0x11   : > { %550 = vmatpush.bf16.msra.mxu0 %v1177_v1  ;;  %1373 = vmatpush.bf16.msra.mxu1 %v1177_v1  ;;  %v1155_v10 = vld [vmem:[%s1510_s5 + $0x80] sm:$0xff]  ;;  %v1156_v14 = vld [vmem:[%s1510_s5 + $0x88] sm:$0xff]  ;;  %v1157_v18 = vld [vmem:[%s1510_s5 + $0x90] sm:$0xff] }
  0x12   : > { %1374 = vmatpush.bf16.msra.mxu2 %v1177_v1  ;;  %1375 = vmatpush.bf16.msra.mxu3 %v1177_v1  ;;  %v1163_v11 = vld [vmem:[%s1510_s5 + $0xc0] sm:$0xff]  ;;  %v1164_v15 = vld [vmem:[%s1510_s5 + $0xc8] sm:$0xff]  ;;  %v1165_v19 = vld [vmem:[%s1510_s5 + $0xd0] sm:$0xff] }
  0x13   : > { %v1142_v20 = vld [vmem:[%s1510_s5 + $0x18] sm:$0xff]  ;;  %v1143_v24 = vld [vmem:[%s1510_s5 + $0x20] sm:$0xff]  ;;  %v1144_v28 = vld [vmem:[%s1510_s5 + $0x28] sm:$0xff] }
  0x14   : > { %v1150_v21 = vld [vmem:[%s1510_s5 + $0x58] sm:$0xff]  ;;  %v1151_v25 = vld [vmem:[%s1510_s5 + $0x60] sm:$0xff]  ;;  %v1152_v29 = vld [vmem:[%s1510_s5 + $0x68] sm:$0xff] }
  0x15   : > { %551 = vmatpush.bf16.msra.mxu0 %v1176_v2  ;;  %1376 = vmatpush.bf16.msra.mxu1 %v1176_v2  ;;  %v1158_v22 = vld [vmem:[%s1510_s5 + $0x98] sm:$0xff]  ;;  %v1159_v26 = vld [vmem:[%s1510_s5 + $0xa0] sm:$0xff]  ;;  %v1160_v30 = vld [vmem:[%s1510_s5 + $0xa8] sm:$0xff] }
  0x16   : > { %1377 = vmatpush.bf16.msra.mxu2 %v1176_v2  ;;  %1378 = vmatpush.bf16.msra.mxu3 %v1176_v2  ;;  %v1166_v23 = vld [vmem:[%s1510_s5 + $0xd8] sm:$0xff]  ;;  %v1167_v27 = vld [vmem:[%s1510_s5 + $0xe0] sm:$0xff]  ;;  %v1168_v31 = vld [vmem:[%s1510_s5 + $0xe8] sm:$0xff] }
  0x17   : > { %v1145_v32 = vld [vmem:[%s1510_s5 + $0x30] sm:$0xff]  ;;  %v1146_v36 = vld [vmem:[%s1510_s5 + $0x38] sm:$0xff] }
  0x18   : > { %v1153_v33 = vld [vmem:[%s1510_s5 + $0x70] sm:$0xff]  ;;  %v1154_v37 = vld [vmem:[%s1510_s5 + $0x78] sm:$0xff] }
  0x19   : > { %552 = vmatpush.bf16.msra.mxu0 %v1175_v3  ;;  %1379 = vmatpush.bf16.msra.mxu1 %v1175_v3  ;;  %v1161_v34 = vld [vmem:[%s1510_s5 + $0xb0] sm:$0xff]  ;;  %v1162_v38 = vld [vmem:[%s1510_s5 + $0xb8] sm:$0xff] }
  0x1a   : > { %1380 = vmatpush.bf16.msra.mxu2 %v1175_v3  ;;  %1381 = vmatpush.bf16.msra.mxu3 %v1175_v3  ;;  %v1169_v35 = vld [vmem:[%s1510_s5 + $0xf0] sm:$0xff]  ;;  %v1170_v39 = vld [vmem:[%s1510_s5 + $0xf8] sm:$0xff] }
  0x1d   : > { %553 = vmatpush.bf16.msra.mxu0 %v1174_v4  ;;  %1382 = vmatpush.bf16.msra.mxu1 %v1174_v4 }
  0x1e   : > { %1383 = vmatpush.bf16.msra.mxu2 %v1174_v4  ;;  %1384 = vmatpush.bf16.msra.mxu3 %v1174_v4 }
  0x21   : > { %554 = vmatpush.bf16.msra.mxu0 %v1173_v5  ;;  %1385 = vmatpush.bf16.msra.mxu1 %v1173_v5 }
  0x22   : > { %1386 = vmatpush.bf16.msra.mxu2 %v1173_v5  ;;  %1387 = vmatpush.bf16.msra.mxu3 %v1173_v5 }
  0x25   : > { %555 = vmatpush.bf16.msra.mxu0 %v1172_v6  ;;  %1388 = vmatpush.bf16.msra.mxu1 %v1172_v6 }
  0x26   : > { %1389 = vmatpush.bf16.msra.mxu2 %v1172_v6  ;;  %1390 = vmatpush.bf16.msra.mxu3 %v1172_v6 }
  0x29   : > { %556 = vmatpush.bf16.msra.mxu0 %v1171_v7  ;;  %1391 = vmatpush.bf16.msra.mxu1 %v1171_v7 }
  0x2a   : > { %1392 = vmatpush.bf16.msra.mxu2 %v1171_v7  ;;  %1393 = vmatpush.bf16.msra.mxu3 %v1171_v7 }
  0x2c   : > { %557 = vmatmul.bf16.vlgmr.msra.gmra.mxu0 %v1139_v8  ;;  %597 = vmatmul.bf16.vlgmr.msra.gmra.mxu1 %v1147_v9 }
  0x2d   : > { %637 = vmatmul.bf16.vlgmr.msra.gmra.mxu2 %v1155_v10  ;;  %677 = vmatmul.bf16.vlgmr.msra.gmra.mxu3 %v1163_v11 }
  0x3c   : > { %562 = vmatmul.bf16.gmra.mxu0 %v1140_v12  ;;  %602 = vmatmul.bf16.gmra.mxu1 %v1148_v13 }
  0x3d   : > { %642 = vmatmul.bf16.gmra.mxu2 %v1156_v14  ;;  %682 = vmatmul.bf16.gmra.mxu3 %v1164_v15 }
  0x4c   : > { %567 = vmatmul.bf16.gmra.mxu0 %v1141_v16  ;;  %607 = vmatmul.bf16.gmra.mxu1 %v1149_v17 }
  0x4d   : > { %647 = vmatmul.bf16.gmra.mxu2 %v1157_v18  ;;  %687 = vmatmul.bf16.gmra.mxu3 %v1165_v19 }
  0x5c   : > { %572 = vmatmul.bf16.gmra.mxu0 %v1142_v20  ;;  %612 = vmatmul.bf16.gmra.mxu1 %v1150_v21 }
  0x5d   : > { %652 = vmatmul.bf16.gmra.mxu2 %v1158_v22  ;;  %692 = vmatmul.bf16.gmra.mxu3 %v1166_v23 }
  0x6c   : > { %577 = vmatmul.bf16.gmra.mxu0 %v1143_v24  ;;  %617 = vmatmul.bf16.gmra.mxu1 %v1151_v25 }
  0x6d   : > { %657 = vmatmul.bf16.gmra.mxu2 %v1159_v26  ;;  %697 = vmatmul.bf16.gmra.mxu3 %v1167_v27 }
  0x7c   : > { %582 = vmatmul.bf16.gmra.mxu0 %v1144_v28  ;;  %622 = vmatmul.bf16.gmra.mxu1 %v1152_v29 }
  0x7d   : > { %662 = vmatmul.bf16.gmra.mxu2 %v1160_v30  ;;  %702 = vmatmul.bf16.gmra.mxu3 %v1168_v31 }
  0x8c   : > { %587 = vmatmul.bf16.gmra.mxu0 %v1145_v32  ;;  %627 = vmatmul.bf16.gmra.mxu1 %v1153_v33 }
  0x8d   : > { %667 = vmatmul.bf16.gmra.mxu2 %v1161_v34  ;;  %707 = vmatmul.bf16.gmra.mxu3 %v1169_v35 }
  0x9c   : > { %592 = vmatmul.bf16.gmra.mxu0 %v1146_v36  ;;  %632 = vmatmul.bf16.gmra.mxu1 %v1154_v37 }
  0x9d   : > { %672 = vmatmul.bf16.gmra.mxu2 %v1162_v38  ;;  %712 = vmatmul.bf16.gmra.mxu3 %v1170_v39 }
  0xa9   : > { %v558_v40 = vpop.f32.mrf.mxu0  ;;  %v598_v41 = vpop.f32.mrf.mxu1 }
  0xb0   : > { %v638_v42 = vpop.f32.mrf.mxu2  ;;  %v678_v43 = vpop.f32.mrf.mxu3 }
  0xb1   : > { %v560_v44 = vpop.f32.mrf.mxu0  ;;  %v600_v45 = vpop.f32.mrf.mxu1 }
  0xb2   : > { %v1182_v46 = vpack.c.bf16 %v560_v44, %v558_v40  ;;  %v1222_v47 = vpack.c.bf16 %v600_v45, %v598_v41 }
  0xb4   : > { %1183 = vst [vmem:[%s1549_s8] sm:$0xff] %v1182_v46  }
  0xb5   : > { %1346 = vst [vmem:[%s1549_s8 + $0x40] sm:$0xff] %v1222_v47  }
  0xb8   : > { %v640_v48 = vpop.f32.mrf.mxu2  ;;  %v680_v49 = vpop.f32.mrf.mxu3 }
  0xb9   : > { %v1262_v50 = vpack.c.bf16 %v640_v48, %v638_v42  ;;  %v1302_v51 = vpack.c.bf16 %v680_v49, %v678_v43  ;;  %v563_v52 = vpop.f32.mrf.mxu0  ;;  %v603_v53 = vpop.f32.mrf.mxu1 }
  0xbb   : > { %1354 = vst [vmem:[%s1549_s8 + $0x80] sm:$0xff] %v1262_v50  }
  0xbc   : > { %1362 = vst [vmem:[%s1549_s8 + $0xc0] sm:$0xff] %v1302_v51  }
  0xc0   : > { %v643_v54 = vpop.f32.mrf.mxu2  ;;  %v683_v55 = vpop.f32.mrf.mxu3 }
  0xc1   : > { %v565_v56 = vpop.f32.mrf.mxu0  ;;  %v605_v57 = vpop.f32.mrf.mxu1 }
  0xc2   : > { %v1187_v58 = vpack.c.bf16 %v565_v56, %v563_v52  ;;  %v1227_v59 = vpack.c.bf16 %v605_v57, %v603_v53 }
  0xc4   : > { %1339 = vst [vmem:[%s1549_s8 + $0x8] sm:$0xff] %v1187_v58  }
  0xc5   : > { %1347 = vst [vmem:[%s1549_s8 + $0x48] sm:$0xff] %v1227_v59  }
  0xc8   : > { %v645_v60 = vpop.f32.mrf.mxu2  ;;  %v685_v61 = vpop.f32.mrf.mxu3 }
  0xc9   : > { %v1267_v62 = vpack.c.bf16 %v645_v60, %v643_v54  ;;  %v1307_v63 = vpack.c.bf16 %v685_v61, %v683_v55  ;;  %v568_v0 = vpop.f32.mrf.mxu0  ;;  %v608_v1 = vpop.f32.mrf.mxu1 }
  0xcb   : > { %1355 = vst [vmem:[%s1549_s8 + $0x88] sm:$0xff] %v1267_v62  }
  0xcc   : > { %1363 = vst [vmem:[%s1549_s8 + $0xc8] sm:$0xff] %v1307_v63  }
  0xd0   : > { %v648_v2 = vpop.f32.mrf.mxu2  ;;  %v688_v3 = vpop.f32.mrf.mxu3 }
  0xd1   : > { %v570_v4 = vpop.f32.mrf.mxu0  ;;  %v610_v5 = vpop.f32.mrf.mxu1 }
  0xd2   : > { %v1192_v6 = vpack.c.bf16 %v570_v4, %v568_v0  ;;  %v1232_v7 = vpack.c.bf16 %v610_v5, %v608_v1 }
  0xd4   : > { %1340 = vst [vmem:[%s1549_s8 + $0x10] sm:$0xff] %v1192_v6  }
  0xd5   : > { %1348 = vst [vmem:[%s1549_s8 + $0x50] sm:$0xff] %v1232_v7  }
  0xd8   : > { %v650_v8 = vpop.f32.mrf.mxu2  ;;  %v690_v9 = vpop.f32.mrf.mxu3 }
  0xd9   : > { %v1272_v10 = vpack.c.bf16 %v650_v8, %v648_v2  ;;  %v1312_v11 = vpack.c.bf16 %v690_v9, %v688_v3  ;;  %v573_v12 = vpop.f32.mrf.mxu0  ;;  %v613_v13 = vpop.f32.mrf.mxu1 }
  0xdb   : > { %1356 = vst [vmem:[%s1549_s8 + $0x90] sm:$0xff] %v1272_v10  }
  0xdc   : > { %1364 = vst [vmem:[%s1549_s8 + $0xd0] sm:$0xff] %v1312_v11  }
  0xe0   : > { %v653_v14 = vpop.f32.mrf.mxu2  ;;  %v693_v15 = vpop.f32.mrf.mxu3 }
  0xe1   : > { %v575_v16 = vpop.f32.mrf.mxu0  ;;  %v615_v17 = vpop.f32.mrf.mxu1 }
  0xe2   : > { %v1197_v18 = vpack.c.bf16 %v575_v16, %v573_v12  ;;  %v1237_v19 = vpack.c.bf16 %v615_v17, %v613_v13 }
  0xe4   : > { %1341 = vst [vmem:[%s1549_s8 + $0x18] sm:$0xff] %v1197_v18  }
  0xe5   : > { %1349 = vst [vmem:[%s1549_s8 + $0x58] sm:$0xff] %v1237_v19  }
  0xe8   : > { %v655_v20 = vpop.f32.mrf.mxu2  ;;  %v695_v21 = vpop.f32.mrf.mxu3 }
  0xe9   : > { %v1277_v22 = vpack.c.bf16 %v655_v20, %v653_v14  ;;  %v1317_v23 = vpack.c.bf16 %v695_v21, %v693_v15  ;;  %v578_v24 = vpop.f32.mrf.mxu0  ;;  %v618_v25 = vpop.f32.mrf.mxu1 }
  0xeb   : > { %1357 = vst [vmem:[%s1549_s8 + $0x98] sm:$0xff] %v1277_v22  }
  0xec   : > { %1365 = vst [vmem:[%s1549_s8 + $0xd8] sm:$0xff] %v1317_v23  }
  0xf0   : > { %v658_v26 = vpop.f32.mrf.mxu2  ;;  %v698_v27 = vpop.f32.mrf.mxu3 }
  0xf1   : > { %v580_v28 = vpop.f32.mrf.mxu0  ;;  %v620_v29 = vpop.f32.mrf.mxu1 }
  0xf2   : > { %v1202_v30 = vpack.c.bf16 %v580_v28, %v578_v24  ;;  %v1242_v31 = vpack.c.bf16 %v620_v29, %v618_v25 }
  0xf4   : > { %1342 = vst [vmem:[%s1549_s8 + $0x20] sm:$0xff] %v1202_v30  }
  0xf5   : > { %1350 = vst [vmem:[%s1549_s8 + $0x60] sm:$0xff] %v1242_v31  }
  0xf8   : > { %v660_v32 = vpop.f32.mrf.mxu2  ;;  %v700_v33 = vpop.f32.mrf.mxu3 }
  0xf9   : > { %v1282_v34 = vpack.c.bf16 %v660_v32, %v658_v26  ;;  %v1322_v35 = vpack.c.bf16 %v700_v33, %v698_v27  ;;  %v583_v36 = vpop.f32.mrf.mxu0  ;;  %v623_v37 = vpop.f32.mrf.mxu1 }
  0xfb   : > { %1358 = vst [vmem:[%s1549_s8 + $0xa0] sm:$0xff] %v1282_v34  }
  0xfc   : > { %1366 = vst [vmem:[%s1549_s8 + $0xe0] sm:$0xff] %v1322_v35  }
 0x100   : > { %v663_v38 = vpop.f32.mrf.mxu2  ;;  %v703_v39 = vpop.f32.mrf.mxu3 }
 0x101   : > { %v585_v40 = vpop.f32.mrf.mxu0  ;;  %v625_v41 = vpop.f32.mrf.mxu1 }
 0x102   : > { %v1207_v42 = vpack.c.bf16 %v585_v40, %v583_v36  ;;  %v1247_v43 = vpack.c.bf16 %v625_v41, %v623_v37 }
 0x104   : > { %1343 = vst [vmem:[%s1549_s8 + $0x28] sm:$0xff] %v1207_v42  }
 0x105   : > { %1351 = vst [vmem:[%s1549_s8 + $0x68] sm:$0xff] %v1247_v43  }
 0x108   : > { %v665_v44 = vpop.f32.mrf.mxu2  ;;  %v705_v45 = vpop.f32.mrf.mxu3 }
 0x109   : > { %v1287_v46 = vpack.c.bf16 %v665_v44, %v663_v38  ;;  %v1327_v47 = vpack.c.bf16 %v705_v45, %v703_v39  ;;  %v588_v48 = vpop.f32.mrf.mxu0  ;;  %v628_v49 = vpop.f32.mrf.mxu1 }
 0x10b   : > { %1359 = vst [vmem:[%s1549_s8 + $0xa8] sm:$0xff] %v1287_v46  }
 0x10c   : > { %1367 = vst [vmem:[%s1549_s8 + $0xe8] sm:$0xff] %v1327_v47  }
 0x110   : > { %v668_v50 = vpop.f32.mrf.mxu2  ;;  %v708_v51 = vpop.f32.mrf.mxu3 }
 0x111   : > { %v590_v52 = vpop.f32.mrf.mxu0  ;;  %v630_v53 = vpop.f32.mrf.mxu1 }
 0x112   : > { %v1212_v54 = vpack.c.bf16 %v590_v52, %v588_v48  ;;  %v1252_v55 = vpack.c.bf16 %v630_v53, %v628_v49 }
 0x114   : > { %1344 = vst [vmem:[%s1549_s8 + $0x30] sm:$0xff] %v1212_v54  }
 0x115   : > { %1352 = vst [vmem:[%s1549_s8 + $0x70] sm:$0xff] %v1252_v55  }
 0x118   : > { %v670_v56 = vpop.f32.mrf.mxu2  ;;  %v710_v57 = vpop.f32.mrf.mxu3 }
 0x119   : > { %v1292_v58 = vpack.c.bf16 %v670_v56, %v668_v50  ;;  %v1332_v59 = vpack.c.bf16 %v710_v57, %v708_v51  ;;  %v593_v60 = vpop.f32.mrf.mxu0  ;;  %v633_v61 = vpop.f32.mrf.mxu1 }
 0x11b   : > { %1360 = vst [vmem:[%s1549_s8 + $0xb0] sm:$0xff] %v1292_v58  }
 0x11c   : > { %1368 = vst [vmem:[%s1549_s8 + $0xf0] sm:$0xff] %v1332_v59  }
 0x120   : > { %v673_v62 = vpop.f32.mrf.mxu2  ;;  %v713_v63 = vpop.f32.mrf.mxu3 }
 0x121   : > { %v595_v0 = vpop.f32.mrf.mxu0  ;;  %v635_v1 = vpop.f32.mrf.mxu1 }
 0x122   : > { %v1217_v2 = vpack.c.bf16 %v595_v0, %v593_v60  ;;  %v1257_v3 = vpack.c.bf16 %v635_v1, %v633_v61 }
 0x124   : > { %1345 = vst [vmem:[%s1549_s8 + $0x38] sm:$0xff] %v1217_v2  }
 0x125   : > { %1353 = vst [vmem:[%s1549_s8 + $0x78] sm:$0xff] %v1257_v3  }
 0x128   : > { %v675_v4 = vpop.f32.mrf.mxu2  ;;  %v715_v5 = vpop.f32.mrf.mxu3 }
 0x129   : > { %v1297_v6 = vpack.c.bf16 %v675_v4, %v673_v62  ;;  %v1337_v7 = vpack.c.bf16 %v715_v5, %v713_v63 }
 0x12b   : > { %1361 = vst [vmem:[%s1549_s8 + $0xb8] sm:$0xff] %v1297_v6  }
 0x12c   : > { %1369 = vst [vmem:[%s1549_s8 + $0xf8] sm:$0xff] %v1337_v7  }
 0x12d PF: > { %s12_s11 = sadd.s32 1, %s1440_s11   ;;  %s1595_s9 = smov %s1436_s10 }
 0x12e   : > { %p9_p5 = scmp.ge.s32.totalorder %s12_s11, 6   ;;  %s1596_s10 = smov %s1598_s12 }
 0x130   :  { %11 = sbr.rel (!%p9_p5) target bundleno = 2 (0x2), region = 61 }

// kernel: font_unet_forward.25
= control target key start
LH: loop header
LB: loop body
LE: loop exit
PB: predicated region body
PF: predicated region fallthrough
CT: control target
= control target key end

     0   :  { %s1112_s0 = inlined_call_operand.vmem [shape: bf16[512,128], index: 0, kind: input, shape index: {}]   ;;  %s1113_s1 = inlined_call_operand.vmem [shape: f32[1,128], index: 1, kind: input, shape index: {}]   ;;  %s1114_s2 = inlined_call_operand.vmem [shape: f32[1,128], index: 2, kind: input, shape index: {}]   ;;  %s1115_s3 = inlined_call_operand.vmem [shape: bf16[512,128], index: 3, kind: output, shape index: {}]  }
   0x1   :  { %v411_v0 = vld [vmem:[%s1112_s0] sm:$0xff]   ;;  %v698_v5 = vld [vmem:[%s1112_s0 + $0x8] sm:$0xff]   ;;  %v699_v8 = vld [vmem:[%s1112_s0 + $0x10] sm:$0xff]  }
   0x2   :  { %v788_v1 = vld [vmem:[%s1113_s1] ss:$0 sm:$0xff]  ;;  %v412_v2 = vunpack.c.l.bf16 %v411_v0  ;;  %v413_v3 = vunpack.c.h.bf16 %v411_v0  ;;  %v416_v6 = vunpack.c.l.bf16 %v698_v5  ;;  %v417_v7 = vunpack.c.h.bf16 %v698_v5  ;;  %v700_v9 = vld [vmem:[%s1112_s0 + $0x18] sm:$0xff]   ;;  %v702_v27 = vld [vmem:[%s1112_s0 + $0x28] sm:$0xff]  }
   0x3   :  { %v793_v4 = vld [vmem:[%s1114_s2] ss:$0 sm:$0xff]  ;;  %v420_v12 = vunpack.c.l.bf16 %v699_v8  ;;  %v421_v13 = vunpack.c.h.bf16 %v699_v8  ;;  %v424_v16 = vunpack.c.l.bf16 %v700_v9  ;;  %v425_v17 = vunpack.c.h.bf16 %v700_v9  ;;  %v703_v32 = vld [vmem:[%s1112_s0 + $0x30] sm:$0xff]   ;;  %v704_v37 = vld [vmem:[%s1112_s0 + $0x38] sm:$0xff]  }
   0x4   :  { %v146_v10 = vmul.f32 %v788_v1, %v412_v2  ;;  %v147_v11 = vmul.f32 %v788_v1, %v413_v3  ;;  %v148_v14 = vmul.f32 %v788_v1, %v416_v6  ;;  %v149_v15 = vmul.f32 %v788_v1, %v417_v7  ;;  %v701_v18 = vld [vmem:[%s1112_s0 + $0x20] sm:$0xff]   ;;  %v706_v59 = vld [vmem:[%s1112_s0 + $0x48] sm:$0xff]   ;;  %v707_v0 = vld [vmem:[%s1112_s0 + $0x50] sm:$0xff]  }
   0x5   :  { %v150_v21 = vmul.f32 %v788_v1, %v420_v12  ;;  %v151_v22 = vmul.f32 %v788_v1, %v421_v13  ;;  %v152_v25 = vmul.f32 %v788_v1, %v424_v16  ;;  %v153_v26 = vmul.f32 %v788_v1, %v425_v17  ;;  %v705_v46 = vld [vmem:[%s1112_s0 + $0x40] sm:$0xff]   ;;  %v708_v7 = vld [vmem:[%s1112_s0 + $0x58] sm:$0xff]  }
   0x6   :  { %v214_v19 = vadd.f32 %v793_v4, %v146_v10  ;;  %v215_v20 = vadd.f32 %v793_v4, %v147_v11  ;;  %v216_v23 = vadd.f32 %v793_v4, %v148_v14  ;;  %v217_v24 = vadd.f32 %v793_v4, %v149_v15  ;;  %v709_v16 = vld [vmem:[%s1112_s0 + $0x60] sm:$0xff]  }
   0x7   :  { %v218_v29 = vadd.f32 %v793_v4, %v150_v21  ;;  %v219_v30 = vadd.f32 %v793_v4, %v151_v22  ;;  %v428_v31 = vunpack.c.l.bf16 %v701_v18  ;;  %v220_v34 = vadd.f32 %v793_v4, %v152_v25 }
   0x8   :  { %v541_v28 = vpack.c.bf16 %v215_v20, %v214_v19  ;;  %v546_v33 = vpack.c.bf16 %v217_v24, %v216_v23  ;;  %v221_v35 = vadd.f32 %v793_v4, %v153_v26  ;;  %v429_v36 = vunpack.c.h.bf16 %v701_v18 }
   0x9   :  { %v551_v38 = vpack.c.bf16 %v219_v30, %v218_v29  ;;  %v154_v39 = vmul.f32 %v788_v1, %v428_v31  ;;  %v432_v40 = vunpack.c.l.bf16 %v702_v27  ;;  %v433_v41 = vunpack.c.h.bf16 %v702_v27  ;;  %v710_v29 = vld [vmem:[%s1112_s0 + $0x68] sm:$0xff]  }
   0xa   :  { %542 = vst [vmem:[%s1115_s3] sm:$0xff] %v541_v28   ;;  %v556_v42 = vpack.c.bf16 %v221_v35, %v220_v34  ;;  %v155_v43 = vmul.f32 %v788_v1, %v429_v36  ;;  %v436_v44 = vunpack.c.l.bf16 %v703_v32  ;;  %v437_v45 = vunpack.c.h.bf16 %v703_v32  ;;  %v711_v34 = vld [vmem:[%s1112_s0 + $0x70] sm:$0xff]  }
   0xb   :  { %729 = vst [vmem:[%s1115_s3 + $0x8] sm:$0xff] %v546_v33   ;;  %v222_v47 = vadd.f32 %v793_v4, %v154_v39  ;;  %v156_v48 = vmul.f32 %v788_v1, %v432_v40  ;;  %v157_v49 = vmul.f32 %v788_v1, %v433_v41  ;;  %v440_v50 = vunpack.c.l.bf16 %v704_v37  ;;  %v712_v39 = vld [vmem:[%s1112_s0 + $0x78] sm:$0xff]  }
   0xc   :  { %730 = vst [vmem:[%s1115_s3 + $0x10] sm:$0xff] %v551_v38   ;;  %v223_v51 = vadd.f32 %v793_v4, %v155_v43  ;;  %v158_v52 = vmul.f32 %v788_v1, %v436_v44  ;;  %v159_v53 = vmul.f32 %v788_v1, %v437_v45  ;;  %v441_v54 = vunpack.c.h.bf16 %v704_v37 }
   0xd   :  { %731 = vst [vmem:[%s1115_s3 + $0x18] sm:$0xff] %v556_v42   ;;  %v224_v55 = vadd.f32 %v793_v4, %v156_v48  ;;  %v225_v56 = vadd.f32 %v793_v4, %v157_v49  ;;  %v160_v57 = vmul.f32 %v788_v1, %v440_v50  ;;  %v444_v58 = vunpack.c.l.bf16 %v705_v46  ;;  %v713_v48 = vld [vmem:[%s1112_s0 + $0x80] sm:$0xff]  }
   0xe   :  { %v561_v60 = vpack.c.bf16 %v223_v51, %v222_v47  ;;  %v226_v61 = vadd.f32 %v793_v4, %v158_v52  ;;  %v227_v62 = vadd.f32 %v793_v4, %v159_v53  ;;  %v161_v63 = vmul.f32 %v788_v1, %v441_v54 }
   0xf   :  { %v566_v2 = vpack.c.bf16 %v225_v56, %v224_v55  ;;  %v228_v3 = vadd.f32 %v793_v4, %v160_v57  ;;  %v445_v5 = vunpack.c.h.bf16 %v705_v46  ;;  %v162_v6 = vmul.f32 %v788_v1, %v444_v58 }
  0x10   :  { %732 = vst [vmem:[%s1115_s3 + $0x20] sm:$0xff] %v561_v60   ;;  %v571_v8 = vpack.c.bf16 %v227_v62, %v226_v61  ;;  %v229_v9 = vadd.f32 %v793_v4, %v161_v63  ;;  %v448_v10 = vunpack.c.l.bf16 %v706_v59  ;;  %v449_v11 = vunpack.c.h.bf16 %v706_v59  ;;  %v714_v61 = vld [vmem:[%s1112_s0 + $0x88] sm:$0xff]  }
  0x11   :  { %733 = vst [vmem:[%s1115_s3 + $0x28] sm:$0xff] %v566_v2   ;;  %v163_v12 = vmul.f32 %v788_v1, %v445_v5  ;;  %v230_v13 = vadd.f32 %v793_v4, %v162_v6  ;;  %v452_v14 = vunpack.c.l.bf16 %v707_v0  ;;  %v453_v15 = vunpack.c.h.bf16 %v707_v0 }
  0x12   :  { %734 = vst [vmem:[%s1115_s3 + $0x30] sm:$0xff] %v571_v8   ;;  %v576_v17 = vpack.c.bf16 %v229_v9, %v228_v3  ;;  %v164_v18 = vmul.f32 %v788_v1, %v448_v10  ;;  %v165_v19 = vmul.f32 %v788_v1, %v449_v11  ;;  %v456_v20 = vunpack.c.l.bf16 %v708_v7  ;;  %v715_v3 = vld [vmem:[%s1112_s0 + $0x90] sm:$0xff]   ;;  %v716_v9 = vld [vmem:[%s1112_s0 + $0x98] sm:$0xff]  }
  0x13   :  { %v231_v21 = vadd.f32 %v793_v4, %v163_v12  ;;  %v166_v22 = vmul.f32 %v788_v1, %v452_v14  ;;  %v167_v23 = vmul.f32 %v788_v1, %v453_v15  ;;  %v457_v24 = vunpack.c.h.bf16 %v708_v7 }
  0x14   :  { %735 = vst [vmem:[%s1115_s3 + $0x38] sm:$0xff] %v576_v17   ;;  %v232_v25 = vadd.f32 %v793_v4, %v164_v18  ;;  %v233_v26 = vadd.f32 %v793_v4, %v165_v19  ;;  %v168_v27 = vmul.f32 %v788_v1, %v456_v20  ;;  %v460_v28 = vunpack.c.l.bf16 %v709_v16  ;;  %v717_v18 = vld [vmem:[%s1112_s0 + $0xa0] sm:$0xff]  }
  0x15   :  { %v581_v30 = vpack.c.bf16 %v231_v21, %v230_v13  ;;  %v234_v31 = vadd.f32 %v793_v4, %v166_v22  ;;  %v235_v32 = vadd.f32 %v793_v4, %v167_v23  ;;  %v169_v33 = vmul.f32 %v788_v1, %v457_v24 }
  0x16   :  { %v586_v35 = vpack.c.bf16 %v233_v26, %v232_v25  ;;  %v236_v36 = vadd.f32 %v793_v4, %v168_v27  ;;  %v461_v37 = vunpack.c.h.bf16 %v709_v16  ;;  %v170_v38 = vmul.f32 %v788_v1, %v460_v28 }
  0x17   :  { %736 = vst [vmem:[%s1115_s3 + $0x40] sm:$0xff] %v581_v30   ;;  %v591_v40 = vpack.c.bf16 %v235_v32, %v234_v31  ;;  %v237_v41 = vadd.f32 %v793_v4, %v169_v33  ;;  %v464_v42 = vunpack.c.l.bf16 %v710_v29  ;;  %v465_v43 = vunpack.c.h.bf16 %v710_v29  ;;  %v718_v31 = vld [vmem:[%s1112_s0 + $0xa8] sm:$0xff]  }
  0x18   :  { %737 = vst [vmem:[%s1115_s3 + $0x48] sm:$0xff] %v586_v35   ;;  %v171_v44 = vmul.f32 %v788_v1, %v461_v37  ;;  %v238_v45 = vadd.f32 %v793_v4, %v170_v38  ;;  %v468_v46 = vunpack.c.l.bf16 %v711_v34  ;;  %v469_v47 = vunpack.c.h.bf16 %v711_v34 }
  0x19   :  { %738 = vst [vmem:[%s1115_s3 + $0x50] sm:$0xff] %v591_v40   ;;  %v596_v49 = vpack.c.bf16 %v237_v41, %v236_v36  ;;  %v172_v50 = vmul.f32 %v788_v1, %v464_v42  ;;  %v173_v51 = vmul.f32 %v788_v1, %v465_v43  ;;  %v472_v52 = vunpack.c.l.bf16 %v712_v39  ;;  %v719_v36 = vld [vmem:[%s1112_s0 + $0xb0] sm:$0xff]   ;;  %v720_v41 = vld [vmem:[%s1112_s0 + $0xb8] sm:$0xff]  }
  0x1a   :  { %v239_v53 = vadd.f32 %v793_v4, %v171_v44  ;;  %v174_v54 = vmul.f32 %v788_v1, %v468_v46  ;;  %v175_v55 = vmul.f32 %v788_v1, %v469_v47  ;;  %v473_v56 = vunpack.c.h.bf16 %v712_v39 }
  0x1b   :  { %739 = vst [vmem:[%s1115_s3 + $0x58] sm:$0xff] %v596_v49   ;;  %v240_v57 = vadd.f32 %v793_v4, %v172_v50  ;;  %v241_v58 = vadd.f32 %v793_v4, %v173_v51  ;;  %v176_v59 = vmul.f32 %v788_v1, %v472_v52  ;;  %v476_v60 = vunpack.c.l.bf16 %v713_v48  ;;  %v721_v50 = vld [vmem:[%s1112_s0 + $0xc0] sm:$0xff]  }
  0x1c   :  { %v601_v62 = vpack.c.bf16 %v239_v53, %v238_v45  ;;  %v242_v63 = vadd.f32 %v793_v4, %v174_v54  ;;  %v243_v0 = vadd.f32 %v793_v4, %v175_v55  ;;  %v177_v2 = vmul.f32 %v788_v1, %v473_v56 }
  0x1d   :  { %v606_v5 = vpack.c.bf16 %v241_v58, %v240_v57  ;;  %v244_v6 = vadd.f32 %v793_v4, %v176_v59  ;;  %v477_v7 = vunpack.c.h.bf16 %v713_v48  ;;  %v178_v8 = vmul.f32 %v788_v1, %v476_v60 }
  0x1e   :  { %740 = vst [vmem:[%s1115_s3 + $0x60] sm:$0xff] %v601_v62   ;;  %v611_v10 = vpack.c.bf16 %v243_v0, %v242_v63  ;;  %v245_v11 = vadd.f32 %v793_v4, %v177_v2  ;;  %v480_v12 = vunpack.c.l.bf16 %v714_v61  ;;  %v481_v13 = vunpack.c.h.bf16 %v714_v61  ;;  %v722_v63 = vld [vmem:[%s1112_s0 + $0xc8] sm:$0xff]  }
  0x1f   :  { %741 = vst [vmem:[%s1115_s3 + $0x68] sm:$0xff] %v606_v5   ;;  %v179_v14 = vmul.f32 %v788_v1, %v477_v7  ;;  %v246_v15 = vadd.f32 %v793_v4, %v178_v8  ;;  %v484_v16 = vunpack.c.l.bf16 %v715_v3  ;;  %v485_v17 = vunpack.c.h.bf16 %v715_v3 }
  0x20   :  { %742 = vst [vmem:[%s1115_s3 + $0x70] sm:$0xff] %v611_v10   ;;  %v616_v19 = vpack.c.bf16 %v245_v11, %v244_v6  ;;  %v180_v20 = vmul.f32 %v788_v1, %v480_v12  ;;  %v181_v21 = vmul.f32 %v788_v1, %v481_v13  ;;  %v488_v22 = vunpack.c.l.bf16 %v716_v9  ;;  %v723_v6 = vld [vmem:[%s1112_s0 + $0xd0] sm:$0xff]   ;;  %v724_v11 = vld [vmem:[%s1112_s0 + $0xd8] sm:$0xff]  }
  0x21   :  { %v247_v23 = vadd.f32 %v793_v4, %v179_v14  ;;  %v182_v24 = vmul.f32 %v788_v1, %v484_v16  ;;  %v183_v25 = vmul.f32 %v788_v1, %v485_v17  ;;  %v489_v26 = vunpack.c.h.bf16 %v716_v9 }
  0x22   :  { %743 = vst [vmem:[%s1115_s3 + $0x78] sm:$0xff] %v616_v19   ;;  %v248_v27 = vadd.f32 %v793_v4, %v180_v20  ;;  %v249_v28 = vadd.f32 %v793_v4, %v181_v21  ;;  %v184_v29 = vmul.f32 %v788_v1, %v488_v22  ;;  %v492_v30 = vunpack.c.l.bf16 %v717_v18  ;;  %v725_v20 = vld [vmem:[%s1112_s0 + $0xe0] sm:$0xff]  }
  0x23   :  { %v621_v32 = vpack.c.bf16 %v247_v23, %v246_v15  ;;  %v250_v33 = vadd.f32 %v793_v4, %v182_v24  ;;  %v251_v34 = vadd.f32 %v793_v4, %v183_v25  ;;  %v185_v35 = vmul.f32 %v788_v1, %v489_v26 }
  0x24   :  { %v626_v37 = vpack.c.bf16 %v249_v28, %v248_v27  ;;  %v252_v38 = vadd.f32 %v793_v4, %v184_v29  ;;  %v493_v39 = vunpack.c.h.bf16 %v717_v18  ;;  %v186_v40 = vmul.f32 %v788_v1, %v492_v30 }
  0x25   :  { %744 = vst [vmem:[%s1115_s3 + $0x80] sm:$0xff] %v621_v32   ;;  %v631_v42 = vpack.c.bf16 %v251_v34, %v250_v33  ;;  %v253_v43 = vadd.f32 %v793_v4, %v185_v35  ;;  %v496_v44 = vunpack.c.l.bf16 %v718_v31  ;;  %v497_v45 = vunpack.c.h.bf16 %v718_v31  ;;  %v726_v33 = vld [vmem:[%s1112_s0 + $0xe8] sm:$0xff]  }
  0x26   :  { %745 = vst [vmem:[%s1115_s3 + $0x88] sm:$0xff] %v626_v37   ;;  %v187_v46 = vmul.f32 %v788_v1, %v493_v39  ;;  %v254_v47 = vadd.f32 %v793_v4, %v186_v40  ;;  %v500_v48 = vunpack.c.l.bf16 %v719_v36  ;;  %v501_v49 = vunpack.c.h.bf16 %v719_v36 }
  0x27   :  { %746 = vst [vmem:[%s1115_s3 + $0x90] sm:$0xff] %v631_v42   ;;  %v636_v51 = vpack.c.bf16 %v253_v43, %v252_v38  ;;  %v188_v52 = vmul.f32 %v788_v1, %v496_v44  ;;  %v189_v53 = vmul.f32 %v788_v1, %v497_v45  ;;  %v504_v54 = vunpack.c.l.bf16 %v720_v41  ;;  %v727_v38 = vld [vmem:[%s1112_s0 + $0xf0] sm:$0xff]   ;;  %v728_v43 = vld [vmem:[%s1112_s0 + $0xf8] sm:$0xff]  }
  0x28   :  { %v255_v55 = vadd.f32 %v793_v4, %v187_v46  ;;  %v190_v56 = vmul.f32 %v788_v1, %v500_v48  ;;  %v191_v57 = vmul.f32 %v788_v1, %v501_v49  ;;  %v505_v58 = vunpack.c.h.bf16 %v720_v41 }
  0x29   :  { %747 = vst [vmem:[%s1115_s3 + $0x98] sm:$0xff] %v636_v51   ;;  %v256_v59 = vadd.f32 %v793_v4, %v188_v52  ;;  %v257_v60 = vadd.f32 %v793_v4, %v189_v53  ;;  %v192_v61 = vmul.f32 %v788_v1, %v504_v54  ;;  %v508_v62 = vunpack.c.l.bf16 %v721_v50 }
  0x2a   :  { %v641_v0 = vpack.c.bf16 %v255_v55, %v254_v47  ;;  %v258_v2 = vadd.f32 %v793_v4, %v190_v56  ;;  %v259_v3 = vadd.f32 %v793_v4, %v191_v57  ;;  %v193_v5 = vmul.f32 %v788_v1, %v505_v58 }
  0x2b   :  { %v646_v7 = vpack.c.bf16 %v257_v60, %v256_v59  ;;  %v260_v8 = vadd.f32 %v793_v4, %v192_v61  ;;  %v509_v9 = vunpack.c.h.bf16 %v721_v50  ;;  %v194_v10 = vmul.f32 %v788_v1, %v508_v62 }
  0x2c   :  { %748 = vst [vmem:[%s1115_s3 + $0xa0] sm:$0xff] %v641_v0   ;;  %v651_v12 = vpack.c.bf16 %v259_v3, %v258_v2  ;;  %v261_v13 = vadd.f32 %v793_v4, %v193_v5  ;;  %v512_v14 = vunpack.c.l.bf16 %v722_v63  ;;  %v513_v15 = vunpack.c.h.bf16 %v722_v63 }
  0x2d   :  { %749 = vst [vmem:[%s1115_s3 + $0xa8] sm:$0xff] %v646_v7   ;;  %v195_v16 = vmul.f32 %v788_v1, %v509_v9  ;;  %v262_v17 = vadd.f32 %v793_v4, %v194_v10  ;;  %v516_v18 = vunpack.c.l.bf16 %v723_v6  ;;  %v517_v19 = vunpack.c.h.bf16 %v723_v6 }
  0x2e   :  { %750 = vst [vmem:[%s1115_s3 + $0xb0] sm:$0xff] %v651_v12   ;;  %v656_v21 = vpack.c.bf16 %v261_v13, %v260_v8  ;;  %v196_v22 = vmul.f32 %v788_v1, %v512_v14  ;;  %v197_v23 = vmul.f32 %v788_v1, %v513_v15  ;;  %v520_v24 = vunpack.c.l.bf16 %v724_v11 }
  0x2f   :  { %v263_v25 = vadd.f32 %v793_v4, %v195_v16  ;;  %v198_v26 = vmul.f32 %v788_v1, %v516_v18  ;;  %v199_v27 = vmul.f32 %v788_v1, %v517_v19  ;;  %v521_v28 = vunpack.c.h.bf16 %v724_v11 }
  0x30   :  { %751 = vst [vmem:[%s1115_s3 + $0xb8] sm:$0xff] %v656_v21   ;;  %v264_v29 = vadd.f32 %v793_v4, %v196_v22  ;;  %v265_v30 = vadd.f32 %v793_v4, %v197_v23  ;;  %v200_v31 = vmul.f32 %v788_v1, %v520_v24  ;;  %v524_v32 = vunpack.c.l.bf16 %v725_v20 }
  0x31   :  { %v661_v34 = vpack.c.bf16 %v263_v25, %v262_v17  ;;  %v266_v35 = vadd.f32 %v793_v4, %v198_v26  ;;  %v267_v36 = vadd.f32 %v793_v4, %v199_v27  ;;  %v201_v37 = vmul.f32 %v788_v1, %v521_v28 }
  0x32   :  { %v666_v39 = vpack.c.bf16 %v265_v30, %v264_v29  ;;  %v268_v40 = vadd.f32 %v793_v4, %v200_v31  ;;  %v525_v41 = vunpack.c.h.bf16 %v725_v20  ;;  %v202_v42 = vmul.f32 %v788_v1, %v524_v32 }
  0x33   :  { %752 = vst [vmem:[%s1115_s3 + $0xc0] sm:$0xff] %v661_v34   ;;  %v671_v44 = vpack.c.bf16 %v267_v36, %v266_v35  ;;  %v269_v45 = vadd.f32 %v793_v4, %v201_v37  ;;  %v528_v46 = vunpack.c.l.bf16 %v726_v33  ;;  %v529_v47 = vunpack.c.h.bf16 %v726_v33 }
  0x34   :  { %753 = vst [vmem:[%s1115_s3 + $0xc8] sm:$0xff] %v666_v39   ;;  %v203_v48 = vmul.f32 %v788_v1, %v525_v41  ;;  %v270_v49 = vadd.f32 %v793_v4, %v202_v42  ;;  %v532_v50 = vunpack.c.l.bf16 %v727_v38  ;;  %v533_v51 = vunpack.c.h.bf16 %v727_v38 }
  0x35   :  { %754 = vst [vmem:[%s1115_s3 + $0xd0] sm:$0xff] %v671_v44   ;;  %v676_v52 = vpack.c.bf16 %v269_v45, %v268_v40  ;;  %v204_v53 = vmul.f32 %v788_v1, %v528_v46  ;;  %v205_v54 = vmul.f32 %v788_v1, %v529_v47  ;;  %v536_v55 = vunpack.c.l.bf16 %v728_v43 }
  0x36   :  { %v271_v56 = vadd.f32 %v793_v4, %v203_v48  ;;  %v206_v57 = vmul.f32 %v788_v1, %v532_v50  ;;  %v207_v58 = vmul.f32 %v788_v1, %v533_v51  ;;  %v537_v59 = vunpack.c.h.bf16 %v728_v43 }
  0x37   :  { %755 = vst [vmem:[%s1115_s3 + $0xd8] sm:$0xff] %v676_v52   ;;  %v272_v60 = vadd.f32 %v793_v4, %v204_v53  ;;  %v273_v61 = vadd.f32 %v793_v4, %v205_v54  ;;  %v208_v62 = vmul.f32 %v788_v1, %v536_v55 }
  0x38   :  { %v681_v63 = vpack.c.bf16 %v271_v56, %v270_v49  ;;  %v274_v0 = vadd.f32 %v793_v4, %v206_v57  ;;  %v275_v2 = vadd.f32 %v793_v4, %v207_v58  ;;  %v209_v3 = vmul.f32 %v788_v1, %v537_v59 }
  0x39   :  { %v686_v5 = vpack.c.bf16 %v273_v61, %v272_v60  ;;  %v276_v6 = vadd.f32 %v793_v4, %v208_v62 }
  0x3a   :  { %756 = vst [vmem:[%s1115_s3 + $0xe0] sm:$0xff] %v681_v63   ;;  %v691_v7 = vpack.c.bf16 %v275_v2, %v274_v0  ;;  %v277_v8 = vadd.f32 %v793_v4, %v209_v3 }
  0x3b   :  { %757 = vst [vmem:[%s1115_s3 + $0xe8] sm:$0xff] %v686_v5  }
  0x3c   :  { %758 = vst [vmem:[%s1115_s3 + $0xf0] sm:$0xff] %v691_v7   ;;  %v696_v9 = vpack.c.bf16 %v277_v8, %v276_v6 }
  0x3e   :  { %759 = vst [vmem:[%s1115_s3 + $0xf8] sm:$0xff] %v696_v9  }

// kernel: font_unet_forward.24
= control target key start
LH: loop header
LB: loop body
LE: loop exit
PB: predicated region body
PF: predicated region fallthrough
CT: control target
= control target key end

     0   :  { %s1787_s1 = inlined_call_operand.vmem [shape: bf16[1,128,128], index: 1, kind: input, shape index: {}]   ;;  %s1788_s0 = inlined_call_operand.vmem [shape: bf16[1,512,128], index: 0, kind: input, shape index: {}]   ;;  %s1789_s2 = inlined_call_operand.vmem [shape: bf16[1,512,128], index: 2, kind: output, shape index: {0}]   ;;  %s1790_s3 = inlined_call_operand.vmem [shape: f32[1,1,8,128], index: 3, kind: output, shape index: {1}]  }
   0x1   :  { %v1041_v0 = vld [vmem:[%s1787_s1 + $0x38] sm:$0xff]  ;;  %v1040_v1 = vld [vmem:[%s1787_s1 + $0x30] sm:$0xff]  ;;  %v1039_v2 = vld [vmem:[%s1787_s1 + $0x28] sm:$0xff] }
   0x2   :  { %333 = vmatpush.bf16.msra.mxu0 %v1041_v0  ;;  %1233 = vmatpush.bf16.msra.mxu1 %v1041_v0  ;;  %v1038_v3 = vld [vmem:[%s1787_s1 + $0x20] sm:$0xff]  ;;  %v1037_v4 = vld [vmem:[%s1787_s1 + $0x18] sm:$0xff]  ;;  %v1036_v5 = vld [vmem:[%s1787_s1 + $0x10] sm:$0xff] }
   0x3   :  { %1234 = vmatpush.bf16.msra.mxu2 %v1041_v0  ;;  %1235 = vmatpush.bf16.msra.mxu3 %v1041_v0  ;;  %v1035_v6 = vld [vmem:[%s1787_s1 + $0x8] sm:$0xff]  ;;  %v1034_v7 = vld [vmem:[%s1787_s1] sm:$0xff]  ;;  %v1004_v13 = vld [vmem:[%s1788_s0 + $0x10] sm:$0xff] }
   0x4   :  { %v1002_v8 = vld [vmem:[%s1788_s0] sm:$0xff]  ;;  %v1003_v10 = vld [vmem:[%s1788_s0 + $0x8] sm:$0xff]  ;;  %v1012_v14 = vld [vmem:[%s1788_s0 + $0x50] sm:$0xff] }
   0x5   :  { %v1010_v9 = vld [vmem:[%s1788_s0 + $0x40] sm:$0xff]  ;;  %v1011_v11 = vld [vmem:[%s1788_s0 + $0x48] sm:$0xff]  ;;  %v1005_v16 = vld [vmem:[%s1788_s0 + $0x18] sm:$0xff] }
   0x6   :  { %334 = vmatpush.bf16.msra.mxu0 %v1040_v1  ;;  %1236 = vmatpush.bf16.msra.mxu1 %v1040_v1  ;;  %v1018_v12 = vld [vmem:[%s1788_s0 + $0x80] sm:$0xff]  ;;  %v1019_v15 = vld [vmem:[%s1788_s0 + $0x88] sm:$0xff]  ;;  %v1013_v17 = vld [vmem:[%s1788_s0 + $0x58] sm:$0xff] }
   0x7   :  { %1237 = vmatpush.bf16.msra.mxu2 %v1040_v1  ;;  %1238 = vmatpush.bf16.msra.mxu3 %v1040_v1  ;;  %v1020_v18 = vld [vmem:[%s1788_s0 + $0x90] sm:$0xff]  ;;  %v1026_v19 = vld [vmem:[%s1788_s0 + $0xc0] sm:$0xff]  ;;  %v1021_v22 = vld [vmem:[%s1788_s0 + $0x98] sm:$0xff] }
   0x8   :  { %v1006_v20 = vld [vmem:[%s1788_s0 + $0x20] sm:$0xff]  ;;  %v1027_v23 = vld [vmem:[%s1788_s0 + $0xc8] sm:$0xff]  ;;  %v1028_v27 = vld [vmem:[%s1788_s0 + $0xd0] sm:$0xff] }
   0x9   :  { %v1014_v21 = vld [vmem:[%s1788_s0 + $0x60] sm:$0xff]  ;;  %v1007_v24 = vld [vmem:[%s1788_s0 + $0x28] sm:$0xff]  ;;  %v1008_v28 = vld [vmem:[%s1788_s0 + $0x30] sm:$0xff] }
   0xa   :  { %335 = vmatpush.bf16.msra.mxu0 %v1039_v2  ;;  %1239 = vmatpush.bf16.msra.mxu1 %v1039_v2  ;;  %v1015_v25 = vld [vmem:[%s1788_s0 + $0x68] sm:$0xff]  ;;  %v1022_v26 = vld [vmem:[%s1788_s0 + $0xa0] sm:$0xff]  ;;  %v1016_v29 = vld [vmem:[%s1788_s0 + $0x70] sm:$0xff] }
   0xb   :  { %1240 = vmatpush.bf16.msra.mxu2 %v1039_v2  ;;  %1241 = vmatpush.bf16.msra.mxu3 %v1039_v2  ;;  %v1023_v30 = vld [vmem:[%s1788_s0 + $0xa8] sm:$0xff]  ;;  %v1029_v31 = vld [vmem:[%s1788_s0 + $0xd8] sm:$0xff]  ;;  %v1024_v34 = vld [vmem:[%s1788_s0 + $0xb0] sm:$0xff] }
   0xc   :  { %v1009_v32 = vld [vmem:[%s1788_s0 + $0x38] sm:$0xff]  ;;  %v1030_v35 = vld [vmem:[%s1788_s0 + $0xe0] sm:$0xff]  ;;  %v1031_v39 = vld [vmem:[%s1788_s0 + $0xe8] sm:$0xff] }
   0xd   :  { %v1017_v33 = vld [vmem:[%s1788_s0 + $0x78] sm:$0xff]  ;;  %v1032_v53 = vld [vmem:[%s1788_s0 + $0xf0] sm:$0xff] }
   0xe   :  { %336 = vmatpush.bf16.msra.mxu0 %v1038_v3  ;;  %1242 = vmatpush.bf16.msra.mxu1 %v1038_v3  ;;  %v1025_v38 = vld [vmem:[%s1788_s0 + $0xb8] sm:$0xff] }
   0xf   :  { %1243 = vmatpush.bf16.msra.mxu2 %v1038_v3  ;;  %1244 = vmatpush.bf16.msra.mxu3 %v1038_v3 }
  0x12   :  { %337 = vmatpush.bf16.msra.mxu0 %v1037_v4  ;;  %1245 = vmatpush.bf16.msra.mxu1 %v1037_v4 }
  0x13   :  { %1246 = vmatpush.bf16.msra.mxu2 %v1037_v4  ;;  %1247 = vmatpush.bf16.msra.mxu3 %v1037_v4 }
  0x16   :  { %338 = vmatpush.bf16.msra.mxu0 %v1036_v5  ;;  %1248 = vmatpush.bf16.msra.mxu1 %v1036_v5 }
  0x17   :  { %1249 = vmatpush.bf16.msra.mxu2 %v1036_v5  ;;  %1250 = vmatpush.bf16.msra.mxu3 %v1036_v5  ;;  %v1033_v5 = vld [vmem:[%s1788_s0 + $0xf8] sm:$0xff] }
  0x1a   :  { %339 = vmatpush.bf16.msra.mxu0 %v1035_v6  ;;  %1251 = vmatpush.bf16.msra.mxu1 %v1035_v6 }
  0x1b   :  { %1252 = vmatpush.bf16.msra.mxu2 %v1035_v6  ;;  %1253 = vmatpush.bf16.msra.mxu3 %v1035_v6 }
  0x1e   :  { %340 = vmatpush.bf16.msra.mxu0 %v1034_v7  ;;  %1254 = vmatpush.bf16.msra.mxu1 %v1034_v7 }
  0x1f   :  { %1255 = vmatpush.bf16.msra.mxu2 %v1034_v7  ;;  %1256 = vmatpush.bf16.msra.mxu3 %v1034_v7 }
  0x21   :  { %341 = vmatmul.bf16.vlgmr.msra.gmra.mxu0 %v1002_v8  ;;  %381 = vmatmul.bf16.vlgmr.msra.gmra.mxu1 %v1010_v9 }
  0x22   :  { %421 = vmatmul.bf16.vlgmr.msra.gmra.mxu2 %v1018_v12  ;;  %461 = vmatmul.bf16.vlgmr.msra.gmra.mxu3 %v1026_v19 }
  0x31   :  { %346 = vmatmul.bf16.gmra.mxu0 %v1003_v10  ;;  %386 = vmatmul.bf16.gmra.mxu1 %v1011_v11 }
  0x32   :  { %426 = vmatmul.bf16.gmra.mxu2 %v1019_v15  ;;  %466 = vmatmul.bf16.gmra.mxu3 %v1027_v23 }
  0x41   :  { %351 = vmatmul.bf16.gmra.mxu0 %v1004_v13  ;;  %391 = vmatmul.bf16.gmra.mxu1 %v1012_v14 }
  0x42   :  { %431 = vmatmul.bf16.gmra.mxu2 %v1020_v18  ;;  %471 = vmatmul.bf16.gmra.mxu3 %v1028_v27 }
  0x51   :  { %356 = vmatmul.bf16.gmra.mxu0 %v1005_v16  ;;  %396 = vmatmul.bf16.gmra.mxu1 %v1013_v17 }
  0x52   :  { %436 = vmatmul.bf16.gmra.mxu2 %v1021_v22  ;;  %476 = vmatmul.bf16.gmra.mxu3 %v1029_v31 }
  0x61   :  { %361 = vmatmul.bf16.gmra.mxu0 %v1006_v20  ;;  %401 = vmatmul.bf16.gmra.mxu1 %v1014_v21 }
  0x62   :  { %441 = vmatmul.bf16.gmra.mxu2 %v1022_v26  ;;  %481 = vmatmul.bf16.gmra.mxu3 %v1030_v35 }
  0x71   :  { %366 = vmatmul.bf16.gmra.mxu0 %v1007_v24  ;;  %406 = vmatmul.bf16.gmra.mxu1 %v1015_v25 }
  0x72   :  { %446 = vmatmul.bf16.gmra.mxu2 %v1023_v30  ;;  %486 = vmatmul.bf16.gmra.mxu3 %v1031_v39 }
  0x81   :  { %371 = vmatmul.bf16.gmra.mxu0 %v1008_v28  ;;  %411 = vmatmul.bf16.gmra.mxu1 %v1016_v29 }
  0x82   :  { %451 = vmatmul.bf16.gmra.mxu2 %v1024_v34  ;;  %491 = vmatmul.bf16.gmra.mxu3 %v1032_v53 }
  0x91   :  { %376 = vmatmul.bf16.gmra.mxu0 %v1009_v32  ;;  %416 = vmatmul.bf16.gmra.mxu1 %v1017_v33 }
  0x92   :  { %456 = vmatmul.bf16.gmra.mxu2 %v1025_v38  ;;  %496 = vmatmul.bf16.gmra.mxu3 %v1033_v5 }
  0x9e   :  { %v342_v36 = vpop.f32.mrf.mxu0  ;;  %v1385_v37 = vpop.f32.mrf.mxu1 }
  0x9f   :  { %v700_v40 = vmul.f32 %v342_v36, %v342_v36 }
  0xa5   :  { %v1412_v60 = vpop.f32.mrf.mxu2  ;;  %v1463_v20 = vpop.f32.mrf.mxu3 }
  0xa6   :  { %v344_v41 = vpop.f32.mrf.mxu0  ;;  %v1393_v42 = vpop.f32.mrf.mxu1 }
  0xa7   :  { %v1045_v43 = vpack.c.bf16 %v344_v41, %v342_v36  ;;  %v630_v44 = vadd.f32 %v344_v41, %v342_v36  ;;  %v701_v45 = vmul.f32 %v344_v41, %v344_v41  ;;  %v1085_v46 = vpack.c.bf16 %v1393_v42, %v1385_v37 }
  0xa9   :  { %1046 = vst [vmem:[%s1789_s2] sm:$0xff] %v1045_v43   ;;  %v764_v47 = vadd.f32 %v701_v45, %v700_v40 }
  0xaa   :  { %1209 = vst [vmem:[%s1789_s2 + $0x40] sm:$0xff] %v1085_v46  }
  0xad   :  { %v1424_v2 = vpop.f32.mrf.mxu2  ;;  %v1475_v24 = vpop.f32.mrf.mxu3 }
  0xae   :  { %v347_v48 = vpop.f32.mrf.mxu0  ;;  %v1403_v49 = vpop.f32.mrf.mxu1  ;;  %v1125_v3 = vpack.c.bf16 %v1424_v2, %v1412_v60  ;;  %v1165_v26 = vpack.c.bf16 %v1475_v24, %v1463_v20 }
  0xaf   :  { %v631_v50 = vadd.f32 %v630_v44, %v347_v48  ;;  %v702_v51 = vmul.f32 %v347_v48, %v347_v48 }
  0xb0   :  { %1217 = vst [vmem:[%s1789_s2 + $0x80] sm:$0xff] %v1125_v3  }
  0xb1   :  { %v765_v52 = vadd.f32 %v764_v47, %v702_v51  ;;  %1225 = vst [vmem:[%s1789_s2 + $0xc0] sm:$0xff] %v1165_v26  }
  0xb5   :  { %v1440_v10 = vpop.f32.mrf.mxu2  ;;  %v1493_v32 = vpop.f32.mrf.mxu3 }
  0xb6   :  { %v349_v54 = vpop.f32.mrf.mxu0  ;;  %v1408_v55 = vpop.f32.mrf.mxu1 }
  0xb7   :  { %v1050_v56 = vpack.c.bf16 %v349_v54, %v347_v48  ;;  %v632_v57 = vadd.f32 %v631_v50, %v349_v54  ;;  %v703_v58 = vmul.f32 %v349_v54, %v349_v54  ;;  %v1090_v59 = vpack.c.bf16 %v1408_v55, %v1403_v49 }
  0xb9   :  { %1202 = vst [vmem:[%s1789_s2 + $0x8] sm:$0xff] %v1050_v56   ;;  %v766_v61 = vadd.f32 %v765_v52, %v703_v58 }
  0xba   :  { %1210 = vst [vmem:[%s1789_s2 + $0x48] sm:$0xff] %v1090_v59  }
  0xbd   :  { %v1450_v13 = vpop.f32.mrf.mxu2  ;;  %v1505_v36 = vpop.f32.mrf.mxu3 }
  0xbe   :  { %v352_v62 = vpop.f32.mrf.mxu0  ;;  %v1420_v63 = vpop.f32.mrf.mxu1  ;;  %v1130_v14 = vpack.c.bf16 %v1450_v13, %v1440_v10  ;;  %v1170_v39 = vpack.c.bf16 %v1505_v36, %v1493_v32 }
  0xbf   :  { %v1422_v0 = vadd.f32 %v632_v57, %v352_v62  ;;  %v704_v1 = vmul.f32 %v352_v62, %v352_v62 }
  0xc0   :  { %1218 = vst [vmem:[%s1789_s2 + $0x88] sm:$0xff] %v1130_v14  }
  0xc1   :  { %v1428_v4 = vadd.f32 %v766_v61, %v704_v1  ;;  %1226 = vst [vmem:[%s1789_s2 + $0xc8] sm:$0xff] %v1170_v39  }
  0xc5   :  { %v1461_v19 = vpop.f32.mrf.mxu2  ;;  %v1523_v46 = vpop.f32.mrf.mxu3 }
  0xc6   :  { %v354_v6 = vpop.f32.mrf.mxu0  ;;  %v1436_v7 = vpop.f32.mrf.mxu1 }
  0xc7   :  { %v1055_v8 = vpack.c.bf16 %v354_v6, %v352_v62  ;;  %v1095_v9 = vpack.c.bf16 %v1436_v7, %v1420_v63  ;;  %v705_v52 = vmul.f32 %v354_v6, %v354_v6  ;;  %v634_v57 = vadd.f32 %v1422_v0, %v354_v6 }
  0xc9   :  { %1203 = vst [vmem:[%s1789_s2 + $0x10] sm:$0xff] %v1055_v8   ;;  %v768_v58 = vadd.f32 %v1428_v4, %v705_v52 }
  0xca   :  { %1211 = vst [vmem:[%s1789_s2 + $0x50] sm:$0xff] %v1095_v9  }
  0xcd   :  { %v1473_v23 = vpop.f32.mrf.mxu2  ;;  %v1535_v51 = vpop.f32.mrf.mxu3 }
  0xce   :  { %v357_v11 = vpop.f32.mrf.mxu0  ;;  %v1448_v12 = vpop.f32.mrf.mxu1  ;;  %v1135_v25 = vpack.c.bf16 %v1473_v23, %v1461_v19  ;;  %v1175_v54 = vpack.c.bf16 %v1535_v51, %v1523_v46 }
  0xcf   :  { %v706_v56 = vmul.f32 %v357_v11, %v357_v11  ;;  %v635_v61 = vadd.f32 %v634_v57, %v357_v11 }
  0xd0   :  { %1219 = vst [vmem:[%s1789_s2 + $0x90] sm:$0xff] %v1135_v25  }
  0xd1   :  { %1227 = vst [vmem:[%s1789_s2 + $0xd0] sm:$0xff] %v1175_v54   ;;  %v769_v62 = vadd.f32 %v768_v58, %v706_v56 }
  0xd5   :  { %v1491_v31 = vpop.f32.mrf.mxu2  ;;  %v1555_v0 = vpop.f32.mrf.mxu3 }
  0xd6   :  { %v359_v15 = vpop.f32.mrf.mxu0  ;;  %v1457_v16 = vpop.f32.mrf.mxu1 }
  0xd7   :  { %v1060_v17 = vpack.c.bf16 %v359_v15, %v357_v11  ;;  %v1100_v18 = vpack.c.bf16 %v1457_v16, %v1448_v12  ;;  %v707_v59 = vmul.f32 %v359_v15, %v359_v15  ;;  %v636_v8 = vadd.f32 %v635_v61, %v359_v15 }
  0xd9   :  { %1204 = vst [vmem:[%s1789_s2 + $0x18] sm:$0xff] %v1060_v17   ;;  %v770_v6 = vadd.f32 %v769_v62, %v707_v59 }
  0xda   :  { %1212 = vst [vmem:[%s1789_s2 + $0x58] sm:$0xff] %v1100_v18  }
  0xdd   :  { %v1503_v35 = vpop.f32.mrf.mxu2 }
  0xde   :  { %v362_v21 = vpop.f32.mrf.mxu0  ;;  %v1471_v22 = vpop.f32.mrf.mxu1  ;;  %v1140_v38 = vpack.c.bf16 %v1503_v35, %v1491_v31 }
  0xdf   :  { %v708_v1 = vmul.f32 %v362_v21, %v362_v21  ;;  %v637_v25 = vadd.f32 %v636_v8, %v362_v21 }
  0xe0   :  { %1220 = vst [vmem:[%s1789_s2 + $0x98] sm:$0xff] %v1140_v38  }
  0xe1   :  { %v771_v4 = vadd.f32 %v770_v6, %v708_v1 }
  0xe5   :  { %v1521_v45 = vpop.f32.mrf.mxu2 }
  0xe6   :  { %v364_v27 = vpop.f32.mrf.mxu0  ;;  %v1487_v28 = vpop.f32.mrf.mxu1 }
  0xe7   :  { %v1065_v29 = vpack.c.bf16 %v364_v27, %v362_v21  ;;  %v1105_v30 = vpack.c.bf16 %v1487_v28, %v1471_v22  ;;  %v709_v18 = vmul.f32 %v364_v27, %v364_v27  ;;  %v638_v15 = vadd.f32 %v637_v25, %v364_v27 }
  0xe9   :  { %1205 = vst [vmem:[%s1789_s2 + $0x20] sm:$0xff] %v1065_v29   ;;  %v772_v26 = vadd.f32 %v771_v4, %v709_v18 }
  0xea   :  { %1213 = vst [vmem:[%s1789_s2 + $0x60] sm:$0xff] %v1105_v30  }
  0xed   :  { %v1533_v50 = vpop.f32.mrf.mxu2 }
  0xee   :  { %v367_v33 = vpop.f32.mrf.mxu0  ;;  %v1501_v34 = vpop.f32.mrf.mxu1  ;;  %v1145_v53 = vpack.c.bf16 %v1533_v50, %v1521_v45 }
  0xef   :  { %v710_v11 = vmul.f32 %v367_v33, %v367_v33  ;;  %v639_v30 = vadd.f32 %v638_v15, %v367_v33 }
  0xf0   :  { %1221 = vst [vmem:[%s1789_s2 + $0xa0] sm:$0xff] %v1145_v53   ;;  %v1567_v53 = vpop.f32.mrf.mxu3 }
  0xf1   :  { %v773_v38 = vadd.f32 %v772_v26, %v710_v11  ;;  %v1180_v27 = vpack.c.bf16 %v1567_v53, %v1555_v0  ;;  %v717_v26 = vmul.f32 %v1393_v42, %v1393_v42 }
  0xf3   :  { %1228 = vst [vmem:[%s1789_s2 + $0xd8] sm:$0xff] %v1180_v27  }
  0xf5   :  { %v1553_v17 = vpop.f32.mrf.mxu2 }
  0xf6   :  { %v369_v40 = vpop.f32.mrf.mxu0  ;;  %v1517_v41 = vpop.f32.mrf.mxu1 }
  0xf7   :  { %v1070_v43 = vpack.c.bf16 %v369_v40, %v367_v33  ;;  %v1110_v44 = vpack.c.bf16 %v1517_v41, %v1501_v34  ;;  %v711_v29 = vmul.f32 %v369_v40, %v369_v40  ;;  %v640_v21 = vadd.f32 %v639_v30, %v369_v40 }
  0xf8   :  { %v1585_v4 = vpop.f32.mrf.mxu3 }
  0xf9   :  { %1206 = vst [vmem:[%s1789_s2 + $0x28] sm:$0xff] %v1070_v43   ;;  %v774_v54 = vadd.f32 %v773_v38, %v711_v29  ;;  %v718_v38 = vmul.f32 %v1403_v49, %v1403_v49 }
  0xfa   :  { %1214 = vst [vmem:[%s1789_s2 + $0x68] sm:$0xff] %v1110_v44  }
  0xfd   :  { %v1565_v52 = vpop.f32.mrf.mxu2 }
  0xfe   :  { %v372_v47 = vpop.f32.mrf.mxu0  ;;  %v1531_v48 = vpop.f32.mrf.mxu1  ;;  %v1150_v57 = vpack.c.bf16 %v1565_v52, %v1553_v17 }
  0xff   :  { %v712_v39 = vmul.f32 %v372_v47, %v372_v47  ;;  %v641_v58 = vadd.f32 %v640_v21, %v372_v47 }
 0x100   :  { %1222 = vst [vmem:[%s1789_s2 + $0xa8] sm:$0xff] %v1150_v57   ;;  %v1607_v57 = vpop.f32.mrf.mxu3 }
 0x101   :  { %v775_v33 = vadd.f32 %v774_v54, %v712_v39  ;;  %v1185_v27 = vpack.c.bf16 %v1607_v57, %v1585_v4 }
 0x103   :  { %1229 = vst [vmem:[%s1789_s2 + $0xe0] sm:$0xff] %v1185_v27  }
 0x105   :  { %v1583_v25 = vpop.f32.mrf.mxu2 }
 0x106   :  { %v374_v3 = vpop.f32.mrf.mxu0  ;;  %v1549_v5 = vpop.f32.mrf.mxu1 }
 0x107   :  { %v1075_v9 = vpack.c.bf16 %v374_v3, %v372_v47  ;;  %v1115_v14 = vpack.c.bf16 %v1549_v5, %v1531_v48  ;;  %v713_v56 = vmul.f32 %v374_v3, %v374_v3  ;;  %v642_v40 = vadd.f32 %v641_v58, %v374_v3 }
 0x108   :  { %v716_v3 = vmul.f32 %v1385_v37, %v1385_v37  ;;  %v729_v27 = vmul.f32 %v1549_v5, %v1549_v5 }
 0x109   :  { %1207 = vst [vmem:[%s1789_s2 + $0x30] sm:$0xff] %v1075_v9   ;;  %v776_v61 = vadd.f32 %v775_v33, %v713_v56 }
 0x10a   :  { %1215 = vst [vmem:[%s1789_s2 + $0x70] sm:$0xff] %v1115_v14  }
 0x10d   :  { %v1605_v56 = vpop.f32.mrf.mxu2 }
 0x10e   :  { %v377_v43 = vpop.f32.mrf.mxu0  ;;  %v1563_v44 = vpop.f32.mrf.mxu1 }
 0x10f   :  { %v714_v59 = vmul.f32 %v377_v43, %v377_v43  ;;  %v643_v62 = vadd.f32 %v642_v40, %v377_v43 }
 0x111   :  { %v777_v1 = vadd.f32 %v776_v61, %v714_v59  ;;  %v722_v61 = vmul.f32 %v1448_v12, %v1448_v12 }
 0x116   :  { %v379_v8 = vpop.f32.mrf.mxu0  ;;  %v1579_v9 = vpop.f32.mrf.mxu1 }
 0x117   :  { %v1080_v14 = vpack.c.bf16 %v379_v8, %v377_v43  ;;  %v644_v6 = vadd.f32 %v643_v62, %v379_v8  ;;  %v715_v47 = vmul.f32 %v379_v8, %v379_v8  ;;  %v1120_v18 = vpack.c.bf16 %v1579_v9, %v1563_v44 }
 0x119   :  { %1208 = vst [vmem:[%s1789_s2 + $0x38] sm:$0xff] %v1080_v14   ;;  %v645_v11 = vadd.f32 %v644_v6, %v1385_v37  ;;  %v778_v15 = vadd.f32 %v777_v1, %v715_v47  ;;  %v719_v37 = vmul.f32 %v1408_v55, %v1408_v55  ;;  %v723_v1 = vmul.f32 %v1457_v16, %v1457_v16  ;;  %v1631_v6 = vpop.f32.mrf.mxu2 }
 0x11a   :  { %1216 = vst [vmem:[%s1789_s2 + $0x78] sm:$0xff] %v1120_v18   ;;  %v724_v47 = vmul.f32 %v1471_v22, %v1471_v22 }
 0x11b   :  { %v646_v29 = vadd.f32 %v645_v11, %v1393_v42  ;;  %v779_v30 = vadd.f32 %v778_v15, %v716_v3  ;;  %v1155_v42 = vpack.c.bf16 %v1605_v56, %v1583_v25  ;;  %v725_v11 = vmul.f32 %v1487_v28, %v1487_v28 }
 0x11d   :  { %v647_v39 = vadd.f32 %v646_v29, %v1403_v49  ;;  %v780_v43 = vadd.f32 %v779_v30, %v717_v26  ;;  %v720_v49 = vmul.f32 %v1420_v63, %v1420_v63  ;;  %1223 = vst [vmem:[%s1789_s2 + $0xb0] sm:$0xff] %v1155_v42   ;;  %v727_v30 = vmul.f32 %v1517_v41, %v1517_v41 }
 0x11f   :  { %v648_v21 = vadd.f32 %v647_v39, %v1408_v55  ;;  %v781_v54 = vadd.f32 %v780_v43, %v718_v38  ;;  %v721_v55 = vmul.f32 %v1436_v7, %v1436_v7 }
 0x121   :  { %v649_v58 = vadd.f32 %v648_v21, %v1420_v63  ;;  %v782_v33 = vadd.f32 %v781_v54, %v719_v37 }
 0x123   :  { %v650_v59 = vadd.f32 %v649_v58, %v1436_v7  ;;  %v783_v40 = vadd.f32 %v782_v33, %v720_v49  ;;  %v1633_v7 = vpop.f32.mrf.mxu3 }
 0x125   :  { %v784_v62 = vadd.f32 %v783_v40, %v721_v55  ;;  %v651_v63 = vadd.f32 %v650_v59, %v1448_v12  ;;  %v731_v59 = vmul.f32 %v1579_v9, %v1579_v9 }
 0x127   :  { %v652_v8 = vadd.f32 %v651_v63, %v1457_v16  ;;  %v785_v14 = vadd.f32 %v784_v62, %v722_v61  ;;  %v726_v16 = vmul.f32 %v1501_v34, %v1501_v34  ;;  %v733_v63 = vmul.f32 %v1424_v2, %v1424_v2 }
 0x129   :  { %v653_v18 = vadd.f32 %v652_v8, %v1471_v22  ;;  %v786_v3 = vadd.f32 %v785_v14, %v723_v1  ;;  %v1647_v22 = vpop.f32.mrf.mxu2  ;;  %v734_v8 = vmul.f32 %v1440_v10, %v1440_v10 }
 0x12b   :  { %v654_v12 = vadd.f32 %v653_v18, %v1487_v28  ;;  %v787_v15 = vadd.f32 %v786_v3, %v724_v47  ;;  %v1649_v43 = vpop.f32.mrf.mxu3  ;;  %v1160_v28 = vpack.c.bf16 %v1647_v22, %v1631_v6  ;;  %v735_v47 = vmul.f32 %v1450_v13, %v1450_v13 }
 0x12c   :  { %v1190_v37 = vpack.c.bf16 %v1649_v43, %v1633_v7 }
 0x12d   :  { %v655_v26 = vadd.f32 %v654_v12, %v1501_v34  ;;  %v788_v29 = vadd.f32 %v787_v15, %v725_v11  ;;  %v728_v34 = vmul.f32 %v1531_v48, %v1531_v48  ;;  %1224 = vst [vmem:[%s1789_s2 + $0xb8] sm:$0xff] %v1160_v28  }
 0x12e   :  { %1230 = vst [vmem:[%s1789_s2 + $0xe8] sm:$0xff] %v1190_v37   ;;  %v740_v37 = vmul.f32 %v1521_v45, %v1521_v45 }
 0x12f   :  { %v656_v38 = vadd.f32 %v655_v26, %v1517_v41  ;;  %v789_v39 = vadd.f32 %v788_v29, %v726_v16  ;;  %v738_v26 = vmul.f32 %v1491_v31, %v1491_v31 }
 0x131   :  { %v657_v21 = vadd.f32 %v656_v38, %v1531_v48  ;;  %v790_v54 = vadd.f32 %v789_v39, %v727_v30  ;;  %v730_v48 = vmul.f32 %v1563_v44, %v1563_v44 }
 0x133   :  { %v791_v41 = vadd.f32 %v790_v54, %v728_v34  ;;  %v658_v42 = vadd.f32 %v657_v21, %v1549_v5  ;;  %v1673_v40 = vpop.f32.mrf.mxu3  ;;  %v732_v5 = vmul.f32 %v1412_v60, %v1412_v60  ;;  %v741_v34 = vmul.f32 %v1533_v50, %v1533_v50 }
 0x135   :  { %v792_v49 = vadd.f32 %v791_v41, %v729_v27  ;;  %v659_v58 = vadd.f32 %v658_v42, %v1563_v44  ;;  %v742_v41 = vmul.f32 %v1553_v17, %v1553_v17 }
 0x137   :  { %v793_v33 = vadd.f32 %v792_v49, %v730_v48  ;;  %v660_v55 = vadd.f32 %v659_v58, %v1579_v9  ;;  %v743_v49 = vmul.f32 %v1565_v52, %v1565_v52 }
 0x139   :  { %v661_v61 = vadd.f32 %v660_v55, %v1412_v60  ;;  %v794_v62 = vadd.f32 %v793_v33, %v731_v59 }
 0x13b   :  { %v662_v1 = vadd.f32 %v661_v61, %v1424_v2  ;;  %v795_v44 = vadd.f32 %v794_v62, %v732_v5  ;;  %v1687_v60 = vpop.f32.mrf.mxu3  ;;  %v736_v2 = vmul.f32 %v1461_v19, %v1461_v19  ;;  %v746_v62 = vmul.f32 %v1631_v6, %v1631_v6 }
 0x13c   :  { %v1195_v11 = vpack.c.bf16 %v1687_v60, %v1673_v40 }
 0x13d   :  { %v663_v14 = vadd.f32 %v662_v1, %v1440_v10  ;;  %v796_v9 = vadd.f32 %v795_v44, %v733_v63  ;;  %v737_v10 = vmul.f32 %v1473_v23, %v1473_v23  ;;  %v748_v44 = vmul.f32 %v1463_v20, %v1463_v20 }
 0x13e   :  { %1231 = vst [vmem:[%s1789_s2 + $0xf0] sm:$0xff] %v1195_v11  }
 0x13f   :  { %v664_v18 = vadd.f32 %v663_v14, %v1450_v13  ;;  %v797_v3 = vadd.f32 %v796_v9, %v734_v8 }
 0x141   :  { %v665_v12 = vadd.f32 %v664_v18, %v1461_v19  ;;  %v798_v15 = vadd.f32 %v797_v3, %v735_v47  ;;  %v739_v19 = vmul.f32 %v1503_v35, %v1503_v35 }
 0x143   :  { %v666_v13 = vadd.f32 %v665_v12, %v1473_v23  ;;  %v799_v16 = vadd.f32 %v798_v15, %v736_v2  ;;  %v1706_v28 = vpop.f32.mrf.mxu3 }
 0x145   :  { %v800_v29 = vadd.f32 %v799_v16, %v737_v10  ;;  %v667_v30 = vadd.f32 %v666_v13, %v1491_v31 }
 0x147   :  { %v668_v38 = vadd.f32 %v667_v30, %v1503_v35  ;;  %v801_v39 = vadd.f32 %v800_v29, %v738_v26 }
 0x149   :  { %v669_v23 = vadd.f32 %v668_v38, %v1521_v45  ;;  %v802_v21 = vadd.f32 %v801_v39, %v739_v19 }
 0x14b   :  { %v670_v54 = vadd.f32 %v669_v23, %v1533_v50  ;;  %v803_v31 = vadd.f32 %v802_v21, %v740_v37  ;;  %v499_v45 = vpop.f32.mrf.mxu3  ;;  %v744_v50 = vmul.f32 %v1583_v25, %v1583_v25 }
 0x14c   :  { %v1200_v48 = vpack.c.bf16 %v499_v45, %v1706_v28 }
 0x14d   :  { %v671_v35 = vadd.f32 %v670_v54, %v1553_v17  ;;  %v804_v42 = vadd.f32 %v803_v31, %v741_v34  ;;  %v759_v34 = vmul.f32 %v1649_v43, %v1649_v43 }
 0x14e   :  { %1232 = vst [vmem:[%s1789_s2 + $0xf8] sm:$0xff] %v1200_v48   ;;  %v763_v48 = vmul.f32 %v499_v45, %v499_v45 }
 0x14f   :  { %v672_v27 = vadd.f32 %v671_v35, %v1565_v52  ;;  %v805_v58 = vadd.f32 %v804_v42, %v742_v41  ;;  %v745_v52 = vmul.f32 %v1605_v56, %v1605_v56  ;;  %v760_v41 = vmul.f32 %v1673_v40, %v1673_v40 }
 0x150   :  { %v761_v42 = vmul.f32 %v1687_v60, %v1687_v60 }
 0x151   :  { %v806_v33 = vadd.f32 %v805_v58, %v743_v49  ;;  %v673_v55 = vadd.f32 %v672_v27, %v1583_v25  ;;  %v747_v25 = vmul.f32 %v1647_v22, %v1647_v22  ;;  %v762_v49 = vmul.f32 %v1706_v28, %v1706_v28 }
 0x153   :  { %v807_v17 = vadd.f32 %v806_v33, %v744_v50  ;;  %v674_v59 = vadd.f32 %v673_v55, %v1605_v56  ;;  %v749_v56 = vmul.f32 %v1475_v24, %v1475_v24 }
 0x155   :  { %v808_v5 = vadd.f32 %v807_v17, %v745_v52  ;;  %v675_v61 = vadd.f32 %v674_v59, %v1631_v6  ;;  %v750_v6 = vmul.f32 %v1493_v32, %v1493_v32 }
 0x157   :  { %v809_v63 = vadd.f32 %v808_v5, %v746_v62  ;;  %v676_v1 = vadd.f32 %v675_v61, %v1647_v22  ;;  %v751_v22 = vmul.f32 %v1505_v36, %v1505_v36 }
 0x159   :  { %v677_v8 = vadd.f32 %v676_v1, %v1463_v20  ;;  %v810_v14 = vadd.f32 %v809_v63, %v747_v25  ;;  %v752_v20 = vmul.f32 %v1523_v46, %v1523_v46 }
 0x15b   :  { %v678_v9 = vadd.f32 %v677_v8, %v1475_v24  ;;  %v811_v47 = vadd.f32 %v810_v14, %v748_v44  ;;  %v753_v24 = vmul.f32 %v1535_v51, %v1535_v51 }
 0x15d   :  { %v679_v18 = vadd.f32 %v678_v9, %v1493_v32  ;;  %v812_v3 = vadd.f32 %v811_v47, %v749_v56  ;;  %v754_v32 = vmul.f32 %v1555_v0, %v1555_v0 }
 0x15f   :  { %v680_v11 = vadd.f32 %v679_v18, %v1505_v36  ;;  %v813_v2 = vadd.f32 %v812_v3, %v750_v6  ;;  %v755_v36 = vmul.f32 %v1567_v53, %v1567_v53 }
 0x161   :  { %v681_v12 = vadd.f32 %v680_v11, %v1523_v46  ;;  %v814_v15 = vadd.f32 %v813_v2, %v751_v22  ;;  %v756_v46 = vmul.f32 %v1585_v4, %v1585_v4 }
 0x163   :  { %v682_v10 = vadd.f32 %v681_v12, %v1535_v51  ;;  %v815_v13 = vadd.f32 %v814_v15, %v752_v20  ;;  %v757_v51 = vmul.f32 %v1607_v57, %v1607_v57 }
 0x165   :  { %v816_v16 = vadd.f32 %v815_v13, %v753_v24  ;;  %v683_v26 = vadd.f32 %v682_v10, %v1555_v0  ;;  %v758_v0 = vmul.f32 %v1633_v7, %v1633_v7 }
 0x167   :  { %v684_v29 = vadd.f32 %v683_v26, %v1567_v53  ;;  %v817_v30 = vadd.f32 %v816_v16, %v754_v32 }
 0x169   :  { %v685_v19 = vadd.f32 %v684_v29, %v1585_v4  ;;  %v818_v38 = vadd.f32 %v817_v30, %v755_v36 }
 0x16b   :  { %v686_v39 = vadd.f32 %v685_v19, %v1607_v57  ;;  %v819_v37 = vadd.f32 %v818_v38, %v756_v46 }
 0x16d   :  { %v687_v23 = vadd.f32 %v686_v39, %v1633_v7  ;;  %v820_v21 = vadd.f32 %v819_v37, %v757_v51 }
 0x16f   :  { %v688_v53 = vadd.f32 %v687_v23, %v1649_v43  ;;  %v821_v54 = vadd.f32 %v820_v21, %v758_v0 }
 0x171   :  { %v822_v4 = vadd.f32 %v821_v54, %v759_v34  ;;  %v689_v31 = vadd.f32 %v688_v53, %v1673_v40 }
 0x173   :  { %v823_v57 = vadd.f32 %v822_v4, %v760_v41  ;;  %v690_v35 = vadd.f32 %v689_v31, %v1687_v60 }
 0x175   :  { %v824_v7 = vadd.f32 %v823_v57, %v761_v42  ;;  %v691_v27 = vadd.f32 %v690_v35, %v1706_v28 }
 0x177   :  { %v825_v43 = vadd.f32 %v824_v7, %v762_v49  ;;  %v692_v58 = vadd.f32 %v691_v27, %v499_v45 }
 0x179   :  { %v693_v33 = vrot.slane %v692_v58, 4  ;;  %v826_v55 = vadd.f32 %v825_v43, %v763_v48 }
 0x17b   :  { %v694_v50 = vadd.f32 %v693_v33, %v692_v58  ;;  %v827_v17 = vrot.slane %v826_v55, 4 }
 0x17d   :  { %v695_v40 = vrot.slane %v694_v50, 2  ;;  %v828_v59 = vadd.f32 %v827_v17, %v826_v55 }
 0x17f   :  { %v696_v52 = vadd.f32 %v695_v40, %v694_v50  ;;  %v829_v5 = vrot.slane %v828_v59, 2 }
 0x181   :  { %v697_v61 = vrot.slane %v696_v52, 1  ;;  %v830_v62 = vadd.f32 %v829_v5, %v828_v59 }
 0x183   :  { %v698_v60 = vadd.f32 %v697_v61, %v696_v52  ;;  %v831_v63 = vrot.slane %v830_v62, 1 }
 0x185   :  { %699 = vst [vmem:[%s1790_s3] sm:$0x1] %v698_v60  ;;  %v832_v28 = vadd.f32 %v831_v63, %v830_v62 }
 0x187   :  { %833 = vst [vmem:[%s1790_s3 + $0x1] sm:$0x1] %v832_v28 }

// kernel: font_unet_forward.26
= control target key start
LH: loop header
LB: loop body
LE: loop exit
PB: predicated region body
PF: predicated region fallthrough
CT: control target
= control target key end

     0   :  { %s876_s1 = inlined_call_operand.vmem [shape: bf16[1,256,128], index: 1, kind: input, shape index: {}]   ;;  %s877_s0 = inlined_call_operand.vmem [shape: bf16[1,128,256], index: 0, kind: input, shape index: {}]   ;;  %s878_s2 = inlined_call_operand.vmem [shape: bf16[1,128,128], index: 2, kind: output, shape index: {0}]   ;;  %s879_s3 = inlined_call_operand.vmem [shape: f32[1,1,8,128], index: 3, kind: output, shape index: {1}]  }
   0x1   :  { %v586_v0 = vld [vmem:[%s876_s1 + $0x38] sm:$0xff]  ;;  %v585_v2 = vld [vmem:[%s876_s1 + $0x30] sm:$0xff]  ;;  %v584_v4 = vld [vmem:[%s876_s1 + $0x28] sm:$0xff] }
   0x2   :  { %v594_v1 = vld [vmem:[%s876_s1 + $0x78] sm:$0xff]  ;;  %237 = vmatpush.bf16.msra.mxu0 %v586_v0  ;;  %v593_v3 = vld [vmem:[%s876_s1 + $0x70] sm:$0xff]  ;;  %642 = vmatpush.bf16.msra.mxu2 %v586_v0  ;;  %v592_v5 = vld [vmem:[%s876_s1 + $0x68] sm:$0xff] }
   0x3   :  { %286 = vmatpush.bf16.msra.mxu1 %v594_v1  ;;  %650 = vmatpush.bf16.msra.mxu3 %v594_v1  ;;  %v583_v6 = vld [vmem:[%s876_s1 + $0x20] sm:$0xff]  ;;  %v582_v8 = vld [vmem:[%s876_s1 + $0x18] sm:$0xff]  ;;  %v581_v10 = vld [vmem:[%s876_s1 + $0x10] sm:$0xff] }
   0x4   :  { %v591_v7 = vld [vmem:[%s876_s1 + $0x60] sm:$0xff]  ;;  %v590_v9 = vld [vmem:[%s876_s1 + $0x58] sm:$0xff]  ;;  %v589_v11 = vld [vmem:[%s876_s1 + $0x50] sm:$0xff] }
   0x5   :  { %v580_v12 = vld [vmem:[%s876_s1 + $0x8] sm:$0xff]  ;;  %v579_v14 = vld [vmem:[%s876_s1] sm:$0xff]  ;;  %v445_v28 = vld [vmem:[%s877_s0 + $0x10] sm:$0xf] }
   0x6   :  { %238 = vmatpush.bf16.msra.mxu0 %v585_v2  ;;  %643 = vmatpush.bf16.msra.mxu2 %v585_v2  ;;  %v588_v13 = vld [vmem:[%s876_s1 + $0x48] sm:$0xff]  ;;  %v587_v15 = vld [vmem:[%s876_s1 + $0x40] sm:$0xff]  ;;  %v566_v29 = vld [vmem:[%s877_s0 + $0x14] sm:$0xf0] }
   0x7   :  { %287 = vmatpush.bf16.msra.mxu1 %v593_v3  ;;  %651 = vmatpush.bf16.msra.mxu3 %v593_v3  ;;  %v437_v16 = vld [vmem:[%s877_s0] sm:$0xf]  ;;  %v564_v17 = vld [vmem:[%s877_s0 + $0x4] sm:$0xf0]  ;;  %v563_v18 = vld [vmem:[%s877_s0 + $0x4] sm:$0xf]  ;;  %v446_v36 = vor.u32 %v566_v29, %v445_v28 }
   0x8   :  { %v439_v19 = vld [vmem:[%s877_s0 + $0x8] sm:$0xf0]  ;;  %v469_v20 = vld [vmem:[%s877_s0 + $0x40] sm:$0xf]  ;;  %v572_v21 = vld [vmem:[%s877_s0 + $0x44] sm:$0xf0]  ;;  %v438_v24 = vor.u32 %v564_v17, %v437_v16 }
   0x9   :  { %v571_v22 = vld [vmem:[%s877_s0 + $0x44] sm:$0xf]  ;;  %v471_v23 = vld [vmem:[%s877_s0 + $0x48] sm:$0xf0]  ;;  %v442_v25 = vor.u32 %v563_v18, %v439_v19  ;;  %v470_v26 = vor.u32 %v572_v21, %v469_v20  ;;  %v565_v30 = vld [vmem:[%s877_s0 + $0x14] sm:$0xf] }
   0xa   :  { %239 = vmatpush.bf16.msra.mxu0 %v584_v4  ;;  %644 = vmatpush.bf16.msra.mxu2 %v584_v4  ;;  %v474_v27 = vor.u32 %v571_v22, %v471_v23  ;;  %v447_v31 = vld [vmem:[%s877_s0 + $0x18] sm:$0xf0]  ;;  %v477_v32 = vld [vmem:[%s877_s0 + $0x50] sm:$0xf]  ;;  %v574_v33 = vld [vmem:[%s877_s0 + $0x54] sm:$0xf0] }
   0xb   :  { %288 = vmatpush.bf16.msra.mxu1 %v592_v5  ;;  %652 = vmatpush.bf16.msra.mxu3 %v592_v5  ;;  %v573_v34 = vld [vmem:[%s877_s0 + $0x54] sm:$0xf]  ;;  %v479_v35 = vld [vmem:[%s877_s0 + $0x58] sm:$0xf0]  ;;  %v450_v37 = vor.u32 %v565_v30, %v447_v31  ;;  %v478_v38 = vor.u32 %v574_v33, %v477_v32  ;;  %v453_v40 = vld [vmem:[%s877_s0 + $0x20] sm:$0xf] }
   0xc   :  { %v482_v39 = vor.u32 %v573_v34, %v479_v35  ;;  %v568_v41 = vld [vmem:[%s877_s0 + $0x24] sm:$0xf0]  ;;  %v567_v42 = vld [vmem:[%s877_s0 + $0x24] sm:$0xf]  ;;  %v455_v43 = vld [vmem:[%s877_s0 + $0x28] sm:$0xf0] }
   0xd   :  { %v485_v44 = vld [vmem:[%s877_s0 + $0x60] sm:$0xf]  ;;  %v576_v45 = vld [vmem:[%s877_s0 + $0x64] sm:$0xf0]  ;;  %v575_v46 = vld [vmem:[%s877_s0 + $0x64] sm:$0xf]  ;;  %v454_v48 = vor.u32 %v568_v41, %v453_v40  ;;  %v458_v49 = vor.u32 %v567_v42, %v455_v43 }
   0xe   :  { %240 = vmatpush.bf16.msra.mxu0 %v583_v6  ;;  %645 = vmatpush.bf16.msra.mxu2 %v583_v6  ;;  %v487_v47 = vld [vmem:[%s877_s0 + $0x68] sm:$0xf0]  ;;  %v486_v50 = vor.u32 %v576_v45, %v485_v44  ;;  %v461_v52 = vld [vmem:[%s877_s0 + $0x30] sm:$0xf]  ;;  %v570_v53 = vld [vmem:[%s877_s0 + $0x34] sm:$0xf0] }
   0xf   :  { %289 = vmatpush.bf16.msra.mxu1 %v591_v7  ;;  %653 = vmatpush.bf16.msra.mxu3 %v591_v7  ;;  %v490_v51 = vor.u32 %v575_v46, %v487_v47  ;;  %v569_v54 = vld [vmem:[%s877_s0 + $0x34] sm:$0xf]  ;;  %v463_v55 = vld [vmem:[%s877_s0 + $0x38] sm:$0xf0]  ;;  %v493_v56 = vld [vmem:[%s877_s0 + $0x70] sm:$0xf]  ;;  %v462_v60 = vor.u32 %v570_v53, %v461_v52 }
  0x10   :  { %v578_v57 = vld [vmem:[%s877_s0 + $0x74] sm:$0xf0]  ;;  %v577_v58 = vld [vmem:[%s877_s0 + $0x74] sm:$0xf]  ;;  %v495_v59 = vld [vmem:[%s877_s0 + $0x78] sm:$0xf0]  ;;  %v466_v61 = vor.u32 %v569_v54, %v463_v55 }
  0x11   :  { %v494_v62 = vor.u32 %v578_v57, %v493_v56  ;;  %v498_v63 = vor.u32 %v577_v58, %v495_v59 }
  0x12   :  { %241 = vmatpush.bf16.msra.mxu0 %v582_v8  ;;  %646 = vmatpush.bf16.msra.mxu2 %v582_v8 }
  0x13   :  { %290 = vmatpush.bf16.msra.mxu1 %v590_v9  ;;  %654 = vmatpush.bf16.msra.mxu3 %v590_v9 }
  0x16   :  { %242 = vmatpush.bf16.msra.mxu0 %v581_v10  ;;  %647 = vmatpush.bf16.msra.mxu2 %v581_v10 }
  0x17   :  { %291 = vmatpush.bf16.msra.mxu1 %v589_v11  ;;  %655 = vmatpush.bf16.msra.mxu3 %v589_v11 }
  0x1a   :  { %243 = vmatpush.bf16.msra.mxu0 %v580_v12  ;;  %648 = vmatpush.bf16.msra.mxu2 %v580_v12 }
  0x1b   :  { %292 = vmatpush.bf16.msra.mxu1 %v588_v13  ;;  %656 = vmatpush.bf16.msra.mxu3 %v588_v13 }
  0x1e   :  { %244 = vmatpush.bf16.msra.mxu0 %v579_v14  ;;  %649 = vmatpush.bf16.msra.mxu2 %v579_v14 }
  0x1f   :  { %293 = vmatpush.bf16.msra.mxu1 %v587_v15  ;;  %657 = vmatpush.bf16.msra.mxu3 %v587_v15 }
  0x21   :  { %245 = vmatmul.bf16.vlgmr.msra.gmra.mxu0 %v438_v24  ;;  %265 = vmatmul.bf16.vlgmr.msra.gmra.mxu2 %v470_v26 }
  0x22   :  { %294 = vmatmul.bf16.vlgmr.msra.gmra.mxu1 %v442_v25  ;;  %314 = vmatmul.bf16.vlgmr.msra.gmra.mxu3 %v474_v27 }
  0x31   :  { %250 = vmatmul.bf16.gmra.mxu0 %v446_v36  ;;  %270 = vmatmul.bf16.gmra.mxu2 %v478_v38 }
  0x32   :  { %299 = vmatmul.bf16.gmra.mxu1 %v450_v37  ;;  %319 = vmatmul.bf16.gmra.mxu3 %v482_v39 }
  0x41   :  { %255 = vmatmul.bf16.gmra.mxu0 %v454_v48  ;;  %275 = vmatmul.bf16.gmra.mxu2 %v486_v50 }
  0x42   :  { %304 = vmatmul.bf16.gmra.mxu1 %v458_v49  ;;  %324 = vmatmul.bf16.gmra.mxu3 %v490_v51 }
  0x51   :  { %260 = vmatmul.bf16.gmra.mxu0 %v462_v60  ;;  %280 = vmatmul.bf16.gmra.mxu2 %v494_v62 }
  0x52   :  { %309 = vmatmul.bf16.gmra.mxu1 %v466_v61  ;;  %329 = vmatmul.bf16.gmra.mxu3 %v498_v63 }
  0x9e   :  { %v246_v0 = vpop.f32.mrf.mxu0 }
  0x9f   :  { %v295_v1 = vpop.f32.mrf.mxu1 }
  0xa0   :  { %v296_v6 = vadd.f32 %v295_v1, %v246_v0 }
  0xa2   :  { %v389_v39 = vmul.f32 %v296_v6, %v296_v6 }
  0xa4   :  { %v266_v2 = vpop.f32.mrf.mxu2 }
  0xa5   :  { %v315_v3 = vpop.f32.mrf.mxu3 }
  0xa6   :  { %v248_v4 = vpop.f32.mrf.mxu0  ;;  %v825_v9 = vadd.f32 %v315_v3, %v266_v2 }
  0xa7   :  { %v297_v5 = vpop.f32.mrf.mxu1 }
  0xa8   :  { %v298_v7 = vadd.f32 %v297_v5, %v248_v4 }
  0xaa   :  { %v598_v8 = vpack.c.bf16 %v298_v7, %v296_v6  ;;  %v390_v37 = vmul.f32 %v298_v7, %v298_v7  ;;  %v367_v40 = vadd.f32 %v298_v7, %v296_v6 }
  0xac   :  { %599 = vst [vmem:[%s878_s2] sm:$0xff] %v598_v8   ;;  %v268_v10 = vpop.f32.mrf.mxu2  ;;  %v405_v47 = vadd.f32 %v390_v37, %v389_v39  ;;  %v397_v8 = vmul.f32 %v825_v9, %v825_v9 }
  0xad   :  { %v317_v11 = vpop.f32.mrf.mxu3 }
  0xae   :  { %v251_v12 = vpop.f32.mrf.mxu0  ;;  %v827_v14 = vadd.f32 %v317_v11, %v268_v10 }
  0xaf   :  { %v300_v13 = vpop.f32.mrf.mxu1 }
  0xb0   :  { %v618_v15 = vpack.c.bf16 %v827_v14, %v825_v9  ;;  %v301_v20 = vadd.f32 %v300_v13, %v251_v12  ;;  %v398_v13 = vmul.f32 %v827_v14, %v827_v14 }
  0xb2   :  { %638 = vst [vmem:[%s878_s2 + $0x20] sm:$0xff] %v618_v15   ;;  %v391_v41 = vmul.f32 %v301_v20, %v301_v20  ;;  %v368_v48 = vadd.f32 %v367_v40, %v301_v20 }
  0xb4   :  { %v271_v16 = vpop.f32.mrf.mxu2  ;;  %v406_v51 = vadd.f32 %v405_v47, %v391_v41 }
  0xb5   :  { %v320_v17 = vpop.f32.mrf.mxu3 }
  0xb6   :  { %v253_v18 = vpop.f32.mrf.mxu0  ;;  %v837_v23 = vadd.f32 %v320_v17, %v271_v16 }
  0xb7   :  { %v302_v19 = vpop.f32.mrf.mxu1 }
  0xb8   :  { %v303_v21 = vadd.f32 %v302_v19, %v253_v18 }
  0xba   :  { %v603_v22 = vpack.c.bf16 %v303_v21, %v301_v20  ;;  %v392_v49 = vmul.f32 %v303_v21, %v303_v21  ;;  %v369_v52 = vadd.f32 %v368_v48, %v303_v21  ;;  %v399_v20 = vmul.f32 %v837_v23, %v837_v23 }
  0xbc   :  { %635 = vst [vmem:[%s878_s2 + $0x8] sm:$0xff] %v603_v22   ;;  %v273_v24 = vpop.f32.mrf.mxu2  ;;  %v407_v55 = vadd.f32 %v406_v51, %v392_v49 }
  0xbd   :  { %v322_v25 = vpop.f32.mrf.mxu3 }
  0xbe   :  { %v256_v26 = vpop.f32.mrf.mxu0  ;;  %v839_v28 = vadd.f32 %v322_v25, %v273_v24 }
  0xbf   :  { %v305_v27 = vpop.f32.mrf.mxu1 }
  0xc0   :  { %v623_v29 = vpack.c.bf16 %v839_v28, %v837_v23  ;;  %v306_v34 = vadd.f32 %v305_v27, %v256_v26 }
  0xc2   :  { %639 = vst [vmem:[%s878_s2 + $0x28] sm:$0xff] %v623_v29   ;;  %v393_v53 = vmul.f32 %v306_v34, %v306_v34  ;;  %v370_v56 = vadd.f32 %v369_v52, %v306_v34 }
  0xc4   :  { %v276_v30 = vpop.f32.mrf.mxu2  ;;  %v408_v58 = vadd.f32 %v407_v55, %v393_v53 }
  0xc5   :  { %v325_v31 = vpop.f32.mrf.mxu3 }
  0xc6   :  { %v258_v32 = vpop.f32.mrf.mxu0  ;;  %v326_v38 = vadd.f32 %v325_v31, %v276_v30 }
  0xc7   :  { %v307_v33 = vpop.f32.mrf.mxu1 }
  0xc8   :  { %v308_v35 = vadd.f32 %v307_v33, %v258_v32 }
  0xca   :  { %v608_v36 = vpack.c.bf16 %v308_v35, %v306_v34  ;;  %v394_v57 = vmul.f32 %v308_v35, %v308_v35  ;;  %v371_v59 = vadd.f32 %v370_v56, %v308_v35 }
  0xcc   :  { %636 = vst [vmem:[%s878_s2 + $0x10] sm:$0xff] %v608_v36   ;;  %v278_v42 = vpop.f32.mrf.mxu2  ;;  %v409_v1 = vadd.f32 %v408_v58, %v394_v57 }
  0xcd   :  { %v327_v43 = vpop.f32.mrf.mxu3 }
  0xce   :  { %v261_v44 = vpop.f32.mrf.mxu0  ;;  %v328_v46 = vadd.f32 %v327_v43, %v278_v42 }
  0xcf   :  { %v310_v45 = vpop.f32.mrf.mxu1 }
  0xd0   :  { %v628_v50 = vpack.c.bf16 %v328_v46, %v326_v38  ;;  %v311_v54 = vadd.f32 %v310_v45, %v261_v44  ;;  %v402_v30 = vmul.f32 %v328_v46, %v328_v46 }
  0xd2   :  { %640 = vst [vmem:[%s878_s2 + $0x30] sm:$0xff] %v628_v50   ;;  %v395_v60 = vmul.f32 %v311_v54, %v311_v54  ;;  %v372_v2 = vadd.f32 %v371_v59, %v311_v54 }
  0xd4   :  { %v281_v61 = vpop.f32.mrf.mxu2  ;;  %v410_v4 = vadd.f32 %v409_v1, %v395_v60 }
  0xd5   :  { %v330_v62 = vpop.f32.mrf.mxu3 }
  0xd6   :  { %v263_v63 = vpop.f32.mrf.mxu0  ;;  %v331_v12 = vadd.f32 %v330_v62, %v281_v61 }
  0xd7   :  { %v312_v0 = vpop.f32.mrf.mxu1 }
  0xd8   :  { %v313_v3 = vadd.f32 %v312_v0, %v263_v63 }
  0xda   :  { %v613_v5 = vpack.c.bf16 %v313_v3, %v311_v54  ;;  %v373_v6 = vadd.f32 %v372_v2, %v313_v3  ;;  %v396_v7 = vmul.f32 %v313_v3, %v313_v3 }
  0xdc   :  { %637 = vst [vmem:[%s878_s2 + $0x18] sm:$0xff] %v613_v5   ;;  %v374_v10 = vadd.f32 %v373_v6, %v825_v9  ;;  %v411_v11 = vadd.f32 %v410_v4, %v396_v7  ;;  %v283_v17 = vpop.f32.mrf.mxu2  ;;  %v400_v9 = vmul.f32 %v839_v28, %v839_v28 }
  0xdd   :  { %v332_v18 = vpop.f32.mrf.mxu3 }
  0xde   :  { %v375_v15 = vadd.f32 %v374_v10, %v827_v14  ;;  %v412_v16 = vadd.f32 %v411_v11, %v397_v8  ;;  %v333_v19 = vadd.f32 %v332_v18, %v283_v17  ;;  %v401_v14 = vmul.f32 %v326_v38, %v326_v38 }
  0xe0   :  { %v376_v21 = vadd.f32 %v375_v15, %v837_v23  ;;  %v413_v22 = vadd.f32 %v412_v16, %v398_v13  ;;  %v633_v24 = vpack.c.bf16 %v333_v19, %v331_v12  ;;  %v403_v23 = vmul.f32 %v331_v12, %v331_v12 }
  0xe1   :  { %v404_v37 = vmul.f32 %v333_v19, %v333_v19 }
  0xe2   :  { %v414_v25 = vadd.f32 %v413_v22, %v399_v20  ;;  %v377_v26 = vadd.f32 %v376_v21, %v839_v28  ;;  %641 = vst [vmem:[%s878_s2 + $0x38] sm:$0xff] %v633_v24  }
  0xe4   :  { %v378_v27 = vadd.f32 %v377_v26, %v326_v38  ;;  %v415_v29 = vadd.f32 %v414_v25, %v400_v9 }
  0xe6   :  { %v379_v31 = vadd.f32 %v378_v27, %v328_v46  ;;  %v416_v32 = vadd.f32 %v415_v29, %v401_v14 }
  0xe8   :  { %v380_v33 = vadd.f32 %v379_v31, %v331_v12  ;;  %v417_v34 = vadd.f32 %v416_v32, %v402_v30 }
  0xea   :  { %v418_v35 = vadd.f32 %v417_v34, %v403_v23  ;;  %v381_v36 = vadd.f32 %v380_v33, %v333_v19 }
  0xec   :  { %v382_v39 = vrot.slane %v381_v36, 4  ;;  %v419_v40 = vadd.f32 %v418_v35, %v404_v37 }
  0xee   :  { %v383_v41 = vadd.f32 %v382_v39, %v381_v36  ;;  %v420_v28 = vrot.slane %v419_v40, 4 }
  0xf0   :  { %v384_v42 = vrot.slane %v383_v41, 2  ;;  %v421_v43 = vadd.f32 %v420_v28, %v419_v40 }
  0xf2   :  { %v385_v44 = vadd.f32 %v384_v42, %v383_v41  ;;  %v422_v45 = vrot.slane %v421_v43, 2 }
  0xf4   :  { %v386_v47 = vrot.slane %v385_v44, 1  ;;  %v423_v38 = vadd.f32 %v422_v45, %v421_v43 }
  0xf6   :  { %v387_v48 = vadd.f32 %v386_v47, %v385_v44  ;;  %v424_v49 = vrot.slane %v423_v38, 1 }
  0xf8   :  { %388 = vst [vmem:[%s879_s3] sm:$0x1] %v387_v48  ;;  %v425_v46 = vadd.f32 %v424_v49, %v423_v38 }
  0xfa   :  { %426 = vst [vmem:[%s879_s3 + $0x1] sm:$0x1] %v425_v46 }

// kernel: font_unet_forward.27
= control target key start
LH: loop header
LB: loop body
LE: loop exit
PB: predicated region body
PF: predicated region fallthrough
CT: control target
= control target key end

     0   :  { %s320_s0 = inlined_call_operand.vmem [shape: bf16[128,128], index: 0, kind: input, shape index: {}]   ;;  %s321_s1 = inlined_call_operand.vmem [shape: f32[1,128], index: 1, kind: input, shape index: {}]   ;;  %s322_s2 = inlined_call_operand.vmem [shape: f32[1,128], index: 2, kind: input, shape index: {}]   ;;  %s323_s3 = inlined_call_operand.vmem [shape: bf16[128,128], index: 3, kind: output, shape index: {}]  }
   0x1   :  { %v123_v0 = vld [vmem:[%s320_s0] sm:$0xff]   ;;  %v194_v5 = vld [vmem:[%s320_s0 + $0x8] sm:$0xff]   ;;  %v195_v8 = vld [vmem:[%s320_s0 + $0x10] sm:$0xff]  }
   0x2   :  { %v236_v1 = vld [vmem:[%s321_s1] ss:$0 sm:$0xff]  ;;  %v124_v2 = vunpack.c.l.bf16 %v123_v0  ;;  %v125_v3 = vunpack.c.h.bf16 %v123_v0  ;;  %v128_v6 = vunpack.c.l.bf16 %v194_v5  ;;  %v129_v7 = vunpack.c.h.bf16 %v194_v5  ;;  %v196_v9 = vld [vmem:[%s320_s0 + $0x18] sm:$0xff]   ;;  %v198_v27 = vld [vmem:[%s320_s0 + $0x28] sm:$0xff]  }
   0x3   :  { %v241_v4 = vld [vmem:[%s322_s2] ss:$0 sm:$0xff]  ;;  %v132_v12 = vunpack.c.l.bf16 %v195_v8  ;;  %v133_v13 = vunpack.c.h.bf16 %v195_v8  ;;  %v136_v16 = vunpack.c.l.bf16 %v196_v9  ;;  %v137_v17 = vunpack.c.h.bf16 %v196_v9  ;;  %v199_v32 = vld [vmem:[%s320_s0 + $0x30] sm:$0xff]   ;;  %v200_v37 = vld [vmem:[%s320_s0 + $0x38] sm:$0xff]  }
   0x4   :  { %v50_v10 = vmul.f32 %v236_v1, %v124_v2  ;;  %v51_v11 = vmul.f32 %v236_v1, %v125_v3  ;;  %v52_v14 = vmul.f32 %v236_v1, %v128_v6  ;;  %v53_v15 = vmul.f32 %v236_v1, %v129_v7  ;;  %v197_v18 = vld [vmem:[%s320_s0 + $0x20] sm:$0xff]  }
   0x5   :  { %v54_v21 = vmul.f32 %v236_v1, %v132_v12  ;;  %v55_v22 = vmul.f32 %v236_v1, %v133_v13  ;;  %v56_v25 = vmul.f32 %v236_v1, %v136_v16  ;;  %v57_v26 = vmul.f32 %v236_v1, %v137_v17 }
   0x6   :  { %v70_v19 = vadd.f32 %v241_v4, %v50_v10  ;;  %v71_v20 = vadd.f32 %v241_v4, %v51_v11  ;;  %v72_v23 = vadd.f32 %v241_v4, %v52_v14  ;;  %v73_v24 = vadd.f32 %v241_v4, %v53_v15 }
   0x7   :  { %v74_v29 = vadd.f32 %v241_v4, %v54_v21  ;;  %v75_v30 = vadd.f32 %v241_v4, %v55_v22  ;;  %v140_v31 = vunpack.c.l.bf16 %v197_v18  ;;  %v76_v34 = vadd.f32 %v241_v4, %v56_v25 }
   0x8   :  { %v157_v28 = vpack.c.bf16 %v71_v20, %v70_v19  ;;  %v162_v33 = vpack.c.bf16 %v73_v24, %v72_v23  ;;  %v77_v35 = vadd.f32 %v241_v4, %v57_v26  ;;  %v141_v36 = vunpack.c.h.bf16 %v197_v18 }
   0x9   :  { %v167_v38 = vpack.c.bf16 %v75_v30, %v74_v29  ;;  %v58_v39 = vmul.f32 %v236_v1, %v140_v31  ;;  %v144_v40 = vunpack.c.l.bf16 %v198_v27  ;;  %v145_v41 = vunpack.c.h.bf16 %v198_v27 }
   0xa   :  { %158 = vst [vmem:[%s323_s3] sm:$0xff] %v157_v28   ;;  %v172_v42 = vpack.c.bf16 %v77_v35, %v76_v34  ;;  %v59_v43 = vmul.f32 %v236_v1, %v141_v36  ;;  %v148_v44 = vunpack.c.l.bf16 %v199_v32  ;;  %v149_v45 = vunpack.c.h.bf16 %v199_v32 }
   0xb   :  { %201 = vst [vmem:[%s323_s3 + $0x8] sm:$0xff] %v162_v33   ;;  %v78_v46 = vadd.f32 %v241_v4, %v58_v39  ;;  %v60_v47 = vmul.f32 %v236_v1, %v144_v40  ;;  %v61_v48 = vmul.f32 %v236_v1, %v145_v41  ;;  %v152_v49 = vunpack.c.l.bf16 %v200_v37 }
   0xc   :  { %202 = vst [vmem:[%s323_s3 + $0x10] sm:$0xff] %v167_v38   ;;  %v79_v50 = vadd.f32 %v241_v4, %v59_v43  ;;  %v62_v51 = vmul.f32 %v236_v1, %v148_v44  ;;  %v63_v52 = vmul.f32 %v236_v1, %v149_v45  ;;  %v153_v53 = vunpack.c.h.bf16 %v200_v37 }
   0xd   :  { %203 = vst [vmem:[%s323_s3 + $0x18] sm:$0xff] %v172_v42   ;;  %v80_v54 = vadd.f32 %v241_v4, %v60_v47  ;;  %v81_v55 = vadd.f32 %v241_v4, %v61_v48  ;;  %v64_v56 = vmul.f32 %v236_v1, %v152_v49 }
   0xe   :  { %v177_v57 = vpack.c.bf16 %v79_v50, %v78_v46  ;;  %v82_v58 = vadd.f32 %v241_v4, %v62_v51  ;;  %v83_v59 = vadd.f32 %v241_v4, %v63_v52  ;;  %v65_v60 = vmul.f32 %v236_v1, %v153_v53 }
   0xf   :  { %v182_v61 = vpack.c.bf16 %v81_v55, %v80_v54  ;;  %v84_v62 = vadd.f32 %v241_v4, %v64_v56 }
  0x10   :  { %204 = vst [vmem:[%s323_s3 + $0x20] sm:$0xff] %v177_v57   ;;  %v187_v63 = vpack.c.bf16 %v83_v59, %v82_v58  ;;  %v85_v0 = vadd.f32 %v241_v4, %v65_v60 }
  0x11   :  { %205 = vst [vmem:[%s323_s3 + $0x28] sm:$0xff] %v182_v61  }
  0x12   :  { %206 = vst [vmem:[%s323_s3 + $0x30] sm:$0xff] %v187_v63   ;;  %v192_v2 = vpack.c.bf16 %v85_v0, %v84_v62 }
  0x14   :  { %207 = vst [vmem:[%s323_s3 + $0x38] sm:$0xff] %v192_v2  }

// kernel: font_unet_forward.28
= control target key start
LH: loop header
LB: loop body
LE: loop exit
PB: predicated region body
PF: predicated region fallthrough
CT: control target
= control target key end

     0   :  { %s820_s1 = inlined_call_operand.vmem [shape: bf16[1,512,128], index: 1, kind: input, shape index: {}]   ;;  %s821_s0 = inlined_call_operand.vmem [shape: bf16[1,32,512], index: 0, kind: input, shape index: {}]   ;;  %s822_s2 = inlined_call_operand.vmem [shape: bf16[1,32,128], index: 2, kind: output, shape index: {0}]   ;;  %s823_s3 = inlined_call_operand.vmem [shape: f32[1,1,8,128], index: 3, kind: output, shape index: {1}]  }
   0x1   :  { %v608_v0 = vld [vmem:[%s820_s1 + $0x38] sm:$0xff]  ;;  %v607_v4 = vld [vmem:[%s820_s1 + $0x30] sm:$0xff]  ;;  %v606_v8 = vld [vmem:[%s820_s1 + $0x28] sm:$0xff] }
   0x2   :  { %v616_v1 = vld [vmem:[%s820_s1 + $0x78] sm:$0xff]  ;;  %317 = vmatpush.bf16.msra.mxu0 %v608_v0  ;;  %v615_v5 = vld [vmem:[%s820_s1 + $0x70] sm:$0xff]  ;;  %v614_v9 = vld [vmem:[%s820_s1 + $0x68] sm:$0xff] }
   0x3   :  { %v624_v2 = vld [vmem:[%s820_s1 + $0xb8] sm:$0xff]  ;;  %336 = vmatpush.bf16.msra.mxu1 %v616_v1  ;;  %v623_v6 = vld [vmem:[%s820_s1 + $0xb0] sm:$0xff]  ;;  %v622_v10 = vld [vmem:[%s820_s1 + $0xa8] sm:$0xff] }
   0x4   :  { %v632_v3 = vld [vmem:[%s820_s1 + $0xf8] sm:$0xff]  ;;  %355 = vmatpush.bf16.msra.mxu2 %v624_v2  ;;  %v631_v7 = vld [vmem:[%s820_s1 + $0xf0] sm:$0xff]  ;;  %v630_v11 = vld [vmem:[%s820_s1 + $0xe8] sm:$0xff] }
   0x5   :  { %374 = vmatpush.bf16.msra.mxu3 %v632_v3  ;;  %v605_v12 = vld [vmem:[%s820_s1 + $0x20] sm:$0xff]  ;;  %v604_v16 = vld [vmem:[%s820_s1 + $0x18] sm:$0xff]  ;;  %v603_v20 = vld [vmem:[%s820_s1 + $0x10] sm:$0xff] }
   0x6   :  { %318 = vmatpush.bf16.msra.mxu0 %v607_v4  ;;  %v613_v13 = vld [vmem:[%s820_s1 + $0x60] sm:$0xff]  ;;  %v612_v17 = vld [vmem:[%s820_s1 + $0x58] sm:$0xff]  ;;  %v611_v21 = vld [vmem:[%s820_s1 + $0x50] sm:$0xff] }
   0x7   :  { %337 = vmatpush.bf16.msra.mxu1 %v615_v5  ;;  %v621_v14 = vld [vmem:[%s820_s1 + $0xa0] sm:$0xff]  ;;  %v620_v18 = vld [vmem:[%s820_s1 + $0x98] sm:$0xff]  ;;  %v619_v22 = vld [vmem:[%s820_s1 + $0x90] sm:$0xff] }
   0x8   :  { %356 = vmatpush.bf16.msra.mxu2 %v623_v6  ;;  %v629_v15 = vld [vmem:[%s820_s1 + $0xe0] sm:$0xff]  ;;  %v628_v19 = vld [vmem:[%s820_s1 + $0xd8] sm:$0xff]  ;;  %v627_v23 = vld [vmem:[%s820_s1 + $0xd0] sm:$0xff] }
   0x9   :  { %375 = vmatpush.bf16.msra.mxu3 %v631_v7  ;;  %v602_v24 = vld [vmem:[%s820_s1 + $0x8] sm:$0xff]  ;;  %v601_v28 = vld [vmem:[%s820_s1] sm:$0xff]  ;;  %v595_v33 = vld [vmem:[%s821_s0 + $0xc] sm:$0xf0] }
   0xa   :  { %319 = vmatpush.bf16.msra.mxu0 %v606_v8  ;;  %v610_v25 = vld [vmem:[%s820_s1 + $0x48] sm:$0xff]  ;;  %v609_v29 = vld [vmem:[%s820_s1 + $0x40] sm:$0xff]  ;;  %v437_v35 = vld [vmem:[%s821_s0 + $0x10] sm:$0xf0] }
   0xb   :  { %338 = vmatpush.bf16.msra.mxu1 %v614_v9  ;;  %v618_v26 = vld [vmem:[%s820_s1 + $0x88] sm:$0xff]  ;;  %v617_v30 = vld [vmem:[%s820_s1 + $0x80] sm:$0xff]  ;;  %v596_v37 = vld [vmem:[%s821_s0 + $0x14] sm:$0xf0] }
   0xc   :  { %357 = vmatpush.bf16.msra.mxu2 %v622_v10  ;;  %v626_v27 = vld [vmem:[%s820_s1 + $0xc8] sm:$0xff]  ;;  %v625_v31 = vld [vmem:[%s820_s1 + $0xc0] sm:$0xff]  ;;  %v445_v39 = vld [vmem:[%s821_s0 + $0x18] sm:$0xf0] }
   0xd   :  { %376 = vmatpush.bf16.msra.mxu3 %v630_v11  ;;  %v435_v32 = vld [vmem:[%s821_s0] sm:$0xf]  ;;  %v593_v34 = vld [vmem:[%s821_s0 + $0x4] sm:$0xf]  ;;  %v443_v36 = vld [vmem:[%s821_s0 + $0x8] sm:$0xf] }
   0xe   :  { %320 = vmatpush.bf16.msra.mxu0 %v605_v12  ;;  %v594_v38 = vld [vmem:[%s821_s0 + $0xc] sm:$0xf]  ;;  %v436_v40 = vor.u32 %v595_v33, %v435_v32  ;;  %v440_v41 = vor.u32 %v593_v34, %v437_v35  ;;  %v444_v42 = vor.u32 %v596_v37, %v443_v36  ;;  %v451_v44 = vld [vmem:[%s821_s0 + $0x20] sm:$0xf]  ;;  %v599_v45 = vld [vmem:[%s821_s0 + $0x2c] sm:$0xf0] }
   0xf   :  { %339 = vmatpush.bf16.msra.mxu1 %v613_v13  ;;  %v448_v43 = vor.u32 %v594_v38, %v445_v39  ;;  %v597_v46 = vld [vmem:[%s821_s0 + $0x24] sm:$0xf]  ;;  %v453_v47 = vld [vmem:[%s821_s0 + $0x30] sm:$0xf0]  ;;  %v459_v48 = vld [vmem:[%s821_s0 + $0x28] sm:$0xf]  ;;  %v452_v52 = vor.u32 %v599_v45, %v451_v44 }
  0x10   :  { %358 = vmatpush.bf16.msra.mxu2 %v621_v14  ;;  %v600_v49 = vld [vmem:[%s821_s0 + $0x34] sm:$0xf0]  ;;  %v598_v50 = vld [vmem:[%s821_s0 + $0x2c] sm:$0xf]  ;;  %v461_v51 = vld [vmem:[%s821_s0 + $0x38] sm:$0xf0]  ;;  %v456_v53 = vor.u32 %v597_v46, %v453_v47 }
  0x11   :  { %377 = vmatpush.bf16.msra.mxu3 %v629_v15  ;;  %v460_v54 = vor.u32 %v600_v49, %v459_v48  ;;  %v464_v55 = vor.u32 %v598_v50, %v461_v51 }
  0x12   :  { %321 = vmatpush.bf16.msra.mxu0 %v604_v16 }
  0x13   :  { %340 = vmatpush.bf16.msra.mxu1 %v612_v17 }
  0x14   :  { %359 = vmatpush.bf16.msra.mxu2 %v620_v18 }
  0x15   :  { %378 = vmatpush.bf16.msra.mxu3 %v628_v19 }
  0x16   :  { %322 = vmatpush.bf16.msra.mxu0 %v603_v20 }
  0x17   :  { %341 = vmatpush.bf16.msra.mxu1 %v611_v21 }
  0x18   :  { %360 = vmatpush.bf16.msra.mxu2 %v619_v22 }
  0x19   :  { %379 = vmatpush.bf16.msra.mxu3 %v627_v23 }
  0x1a   :  { %323 = vmatpush.bf16.msra.mxu0 %v602_v24 }
  0x1b   :  { %342 = vmatpush.bf16.msra.mxu1 %v610_v25 }
  0x1c   :  { %361 = vmatpush.bf16.msra.mxu2 %v618_v26 }
  0x1d   :  { %380 = vmatpush.bf16.msra.mxu3 %v626_v27 }
  0x1e   :  { %324 = vmatpush.bf16.msra.mxu0 %v601_v28 }
  0x1f   :  { %343 = vmatpush.bf16.msra.mxu1 %v609_v29 }
  0x20   :  { %362 = vmatpush.bf16.msra.mxu2 %v617_v30 }
  0x21   :  { %381 = vmatpush.bf16.msra.mxu3 %v625_v31  ;;  %325 = vmatmul.bf16.vlgmr.msra.gmra.mxu0 %v436_v40 }
  0x22   :  { %344 = vmatmul.bf16.vlgmr.msra.gmra.mxu1 %v440_v41 }
  0x23   :  { %363 = vmatmul.bf16.vlgmr.msra.gmra.mxu2 %v444_v42 }
  0x24   :  { %382 = vmatmul.bf16.vlgmr.msra.gmra.mxu3 %v448_v43 }
  0x31   :  { %330 = vmatmul.bf16.gmra.mxu0 %v452_v52 }
  0x32   :  { %349 = vmatmul.bf16.gmra.mxu1 %v456_v53 }
  0x33   :  { %368 = vmatmul.bf16.gmra.mxu2 %v460_v54 }
  0x34   :  { %387 = vmatmul.bf16.gmra.mxu3 %v464_v55 }
  0x9e   :  { %v326_v56 = vpop.f32.mrf.mxu0 }
  0x9f   :  { %v345_v57 = vpop.f32.mrf.mxu1 }
  0xa0   :  { %v346_v62 = vadd.f32 %v345_v57, %v326_v56 }
  0xa6   :  { %v364_v58 = vpop.f32.mrf.mxu2  ;;  %v328_v60 = vpop.f32.mrf.mxu0 }
  0xa7   :  { %v383_v59 = vpop.f32.mrf.mxu3  ;;  %v347_v61 = vpop.f32.mrf.mxu1  ;;  %v365_v63 = vadd.f32 %v364_v58, %v346_v62 }
  0xa8   :  { %v348_v0 = vadd.f32 %v347_v61, %v328_v60 }
  0xa9   :  { %v384_v6 = vadd.f32 %v383_v59, %v365_v63 }
  0xab   :  { %v411_v19 = vmul.f32 %v384_v6, %v384_v6 }
  0xae   :  { %v366_v1 = vpop.f32.mrf.mxu2  ;;  %v331_v4 = vpop.f32.mrf.mxu0 }
  0xaf   :  { %v385_v2 = vpop.f32.mrf.mxu3  ;;  %v367_v3 = vadd.f32 %v366_v1, %v348_v0  ;;  %v350_v5 = vpop.f32.mrf.mxu1 }
  0xb0   :  { %v351_v9 = vadd.f32 %v350_v5, %v331_v4 }
  0xb1   :  { %v386_v7 = vadd.f32 %v385_v2, %v367_v3 }
  0xb3   :  { %v636_v8 = vpack.c.bf16 %v386_v7, %v384_v6  ;;  %v412_v16 = vmul.f32 %v386_v7, %v386_v7  ;;  %v401_v20 = vadd.f32 %v386_v7, %v384_v6 }
  0xb5   :  { %637 = vst [vmem:[%s822_s2] sm:$0xff] %v636_v8   ;;  %v415_v24 = vadd.f32 %v412_v16, %v411_v19 }
  0xb6   :  { %v369_v10 = vpop.f32.mrf.mxu2  ;;  %v333_v13 = vpop.f32.mrf.mxu0 }
  0xb7   :  { %v388_v11 = vpop.f32.mrf.mxu3  ;;  %v370_v12 = vadd.f32 %v369_v10, %v351_v9  ;;  %v352_v14 = vpop.f32.mrf.mxu1 }
  0xb8   :  { %v353_v17 = vadd.f32 %v352_v14, %v333_v13 }
  0xb9   :  { %v389_v15 = vadd.f32 %v388_v11, %v370_v12 }
  0xbb   :  { %v413_v21 = vmul.f32 %v389_v15, %v389_v15  ;;  %v402_v25 = vadd.f32 %v401_v20, %v389_v15 }
  0xbd   :  { %v416_v27 = vadd.f32 %v415_v24, %v413_v21 }
  0xbe   :  { %v371_v18 = vpop.f32.mrf.mxu2 }
  0xbf   :  { %v372_v22 = vadd.f32 %v371_v18, %v353_v17  ;;  %v390_v23 = vpop.f32.mrf.mxu3 }
  0xc1   :  { %v391_v26 = vadd.f32 %v390_v23, %v372_v22 }
  0xc3   :  { %v641_v28 = vpack.c.bf16 %v391_v26, %v389_v15  ;;  %v403_v29 = vadd.f32 %v402_v25, %v391_v26  ;;  %v414_v30 = vmul.f32 %v391_v26, %v391_v26 }
  0xc5   :  { %643 = vst [vmem:[%s822_s2 + $0x8] sm:$0xff] %v641_v28   ;;  %v404_v31 = vrot.slane %v403_v29, 4  ;;  %v417_v32 = vadd.f32 %v416_v27, %v414_v30 }
  0xc7   :  { %v405_v33 = vadd.f32 %v404_v31, %v403_v29  ;;  %v418_v34 = vrot.slane %v417_v32, 4 }
  0xc9   :  { %v406_v35 = vrot.slane %v405_v33, 2  ;;  %v419_v36 = vadd.f32 %v418_v34, %v417_v32 }
  0xcb   :  { %v407_v37 = vadd.f32 %v406_v35, %v405_v33  ;;  %v420_v38 = vrot.slane %v419_v36, 2 }
  0xcd   :  { %v408_v39 = vrot.slane %v407_v37, 1  ;;  %v421_v40 = vadd.f32 %v420_v38, %v419_v36 }
  0xcf   :  { %v409_v41 = vadd.f32 %v408_v39, %v407_v37  ;;  %v422_v42 = vrot.slane %v421_v40, 1 }
  0xd1   :  { %410 = vst [vmem:[%s823_s3] sm:$0x1] %v409_v41  ;;  %v423_v43 = vadd.f32 %v422_v42, %v421_v40 }
  0xd3   :  { %424 = vst [vmem:[%s823_s3 + $0x1] sm:$0x1] %v423_v43 }

// kernel: font_unet_forward.29
= control target key start
LH: loop header
LB: loop body
LE: loop exit
PB: predicated region body
PF: predicated region fallthrough
CT: control target
= control target key end

     0   :  { %s110_s0 = inlined_call_operand.vmem [shape: bf16[32,128], index: 0, kind: input, shape index: {}]   ;;  %s111_s1 = inlined_call_operand.vmem [shape: f32[1,128], index: 1, kind: input, shape index: {}]   ;;  %s112_s2 = inlined_call_operand.vmem [shape: f32[1,128], index: 2, kind: input, shape index: {}]   ;;  %s113_s3 = inlined_call_operand.vmem [shape: bf16[32,128], index: 3, kind: output, shape index: {}]  }
   0x1   :  { %v51_v0 = vld [vmem:[%s110_s0] sm:$0xff]   ;;  %v68_v5 = vld [vmem:[%s110_s0 + $0x8] sm:$0xff]  }
   0x2   :  { %v70_v1 = vld [vmem:[%s111_s1] ss:$0 sm:$0xff]  ;;  %v52_v2 = vunpack.c.l.bf16 %v51_v0  ;;  %v53_v3 = vunpack.c.h.bf16 %v51_v0  ;;  %v56_v6 = vunpack.c.l.bf16 %v68_v5  ;;  %v57_v7 = vunpack.c.h.bf16 %v68_v5 }
   0x3   :  { %v71_v4 = vld [vmem:[%s112_s2] ss:$0 sm:$0xff] }
   0x4   :  { %v26_v8 = vmul.f32 %v70_v1, %v52_v2  ;;  %v27_v9 = vmul.f32 %v70_v1, %v53_v3  ;;  %v28_v10 = vmul.f32 %v70_v1, %v56_v6  ;;  %v29_v11 = vmul.f32 %v70_v1, %v57_v7 }
   0x6   :  { %v34_v12 = vadd.f32 %v71_v4, %v26_v8  ;;  %v35_v13 = vadd.f32 %v71_v4, %v27_v9  ;;  %v36_v14 = vadd.f32 %v71_v4, %v28_v10  ;;  %v37_v15 = vadd.f32 %v71_v4, %v29_v11 }
   0x8   :  { %v61_v16 = vpack.c.bf16 %v35_v13, %v34_v12  ;;  %v66_v17 = vpack.c.bf16 %v37_v15, %v36_v14 }
   0xa   :  { %62 = vst [vmem:[%s113_s3] sm:$0xff] %v61_v16  }
   0xb   :  { %69 = vst [vmem:[%s113_s3 + $0x8] sm:$0xff] %v66_v17  }

// kernel: font_unet_forward.31
= control target key start
LH: loop header
LB: loop body
LE: loop exit
PB: predicated region body
PF: predicated region fallthrough
CT: control target
= control target key end

     0   :  { %s66_s0 = inlined_call_operand.vmem [shape: bf16[8,128], index: 0, kind: input, shape index: {}]   ;;  %s67_s1 = inlined_call_operand.vmem [shape: f32[1,128], index: 1, kind: input, shape index: {}]   ;;  %s68_s2 = inlined_call_operand.vmem [shape: f32[1,128], index: 2, kind: input, shape index: {}]   ;;  %s69_s3 = inlined_call_operand.vmem [shape: bf16[8,128], index: 3, kind: output, shape index: {}]  }
   0x1   :  { %v14_v0 = vld [vmem:[%s66_s0] sm:$0xf] }
   0x2   :  { %v32_v1 = vld [vmem:[%s67_s1] ss:$0 sm:$0xff]  ;;  %v15_v2 = vunpack.c.l.bf16 %v14_v0 }
   0x3   :  { %v33_v3 = vld [vmem:[%s68_s2] ss:$0 sm:$0xff] }
   0x4   :  { %v20_v4 = vmul.f32 %v32_v1, %v15_v2 }
   0x6   :  { %v25_v5 = vadd.f32 %v33_v3, %v20_v4 }
   0x8   :  { %v26_v6 = vpack.c.bf16 %v25_v5, %v25_v5 }
   0xa   :  { %27 = vst [vmem:[%s69_s3] sm:$0xf] %v26_v6 }

// kernel: font_unet_forward.30
= control target key start
LH: loop header
LB: loop body
LE: loop exit
PB: predicated region body
PF: predicated region fallthrough
CT: control target
= control target key end

     0   :  { %s1239_s1 = inlined_call_operand.vmem [shape: bf16[1,1024,128], index: 1, kind: input, shape index: {}]   ;;  %s1240_s0 = inlined_call_operand.vmem [shape: bf16[1,8,1024], index: 0, kind: input, shape index: {}]   ;;  %s1241_s2 = inlined_call_operand.vmem [shape: bf16[1,8,128], index: 2, kind: output, shape index: {0}]   ;;  %s1242_s3 = inlined_call_operand.vmem [shape: f32[1,1,8,128], index: 3, kind: output, shape index: {1}]  }
   0x1   :  { %v949_v0 = vld [vmem:[%s1239_s1 + $0x38] sm:$0xff]  ;;  %v948_v4 = vld [vmem:[%s1239_s1 + $0x30] sm:$0xff]  ;;  %v947_v8 = vld [vmem:[%s1239_s1 + $0x28] sm:$0xff] }
   0x2   :  { %v957_v1 = vld [vmem:[%s1239_s1 + $0x78] sm:$0xff]  ;;  %557 = vmatpush.bf16.msra.mxu0 %v949_v0  ;;  %v956_v5 = vld [vmem:[%s1239_s1 + $0x70] sm:$0xff]  ;;  %v955_v9 = vld [vmem:[%s1239_s1 + $0x68] sm:$0xff] }
   0x3   :  { %v965_v2 = vld [vmem:[%s1239_s1 + $0xb8] sm:$0xff]  ;;  %570 = vmatpush.bf16.msra.mxu1 %v957_v1  ;;  %v964_v6 = vld [vmem:[%s1239_s1 + $0xb0] sm:$0xff]  ;;  %v963_v10 = vld [vmem:[%s1239_s1 + $0xa8] sm:$0xff] }
   0x4   :  { %v973_v3 = vld [vmem:[%s1239_s1 + $0xf8] sm:$0xff]  ;;  %583 = vmatpush.bf16.msra.mxu2 %v965_v2  ;;  %v972_v7 = vld [vmem:[%s1239_s1 + $0xf0] sm:$0xff]  ;;  %v971_v11 = vld [vmem:[%s1239_s1 + $0xe8] sm:$0xff] }
   0x5   :  { %596 = vmatpush.bf16.msra.mxu3 %v973_v3  ;;  %v946_v12 = vld [vmem:[%s1239_s1 + $0x20] sm:$0xff]  ;;  %v945_v16 = vld [vmem:[%s1239_s1 + $0x18] sm:$0xff]  ;;  %v944_v20 = vld [vmem:[%s1239_s1 + $0x10] sm:$0xff] }
   0x6   :  { %558 = vmatpush.bf16.msra.mxu0 %v948_v4  ;;  %v954_v13 = vld [vmem:[%s1239_s1 + $0x60] sm:$0xff]  ;;  %v953_v17 = vld [vmem:[%s1239_s1 + $0x58] sm:$0xff]  ;;  %v952_v21 = vld [vmem:[%s1239_s1 + $0x50] sm:$0xff] }
   0x7   :  { %571 = vmatpush.bf16.msra.mxu1 %v956_v5  ;;  %v962_v14 = vld [vmem:[%s1239_s1 + $0xa0] sm:$0xff]  ;;  %v961_v18 = vld [vmem:[%s1239_s1 + $0x98] sm:$0xff]  ;;  %v960_v22 = vld [vmem:[%s1239_s1 + $0x90] sm:$0xff] }
   0x8   :  { %584 = vmatpush.bf16.msra.mxu2 %v964_v6  ;;  %v970_v15 = vld [vmem:[%s1239_s1 + $0xe0] sm:$0xff]  ;;  %v969_v19 = vld [vmem:[%s1239_s1 + $0xd8] sm:$0xff]  ;;  %v968_v23 = vld [vmem:[%s1239_s1 + $0xd0] sm:$0xff] }
   0x9   :  { %597 = vmatpush.bf16.msra.mxu3 %v972_v7  ;;  %v943_v24 = vld [vmem:[%s1239_s1 + $0x8] sm:$0xff]  ;;  %v13_v29 = vld [vmem:[%s1240_s0] sm:$0xff]  ;;  %v981_v38 = vld [vmem:[%s1239_s1 + $0x138] sm:$0xff] }
   0xa   :  { %559 = vmatpush.bf16.msra.mxu0 %v947_v8  ;;  %v951_v25 = vld [vmem:[%s1239_s1 + $0x48] sm:$0xff]  ;;  %v942_v30 = vld [vmem:[%s1239_s1] sm:$0xff]  ;;  %v149_v33 = vunpack.c.l.b16 %v13_v29  ;;  %v150_v37 = vunpack.c.h.b16 %v13_v29  ;;  %v989_v39 = vld [vmem:[%s1239_s1 + $0x178] sm:$0xff] }
   0xb   :  { %572 = vmatpush.bf16.msra.mxu1 %v955_v9  ;;  %v959_v26 = vld [vmem:[%s1239_s1 + $0x88] sm:$0xff]  ;;  %v950_v31 = vld [vmem:[%s1239_s1 + $0x40] sm:$0xff]  ;;  %v997_v40 = vld [vmem:[%s1239_s1 + $0x1b8] sm:$0xff] }
   0xc   :  { %585 = vmatpush.bf16.msra.mxu2 %v963_v10  ;;  %v967_v27 = vld [vmem:[%s1239_s1 + $0xc8] sm:$0xff]  ;;  %v958_v34 = vld [vmem:[%s1239_s1 + $0x80] sm:$0xff]  ;;  %v1005_v41 = vld [vmem:[%s1239_s1 + $0x1f8] sm:$0xff]  ;;  %v157_v43 = vpack.c.b16 %v149_v33, %v149_v33  ;;  %v158_v45 = vpack.c.b16 %v150_v37, %v150_v37 }
   0xd   :  { %598 = vmatpush.bf16.msra.mxu3 %v971_v11  ;;  %v14_v28 = vld [vmem:[%s1240_s0 + $0x8] sm:$0xff]  ;;  %v966_v35 = vld [vmem:[%s1239_s1 + $0xc0] sm:$0xff]  ;;  %v980_v46 = vld [vmem:[%s1239_s1 + $0x130] sm:$0xff] }
   0xe   :  { %560 = vmatpush.bf16.msra.mxu0 %v946_v12  ;;  %v151_v32 = vunpack.c.l.b16 %v14_v28  ;;  %v152_v36 = vunpack.c.h.b16 %v14_v28  ;;  %v988_v47 = vld [vmem:[%s1239_s1 + $0x170] sm:$0xff]  ;;  %v979_v50 = vld [vmem:[%s1239_s1 + $0x128] sm:$0xff]  ;;  %v978_v54 = vld [vmem:[%s1239_s1 + $0x120] sm:$0xff] }
   0xf   :  { %573 = vmatpush.bf16.msra.mxu1 %v954_v13  ;;  %v996_v48 = vld [vmem:[%s1239_s1 + $0x1b0] sm:$0xff]  ;;  %v987_v51 = vld [vmem:[%s1239_s1 + $0x168] sm:$0xff]  ;;  %v986_v55 = vld [vmem:[%s1239_s1 + $0x160] sm:$0xff] }
  0x10   :  { %586 = vmatpush.bf16.msra.mxu2 %v962_v14  ;;  %v159_v42 = vpack.c.b16 %v151_v32, %v151_v32  ;;  %v160_v44 = vpack.c.b16 %v152_v36, %v152_v36  ;;  %v1004_v49 = vld [vmem:[%s1239_s1 + $0x1f0] sm:$0xff]  ;;  %v995_v52 = vld [vmem:[%s1239_s1 + $0x1a8] sm:$0xff]  ;;  %v994_v56 = vld [vmem:[%s1239_s1 + $0x1a0] sm:$0xff] }
  0x11   :  { %599 = vmatpush.bf16.msra.mxu3 %v970_v15  ;;  %v1003_v53 = vld [vmem:[%s1239_s1 + $0x1e8] sm:$0xff]  ;;  %v1002_v57 = vld [vmem:[%s1239_s1 + $0x1e0] sm:$0xff]  ;;  %v977_v58 = vld [vmem:[%s1239_s1 + $0x118] sm:$0xff] }
  0x12   :  { %561 = vmatpush.bf16.msra.mxu0 %v945_v16  ;;  %v985_v59 = vld [vmem:[%s1239_s1 + $0x158] sm:$0xff]  ;;  %v976_v62 = vld [vmem:[%s1239_s1 + $0x110] sm:$0xff]  ;;  %v975_v2 = vld [vmem:[%s1239_s1 + $0x108] sm:$0xff] }
  0x13   :  { %574 = vmatpush.bf16.msra.mxu1 %v953_v17  ;;  %v993_v60 = vld [vmem:[%s1239_s1 + $0x198] sm:$0xff]  ;;  %v984_v63 = vld [vmem:[%s1239_s1 + $0x150] sm:$0xff]  ;;  %v983_v3 = vld [vmem:[%s1239_s1 + $0x148] sm:$0xff] }
  0x14   :  { %587 = vmatpush.bf16.msra.mxu2 %v961_v18  ;;  %v1001_v61 = vld [vmem:[%s1239_s1 + $0x1d8] sm:$0xff]  ;;  %v992_v0 = vld [vmem:[%s1239_s1 + $0x190] sm:$0xff]  ;;  %v991_v5 = vld [vmem:[%s1239_s1 + $0x188] sm:$0xff] }
  0x15   :  { %600 = vmatpush.bf16.msra.mxu3 %v969_v19  ;;  %v1000_v1 = vld [vmem:[%s1239_s1 + $0x1d0] sm:$0xff]  ;;  %v999_v6 = vld [vmem:[%s1239_s1 + $0x1c8] sm:$0xff]  ;;  %v16_v7 = vld [vmem:[%s1240_s0 + $0x18] sm:$0xff] }
  0x16   :  { %562 = vmatpush.bf16.msra.mxu0 %v944_v20  ;;  %v15_v4 = vld [vmem:[%s1240_s0 + $0x10] sm:$0xff]  ;;  %v974_v10 = vld [vmem:[%s1239_s1 + $0x100] sm:$0xff]  ;;  %v155_v12 = vunpack.c.l.b16 %v16_v7  ;;  %v156_v13 = vunpack.c.h.b16 %v16_v7 }
  0x17   :  { %575 = vmatpush.bf16.msra.mxu1 %v952_v21  ;;  %v153_v8 = vunpack.c.l.b16 %v15_v4  ;;  %v154_v9 = vunpack.c.h.b16 %v15_v4  ;;  %v982_v11 = vld [vmem:[%s1239_s1 + $0x140] sm:$0xff] }
  0x18   :  { %588 = vmatpush.bf16.msra.mxu2 %v960_v22  ;;  %v990_v14 = vld [vmem:[%s1239_s1 + $0x180] sm:$0xff]  ;;  %v163_v18 = vpack.c.b16 %v155_v12, %v155_v12  ;;  %v164_v19 = vpack.c.b16 %v156_v13, %v156_v13 }
  0x19   :  { %601 = vmatpush.bf16.msra.mxu3 %v968_v23  ;;  %v998_v15 = vld [vmem:[%s1239_s1 + $0x1c0] sm:$0xff]  ;;  %v161_v16 = vpack.c.b16 %v153_v8, %v153_v8  ;;  %v162_v17 = vpack.c.b16 %v154_v9, %v154_v9 }
  0x1a   :  { %563 = vmatpush.bf16.msra.mxu0 %v943_v24 }
  0x1b   :  { %576 = vmatpush.bf16.msra.mxu1 %v951_v25 }
  0x1c   :  { %589 = vmatpush.bf16.msra.mxu2 %v959_v26 }
  0x1d   :  { %602 = vmatpush.bf16.msra.mxu3 %v967_v27 }
  0x1e   :  { %564 = vmatpush.bf16.msra.mxu0 %v942_v30 }
  0x1f   :  { %577 = vmatpush.bf16.msra.mxu1 %v950_v31 }
  0x20   :  { %590 = vmatpush.bf16.msra.mxu2 %v958_v34 }
  0x21   :  { %603 = vmatpush.bf16.msra.mxu3 %v966_v35  ;;  %565 = vmatmul.bf16.vlgmr.msra.gmra.mxu0 %v157_v43 }
  0x22   :  { %609 = vmatpush.bf16.msrb.mxu0 %v981_v38  ;;  %578 = vmatmul.bf16.vlgmr.msra.gmra.mxu1 %v158_v45 }
  0x23   :  { %622 = vmatpush.bf16.msrb.mxu1 %v989_v39  ;;  %591 = vmatmul.bf16.vlgmr.msra.gmra.mxu2 %v159_v42 }
  0x24   :  { %635 = vmatpush.bf16.msrb.mxu2 %v997_v40  ;;  %604 = vmatmul.bf16.vlgmr.msra.gmra.mxu3 %v160_v44 }
  0x25   :  { %648 = vmatpush.bf16.msrb.mxu3 %v1005_v41 }
  0x26   :  { %610 = vmatpush.bf16.msrb.mxu0 %v980_v46 }
  0x27   :  { %623 = vmatpush.bf16.msrb.mxu1 %v988_v47 }
  0x28   :  { %636 = vmatpush.bf16.msrb.mxu2 %v996_v48 }
  0x29   :  { %649 = vmatpush.bf16.msrb.mxu3 %v1004_v49 }
  0x2a   :  { %611 = vmatpush.bf16.msrb.mxu0 %v979_v50 }
  0x2b   :  { %624 = vmatpush.bf16.msrb.mxu1 %v987_v51 }
  0x2c   :  { %637 = vmatpush.bf16.msrb.mxu2 %v995_v52 }
  0x2d   :  { %650 = vmatpush.bf16.msrb.mxu3 %v1003_v53 }
  0x2e   :  { %612 = vmatpush.bf16.msrb.mxu0 %v978_v54 }
  0x2f   :  { %625 = vmatpush.bf16.msrb.mxu1 %v986_v55 }
  0x30   :  { %638 = vmatpush.bf16.msrb.mxu2 %v994_v56 }
  0x31   :  { %651 = vmatpush.bf16.msrb.mxu3 %v1002_v57 }
  0x32   :  { %613 = vmatpush.bf16.msrb.mxu0 %v977_v58 }
  0x33   :  { %626 = vmatpush.bf16.msrb.mxu1 %v985_v59 }
  0x34   :  { %639 = vmatpush.bf16.msrb.mxu2 %v993_v60 }
  0x35   :  { %652 = vmatpush.bf16.msrb.mxu3 %v1001_v61 }
  0x36   :  { %614 = vmatpush.bf16.msrb.mxu0 %v976_v62 }
  0x37   :  { %627 = vmatpush.bf16.msrb.mxu1 %v984_v63 }
  0x38   :  { %640 = vmatpush.bf16.msrb.mxu2 %v992_v0 }
  0x39   :  { %653 = vmatpush.bf16.msrb.mxu3 %v1000_v1 }
  0x3a   :  { %615 = vmatpush.bf16.msrb.mxu0 %v975_v2 }
  0x3b   :  { %628 = vmatpush.bf16.msrb.mxu1 %v983_v3 }
  0x3c   :  { %641 = vmatpush.bf16.msrb.mxu2 %v991_v5 }
  0x3d   :  { %654 = vmatpush.bf16.msrb.mxu3 %v999_v6 }
  0x3e   :  { %616 = vmatpush.bf16.msrb.mxu0 %v974_v10 }
  0x3f   :  { %629 = vmatpush.bf16.msrb.mxu1 %v982_v11 }
  0x40   :  { %642 = vmatpush.bf16.msrb.mxu2 %v990_v14 }
  0x41   :  { %655 = vmatpush.bf16.msrb.mxu3 %v998_v15  ;;  %617 = vmatmul.bf16.vlgmr.msrb.gmra.mxu0 %v161_v16 }
  0x42   :  { %630 = vmatmul.bf16.vlgmr.msrb.gmra.mxu1 %v162_v17 }
  0x43   :  { %643 = vmatmul.bf16.vlgmr.msrb.gmra.mxu2 %v163_v18 }
  0x44   :  { %656 = vmatmul.bf16.vlgmr.msrb.gmra.mxu3 %v164_v19 }
  0x9e   :  { %v566_v20 = vpop.f32.mrf.mxu0 }
  0x9f   :  { %v579_v21 = vpop.f32.mrf.mxu1 }
  0xa0   :  { %v580_v28 = vadd.f32 %v579_v21, %v566_v20 }
  0xa6   :  { %v592_v22 = vpop.f32.mrf.mxu2  ;;  %v568_v24 = vpop.f32.mrf.mxu0 }
  0xa7   :  { %v605_v23 = vpop.f32.mrf.mxu3  ;;  %v581_v25 = vpop.f32.mrf.mxu1  ;;  %v593_v29 = vadd.f32 %v592_v22, %v580_v28 }
  0xa9   :  { %v606_v30 = vadd.f32 %v605_v23, %v593_v29 }
  0xae   :  { %v594_v26 = vpop.f32.mrf.mxu2 }
  0xaf   :  { %v607_v27 = vpop.f32.mrf.mxu3 }
  0xbe   :  { %v618_v31 = vpop.f32.mrf.mxu0 }
  0xbf   :  { %v631_v32 = vpop.f32.mrf.mxu1  ;;  %v619_v33 = vadd.f32 %v618_v31, %v606_v30 }
  0xc1   :  { %v632_v34 = vadd.f32 %v631_v32, %v619_v33 }
  0xc6   :  { %v644_v35 = vpop.f32.mrf.mxu2  ;;  %v620_v38 = vpop.f32.mrf.mxu0 }
  0xc7   :  { %v657_v36 = vpop.f32.mrf.mxu3  ;;  %v645_v37 = vadd.f32 %v644_v35, %v632_v34  ;;  %v633_v39 = vpop.f32.mrf.mxu1 }
  0xc9   :  { %v658_v40 = vadd.f32 %v657_v36, %v645_v37 }
  0xcb   :  { %v661_v41 = vpack.c.bf16 %v658_v40, %v658_v40  ;;  %v663_v42 = vrot.slane %v658_v40, 4  ;;  %v670_v43 = vmul.f32 %v658_v40, %v658_v40 }
  0xcd   :  { %662 = vst [vmem:[%s1241_s2] sm:$0xf] %v661_v41  ;;  %v664_v44 = vadd.f32 %v663_v42, %v658_v40  ;;  %v671_v45 = vrot.slane %v670_v43, 4 }
  0xce   :  { %v646_v46 = vpop.f32.mrf.mxu2 }
  0xcf   :  { %v659_v47 = vpop.f32.mrf.mxu3  ;;  %v665_v48 = vrot.slane %v664_v44, 2  ;;  %v672_v49 = vadd.f32 %v671_v45, %v670_v43 }
  0xd1   :  { %v666_v50 = vadd.f32 %v665_v48, %v664_v44  ;;  %v673_v51 = vrot.slane %v672_v49, 2 }
  0xd3   :  { %v667_v52 = vrot.slane %v666_v50, 1  ;;  %v674_v53 = vadd.f32 %v673_v51, %v672_v49 }
  0xd5   :  { %v668_v54 = vadd.f32 %v667_v52, %v666_v50  ;;  %v675_v55 = vrot.slane %v674_v53, 1 }
  0xd7   :  { %669 = vst [vmem:[%s1242_s3] sm:$0x1] %v668_v54  ;;  %v676_v56 = vadd.f32 %v675_v55, %v674_v53 }
  0xd9   :  { %677 = vst [vmem:[%s1242_s3 + $0x1] sm:$0x1] %v676_v56 }

// kernel: font_unet_forward.34
= control target key start
LH: loop header
LB: loop body
LE: loop exit
PB: predicated region body
PF: predicated region fallthrough
CT: control target
= control target key end

     0   :  { %s67_s0 = inlined_call_operand.vmem [shape: bf16[8,128], index: 0, kind: input, shape index: {}]   ;;  %s68_s1 = inlined_call_operand.vmem [shape: f32[1,128], index: 1, kind: input, shape index: {}]   ;;  %s69_s2 = inlined_call_operand.vmem [shape: f32[1,128], index: 2, kind: input, shape index: {}]   ;;  %s70_s3 = inlined_call_operand.vmem [shape: bf16[8,128], index: 3, kind: output, shape index: {}]  }
   0x1   :  { %v14_v0 = vld [vmem:[%s67_s0] sm:$0xf] }
   0x2   :  { %v33_v1 = vld [vmem:[%s68_s1] ss:$0 sm:$0xff]  ;;  %v15_v2 = vunpack.c.l.bf16 %v14_v0 }
   0x3   :  { %v34_v3 = vld [vmem:[%s69_s2] ss:$0 sm:$0xff] }
   0x4   :  { %v20_v4 = vmul.f32 %v33_v1, %v15_v2 }
   0x6   :  { %v25_v5 = vadd.f32 %v34_v3, %v20_v4 }
   0x8   :  { %v26_v6 = vmax.f32 %v25_v5, 0.0 }
   0xa   :  { %v27_v7 = vpack.c.bf16 %v26_v6, %v26_v6 }
   0xc   :  { %28 = vst [vmem:[%s70_s3] sm:$0xf] %v27_v7 }

// kernel: font_unet_forward.33
= control target key start
LH: loop header
LB: loop body
LE: loop exit
PB: predicated region body
PF: predicated region fallthrough
CT: control target
= control target key end

     0   :  { %s212_s1 = inlined_call_operand.vmem [shape: bf16[1,128,128], index: 1, kind: input, shape index: {}]   ;;  %s213_s0 = inlined_call_operand.vmem [shape: bf16[1,8,128], index: 0, kind: input, shape index: {}]   ;;  %s214_s2 = inlined_call_operand.vmem [shape: bf16[1,8,128], index: 2, kind: output, shape index: {0}]   ;;  %s215_s3 = inlined_call_operand.vmem [shape: f32[1,1,8,128], index: 3, kind: output, shape index: {1}]  }
   0x1   :  { %v155_v0 = vld [vmem:[%s212_s1 + $0x38] sm:$0xff]  ;;  %v154_v1 = vld [vmem:[%s212_s1 + $0x30] sm:$0xff]  ;;  %v153_v2 = vld [vmem:[%s212_s1 + $0x28] sm:$0xff] }
   0x2   :  { %78 = vmatpush.bf16.msra.mxu0 %v155_v0  ;;  %v152_v3 = vld [vmem:[%s212_s1 + $0x20] sm:$0xff]  ;;  %v151_v4 = vld [vmem:[%s212_s1 + $0x18] sm:$0xff]  ;;  %v150_v5 = vld [vmem:[%s212_s1 + $0x10] sm:$0xff] }
   0x3   :  { %v149_v6 = vld [vmem:[%s212_s1 + $0x8] sm:$0xff]  ;;  %v148_v7 = vld [vmem:[%s212_s1] sm:$0xff] }
   0x4   :  { %v13_v8 = vld [vmem:[%s213_s0] sm:$0xf] }
   0x6   :  { %79 = vmatpush.bf16.msra.mxu0 %v154_v1 }
   0xa   :  { %80 = vmatpush.bf16.msra.mxu0 %v153_v2 }
   0xe   :  { %81 = vmatpush.bf16.msra.mxu0 %v152_v3 }
  0x12   :  { %82 = vmatpush.bf16.msra.mxu0 %v151_v4 }
  0x16   :  { %83 = vmatpush.bf16.msra.mxu0 %v150_v5 }
  0x1a   :  { %84 = vmatpush.bf16.msra.mxu0 %v149_v6 }
  0x1e   :  { %85 = vmatpush.bf16.msra.mxu0 %v148_v7 }
  0x21   :  { %86 = vmatmul.bf16.vlgmr.msra.gmra.mxu0 %v13_v8 }
  0x9e   :  { %v87_v9 = vpop.f32.mrf.mxu0 }
  0x9f   :  { %v91_v10 = vpack.c.bf16 %v87_v9, %v87_v9  ;;  %v93_v11 = vrot.slane %v87_v9, 4  ;;  %v100_v12 = vmul.f32 %v87_v9, %v87_v9 }
  0xa1   :  { %92 = vst [vmem:[%s214_s2] sm:$0xf] %v91_v10  ;;  %v94_v13 = vadd.f32 %v93_v11, %v87_v9  ;;  %v101_v14 = vrot.slane %v100_v12, 4 }
  0xa3   :  { %v95_v15 = vrot.slane %v94_v13, 2  ;;  %v102_v16 = vadd.f32 %v101_v14, %v100_v12 }
  0xa5   :  { %v96_v17 = vadd.f32 %v95_v15, %v94_v13  ;;  %v103_v18 = vrot.slane %v102_v16, 2 }
  0xa6   :  { %v89_v19 = vpop.f32.mrf.mxu0 }
  0xa7   :  { %v97_v20 = vrot.slane %v96_v17, 1  ;;  %v104_v21 = vadd.f32 %v103_v18, %v102_v16 }
  0xa9   :  { %v98_v22 = vadd.f32 %v97_v20, %v96_v17  ;;  %v105_v23 = vrot.slane %v104_v21, 1 }
  0xab   :  { %99 = vst [vmem:[%s215_s3] sm:$0x1] %v98_v22  ;;  %v106_v24 = vadd.f32 %v105_v23, %v104_v21 }
  0xad   :  { %107 = vst [vmem:[%s215_s3 + $0x1] sm:$0x1] %v106_v24 }

// kernel: font_unet_forward.32
= control target key start
LH: loop header
LB: loop body
LE: loop exit
PB: predicated region body
PF: predicated region fallthrough
CT: control target
= control target key end

     0   :  { %s1207_s1 = inlined_call_operand.vmem [shape: bf16[1,1024,128], index: 1, kind: input, shape index: {}]   ;;  %s1208_s0 = inlined_call_operand.vmem [shape: bf16[1,8,1024], index: 0, kind: input, shape index: {}]   ;;  %s1209_s2 = inlined_call_operand.vmem [shape: bf16[1,8,128], index: 2, kind: output, shape index: {}]  }
   0x1   :  { %v928_v0 = vld [vmem:[%s1207_s1 + $0x38] sm:$0xff]  ;;  %v927_v4 = vld [vmem:[%s1207_s1 + $0x30] sm:$0xff]  ;;  %v926_v8 = vld [vmem:[%s1207_s1 + $0x28] sm:$0xff] }
   0x2   :  { %v936_v1 = vld [vmem:[%s1207_s1 + $0x78] sm:$0xff]  ;;  %555 = vmatpush.bf16.msra.mxu0 %v928_v0  ;;  %v935_v5 = vld [vmem:[%s1207_s1 + $0x70] sm:$0xff]  ;;  %v934_v9 = vld [vmem:[%s1207_s1 + $0x68] sm:$0xff] }
   0x3   :  { %v944_v2 = vld [vmem:[%s1207_s1 + $0xb8] sm:$0xff]  ;;  %568 = vmatpush.bf16.msra.mxu1 %v936_v1  ;;  %v943_v6 = vld [vmem:[%s1207_s1 + $0xb0] sm:$0xff]  ;;  %v942_v10 = vld [vmem:[%s1207_s1 + $0xa8] sm:$0xff] }
   0x4   :  { %v952_v3 = vld [vmem:[%s1207_s1 + $0xf8] sm:$0xff]  ;;  %581 = vmatpush.bf16.msra.mxu2 %v944_v2  ;;  %v951_v7 = vld [vmem:[%s1207_s1 + $0xf0] sm:$0xff]  ;;  %v950_v11 = vld [vmem:[%s1207_s1 + $0xe8] sm:$0xff] }
   0x5   :  { %594 = vmatpush.bf16.msra.mxu3 %v952_v3  ;;  %v925_v12 = vld [vmem:[%s1207_s1 + $0x20] sm:$0xff]  ;;  %v924_v16 = vld [vmem:[%s1207_s1 + $0x18] sm:$0xff]  ;;  %v923_v20 = vld [vmem:[%s1207_s1 + $0x10] sm:$0xff] }
   0x6   :  { %556 = vmatpush.bf16.msra.mxu0 %v927_v4  ;;  %v933_v13 = vld [vmem:[%s1207_s1 + $0x60] sm:$0xff]  ;;  %v932_v17 = vld [vmem:[%s1207_s1 + $0x58] sm:$0xff]  ;;  %v931_v21 = vld [vmem:[%s1207_s1 + $0x50] sm:$0xff] }
   0x7   :  { %569 = vmatpush.bf16.msra.mxu1 %v935_v5  ;;  %v941_v14 = vld [vmem:[%s1207_s1 + $0xa0] sm:$0xff]  ;;  %v940_v18 = vld [vmem:[%s1207_s1 + $0x98] sm:$0xff]  ;;  %v939_v22 = vld [vmem:[%s1207_s1 + $0x90] sm:$0xff] }
   0x8   :  { %582 = vmatpush.bf16.msra.mxu2 %v943_v6  ;;  %v949_v15 = vld [vmem:[%s1207_s1 + $0xe0] sm:$0xff]  ;;  %v948_v19 = vld [vmem:[%s1207_s1 + $0xd8] sm:$0xff]  ;;  %v947_v23 = vld [vmem:[%s1207_s1 + $0xd0] sm:$0xff] }
   0x9   :  { %595 = vmatpush.bf16.msra.mxu3 %v951_v7  ;;  %v922_v24 = vld [vmem:[%s1207_s1 + $0x8] sm:$0xff]  ;;  %v11_v29 = vld [vmem:[%s1208_s0] sm:$0xff]  ;;  %v960_v38 = vld [vmem:[%s1207_s1 + $0x138] sm:$0xff] }
   0xa   :  { %557 = vmatpush.bf16.msra.mxu0 %v926_v8  ;;  %v930_v25 = vld [vmem:[%s1207_s1 + $0x48] sm:$0xff]  ;;  %v921_v30 = vld [vmem:[%s1207_s1] sm:$0xff]  ;;  %v147_v36 = vunpack.c.l.b16 %v11_v29  ;;  %v148_v37 = vunpack.c.h.b16 %v11_v29  ;;  %v968_v39 = vld [vmem:[%s1207_s1 + $0x178] sm:$0xff] }
   0xb   :  { %570 = vmatpush.bf16.msra.mxu1 %v934_v9  ;;  %v938_v26 = vld [vmem:[%s1207_s1 + $0x88] sm:$0xff]  ;;  %v929_v31 = vld [vmem:[%s1207_s1 + $0x40] sm:$0xff]  ;;  %v976_v40 = vld [vmem:[%s1207_s1 + $0x1b8] sm:$0xff] }
   0xc   :  { %583 = vmatpush.bf16.msra.mxu2 %v942_v10  ;;  %v946_v27 = vld [vmem:[%s1207_s1 + $0xc8] sm:$0xff]  ;;  %v937_v34 = vld [vmem:[%s1207_s1 + $0x80] sm:$0xff]  ;;  %v984_v41 = vld [vmem:[%s1207_s1 + $0x1f8] sm:$0xff]  ;;  %v155_v44 = vpack.c.b16 %v147_v36, %v147_v36  ;;  %v156_v45 = vpack.c.b16 %v148_v37, %v148_v37 }
   0xd   :  { %596 = vmatpush.bf16.msra.mxu3 %v950_v11  ;;  %v12_v28 = vld [vmem:[%s1208_s0 + $0x8] sm:$0xff]  ;;  %v945_v35 = vld [vmem:[%s1207_s1 + $0xc0] sm:$0xff]  ;;  %v959_v46 = vld [vmem:[%s1207_s1 + $0x130] sm:$0xff] }
   0xe   :  { %558 = vmatpush.bf16.msra.mxu0 %v925_v12  ;;  %v149_v32 = vunpack.c.l.b16 %v12_v28  ;;  %v150_v33 = vunpack.c.h.b16 %v12_v28  ;;  %v967_v47 = vld [vmem:[%s1207_s1 + $0x170] sm:$0xff]  ;;  %v958_v50 = vld [vmem:[%s1207_s1 + $0x128] sm:$0xff]  ;;  %v957_v54 = vld [vmem:[%s1207_s1 + $0x120] sm:$0xff] }
   0xf   :  { %571 = vmatpush.bf16.msra.mxu1 %v933_v13  ;;  %v975_v48 = vld [vmem:[%s1207_s1 + $0x1b0] sm:$0xff]  ;;  %v966_v51 = vld [vmem:[%s1207_s1 + $0x168] sm:$0xff]  ;;  %v965_v55 = vld [vmem:[%s1207_s1 + $0x160] sm:$0xff] }
  0x10   :  { %584 = vmatpush.bf16.msra.mxu2 %v941_v14  ;;  %v157_v42 = vpack.c.b16 %v149_v32, %v149_v32  ;;  %v158_v43 = vpack.c.b16 %v150_v33, %v150_v33  ;;  %v983_v49 = vld [vmem:[%s1207_s1 + $0x1f0] sm:$0xff]  ;;  %v974_v52 = vld [vmem:[%s1207_s1 + $0x1a8] sm:$0xff]  ;;  %v973_v56 = vld [vmem:[%s1207_s1 + $0x1a0] sm:$0xff] }
  0x11   :  { %597 = vmatpush.bf16.msra.mxu3 %v949_v15  ;;  %v982_v53 = vld [vmem:[%s1207_s1 + $0x1e8] sm:$0xff]  ;;  %v981_v57 = vld [vmem:[%s1207_s1 + $0x1e0] sm:$0xff]  ;;  %v956_v58 = vld [vmem:[%s1207_s1 + $0x118] sm:$0xff] }
  0x12   :  { %559 = vmatpush.bf16.msra.mxu0 %v924_v16  ;;  %v964_v59 = vld [vmem:[%s1207_s1 + $0x158] sm:$0xff]  ;;  %v955_v62 = vld [vmem:[%s1207_s1 + $0x110] sm:$0xff]  ;;  %v954_v2 = vld [vmem:[%s1207_s1 + $0x108] sm:$0xff] }
  0x13   :  { %572 = vmatpush.bf16.msra.mxu1 %v932_v17  ;;  %v972_v60 = vld [vmem:[%s1207_s1 + $0x198] sm:$0xff]  ;;  %v963_v63 = vld [vmem:[%s1207_s1 + $0x150] sm:$0xff]  ;;  %v962_v3 = vld [vmem:[%s1207_s1 + $0x148] sm:$0xff] }
  0x14   :  { %585 = vmatpush.bf16.msra.mxu2 %v940_v18  ;;  %v980_v61 = vld [vmem:[%s1207_s1 + $0x1d8] sm:$0xff]  ;;  %v971_v0 = vld [vmem:[%s1207_s1 + $0x190] sm:$0xff]  ;;  %v970_v5 = vld [vmem:[%s1207_s1 + $0x188] sm:$0xff] }
  0x15   :  { %598 = vmatpush.bf16.msra.mxu3 %v948_v19  ;;  %v979_v1 = vld [vmem:[%s1207_s1 + $0x1d0] sm:$0xff]  ;;  %v978_v6 = vld [vmem:[%s1207_s1 + $0x1c8] sm:$0xff]  ;;  %v14_v7 = vld [vmem:[%s1208_s0 + $0x18] sm:$0xff] }
  0x16   :  { %560 = vmatpush.bf16.msra.mxu0 %v923_v20  ;;  %v13_v4 = vld [vmem:[%s1208_s0 + $0x10] sm:$0xff]  ;;  %v953_v10 = vld [vmem:[%s1207_s1 + $0x100] sm:$0xff]  ;;  %v153_v12 = vunpack.c.l.b16 %v14_v7  ;;  %v154_v13 = vunpack.c.h.b16 %v14_v7 }
  0x17   :  { %573 = vmatpush.bf16.msra.mxu1 %v931_v21  ;;  %v151_v8 = vunpack.c.l.b16 %v13_v4  ;;  %v152_v9 = vunpack.c.h.b16 %v13_v4  ;;  %v961_v11 = vld [vmem:[%s1207_s1 + $0x140] sm:$0xff] }
  0x18   :  { %586 = vmatpush.bf16.msra.mxu2 %v939_v22  ;;  %v969_v14 = vld [vmem:[%s1207_s1 + $0x180] sm:$0xff]  ;;  %v161_v18 = vpack.c.b16 %v153_v12, %v153_v12  ;;  %v162_v19 = vpack.c.b16 %v154_v13, %v154_v13 }
  0x19   :  { %599 = vmatpush.bf16.msra.mxu3 %v947_v23  ;;  %v977_v15 = vld [vmem:[%s1207_s1 + $0x1c0] sm:$0xff]  ;;  %v159_v16 = vpack.c.b16 %v151_v8, %v151_v8  ;;  %v160_v17 = vpack.c.b16 %v152_v9, %v152_v9 }
  0x1a   :  { %561 = vmatpush.bf16.msra.mxu0 %v922_v24 }
  0x1b   :  { %574 = vmatpush.bf16.msra.mxu1 %v930_v25 }
  0x1c   :  { %587 = vmatpush.bf16.msra.mxu2 %v938_v26 }
  0x1d   :  { %600 = vmatpush.bf16.msra.mxu3 %v946_v27 }
  0x1e   :  { %562 = vmatpush.bf16.msra.mxu0 %v921_v30 }
  0x1f   :  { %575 = vmatpush.bf16.msra.mxu1 %v929_v31 }
  0x20   :  { %588 = vmatpush.bf16.msra.mxu2 %v937_v34 }
  0x21   :  { %601 = vmatpush.bf16.msra.mxu3 %v945_v35  ;;  %563 = vmatmul.bf16.vlgmr.msra.gmra.mxu0 %v155_v44 }
  0x22   :  { %607 = vmatpush.bf16.msrb.mxu0 %v960_v38  ;;  %576 = vmatmul.bf16.vlgmr.msra.gmra.mxu1 %v156_v45 }
  0x23   :  { %620 = vmatpush.bf16.msrb.mxu1 %v968_v39  ;;  %589 = vmatmul.bf16.vlgmr.msra.gmra.mxu2 %v157_v42 }
  0x24   :  { %633 = vmatpush.bf16.msrb.mxu2 %v976_v40  ;;  %602 = vmatmul.bf16.vlgmr.msra.gmra.mxu3 %v158_v43 }
  0x25   :  { %646 = vmatpush.bf16.msrb.mxu3 %v984_v41 }
  0x26   :  { %608 = vmatpush.bf16.msrb.mxu0 %v959_v46 }
  0x27   :  { %621 = vmatpush.bf16.msrb.mxu1 %v967_v47 }
  0x28   :  { %634 = vmatpush.bf16.msrb.mxu2 %v975_v48 }
  0x29   :  { %647 = vmatpush.bf16.msrb.mxu3 %v983_v49 }
  0x2a   :  { %609 = vmatpush.bf16.msrb.mxu0 %v958_v50 }
  0x2b   :  { %622 = vmatpush.bf16.msrb.mxu1 %v966_v51 }
  0x2c   :  { %635 = vmatpush.bf16.msrb.mxu2 %v974_v52 }
  0x2d   :  { %648 = vmatpush.bf16.msrb.mxu3 %v982_v53 }
  0x2e   :  { %610 = vmatpush.bf16.msrb.mxu0 %v957_v54 }
  0x2f   :  { %623 = vmatpush.bf16.msrb.mxu1 %v965_v55 }
  0x30   :  { %636 = vmatpush.bf16.msrb.mxu2 %v973_v56 }
  0x31   :  { %649 = vmatpush.bf16.msrb.mxu3 %v981_v57 }
  0x32   :  { %611 = vmatpush.bf16.msrb.mxu0 %v956_v58 }
  0x33   :  { %624 = vmatpush.bf16.msrb.mxu1 %v964_v59 }
  0x34   :  { %637 = vmatpush.bf16.msrb.mxu2 %v972_v60 }
  0x35   :  { %650 = vmatpush.bf16.msrb.mxu3 %v980_v61 }
  0x36   :  { %612 = vmatpush.bf16.msrb.mxu0 %v955_v62 }
  0x37   :  { %625 = vmatpush.bf16.msrb.mxu1 %v963_v63 }
  0x38   :  { %638 = vmatpush.bf16.msrb.mxu2 %v971_v0 }
  0x39   :  { %651 = vmatpush.bf16.msrb.mxu3 %v979_v1 }
  0x3a   :  { %613 = vmatpush.bf16.msrb.mxu0 %v954_v2 }
  0x3b   :  { %626 = vmatpush.bf16.msrb.mxu1 %v962_v3 }
  0x3c   :  { %639 = vmatpush.bf16.msrb.mxu2 %v970_v5 }
  0x3d   :  { %652 = vmatpush.bf16.msrb.mxu3 %v978_v6 }
  0x3e   :  { %614 = vmatpush.bf16.msrb.mxu0 %v953_v10 }
  0x3f   :  { %627 = vmatpush.bf16.msrb.mxu1 %v961_v11 }
  0x40   :  { %640 = vmatpush.bf16.msrb.mxu2 %v969_v14 }
  0x41   :  { %653 = vmatpush.bf16.msrb.mxu3 %v977_v15  ;;  %615 = vmatmul.bf16.vlgmr.msrb.gmra.mxu0 %v159_v16 }
  0x42   :  { %628 = vmatmul.bf16.vlgmr.msrb.gmra.mxu1 %v160_v17 }
  0x43   :  { %641 = vmatmul.bf16.vlgmr.msrb.gmra.mxu2 %v161_v18 }
  0x44   :  { %654 = vmatmul.bf16.vlgmr.msrb.gmra.mxu3 %v162_v19 }
  0x9e   :  { %v564_v20 = vpop.f32.mrf.mxu0 }
  0x9f   :  { %v577_v21 = vpop.f32.mrf.mxu1 }
  0xa0   :  { %v578_v28 = vadd.f32 %v577_v21, %v564_v20 }
  0xa6   :  { %v590_v22 = vpop.f32.mrf.mxu2  ;;  %v566_v24 = vpop.f32.mrf.mxu0 }
  0xa7   :  { %v603_v23 = vpop.f32.mrf.mxu3  ;;  %v579_v25 = vpop.f32.mrf.mxu1  ;;  %v591_v29 = vadd.f32 %v590_v22, %v578_v28 }
  0xa9   :  { %v604_v30 = vadd.f32 %v603_v23, %v591_v29 }
  0xae   :  { %v592_v26 = vpop.f32.mrf.mxu2 }
  0xaf   :  { %v605_v27 = vpop.f32.mrf.mxu3 }
  0xbe   :  { %v616_v31 = vpop.f32.mrf.mxu0 }
  0xbf   :  { %v629_v32 = vpop.f32.mrf.mxu1  ;;  %v617_v33 = vadd.f32 %v616_v31, %v604_v30 }
  0xc1   :  { %v630_v34 = vadd.f32 %v629_v32, %v617_v33 }
  0xc6   :  { %v642_v35 = vpop.f32.mrf.mxu2  ;;  %v618_v38 = vpop.f32.mrf.mxu0 }
  0xc7   :  { %v655_v36 = vpop.f32.mrf.mxu3  ;;  %v643_v37 = vadd.f32 %v642_v35, %v630_v34  ;;  %v631_v39 = vpop.f32.mrf.mxu1 }
  0xc9   :  { %v656_v40 = vadd.f32 %v655_v36, %v643_v37 }
  0xcb   :  { %v659_v41 = vpack.c.bf16 %v656_v40, %v656_v40 }
  0xcd   :  { %660 = vst [vmem:[%s1209_s2] sm:$0xf] %v659_v41 }
  0xce   :  { %v644_v42 = vpop.f32.mrf.mxu2 }
  0xcf   :  { %v657_v43 = vpop.f32.mrf.mxu3 }

// kernel: font_unet_forward.35
= control target key start
LH: loop header
LB: loop body
LE: loop exit
PB: predicated region body
PF: predicated region fallthrough
CT: control target
= control target key end

     0   :  { %s780_s12 = smov 0   ;;  %s782_s13 = smov 0   ;;  %s846_s0 = inlined_call_operand.vmem [shape: bf16[4,8,256], index: 0, kind: input, shape index: {}]   ;;  %s847_s1 = inlined_call_operand.vmem [shape: bf16[4,256,128], index: 1, kind: input, shape index: {}]   ;;  %s848_s2 = inlined_call_operand.vmem [shape: bf16[4,8,128], index: 2, kind: output, shape index: {0}]   ;;  %s849_s3 = inlined_call_operand.vmem [shape: f32[4,1,8,128], index: 3, kind: output, shape index: {1}]  }
   0x1   :  { %s784_s14 = smov 0  }
   0x2 LB: > { %s33_s15 = sadd.s32 1, %s754_s13  ;;  %p621_p0 = scmp.ge.s32.totalorder %s758_s14, 1  ;;  %s758_s14 = sphi %s784_s14, %s14_s14   ;;  %s754_s13 = sphi %s782_s13, %s851_s13   ;;  %s750_s12 = sphi %s780_s12, %s850_s12  }
   0x3   : > { %p35_p1 = scmp.ge.s32.totalorder %s33_s15, 4  ;;  %p188_p2 = scmp.lt.s32.totalorder %s758_s14, 5 }
   0x5   : > { %s853_s15 = smov (%p35_p1, %s33_s15), 0  ;;  %p189_p3 = pnand %p621_p0, %p188_p2 }
   0x6   : > { %p239_p4 = scmp.lt.s32.totalorder (!%p189_p3), %s750_s12, 3 }
   0x7   : > { %192 = sbr.rel (%p189_p3) target bundleno = 191 (0xbf), region = 28 }
   0xc   : > { %s855_s12 = smov (!%p239_p4, %s750_s12), 3 }
   0xd   : > { %s695_s16 = sshll.u32 %s855_s12, 7  ;;  %s694_s20 = sshll.u32 %s855_s12, 3 }
   0xe   : > { %s804_s19 = scalar_lea.vmem %s847_s1, %s695_s16  ;;  %s247_s23 = scalar_lea.vmem %s846_s0, %s694_s20 }
   0xf   : > { %v703_v0 = vld [vmem:[%s804_s19 + $0x38] sm:$0xff]  ;;  %v702_v2 = vld [vmem:[%s804_s19 + $0x30] sm:$0xff]  ;;  %v701_v4 = vld [vmem:[%s804_s19 + $0x28] sm:$0xff]  ;;  %s626_s24 = sshll.u32 %s855_s12, 2  ;;  %s275_s30 = scalar_lea.vmem %s849_s3, %s694_s20 }
  0x10   : > { %v711_v1 = vld [vmem:[%s804_s19 + $0x78] sm:$0xff]  ;;  %412 = vmatpush.bf16.msra.mxu0 %v703_v0  ;;  %v710_v3 = vld [vmem:[%s804_s19 + $0x70] sm:$0xff]  ;;  %v709_v5 = vld [vmem:[%s804_s19 + $0x68] sm:$0xff]  ;;  %s265_s27 = scalar_lea.vmem %s848_s2, %s626_s24 }
  0x11   : > { %425 = vmatpush.bf16.msra.mxu1 %v711_v1  ;;  %v700_v6 = vld [vmem:[%s804_s19 + $0x20] sm:$0xff]  ;;  %v699_v8 = vld [vmem:[%s804_s19 + $0x18] sm:$0xff]  ;;  %v698_v10 = vld [vmem:[%s804_s19 + $0x10] sm:$0xff] }
  0x12   : > { %v708_v7 = vld [vmem:[%s804_s19 + $0x60] sm:$0xff]  ;;  %v707_v9 = vld [vmem:[%s804_s19 + $0x58] sm:$0xff]  ;;  %v706_v11 = vld [vmem:[%s804_s19 + $0x50] sm:$0xff] }
  0x13   : > { %v697_v12 = vld [vmem:[%s804_s19 + $0x8] sm:$0xff]  ;;  %v276_v14 = vld [vmem:[%s247_s23] sm:$0xff] }
  0x14   : > { %413 = vmatpush.bf16.msra.mxu0 %v702_v2  ;;  %v705_v13 = vld [vmem:[%s804_s19 + $0x48] sm:$0xff]  ;;  %v310_v15 = vunpack.c.l.b16 %v276_v14  ;;  %v311_v16 = vunpack.c.h.b16 %v276_v14  ;;  %v696_v17 = vld [vmem:[%s804_s19] sm:$0xff] }
  0x15   : > { %426 = vmatpush.bf16.msra.mxu1 %v710_v3  ;;  %v704_v18 = vld [vmem:[%s804_s19 + $0x40] sm:$0xff] }
  0x16   : > { %v312_v19 = vpack.c.b16 %v310_v15, %v310_v15  ;;  %v313_v20 = vpack.c.b16 %v311_v16, %v311_v16 }
  0x18   : > { %414 = vmatpush.bf16.msra.mxu0 %v701_v4 }
  0x19   : > { %427 = vmatpush.bf16.msra.mxu1 %v709_v5 }
  0x1c   : > { %415 = vmatpush.bf16.msra.mxu0 %v700_v6 }
  0x1d   : > { %428 = vmatpush.bf16.msra.mxu1 %v708_v7 }
  0x20   : > { %416 = vmatpush.bf16.msra.mxu0 %v699_v8 }
  0x21   : > { %429 = vmatpush.bf16.msra.mxu1 %v707_v9 }
  0x24   : > { %417 = vmatpush.bf16.msra.mxu0 %v698_v10 }
  0x25   : > { %430 = vmatpush.bf16.msra.mxu1 %v706_v11 }
  0x28   : > { %418 = vmatpush.bf16.msra.mxu0 %v697_v12 }
  0x29   : > { %431 = vmatpush.bf16.msra.mxu1 %v705_v13 }
  0x2c   : > { %419 = vmatpush.bf16.msra.mxu0 %v696_v17 }
  0x2d   : > { %432 = vmatpush.bf16.msra.mxu1 %v704_v18 }
  0x2f   : > { %420 = vmatmul.bf16.vlgmr.msra.gmra.mxu0 %v312_v19 }
  0x30   : > { %433 = vmatmul.bf16.vlgmr.msra.gmra.mxu1 %v313_v20 }
  0xac   : > { %v421_v21 = vpop.f32.mrf.mxu0 }
  0xad   : > { %v434_v22 = vpop.f32.mrf.mxu1 }
  0xae   : > { %v435_v23 = vadd.f32 %v434_v22, %v421_v21 }
  0xb0   : > { %v438_v24 = vpack.c.bf16 %v435_v23, %v435_v23  ;;  %v440_v25 = vrot.slane %v435_v23, 4  ;;  %v447_v26 = vmul.f32 %v435_v23, %v435_v23 }
  0xb2   : > { %439 = vst [vmem:[%s265_s27] sm:$0xf] %v438_v24  ;;  %v441_v27 = vadd.f32 %v440_v25, %v435_v23  ;;  %v448_v28 = vrot.slane %v447_v26, 4 }
  0xb4   : > { %v442_v29 = vrot.slane %v441_v27, 2  ;;  %v449_v30 = vadd.f32 %v448_v28, %v447_v26  ;;  %v423_v31 = vpop.f32.mrf.mxu0 }
  0xb5   : > { %v436_v32 = vpop.f32.mrf.mxu1 }
  0xb6   : > { %v443_v33 = vadd.f32 %v442_v29, %v441_v27  ;;  %v450_v34 = vrot.slane %v449_v30, 2 }
  0xb8   : > { %v444_v35 = vrot.slane %v443_v33, 1  ;;  %v451_v36 = vadd.f32 %v450_v34, %v449_v30 }
  0xba   : > { %v445_v37 = vadd.f32 %v444_v35, %v443_v33  ;;  %v452_v38 = vrot.slane %v451_v36, 1 }
  0xbc   : > { %446 = vst [vmem:[%s275_s30] sm:$0x1] %v445_v37  ;;  %v453_v39 = vadd.f32 %v452_v38, %v451_v36 }
  0xbe   : > { %454 = vst [vmem:[%s275_s30 + $0x1] sm:$0x1] %v453_v39 }
  0xbf PF: > { %s14_s14 = sadd.s32 1, %s758_s14   ;;  %s850_s12 = smov %s754_s13 }
  0xc0   : > { %p11_p5 = scmp.ge.s32.totalorder %s14_s14, 6   ;;  %s851_s13 = smov %s853_s15 }
  0xc2   :  { %13 = sbr.rel (!%p11_p5) target bundleno = 2 (0x2), region = 73 }

// kernel: font_unet_forward.36
= control target key start
LH: loop header
LB: loop body
LE: loop exit
PB: predicated region body
PF: predicated region fallthrough
CT: control target
= control target key end

     0   :  { %s114_s0 = inlined_call_operand.vmem [shape: bf16[32,128], index: 0, kind: input, shape index: {}]   ;;  %s115_s1 = inlined_call_operand.vmem [shape: f32[1,128], index: 1, kind: input, shape index: {}]   ;;  %s116_s2 = inlined_call_operand.vmem [shape: f32[1,128], index: 2, kind: input, shape index: {}]   ;;  %s117_s3 = inlined_call_operand.vmem [shape: bf16[32,128], index: 3, kind: output, shape index: {}]  }
   0x1   :  { %v55_v0 = vld [vmem:[%s114_s0] sm:$0xff]   ;;  %v72_v5 = vld [vmem:[%s114_s0 + $0x8] sm:$0xff]  }
   0x2   :  { %v74_v1 = vld [vmem:[%s115_s1] ss:$0 sm:$0xff]  ;;  %v56_v2 = vunpack.c.l.bf16 %v55_v0  ;;  %v57_v3 = vunpack.c.h.bf16 %v55_v0  ;;  %v60_v6 = vunpack.c.l.bf16 %v72_v5  ;;  %v61_v7 = vunpack.c.h.bf16 %v72_v5 }
   0x3   :  { %v75_v4 = vld [vmem:[%s116_s2] ss:$0 sm:$0xff] }
   0x4   :  { %v26_v8 = vmul.f32 %v74_v1, %v56_v2  ;;  %v27_v9 = vmul.f32 %v74_v1, %v57_v3  ;;  %v28_v10 = vmul.f32 %v74_v1, %v60_v6  ;;  %v29_v11 = vmul.f32 %v74_v1, %v61_v7 }
   0x6   :  { %v34_v12 = vadd.f32 %v75_v4, %v26_v8  ;;  %v35_v13 = vadd.f32 %v75_v4, %v27_v9  ;;  %v36_v14 = vadd.f32 %v75_v4, %v28_v10  ;;  %v37_v15 = vadd.f32 %v75_v4, %v29_v11 }
   0x8   :  { %v38_v16 = vmax.f32 %v34_v12, 0.0  ;;  %v39_v17 = vmax.f32 %v35_v13, 0.0  ;;  %v40_v18 = vmax.f32 %v36_v14, 0.0  ;;  %v41_v19 = vmax.f32 %v37_v15, 0.0 }
   0xa   :  { %v65_v20 = vpack.c.bf16 %v39_v17, %v38_v16  ;;  %v70_v21 = vpack.c.bf16 %v41_v19, %v40_v18 }
   0xc   :  { %66 = vst [vmem:[%s117_s3] sm:$0xff] %v65_v20  }
   0xd   :  { %73 = vst [vmem:[%s117_s3 + $0x8] sm:$0xff] %v70_v21  }

// kernel: font_unet_forward.37
= control target key start
LH: loop header
LB: loop body
LE: loop exit
PB: predicated region body
PF: predicated region fallthrough
CT: control target
= control target key end

     0   :  { %s1022_s12 = smov 0   ;;  %s1024_s13 = smov 0   ;;  %s1101_s0 = inlined_call_operand.vmem [shape: bf16[4,8,512], index: 0, kind: input, shape index: {}]   ;;  %s1102_s1 = inlined_call_operand.vmem [shape: bf16[4,512,128], index: 1, kind: input, shape index: {}]   ;;  %s1103_s2 = inlined_call_operand.vmem [shape: bf16[4,8,128], index: 2, kind: output, shape index: {0}]   ;;  %s1104_s3 = inlined_call_operand.vmem [shape: f32[4,1,8,128], index: 3, kind: output, shape index: {1}]  }
   0x1   :  { %s1026_s14 = smov 0  }
   0x2 LB: > { %s33_s15 = sadd.s32 1, %s996_s13  ;;  %p783_p0 = scmp.ge.s32.totalorder %s1000_s14, 1  ;;  %s1000_s14 = sphi %s1026_s14, %s14_s14   ;;  %s996_s13 = sphi %s1024_s13, %s1106_s13   ;;  %s992_s12 = sphi %s1022_s12, %s1105_s12  }
   0x3   : > { %p35_p1 = scmp.ge.s32.totalorder %s33_s15, 4  ;;  %p188_p2 = scmp.lt.s32.totalorder %s1000_s14, 5 }
   0x5   : > { %s1108_s15 = smov (%p35_p1, %s33_s15), 0  ;;  %p189_p3 = pnand %p783_p0, %p188_p2 }
   0x6   : > { %p239_p4 = scmp.lt.s32.totalorder (!%p189_p3), %s992_s12, 3 }
   0x7   : > { %192 = sbr.rel (%p189_p3) target bundleno = 200 (0xc8), region = 28 }
   0xc   : > { %s1110_s12 = smov (!%p239_p4, %s992_s12), 3 }
   0xd   : > { %s921_s16 = sshll.u32 %s1110_s12, 8  ;;  %s920_s20 = sshll.u32 %s1110_s12, 4 }
   0xe   : > { %s1046_s19 = scalar_lea.vmem %s1102_s1, %s921_s16  ;;  %s247_s23 = scalar_lea.vmem %s1101_s0, %s920_s20 }
   0xf   : > { %v929_v0 = vld [vmem:[%s1046_s19 + $0x38] sm:$0xff]  ;;  %v928_v4 = vld [vmem:[%s1046_s19 + $0x30] sm:$0xff]  ;;  %v927_v8 = vld [vmem:[%s1046_s19 + $0x28] sm:$0xff]  ;;  %s788_s24 = sshll.u32 %s1110_s12, 2  ;;  %s789_s28 = sshll.u32 %s1110_s12, 3 }
  0x10   : > { %v937_v1 = vld [vmem:[%s1046_s19 + $0x78] sm:$0xff]  ;;  %548 = vmatpush.bf16.msra.mxu0 %v929_v0  ;;  %v936_v5 = vld [vmem:[%s1046_s19 + $0x70] sm:$0xff]  ;;  %v935_v9 = vld [vmem:[%s1046_s19 + $0x68] sm:$0xff]  ;;  %s265_s27 = scalar_lea.vmem %s1103_s2, %s788_s24  ;;  %s275_s4 = scalar_lea.vmem %s1104_s3, %s789_s28 }
  0x11   : > { %v945_v2 = vld [vmem:[%s1046_s19 + $0xb8] sm:$0xff]  ;;  %561 = vmatpush.bf16.msra.mxu1 %v937_v1  ;;  %v944_v6 = vld [vmem:[%s1046_s19 + $0xb0] sm:$0xff]  ;;  %v943_v10 = vld [vmem:[%s1046_s19 + $0xa8] sm:$0xff] }
  0x12   : > { %v953_v3 = vld [vmem:[%s1046_s19 + $0xf8] sm:$0xff]  ;;  %574 = vmatpush.bf16.msra.mxu2 %v945_v2  ;;  %v952_v7 = vld [vmem:[%s1046_s19 + $0xf0] sm:$0xff]  ;;  %v951_v11 = vld [vmem:[%s1046_s19 + $0xe8] sm:$0xff] }
  0x13   : > { %587 = vmatpush.bf16.msra.mxu3 %v953_v3  ;;  %v926_v12 = vld [vmem:[%s1046_s19 + $0x20] sm:$0xff]  ;;  %v925_v16 = vld [vmem:[%s1046_s19 + $0x18] sm:$0xff]  ;;  %v924_v20 = vld [vmem:[%s1046_s19 + $0x10] sm:$0xff] }
  0x14   : > { %549 = vmatpush.bf16.msra.mxu0 %v928_v4  ;;  %v934_v13 = vld [vmem:[%s1046_s19 + $0x60] sm:$0xff]  ;;  %v933_v17 = vld [vmem:[%s1046_s19 + $0x58] sm:$0xff]  ;;  %v932_v21 = vld [vmem:[%s1046_s19 + $0x50] sm:$0xff] }
  0x15   : > { %562 = vmatpush.bf16.msra.mxu1 %v936_v5  ;;  %v942_v14 = vld [vmem:[%s1046_s19 + $0xa0] sm:$0xff]  ;;  %v941_v18 = vld [vmem:[%s1046_s19 + $0x98] sm:$0xff]  ;;  %v940_v22 = vld [vmem:[%s1046_s19 + $0x90] sm:$0xff] }
  0x16   : > { %575 = vmatpush.bf16.msra.mxu2 %v944_v6  ;;  %v950_v15 = vld [vmem:[%s1046_s19 + $0xe0] sm:$0xff]  ;;  %v949_v19 = vld [vmem:[%s1046_s19 + $0xd8] sm:$0xff]  ;;  %v948_v23 = vld [vmem:[%s1046_s19 + $0xd0] sm:$0xff] }
  0x17   : > { %588 = vmatpush.bf16.msra.mxu3 %v952_v7  ;;  %v923_v24 = vld [vmem:[%s1046_s19 + $0x8] sm:$0xff]  ;;  %v276_v26 = vld [vmem:[%s247_s23] sm:$0xff] }
  0x18   : > { %550 = vmatpush.bf16.msra.mxu0 %v927_v8  ;;  %v931_v25 = vld [vmem:[%s1046_s19 + $0x48] sm:$0xff]  ;;  %v344_v30 = vunpack.c.l.b16 %v276_v26  ;;  %v345_v31 = vunpack.c.h.b16 %v276_v26  ;;  %v922_v32 = vld [vmem:[%s1046_s19] sm:$0xff] }
  0x19   : > { %563 = vmatpush.bf16.msra.mxu1 %v935_v9  ;;  %v939_v27 = vld [vmem:[%s1046_s19 + $0x88] sm:$0xff]  ;;  %v930_v33 = vld [vmem:[%s1046_s19 + $0x40] sm:$0xff] }
  0x1a   : > { %576 = vmatpush.bf16.msra.mxu2 %v943_v10  ;;  %v947_v28 = vld [vmem:[%s1046_s19 + $0xc8] sm:$0xff]  ;;  %v938_v36 = vld [vmem:[%s1046_s19 + $0x80] sm:$0xff]  ;;  %v348_v38 = vpack.c.b16 %v344_v30, %v344_v30  ;;  %v349_v39 = vpack.c.b16 %v345_v31, %v345_v31 }
  0x1b   : > { %589 = vmatpush.bf16.msra.mxu3 %v951_v11  ;;  %v277_v29 = vld [vmem:[%s247_s23 + $0x8] sm:$0xff]  ;;  %v946_v37 = vld [vmem:[%s1046_s19 + $0xc0] sm:$0xff] }
  0x1c   : > { %551 = vmatpush.bf16.msra.mxu0 %v926_v12  ;;  %v346_v34 = vunpack.c.l.b16 %v277_v29  ;;  %v347_v35 = vunpack.c.h.b16 %v277_v29 }
  0x1d   : > { %564 = vmatpush.bf16.msra.mxu1 %v934_v13 }
  0x1e   : > { %577 = vmatpush.bf16.msra.mxu2 %v942_v14  ;;  %v350_v40 = vpack.c.b16 %v346_v34, %v346_v34  ;;  %v351_v41 = vpack.c.b16 %v347_v35, %v347_v35 }
  0x1f   : > { %590 = vmatpush.bf16.msra.mxu3 %v950_v15 }
  0x20   : > { %552 = vmatpush.bf16.msra.mxu0 %v925_v16 }
  0x21   : > { %565 = vmatpush.bf16.msra.mxu1 %v933_v17 }
  0x22   : > { %578 = vmatpush.bf16.msra.mxu2 %v941_v18 }
  0x23   : > { %591 = vmatpush.bf16.msra.mxu3 %v949_v19 }
  0x24   : > { %553 = vmatpush.bf16.msra.mxu0 %v924_v20 }
  0x25   : > { %566 = vmatpush.bf16.msra.mxu1 %v932_v21 }
  0x26   : > { %579 = vmatpush.bf16.msra.mxu2 %v940_v22 }
  0x27   : > { %592 = vmatpush.bf16.msra.mxu3 %v948_v23 }
  0x28   : > { %554 = vmatpush.bf16.msra.mxu0 %v923_v24 }
  0x29   : > { %567 = vmatpush.bf16.msra.mxu1 %v931_v25 }
  0x2a   : > { %580 = vmatpush.bf16.msra.mxu2 %v939_v27 }
  0x2b   : > { %593 = vmatpush.bf16.msra.mxu3 %v947_v28 }
  0x2c   : > { %555 = vmatpush.bf16.msra.mxu0 %v922_v32 }
  0x2d   : > { %568 = vmatpush.bf16.msra.mxu1 %v930_v33 }
  0x2e   : > { %581 = vmatpush.bf16.msra.mxu2 %v938_v36 }
  0x2f   : > { %594 = vmatpush.bf16.msra.mxu3 %v946_v37  ;;  %556 = vmatmul.bf16.vlgmr.msra.gmra.mxu0 %v348_v38 }
  0x30   : > { %569 = vmatmul.bf16.vlgmr.msra.gmra.mxu1 %v349_v39 }
  0x31   : > { %582 = vmatmul.bf16.vlgmr.msra.gmra.mxu2 %v350_v40 }
  0x32   : > { %595 = vmatmul.bf16.vlgmr.msra.gmra.mxu3 %v351_v41 }
  0xac   : > { %v557_v42 = vpop.f32.mrf.mxu0 }
  0xad   : > { %v570_v43 = vpop.f32.mrf.mxu1 }
  0xae   : > { %v571_v44 = vadd.f32 %v570_v43, %v557_v42 }
  0xb4   : > { %v583_v45 = vpop.f32.mrf.mxu2  ;;  %v559_v48 = vpop.f32.mrf.mxu0 }
  0xb5   : > { %v596_v46 = vpop.f32.mrf.mxu3  ;;  %v584_v47 = vadd.f32 %v583_v45, %v571_v44  ;;  %v572_v49 = vpop.f32.mrf.mxu1 }
  0xb7   : > { %v597_v50 = vadd.f32 %v596_v46, %v584_v47 }
  0xb9   : > { %v600_v51 = vpack.c.bf16 %v597_v50, %v597_v50  ;;  %v602_v52 = vrot.slane %v597_v50, 4  ;;  %v609_v53 = vmul.f32 %v597_v50, %v597_v50 }
  0xbb   : > { %601 = vst [vmem:[%s265_s27] sm:$0xf] %v600_v51  ;;  %v603_v54 = vadd.f32 %v602_v52, %v597_v50  ;;  %v610_v55 = vrot.slane %v609_v53, 4 }
  0xbc   : > { %v585_v56 = vpop.f32.mrf.mxu2 }
  0xbd   : > { %v598_v57 = vpop.f32.mrf.mxu3  ;;  %v604_v58 = vrot.slane %v603_v54, 2  ;;  %v611_v59 = vadd.f32 %v610_v55, %v609_v53 }
  0xbf   : > { %v605_v60 = vadd.f32 %v604_v58, %v603_v54  ;;  %v612_v61 = vrot.slane %v611_v59, 2 }
  0xc1   : > { %v606_v62 = vrot.slane %v605_v60, 1  ;;  %v613_v63 = vadd.f32 %v612_v61, %v611_v59 }
  0xc3   : > { %v607_v0 = vadd.f32 %v606_v62, %v605_v60  ;;  %v614_v1 = vrot.slane %v613_v63, 1 }
  0xc5   : > { %608 = vst [vmem:[%s275_s4] sm:$0x1] %v607_v0  ;;  %v615_v2 = vadd.f32 %v614_v1, %v613_v63 }
  0xc7   : > { %616 = vst [vmem:[%s275_s4 + $0x1] sm:$0x1] %v615_v2 }
  0xc8 PF: > { %s14_s14 = sadd.s32 1, %s1000_s14   ;;  %s1105_s12 = smov %s996_s13 }
  0xc9   : > { %p11_p5 = scmp.ge.s32.totalorder %s14_s14, 6   ;;  %s1106_s13 = smov %s1108_s15 }
  0xcb   :  { %13 = sbr.rel (!%p11_p5) target bundleno = 2 (0x2), region = 73 }

// kernel: font_unet_forward.39
= control target key start
LH: loop header
LB: loop body
LE: loop exit
PB: predicated region body
PF: predicated region fallthrough
CT: control target
= control target key end

     0   :  { %s1166_s12 = smov 0   ;;  %s1168_s13 = smov 0   ;;  %s1263_s0 = inlined_call_operand.vmem [shape: bf16[4,32,512], index: 0, kind: input, shape index: {}]   ;;  %s1264_s1 = inlined_call_operand.vmem [shape: bf16[4,512,128], index: 1, kind: input, shape index: {}]   ;;  %s1265_s2 = inlined_call_operand.vmem [shape: bf16[4,32,128], index: 2, kind: output, shape index: {0}]   ;;  %s1266_s3 = inlined_call_operand.vmem [shape: f32[4,1,8,128], index: 3, kind: output, shape index: {1}]  }
   0x1   :  { %s1170_s14 = smov 0  }
   0x2 LB: > { %s33_s15 = sadd.s32 1, %s1140_s13  ;;  %p874_p0 = scmp.ge.s32.totalorder %s1144_s14, 1  ;;  %s1144_s14 = sphi %s1170_s14, %s14_s14   ;;  %s1140_s13 = sphi %s1168_s13, %s1268_s13   ;;  %s1136_s12 = sphi %s1166_s12, %s1267_s12  }
   0x3   : > { %p35_p1 = scmp.ge.s32.totalorder %s33_s15, 4  ;;  %p190_p2 = scmp.lt.s32.totalorder %s1144_s14, 5 }
   0x5   : > { %s1270_s15 = smov (%p35_p1, %s33_s15), 0  ;;  %p191_p3 = pnand %p874_p0, %p190_p2 }
   0x6   : > { %p245_p4 = scmp.lt.s32.totalorder (!%p191_p3), %s1136_s12, 3 }
   0x7   : > { %194 = sbr.rel (%p191_p3) target bundleno = 226 (0xe2), region = 28 }
   0xc   : > { %s1272_s12 = smov (!%p245_p4, %s1136_s12), 3 }
   0xd   : > { %s1045_s16 = sshll.u32 %s1272_s12, 8  ;;  %s1044_s20 = sshll.u32 %s1272_s12, 6 }
   0xe   : > { %s1190_s19 = scalar_lea.vmem %s1264_s1, %s1045_s16  ;;  %s1222_s23 = scalar_lea.vmem %s1263_s0, %s1044_s20 }
   0xf   : > { %v1062_v0 = vld [vmem:[%s1190_s19 + $0x38] sm:$0xff]  ;;  %v1061_v4 = vld [vmem:[%s1190_s19 + $0x30] sm:$0xff]  ;;  %v1060_v8 = vld [vmem:[%s1190_s19 + $0x28] sm:$0xff]  ;;  %s1046_s24 = sshll.u32 %s1272_s12, 4  ;;  %s881_s28 = sshll.u32 %s1272_s12, 3 }
  0x10   : > { %v1070_v1 = vld [vmem:[%s1190_s19 + $0x78] sm:$0xff]  ;;  %590 = vmatpush.bf16.msra.mxu0 %v1062_v0  ;;  %v1069_v5 = vld [vmem:[%s1190_s19 + $0x70] sm:$0xff]  ;;  %v1068_v9 = vld [vmem:[%s1190_s19 + $0x68] sm:$0xff]  ;;  %s274_s27 = scalar_lea.vmem %s1265_s2, %s1046_s24  ;;  %s285_s4 = scalar_lea.vmem %s1266_s3, %s881_s28 }
  0x11   : > { %v1078_v2 = vld [vmem:[%s1190_s19 + $0xb8] sm:$0xff]  ;;  %609 = vmatpush.bf16.msra.mxu1 %v1070_v1  ;;  %v1077_v6 = vld [vmem:[%s1190_s19 + $0xb0] sm:$0xff]  ;;  %v1076_v10 = vld [vmem:[%s1190_s19 + $0xa8] sm:$0xff] }
  0x12   : > { %v1086_v3 = vld [vmem:[%s1190_s19 + $0xf8] sm:$0xff]  ;;  %628 = vmatpush.bf16.msra.mxu2 %v1078_v2  ;;  %v1085_v7 = vld [vmem:[%s1190_s19 + $0xf0] sm:$0xff]  ;;  %v1084_v11 = vld [vmem:[%s1190_s19 + $0xe8] sm:$0xff] }
  0x13   : > { %647 = vmatpush.bf16.msra.mxu3 %v1086_v3  ;;  %v1059_v12 = vld [vmem:[%s1190_s19 + $0x20] sm:$0xff]  ;;  %v1058_v16 = vld [vmem:[%s1190_s19 + $0x18] sm:$0xff]  ;;  %v1057_v20 = vld [vmem:[%s1190_s19 + $0x10] sm:$0xff] }
  0x14   : > { %591 = vmatpush.bf16.msra.mxu0 %v1061_v4  ;;  %v1067_v13 = vld [vmem:[%s1190_s19 + $0x60] sm:$0xff]  ;;  %v1066_v17 = vld [vmem:[%s1190_s19 + $0x58] sm:$0xff]  ;;  %v1065_v21 = vld [vmem:[%s1190_s19 + $0x50] sm:$0xff] }
  0x15   : > { %610 = vmatpush.bf16.msra.mxu1 %v1069_v5  ;;  %v1075_v14 = vld [vmem:[%s1190_s19 + $0xa0] sm:$0xff]  ;;  %v1074_v18 = vld [vmem:[%s1190_s19 + $0x98] sm:$0xff]  ;;  %v1073_v22 = vld [vmem:[%s1190_s19 + $0x90] sm:$0xff] }
  0x16   : > { %629 = vmatpush.bf16.msra.mxu2 %v1077_v6  ;;  %v1083_v15 = vld [vmem:[%s1190_s19 + $0xe0] sm:$0xff]  ;;  %v1082_v19 = vld [vmem:[%s1190_s19 + $0xd8] sm:$0xff]  ;;  %v1081_v23 = vld [vmem:[%s1190_s19 + $0xd0] sm:$0xff] }
  0x17   : > { %648 = vmatpush.bf16.msra.mxu3 %v1085_v7  ;;  %v1056_v24 = vld [vmem:[%s1190_s19 + $0x8] sm:$0xff]  ;;  %v1055_v28 = vld [vmem:[%s1190_s19] sm:$0xff]  ;;  %v1049_v33 = vld [vmem:[%s1222_s23 + $0xc] sm:$0xf0] }
  0x18   : > { %592 = vmatpush.bf16.msra.mxu0 %v1060_v8  ;;  %v1064_v25 = vld [vmem:[%s1190_s19 + $0x48] sm:$0xff]  ;;  %v1063_v29 = vld [vmem:[%s1190_s19 + $0x40] sm:$0xff]  ;;  %v886_v35 = vld [vmem:[%s1222_s23 + $0x10] sm:$0xf0] }
  0x19   : > { %611 = vmatpush.bf16.msra.mxu1 %v1068_v9  ;;  %v1072_v26 = vld [vmem:[%s1190_s19 + $0x88] sm:$0xff]  ;;  %v1071_v30 = vld [vmem:[%s1190_s19 + $0x80] sm:$0xff]  ;;  %v1050_v37 = vld [vmem:[%s1222_s23 + $0x14] sm:$0xf0] }
  0x1a   : > { %630 = vmatpush.bf16.msra.mxu2 %v1076_v10  ;;  %v1080_v27 = vld [vmem:[%s1190_s19 + $0xc8] sm:$0xff]  ;;  %v1079_v31 = vld [vmem:[%s1190_s19 + $0xc0] sm:$0xff]  ;;  %v894_v39 = vld [vmem:[%s1222_s23 + $0x18] sm:$0xf0] }
  0x1b   : > { %649 = vmatpush.bf16.msra.mxu3 %v1084_v11  ;;  %v884_v32 = vld [vmem:[%s1222_s23] sm:$0xf]  ;;  %v1047_v34 = vld [vmem:[%s1222_s23 + $0x4] sm:$0xf]  ;;  %v892_v36 = vld [vmem:[%s1222_s23 + $0x8] sm:$0xf] }
  0x1c   : > { %593 = vmatpush.bf16.msra.mxu0 %v1059_v12  ;;  %v1048_v38 = vld [vmem:[%s1222_s23 + $0xc] sm:$0xf]  ;;  %v885_v40 = vor.u32 %v1049_v33, %v884_v32  ;;  %v889_v41 = vor.u32 %v1047_v34, %v886_v35  ;;  %v893_v42 = vor.u32 %v1050_v37, %v892_v36  ;;  %v900_v44 = vld [vmem:[%s1222_s23 + $0x20] sm:$0xf]  ;;  %v1053_v45 = vld [vmem:[%s1222_s23 + $0x2c] sm:$0xf0] }
  0x1d   : > { %612 = vmatpush.bf16.msra.mxu1 %v1067_v13  ;;  %v897_v43 = vor.u32 %v1048_v38, %v894_v39  ;;  %v1051_v46 = vld [vmem:[%s1222_s23 + $0x24] sm:$0xf]  ;;  %v902_v47 = vld [vmem:[%s1222_s23 + $0x30] sm:$0xf0]  ;;  %v908_v48 = vld [vmem:[%s1222_s23 + $0x28] sm:$0xf]  ;;  %v901_v52 = vor.u32 %v1053_v45, %v900_v44 }
  0x1e   : > { %631 = vmatpush.bf16.msra.mxu2 %v1075_v14  ;;  %v1054_v49 = vld [vmem:[%s1222_s23 + $0x34] sm:$0xf0]  ;;  %v1052_v50 = vld [vmem:[%s1222_s23 + $0x2c] sm:$0xf]  ;;  %v910_v51 = vld [vmem:[%s1222_s23 + $0x38] sm:$0xf0]  ;;  %v905_v53 = vor.u32 %v1051_v46, %v902_v47 }
  0x1f   : > { %650 = vmatpush.bf16.msra.mxu3 %v1083_v15  ;;  %v909_v54 = vor.u32 %v1054_v49, %v908_v48  ;;  %v913_v55 = vor.u32 %v1052_v50, %v910_v51 }
  0x20   : > { %594 = vmatpush.bf16.msra.mxu0 %v1058_v16 }
  0x21   : > { %613 = vmatpush.bf16.msra.mxu1 %v1066_v17 }
  0x22   : > { %632 = vmatpush.bf16.msra.mxu2 %v1074_v18 }
  0x23   : > { %651 = vmatpush.bf16.msra.mxu3 %v1082_v19 }
  0x24   : > { %595 = vmatpush.bf16.msra.mxu0 %v1057_v20 }
  0x25   : > { %614 = vmatpush.bf16.msra.mxu1 %v1065_v21 }
  0x26   : > { %633 = vmatpush.bf16.msra.mxu2 %v1073_v22 }
  0x27   : > { %652 = vmatpush.bf16.msra.mxu3 %v1081_v23 }
  0x28   : > { %596 = vmatpush.bf16.msra.mxu0 %v1056_v24 }
  0x29   : > { %615 = vmatpush.bf16.msra.mxu1 %v1064_v25 }
  0x2a   : > { %634 = vmatpush.bf16.msra.mxu2 %v1072_v26 }
  0x2b   : > { %653 = vmatpush.bf16.msra.mxu3 %v1080_v27 }
  0x2c   : > { %597 = vmatpush.bf16.msra.mxu0 %v1055_v28 }
  0x2d   : > { %616 = vmatpush.bf16.msra.mxu1 %v1063_v29 }
  0x2e   : > { %635 = vmatpush.bf16.msra.mxu2 %v1071_v30 }
  0x2f   : > { %654 = vmatpush.bf16.msra.mxu3 %v1079_v31  ;;  %598 = vmatmul.bf16.vlgmr.msra.gmra.mxu0 %v885_v40 }
  0x30   : > { %617 = vmatmul.bf16.vlgmr.msra.gmra.mxu1 %v889_v41 }
  0x31   : > { %636 = vmatmul.bf16.vlgmr.msra.gmra.mxu2 %v893_v42 }
  0x32   : > { %655 = vmatmul.bf16.vlgmr.msra.gmra.mxu3 %v897_v43 }
  0x3f   : > { %603 = vmatmul.bf16.gmra.mxu0 %v901_v52 }
  0x40   : > { %622 = vmatmul.bf16.gmra.mxu1 %v905_v53 }
  0x41   : > { %641 = vmatmul.bf16.gmra.mxu2 %v909_v54 }
  0x42   : > { %660 = vmatmul.bf16.gmra.mxu3 %v913_v55 }
  0xac   : > { %v599_v56 = vpop.f32.mrf.mxu0 }
  0xad   : > { %v618_v57 = vpop.f32.mrf.mxu1 }
  0xae   : > { %v619_v62 = vadd.f32 %v618_v57, %v599_v56 }
  0xb4   : > { %v637_v58 = vpop.f32.mrf.mxu2  ;;  %v601_v60 = vpop.f32.mrf.mxu0 }
  0xb5   : > { %v656_v59 = vpop.f32.mrf.mxu3  ;;  %v620_v61 = vpop.f32.mrf.mxu1  ;;  %v638_v63 = vadd.f32 %v637_v58, %v619_v62 }
  0xb6   : > { %v621_v0 = vadd.f32 %v620_v61, %v601_v60 }
  0xb7   : > { %v657_v6 = vadd.f32 %v656_v59, %v638_v63 }
  0xb9   : > { %v684_v19 = vmul.f32 %v657_v6, %v657_v6 }
  0xbc   : > { %v639_v1 = vpop.f32.mrf.mxu2  ;;  %v604_v4 = vpop.f32.mrf.mxu0 }
  0xbd   : > { %v658_v2 = vpop.f32.mrf.mxu3  ;;  %v640_v3 = vadd.f32 %v639_v1, %v621_v0  ;;  %v623_v5 = vpop.f32.mrf.mxu1 }
  0xbe   : > { %v624_v9 = vadd.f32 %v623_v5, %v604_v4 }
  0xbf   : > { %v659_v7 = vadd.f32 %v658_v2, %v640_v3 }
  0xc1   : > { %v1090_v8 = vpack.c.bf16 %v659_v7, %v657_v6  ;;  %v685_v16 = vmul.f32 %v659_v7, %v659_v7  ;;  %v674_v20 = vadd.f32 %v659_v7, %v657_v6 }
  0xc3   : > { %1091 = vst [vmem:[%s274_s27] sm:$0xff] %v1090_v8   ;;  %v688_v24 = vadd.f32 %v685_v16, %v684_v19 }
  0xc4   : > { %v642_v10 = vpop.f32.mrf.mxu2  ;;  %v606_v13 = vpop.f32.mrf.mxu0 }
  0xc5   : > { %v661_v11 = vpop.f32.mrf.mxu3  ;;  %v643_v12 = vadd.f32 %v642_v10, %v624_v9  ;;  %v625_v14 = vpop.f32.mrf.mxu1 }
  0xc6   : > { %v626_v17 = vadd.f32 %v625_v14, %v606_v13 }
  0xc7   : > { %v662_v15 = vadd.f32 %v661_v11, %v643_v12 }
  0xc9   : > { %v686_v21 = vmul.f32 %v662_v15, %v662_v15  ;;  %v675_v25 = vadd.f32 %v674_v20, %v662_v15 }
  0xcb   : > { %v689_v27 = vadd.f32 %v688_v24, %v686_v21 }
  0xcc   : > { %v644_v18 = vpop.f32.mrf.mxu2 }
  0xcd   : > { %v645_v22 = vadd.f32 %v644_v18, %v626_v17  ;;  %v663_v23 = vpop.f32.mrf.mxu3 }
  0xcf   : > { %v664_v26 = vadd.f32 %v663_v23, %v645_v22 }
  0xd1   : > { %v1095_v28 = vpack.c.bf16 %v664_v26, %v662_v15  ;;  %v676_v29 = vadd.f32 %v675_v25, %v664_v26  ;;  %v687_v30 = vmul.f32 %v664_v26, %v664_v26 }
  0xd3   : > { %1097 = vst [vmem:[%s274_s27 + $0x8] sm:$0xff] %v1095_v28   ;;  %v677_v31 = vrot.slane %v676_v29, 4  ;;  %v690_v32 = vadd.f32 %v689_v27, %v687_v30 }
  0xd5   : > { %v678_v33 = vadd.f32 %v677_v31, %v676_v29  ;;  %v691_v34 = vrot.slane %v690_v32, 4 }
  0xd7   : > { %v679_v35 = vrot.slane %v678_v33, 2  ;;  %v692_v36 = vadd.f32 %v691_v34, %v690_v32 }
  0xd9   : > { %v680_v37 = vadd.f32 %v679_v35, %v678_v33  ;;  %v693_v38 = vrot.slane %v692_v36, 2 }
  0xdb   : > { %v681_v39 = vrot.slane %v680_v37, 1  ;;  %v694_v40 = vadd.f32 %v693_v38, %v692_v36 }
  0xdd   : > { %v682_v41 = vadd.f32 %v681_v39, %v680_v37  ;;  %v695_v42 = vrot.slane %v694_v40, 1 }
  0xdf   : > { %683 = vst [vmem:[%s285_s4] sm:$0x1] %v682_v41  ;;  %v696_v43 = vadd.f32 %v695_v42, %v694_v40 }
  0xe1   : > { %697 = vst [vmem:[%s285_s4 + $0x1] sm:$0x1] %v696_v43 }
  0xe2 PF: > { %s14_s14 = sadd.s32 1, %s1144_s14   ;;  %s1267_s12 = smov %s1140_s13 }
  0xe3   : > { %p11_p5 = scmp.ge.s32.totalorder %s14_s14, 6   ;;  %s1268_s13 = smov %s1270_s15 }
  0xe5   :  { %13 = sbr.rel (!%p11_p5) target bundleno = 2 (0x2), region = 73 }

// kernel: font_unet_forward.40
= control target key start
LH: loop header
LB: loop body
LE: loop exit
PB: predicated region body
PF: predicated region fallthrough
CT: control target
= control target key end

     0   :  { %s336_s0 = inlined_call_operand.vmem [shape: bf16[128,128], index: 0, kind: input, shape index: {}]   ;;  %s337_s1 = inlined_call_operand.vmem [shape: f32[1,128], index: 1, kind: input, shape index: {}]   ;;  %s338_s2 = inlined_call_operand.vmem [shape: f32[1,128], index: 2, kind: input, shape index: {}]   ;;  %s339_s3 = inlined_call_operand.vmem [shape: bf16[128,128], index: 3, kind: output, shape index: {}]  }
   0x1   :  { %v139_v0 = vld [vmem:[%s336_s0] sm:$0xff]   ;;  %v210_v5 = vld [vmem:[%s336_s0 + $0x8] sm:$0xff]   ;;  %v211_v8 = vld [vmem:[%s336_s0 + $0x10] sm:$0xff]  }
   0x2   :  { %v252_v1 = vld [vmem:[%s337_s1] ss:$0 sm:$0xff]  ;;  %v140_v2 = vunpack.c.l.bf16 %v139_v0  ;;  %v141_v3 = vunpack.c.h.bf16 %v139_v0  ;;  %v144_v6 = vunpack.c.l.bf16 %v210_v5  ;;  %v145_v7 = vunpack.c.h.bf16 %v210_v5  ;;  %v212_v9 = vld [vmem:[%s336_s0 + $0x18] sm:$0xff]   ;;  %v214_v35 = vld [vmem:[%s336_s0 + $0x28] sm:$0xff]  }
   0x3   :  { %v257_v4 = vld [vmem:[%s338_s2] ss:$0 sm:$0xff]  ;;  %v148_v12 = vunpack.c.l.bf16 %v211_v8  ;;  %v149_v13 = vunpack.c.h.bf16 %v211_v8  ;;  %v152_v16 = vunpack.c.l.bf16 %v212_v9  ;;  %v153_v17 = vunpack.c.h.bf16 %v212_v9  ;;  %v215_v40 = vld [vmem:[%s336_s0 + $0x30] sm:$0xff]   ;;  %v216_v45 = vld [vmem:[%s336_s0 + $0x38] sm:$0xff]  }
   0x4   :  { %v50_v10 = vmul.f32 %v252_v1, %v140_v2  ;;  %v51_v11 = vmul.f32 %v252_v1, %v141_v3  ;;  %v52_v14 = vmul.f32 %v252_v1, %v144_v6  ;;  %v53_v15 = vmul.f32 %v252_v1, %v145_v7  ;;  %v213_v26 = vld [vmem:[%s336_s0 + $0x20] sm:$0xff]  }
   0x5   :  { %v54_v20 = vmul.f32 %v252_v1, %v148_v12  ;;  %v55_v21 = vmul.f32 %v252_v1, %v149_v13  ;;  %v56_v24 = vmul.f32 %v252_v1, %v152_v16  ;;  %v57_v25 = vmul.f32 %v252_v1, %v153_v17 }
   0x6   :  { %v70_v18 = vadd.f32 %v257_v4, %v50_v10  ;;  %v71_v19 = vadd.f32 %v257_v4, %v51_v11  ;;  %v72_v22 = vadd.f32 %v257_v4, %v52_v14  ;;  %v73_v23 = vadd.f32 %v257_v4, %v53_v15 }
   0x7   :  { %v74_v29 = vadd.f32 %v257_v4, %v54_v20  ;;  %v75_v30 = vadd.f32 %v257_v4, %v55_v21  ;;  %v76_v33 = vadd.f32 %v257_v4, %v56_v24  ;;  %v77_v34 = vadd.f32 %v257_v4, %v57_v25 }
   0x8   :  { %v86_v27 = vmax.f32 %v70_v18, 0.0  ;;  %v87_v28 = vmax.f32 %v71_v19, 0.0  ;;  %v88_v31 = vmax.f32 %v72_v22, 0.0  ;;  %v89_v32 = vmax.f32 %v73_v23, 0.0 }
   0x9   :  { %v90_v37 = vmax.f32 %v74_v29, 0.0  ;;  %v91_v38 = vmax.f32 %v75_v30, 0.0  ;;  %v156_v39 = vunpack.c.l.bf16 %v213_v26  ;;  %v92_v42 = vmax.f32 %v76_v33, 0.0 }
   0xa   :  { %v173_v36 = vpack.c.bf16 %v87_v28, %v86_v27  ;;  %v178_v41 = vpack.c.bf16 %v89_v32, %v88_v31  ;;  %v93_v43 = vmax.f32 %v77_v34, 0.0  ;;  %v157_v44 = vunpack.c.h.bf16 %v213_v26 }
   0xb   :  { %v183_v46 = vpack.c.bf16 %v91_v38, %v90_v37  ;;  %v58_v47 = vmul.f32 %v252_v1, %v156_v39  ;;  %v160_v48 = vunpack.c.l.bf16 %v214_v35  ;;  %v161_v49 = vunpack.c.h.bf16 %v214_v35 }
   0xc   :  { %174 = vst [vmem:[%s339_s3] sm:$0xff] %v173_v36   ;;  %v188_v50 = vpack.c.bf16 %v93_v43, %v92_v42  ;;  %v59_v51 = vmul.f32 %v252_v1, %v157_v44  ;;  %v164_v52 = vunpack.c.l.bf16 %v215_v40  ;;  %v165_v53 = vunpack.c.h.bf16 %v215_v40 }
   0xd   :  { %217 = vst [vmem:[%s339_s3 + $0x8] sm:$0xff] %v178_v41   ;;  %v78_v54 = vadd.f32 %v257_v4, %v58_v47  ;;  %v60_v55 = vmul.f32 %v252_v1, %v160_v48  ;;  %v61_v56 = vmul.f32 %v252_v1, %v161_v49  ;;  %v168_v57 = vunpack.c.l.bf16 %v216_v45 }
   0xe   :  { %218 = vst [vmem:[%s339_s3 + $0x10] sm:$0xff] %v183_v46   ;;  %v79_v58 = vadd.f32 %v257_v4, %v59_v51  ;;  %v62_v59 = vmul.f32 %v252_v1, %v164_v52  ;;  %v63_v60 = vmul.f32 %v252_v1, %v165_v53  ;;  %v169_v61 = vunpack.c.h.bf16 %v216_v45 }
   0xf   :  { %219 = vst [vmem:[%s339_s3 + $0x18] sm:$0xff] %v188_v50   ;;  %v94_v62 = vmax.f32 %v78_v54, 0.0  ;;  %v80_v63 = vadd.f32 %v257_v4, %v60_v55  ;;  %v81_v0 = vadd.f32 %v257_v4, %v61_v56  ;;  %v64_v2 = vmul.f32 %v252_v1, %v168_v57 }
  0x10   :  { %v95_v3 = vmax.f32 %v79_v58, 0.0  ;;  %v82_v5 = vadd.f32 %v257_v4, %v62_v59  ;;  %v83_v6 = vadd.f32 %v257_v4, %v63_v60  ;;  %v65_v7 = vmul.f32 %v252_v1, %v169_v61 }
  0x11   :  { %v96_v8 = vmax.f32 %v80_v63, 0.0  ;;  %v97_v9 = vmax.f32 %v81_v0, 0.0  ;;  %v84_v10 = vadd.f32 %v257_v4, %v64_v2 }
  0x12   :  { %v193_v11 = vpack.c.bf16 %v95_v3, %v94_v62  ;;  %v98_v12 = vmax.f32 %v82_v5, 0.0  ;;  %v99_v13 = vmax.f32 %v83_v6, 0.0  ;;  %v85_v14 = vadd.f32 %v257_v4, %v65_v7 }
  0x13   :  { %v198_v15 = vpack.c.bf16 %v97_v9, %v96_v8  ;;  %v100_v16 = vmax.f32 %v84_v10, 0.0 }
  0x14   :  { %220 = vst [vmem:[%s339_s3 + $0x20] sm:$0xff] %v193_v11   ;;  %v203_v17 = vpack.c.bf16 %v99_v13, %v98_v12  ;;  %v101_v18 = vmax.f32 %v85_v14, 0.0 }
  0x15   :  { %221 = vst [vmem:[%s339_s3 + $0x28] sm:$0xff] %v198_v15  }
  0x16   :  { %222 = vst [vmem:[%s339_s3 + $0x30] sm:$0xff] %v203_v17   ;;  %v208_v1 = vpack.c.bf16 %v101_v18, %v100_v16 }
  0x18   :  { %223 = vst [vmem:[%s339_s3 + $0x38] sm:$0xff] %v208_v1  }

// kernel: font_unet_forward.41
= control target key start
LH: loop header
LB: loop body
LE: loop exit
PB: predicated region body
PF: predicated region fallthrough
CT: control target
= control target key end

     0   :  { %s1180_s12 = smov 0   ;;  %s1182_s13 = smov 0   ;;  %s1314_s0 = inlined_call_operand.vmem [shape: bf16[4,128,256], index: 0, kind: input, shape index: {}]   ;;  %s1315_s1 = inlined_call_operand.vmem [shape: bf16[4,256,128], index: 1, kind: input, shape index: {}]   ;;  %s1316_s2 = inlined_call_operand.vmem [shape: bf16[4,128,128], index: 2, kind: output, shape index: {0}]   ;;  %s1317_s3 = inlined_call_operand.vmem [shape: f32[4,1,8,128], index: 3, kind: output, shape index: {1}]  }
   0x1   :  { %s1184_s14 = smov 0  }
   0x2 LB: > { %s33_s15 = sadd.s32 1, %s1154_s13  ;;  %p876_p0 = scmp.ge.s32.totalorder %s1158_s14, 1  ;;  %s1158_s14 = sphi %s1184_s14, %s14_s14   ;;  %s1154_s13 = sphi %s1182_s13, %s1319_s13   ;;  %s1150_s12 = sphi %s1180_s12, %s1318_s12  }
   0x3   : > { %p35_p1 = scmp.ge.s32.totalorder %s33_s15, 4  ;;  %p190_p2 = scmp.lt.s32.totalorder %s1158_s14, 5 }
   0x5   : > { %s1321_s15 = smov (%p35_p1, %s33_s15), 0  ;;  %p191_p3 = pnand %p876_p0, %p190_p2 }
   0x6   : > { %p245_p4 = scmp.lt.s32.totalorder (!%p191_p3), %s1150_s12, 3 }
   0x7   : > { %194 = sbr.rel (%p191_p3) target bundleno = 265 (0x109), region = 28 }
   0xc   : > { %s1323_s12 = smov (!%p245_p4, %s1150_s12), 3 }
   0xd   : > { %s1014_s16 = sshll.u32 %s1323_s12, 7  ;;  %s1016_s23 = sshll.u32 %s1323_s12, 6 }
   0xe   : > { %s1206_s19 = scalar_lea.vmem %s1315_s1, %s1014_s16  ;;  %s1227_s22 = scalar_lea.vmem %s1314_s0, %s1014_s16 }
   0xf   : > { %v1040_v0 = vld [vmem:[%s1206_s19 + $0x38] sm:$0xff]  ;;  %v1039_v2 = vld [vmem:[%s1206_s19 + $0x30] sm:$0xff]  ;;  %v1038_v4 = vld [vmem:[%s1206_s19 + $0x28] sm:$0xff]  ;;  %s1267_s26 = scalar_lea.vmem %s1316_s2, %s1016_s23  ;;  %s883_s27 = sshll.u32 %s1323_s12, 3 }
  0x10   : > { %v1048_v1 = vld [vmem:[%s1206_s19 + $0x78] sm:$0xff]  ;;  %510 = vmatpush.bf16.msra.mxu0 %v1040_v0  ;;  %v1047_v3 = vld [vmem:[%s1206_s19 + $0x70] sm:$0xff]  ;;  %1096 = vmatpush.bf16.msra.mxu2 %v1040_v0  ;;  %v1046_v5 = vld [vmem:[%s1206_s19 + $0x68] sm:$0xff]  ;;  %s285_s30 = scalar_lea.vmem %s1317_s3, %s883_s27 }
  0x11   : > { %559 = vmatpush.bf16.msra.mxu1 %v1048_v1  ;;  %1104 = vmatpush.bf16.msra.mxu3 %v1048_v1  ;;  %v1037_v6 = vld [vmem:[%s1206_s19 + $0x20] sm:$0xff]  ;;  %v1036_v8 = vld [vmem:[%s1206_s19 + $0x18] sm:$0xff]  ;;  %v1035_v10 = vld [vmem:[%s1206_s19 + $0x10] sm:$0xff] }
  0x12   : > { %v1045_v7 = vld [vmem:[%s1206_s19 + $0x60] sm:$0xff]  ;;  %v1044_v9 = vld [vmem:[%s1206_s19 + $0x58] sm:$0xff]  ;;  %v1043_v11 = vld [vmem:[%s1206_s19 + $0x50] sm:$0xff] }
  0x13   : > { %v1034_v12 = vld [vmem:[%s1206_s19 + $0x8] sm:$0xff]  ;;  %v1033_v14 = vld [vmem:[%s1206_s19] sm:$0xff]  ;;  %v894_v28 = vld [vmem:[%s1227_s22 + $0x10] sm:$0xf] }
  0x14   : > { %511 = vmatpush.bf16.msra.mxu0 %v1039_v2  ;;  %1097 = vmatpush.bf16.msra.mxu2 %v1039_v2  ;;  %v1042_v13 = vld [vmem:[%s1206_s19 + $0x48] sm:$0xff]  ;;  %v1041_v15 = vld [vmem:[%s1206_s19 + $0x40] sm:$0xff]  ;;  %v1020_v29 = vld [vmem:[%s1227_s22 + $0x14] sm:$0xf0] }
  0x15   : > { %560 = vmatpush.bf16.msra.mxu1 %v1047_v3  ;;  %1105 = vmatpush.bf16.msra.mxu3 %v1047_v3  ;;  %v886_v16 = vld [vmem:[%s1227_s22] sm:$0xf]  ;;  %v1018_v17 = vld [vmem:[%s1227_s22 + $0x4] sm:$0xf0]  ;;  %v1017_v18 = vld [vmem:[%s1227_s22 + $0x4] sm:$0xf]  ;;  %v895_v36 = vor.u32 %v1020_v29, %v894_v28 }
  0x16   : > { %v888_v19 = vld [vmem:[%s1227_s22 + $0x8] sm:$0xf0]  ;;  %v918_v20 = vld [vmem:[%s1227_s22 + $0x40] sm:$0xf]  ;;  %v1026_v21 = vld [vmem:[%s1227_s22 + $0x44] sm:$0xf0]  ;;  %v887_v24 = vor.u32 %v1018_v17, %v886_v16 }
  0x17   : > { %v1025_v22 = vld [vmem:[%s1227_s22 + $0x44] sm:$0xf]  ;;  %v920_v23 = vld [vmem:[%s1227_s22 + $0x48] sm:$0xf0]  ;;  %v891_v25 = vor.u32 %v1017_v18, %v888_v19  ;;  %v919_v26 = vor.u32 %v1026_v21, %v918_v20  ;;  %v1019_v30 = vld [vmem:[%s1227_s22 + $0x14] sm:$0xf] }
  0x18   : > { %512 = vmatpush.bf16.msra.mxu0 %v1038_v4  ;;  %1098 = vmatpush.bf16.msra.mxu2 %v1038_v4  ;;  %v923_v27 = vor.u32 %v1025_v22, %v920_v23  ;;  %v896_v31 = vld [vmem:[%s1227_s22 + $0x18] sm:$0xf0]  ;;  %v926_v32 = vld [vmem:[%s1227_s22 + $0x50] sm:$0xf]  ;;  %v1028_v33 = vld [vmem:[%s1227_s22 + $0x54] sm:$0xf0] }
  0x19   : > { %561 = vmatpush.bf16.msra.mxu1 %v1046_v5  ;;  %1106 = vmatpush.bf16.msra.mxu3 %v1046_v5  ;;  %v1027_v34 = vld [vmem:[%s1227_s22 + $0x54] sm:$0xf]  ;;  %v928_v35 = vld [vmem:[%s1227_s22 + $0x58] sm:$0xf0]  ;;  %v899_v37 = vor.u32 %v1019_v30, %v896_v31  ;;  %v927_v38 = vor.u32 %v1028_v33, %v926_v32  ;;  %v902_v40 = vld [vmem:[%s1227_s22 + $0x20] sm:$0xf] }
  0x1a   : > { %v931_v39 = vor.u32 %v1027_v34, %v928_v35  ;;  %v1022_v41 = vld [vmem:[%s1227_s22 + $0x24] sm:$0xf0]  ;;  %v1021_v42 = vld [vmem:[%s1227_s22 + $0x24] sm:$0xf]  ;;  %v904_v43 = vld [vmem:[%s1227_s22 + $0x28] sm:$0xf0] }
  0x1b   : > { %v934_v44 = vld [vmem:[%s1227_s22 + $0x60] sm:$0xf]  ;;  %v1030_v45 = vld [vmem:[%s1227_s22 + $0x64] sm:$0xf0]  ;;  %v1029_v46 = vld [vmem:[%s1227_s22 + $0x64] sm:$0xf]  ;;  %v903_v48 = vor.u32 %v1022_v41, %v902_v40  ;;  %v907_v49 = vor.u32 %v1021_v42, %v904_v43 }
  0x1c   : > { %513 = vmatpush.bf16.msra.mxu0 %v1037_v6  ;;  %1099 = vmatpush.bf16.msra.mxu2 %v1037_v6  ;;  %v936_v47 = vld [vmem:[%s1227_s22 + $0x68] sm:$0xf0]  ;;  %v935_v50 = vor.u32 %v1030_v45, %v934_v44  ;;  %v910_v52 = vld [vmem:[%s1227_s22 + $0x30] sm:$0xf]  ;;  %v1024_v53 = vld [vmem:[%s1227_s22 + $0x34] sm:$0xf0] }
  0x1d   : > { %562 = vmatpush.bf16.msra.mxu1 %v1045_v7  ;;  %1107 = vmatpush.bf16.msra.mxu3 %v1045_v7  ;;  %v939_v51 = vor.u32 %v1029_v46, %v936_v47  ;;  %v1023_v54 = vld [vmem:[%s1227_s22 + $0x34] sm:$0xf]  ;;  %v912_v55 = vld [vmem:[%s1227_s22 + $0x38] sm:$0xf0]  ;;  %v942_v56 = vld [vmem:[%s1227_s22 + $0x70] sm:$0xf]  ;;  %v911_v60 = vor.u32 %v1024_v53, %v910_v52 }
  0x1e   : > { %v1032_v57 = vld [vmem:[%s1227_s22 + $0x74] sm:$0xf0]  ;;  %v1031_v58 = vld [vmem:[%s1227_s22 + $0x74] sm:$0xf]  ;;  %v944_v59 = vld [vmem:[%s1227_s22 + $0x78] sm:$0xf0]  ;;  %v915_v61 = vor.u32 %v1023_v54, %v912_v55 }
  0x1f   : > { %v943_v62 = vor.u32 %v1032_v57, %v942_v56  ;;  %v947_v63 = vor.u32 %v1031_v58, %v944_v59 }
  0x20   : > { %514 = vmatpush.bf16.msra.mxu0 %v1036_v8  ;;  %1100 = vmatpush.bf16.msra.mxu2 %v1036_v8 }
  0x21   : > { %563 = vmatpush.bf16.msra.mxu1 %v1044_v9  ;;  %1108 = vmatpush.bf16.msra.mxu3 %v1044_v9 }
  0x24   : > { %515 = vmatpush.bf16.msra.mxu0 %v1035_v10  ;;  %1101 = vmatpush.bf16.msra.mxu2 %v1035_v10 }
  0x25   : > { %564 = vmatpush.bf16.msra.mxu1 %v1043_v11  ;;  %1109 = vmatpush.bf16.msra.mxu3 %v1043_v11 }
  0x28   : > { %516 = vmatpush.bf16.msra.mxu0 %v1034_v12  ;;  %1102 = vmatpush.bf16.msra.mxu2 %v1034_v12 }
  0x29   : > { %565 = vmatpush.bf16.msra.mxu1 %v1042_v13  ;;  %1110 = vmatpush.bf16.msra.mxu3 %v1042_v13 }
  0x2c   : > { %517 = vmatpush.bf16.msra.mxu0 %v1033_v14  ;;  %1103 = vmatpush.bf16.msra.mxu2 %v1033_v14 }
  0x2d   : > { %566 = vmatpush.bf16.msra.mxu1 %v1041_v15  ;;  %1111 = vmatpush.bf16.msra.mxu3 %v1041_v15 }
  0x2f   : > { %518 = vmatmul.bf16.vlgmr.msra.gmra.mxu0 %v887_v24  ;;  %538 = vmatmul.bf16.vlgmr.msra.gmra.mxu2 %v919_v26 }
  0x30   : > { %567 = vmatmul.bf16.vlgmr.msra.gmra.mxu1 %v891_v25  ;;  %587 = vmatmul.bf16.vlgmr.msra.gmra.mxu3 %v923_v27 }
  0x3f   : > { %523 = vmatmul.bf16.gmra.mxu0 %v895_v36  ;;  %543 = vmatmul.bf16.gmra.mxu2 %v927_v38 }
  0x40   : > { %572 = vmatmul.bf16.gmra.mxu1 %v899_v37  ;;  %592 = vmatmul.bf16.gmra.mxu3 %v931_v39 }
  0x4f   : > { %528 = vmatmul.bf16.gmra.mxu0 %v903_v48  ;;  %548 = vmatmul.bf16.gmra.mxu2 %v935_v50 }
  0x50   : > { %577 = vmatmul.bf16.gmra.mxu1 %v907_v49  ;;  %597 = vmatmul.bf16.gmra.mxu3 %v939_v51 }
  0x5f   : > { %533 = vmatmul.bf16.gmra.mxu0 %v911_v60  ;;  %553 = vmatmul.bf16.gmra.mxu2 %v943_v62 }
  0x60   : > { %582 = vmatmul.bf16.gmra.mxu1 %v915_v61  ;;  %602 = vmatmul.bf16.gmra.mxu3 %v947_v63 }
  0xac   : > { %v519_v0 = vpop.f32.mrf.mxu0 }
  0xad   : > { %v568_v1 = vpop.f32.mrf.mxu1 }
  0xae   : > { %v569_v6 = vadd.f32 %v568_v1, %v519_v0 }
  0xb0   : > { %v662_v39 = vmul.f32 %v569_v6, %v569_v6 }
  0xb2   : > { %v539_v2 = vpop.f32.mrf.mxu2 }
  0xb3   : > { %v588_v3 = vpop.f32.mrf.mxu3 }
  0xb4   : > { %v521_v4 = vpop.f32.mrf.mxu0  ;;  %v1270_v9 = vadd.f32 %v588_v3, %v539_v2 }
  0xb5   : > { %v570_v5 = vpop.f32.mrf.mxu1 }
  0xb6   : > { %v571_v7 = vadd.f32 %v570_v5, %v521_v4 }
  0xb8   : > { %v1052_v8 = vpack.c.bf16 %v571_v7, %v569_v6  ;;  %v663_v37 = vmul.f32 %v571_v7, %v571_v7  ;;  %v640_v40 = vadd.f32 %v571_v7, %v569_v6 }
  0xba   : > { %1053 = vst [vmem:[%s1267_s26] sm:$0xff] %v1052_v8   ;;  %v541_v10 = vpop.f32.mrf.mxu2  ;;  %v678_v47 = vadd.f32 %v663_v37, %v662_v39  ;;  %v670_v8 = vmul.f32 %v1270_v9, %v1270_v9 }
  0xbb   : > { %v590_v11 = vpop.f32.mrf.mxu3 }
  0xbc   : > { %v524_v12 = vpop.f32.mrf.mxu0  ;;  %v1272_v14 = vadd.f32 %v590_v11, %v541_v10 }
  0xbd   : > { %v573_v13 = vpop.f32.mrf.mxu1 }
  0xbe   : > { %v1072_v15 = vpack.c.bf16 %v1272_v14, %v1270_v9  ;;  %v574_v20 = vadd.f32 %v573_v13, %v524_v12  ;;  %v671_v13 = vmul.f32 %v1272_v14, %v1272_v14 }
  0xc0   : > { %1092 = vst [vmem:[%s1267_s26 + $0x20] sm:$0xff] %v1072_v15   ;;  %v664_v41 = vmul.f32 %v574_v20, %v574_v20  ;;  %v641_v48 = vadd.f32 %v640_v40, %v574_v20 }
  0xc2   : > { %v544_v16 = vpop.f32.mrf.mxu2  ;;  %v679_v51 = vadd.f32 %v678_v47, %v664_v41 }
  0xc3   : > { %v593_v17 = vpop.f32.mrf.mxu3 }
  0xc4   : > { %v526_v18 = vpop.f32.mrf.mxu0  ;;  %v1278_v23 = vadd.f32 %v593_v17, %v544_v16 }
  0xc5   : > { %v575_v19 = vpop.f32.mrf.mxu1 }
  0xc6   : > { %v576_v21 = vadd.f32 %v575_v19, %v526_v18 }
  0xc8   : > { %v1057_v22 = vpack.c.bf16 %v576_v21, %v574_v20  ;;  %v665_v49 = vmul.f32 %v576_v21, %v576_v21  ;;  %v642_v52 = vadd.f32 %v641_v48, %v576_v21  ;;  %v672_v20 = vmul.f32 %v1278_v23, %v1278_v23 }
  0xca   : > { %1089 = vst [vmem:[%s1267_s26 + $0x8] sm:$0xff] %v1057_v22   ;;  %v546_v24 = vpop.f32.mrf.mxu2  ;;  %v680_v55 = vadd.f32 %v679_v51, %v665_v49 }
  0xcb   : > { %v595_v25 = vpop.f32.mrf.mxu3 }
  0xcc   : > { %v529_v26 = vpop.f32.mrf.mxu0  ;;  %v1280_v28 = vadd.f32 %v595_v25, %v546_v24 }
  0xcd   : > { %v578_v27 = vpop.f32.mrf.mxu1 }
  0xce   : > { %v1077_v29 = vpack.c.bf16 %v1280_v28, %v1278_v23  ;;  %v579_v34 = vadd.f32 %v578_v27, %v529_v26 }
  0xd0   : > { %1093 = vst [vmem:[%s1267_s26 + $0x28] sm:$0xff] %v1077_v29   ;;  %v666_v53 = vmul.f32 %v579_v34, %v579_v34  ;;  %v643_v56 = vadd.f32 %v642_v52, %v579_v34 }
  0xd2   : > { %v549_v30 = vpop.f32.mrf.mxu2  ;;  %v681_v58 = vadd.f32 %v680_v55, %v666_v53 }
  0xd3   : > { %v598_v31 = vpop.f32.mrf.mxu3 }
  0xd4   : > { %v531_v32 = vpop.f32.mrf.mxu0  ;;  %v599_v38 = vadd.f32 %v598_v31, %v549_v30 }
  0xd5   : > { %v580_v33 = vpop.f32.mrf.mxu1 }
  0xd6   : > { %v581_v35 = vadd.f32 %v580_v33, %v531_v32  ;;  %v674_v27 = vmul.f32 %v599_v38, %v599_v38 }
  0xd8   : > { %v1062_v36 = vpack.c.bf16 %v581_v35, %v579_v34  ;;  %v667_v57 = vmul.f32 %v581_v35, %v581_v35  ;;  %v644_v59 = vadd.f32 %v643_v56, %v581_v35 }
  0xda   : > { %1090 = vst [vmem:[%s1267_s26 + $0x10] sm:$0xff] %v1062_v36   ;;  %v551_v42 = vpop.f32.mrf.mxu2  ;;  %v682_v1 = vadd.f32 %v681_v58, %v667_v57 }
  0xdb   : > { %v600_v43 = vpop.f32.mrf.mxu3 }
  0xdc   : > { %v534_v44 = vpop.f32.mrf.mxu0  ;;  %v601_v46 = vadd.f32 %v600_v43, %v551_v42 }
  0xdd   : > { %v583_v45 = vpop.f32.mrf.mxu1 }
  0xde   : > { %v1082_v50 = vpack.c.bf16 %v601_v46, %v599_v38  ;;  %v584_v54 = vadd.f32 %v583_v45, %v534_v44  ;;  %v675_v30 = vmul.f32 %v601_v46, %v601_v46 }
  0xe0   : > { %1094 = vst [vmem:[%s1267_s26 + $0x30] sm:$0xff] %v1082_v50   ;;  %v668_v60 = vmul.f32 %v584_v54, %v584_v54  ;;  %v645_v2 = vadd.f32 %v644_v59, %v584_v54 }
  0xe2   : > { %v554_v61 = vpop.f32.mrf.mxu2  ;;  %v683_v4 = vadd.f32 %v682_v1, %v668_v60 }
  0xe3   : > { %v603_v62 = vpop.f32.mrf.mxu3 }
  0xe4   : > { %v536_v63 = vpop.f32.mrf.mxu0  ;;  %v604_v12 = vadd.f32 %v603_v62, %v554_v61 }
  0xe5   : > { %v585_v0 = vpop.f32.mrf.mxu1 }
  0xe6   : > { %v586_v3 = vadd.f32 %v585_v0, %v536_v63  ;;  %v676_v34 = vmul.f32 %v604_v12, %v604_v12 }
  0xe8   : > { %v1067_v5 = vpack.c.bf16 %v586_v3, %v584_v54  ;;  %v646_v6 = vadd.f32 %v645_v2, %v586_v3  ;;  %v669_v7 = vmul.f32 %v586_v3, %v586_v3 }
  0xea   : > { %1091 = vst [vmem:[%s1267_s26 + $0x18] sm:$0xff] %v1067_v5   ;;  %v647_v10 = vadd.f32 %v646_v6, %v1270_v9  ;;  %v684_v11 = vadd.f32 %v683_v4, %v669_v7  ;;  %v556_v17 = vpop.f32.mrf.mxu2  ;;  %v673_v9 = vmul.f32 %v1280_v28, %v1280_v28 }
  0xeb   : > { %v605_v18 = vpop.f32.mrf.mxu3 }
  0xec   : > { %v648_v15 = vadd.f32 %v647_v10, %v1272_v14  ;;  %v685_v16 = vadd.f32 %v684_v11, %v670_v8  ;;  %v606_v19 = vadd.f32 %v605_v18, %v556_v17 }
  0xee   : > { %v649_v21 = vadd.f32 %v648_v15, %v1278_v23  ;;  %v686_v22 = vadd.f32 %v685_v16, %v671_v13  ;;  %v1087_v24 = vpack.c.bf16 %v606_v19, %v604_v12  ;;  %v677_v37 = vmul.f32 %v606_v19, %v606_v19 }
  0xf0   : > { %v687_v25 = vadd.f32 %v686_v22, %v672_v20  ;;  %v650_v26 = vadd.f32 %v649_v21, %v1280_v28  ;;  %1095 = vst [vmem:[%s1267_s26 + $0x38] sm:$0xff] %v1087_v24  }
  0xf2   : > { %v651_v14 = vadd.f32 %v650_v26, %v599_v38  ;;  %v688_v29 = vadd.f32 %v687_v25, %v673_v9 }
  0xf4   : > { %v652_v31 = vadd.f32 %v651_v14, %v601_v46  ;;  %v689_v32 = vadd.f32 %v688_v29, %v674_v27 }
  0xf6   : > { %v653_v33 = vadd.f32 %v652_v31, %v604_v12  ;;  %v690_v35 = vadd.f32 %v689_v32, %v675_v30 }
  0xf8   : > { %v691_v23 = vadd.f32 %v690_v35, %v676_v34  ;;  %v654_v36 = vadd.f32 %v653_v33, %v606_v19 }
  0xfa   : > { %v655_v39 = vrot.slane %v654_v36, 4  ;;  %v692_v40 = vadd.f32 %v691_v23, %v677_v37 }
  0xfc   : > { %v656_v41 = vadd.f32 %v655_v39, %v654_v36  ;;  %v693_v42 = vrot.slane %v692_v40, 4 }
  0xfe   : > { %v657_v43 = vrot.slane %v656_v41, 2  ;;  %v694_v28 = vadd.f32 %v693_v42, %v692_v40 }
 0x100   : > { %v658_v44 = vadd.f32 %v657_v43, %v656_v41  ;;  %v695_v38 = vrot.slane %v694_v28, 2 }
 0x102   : > { %v659_v45 = vrot.slane %v658_v44, 1  ;;  %v696_v47 = vadd.f32 %v695_v38, %v694_v28 }
 0x104   : > { %v660_v46 = vadd.f32 %v659_v45, %v658_v44  ;;  %v697_v48 = vrot.slane %v696_v47, 1 }
 0x106   : > { %661 = vst [vmem:[%s285_s30] sm:$0x1] %v660_v46  ;;  %v698_v49 = vadd.f32 %v697_v48, %v696_v47 }
 0x108   : > { %699 = vst [vmem:[%s285_s30 + $0x1] sm:$0x1] %v698_v49 }
 0x109 PF: > { %s14_s14 = sadd.s32 1, %s1158_s14   ;;  %s1318_s12 = smov %s1154_s13 }
 0x10a   : > { %p11_p5 = scmp.ge.s32.totalorder %s14_s14, 6   ;;  %s1319_s13 = smov %s1321_s15 }
 0x10c   :  { %13 = sbr.rel (!%p11_p5) target bundleno = 2 (0x2), region = 73 }

// kernel: font_unet_forward.42
= control target key start
LH: loop header
LB: loop body
LE: loop exit
PB: predicated region body
PF: predicated region fallthrough
CT: control target
= control target key end

     0   :  { %s1176_s0 = inlined_call_operand.vmem [shape: bf16[512,128], index: 0, kind: input, shape index: {}]   ;;  %s1177_s1 = inlined_call_operand.vmem [shape: f32[1,128], index: 1, kind: input, shape index: {}]   ;;  %s1178_s2 = inlined_call_operand.vmem [shape: f32[1,128], index: 2, kind: input, shape index: {}]   ;;  %s1179_s3 = inlined_call_operand.vmem [shape: bf16[512,128], index: 3, kind: output, shape index: {}]  }
   0x1   :  { %v475_v0 = vld [vmem:[%s1176_s0] sm:$0xff]   ;;  %v762_v5 = vld [vmem:[%s1176_s0 + $0x8] sm:$0xff]   ;;  %v763_v8 = vld [vmem:[%s1176_s0 + $0x10] sm:$0xff]  }
   0x2   :  { %v852_v1 = vld [vmem:[%s1177_s1] ss:$0 sm:$0xff]  ;;  %v476_v2 = vunpack.c.l.bf16 %v475_v0  ;;  %v477_v3 = vunpack.c.h.bf16 %v475_v0  ;;  %v480_v6 = vunpack.c.l.bf16 %v762_v5  ;;  %v481_v7 = vunpack.c.h.bf16 %v762_v5  ;;  %v764_v9 = vld [vmem:[%s1176_s0 + $0x18] sm:$0xff]   ;;  %v766_v35 = vld [vmem:[%s1176_s0 + $0x28] sm:$0xff]  }
   0x3   :  { %v857_v4 = vld [vmem:[%s1178_s2] ss:$0 sm:$0xff]  ;;  %v484_v12 = vunpack.c.l.bf16 %v763_v8  ;;  %v485_v13 = vunpack.c.h.bf16 %v763_v8  ;;  %v488_v16 = vunpack.c.l.bf16 %v764_v9  ;;  %v489_v17 = vunpack.c.h.bf16 %v764_v9  ;;  %v767_v40 = vld [vmem:[%s1176_s0 + $0x30] sm:$0xff]   ;;  %v768_v45 = vld [vmem:[%s1176_s0 + $0x38] sm:$0xff]  }
   0x4   :  { %v146_v10 = vmul.f32 %v852_v1, %v476_v2  ;;  %v147_v11 = vmul.f32 %v852_v1, %v477_v3  ;;  %v148_v14 = vmul.f32 %v852_v1, %v480_v6  ;;  %v149_v15 = vmul.f32 %v852_v1, %v481_v7  ;;  %v765_v26 = vld [vmem:[%s1176_s0 + $0x20] sm:$0xff]  }
   0x5   :  { %v150_v20 = vmul.f32 %v852_v1, %v484_v12  ;;  %v151_v21 = vmul.f32 %v852_v1, %v485_v13  ;;  %v152_v24 = vmul.f32 %v852_v1, %v488_v16  ;;  %v153_v25 = vmul.f32 %v852_v1, %v489_v17  ;;  %v769_v62 = vld [vmem:[%s1176_s0 + $0x40] sm:$0xff]   ;;  %v770_v13 = vld [vmem:[%s1176_s0 + $0x48] sm:$0xff]  }
   0x6   :  { %v214_v18 = vadd.f32 %v857_v4, %v146_v10  ;;  %v215_v19 = vadd.f32 %v857_v4, %v147_v11  ;;  %v216_v22 = vadd.f32 %v857_v4, %v148_v14  ;;  %v217_v23 = vadd.f32 %v857_v4, %v149_v15 }
   0x7   :  { %v218_v29 = vadd.f32 %v857_v4, %v150_v20  ;;  %v219_v30 = vadd.f32 %v857_v4, %v151_v21  ;;  %v220_v33 = vadd.f32 %v857_v4, %v152_v24  ;;  %v221_v34 = vadd.f32 %v857_v4, %v153_v25 }
   0x8   :  { %v278_v27 = vmax.f32 %v214_v18, 0.0  ;;  %v279_v28 = vmax.f32 %v215_v19, 0.0  ;;  %v280_v31 = vmax.f32 %v216_v22, 0.0  ;;  %v281_v32 = vmax.f32 %v217_v23, 0.0  ;;  %v771_v18 = vld [vmem:[%s1176_s0 + $0x50] sm:$0xff]   ;;  %v772_v23 = vld [vmem:[%s1176_s0 + $0x58] sm:$0xff]  }
   0x9   :  { %v282_v37 = vmax.f32 %v218_v29, 0.0  ;;  %v283_v38 = vmax.f32 %v219_v30, 0.0  ;;  %v492_v39 = vunpack.c.l.bf16 %v765_v26  ;;  %v284_v42 = vmax.f32 %v220_v33, 0.0 }
   0xa   :  { %v605_v36 = vpack.c.bf16 %v279_v28, %v278_v27  ;;  %v610_v41 = vpack.c.bf16 %v281_v32, %v280_v31  ;;  %v285_v43 = vmax.f32 %v221_v34, 0.0  ;;  %v493_v44 = vunpack.c.h.bf16 %v765_v26 }
   0xb   :  { %v615_v46 = vpack.c.bf16 %v283_v38, %v282_v37  ;;  %v154_v47 = vmul.f32 %v852_v1, %v492_v39  ;;  %v496_v48 = vunpack.c.l.bf16 %v766_v35  ;;  %v497_v49 = vunpack.c.h.bf16 %v766_v35 }
   0xc   :  { %606 = vst [vmem:[%s1179_s3] sm:$0xff] %v605_v36   ;;  %v620_v50 = vpack.c.bf16 %v285_v43, %v284_v42  ;;  %v155_v51 = vmul.f32 %v852_v1, %v493_v44  ;;  %v500_v52 = vunpack.c.l.bf16 %v767_v40  ;;  %v501_v53 = vunpack.c.h.bf16 %v767_v40  ;;  %v773_v36 = vld [vmem:[%s1176_s0 + $0x60] sm:$0xff]  }
   0xd   :  { %793 = vst [vmem:[%s1179_s3 + $0x8] sm:$0xff] %v610_v41   ;;  %v222_v54 = vadd.f32 %v857_v4, %v154_v47  ;;  %v156_v55 = vmul.f32 %v852_v1, %v496_v48  ;;  %v157_v56 = vmul.f32 %v852_v1, %v497_v49  ;;  %v504_v57 = vunpack.c.l.bf16 %v768_v45 }
   0xe   :  { %794 = vst [vmem:[%s1179_s3 + $0x10] sm:$0xff] %v615_v46   ;;  %v223_v58 = vadd.f32 %v857_v4, %v155_v51  ;;  %v158_v59 = vmul.f32 %v852_v1, %v500_v52  ;;  %v159_v60 = vmul.f32 %v852_v1, %v501_v53  ;;  %v505_v61 = vunpack.c.h.bf16 %v768_v45  ;;  %v774_v53 = vld [vmem:[%s1176_s0 + $0x68] sm:$0xff]  }
   0xf   :  { %795 = vst [vmem:[%s1179_s3 + $0x18] sm:$0xff] %v620_v50   ;;  %v286_v63 = vmax.f32 %v222_v54, 0.0  ;;  %v224_v0 = vadd.f32 %v857_v4, %v156_v55  ;;  %v225_v2 = vadd.f32 %v857_v4, %v157_v56  ;;  %v160_v3 = vmul.f32 %v852_v1, %v504_v57 }
  0x10   :  { %v287_v5 = vmax.f32 %v223_v58, 0.0  ;;  %v226_v6 = vadd.f32 %v857_v4, %v158_v59  ;;  %v227_v7 = vadd.f32 %v857_v4, %v159_v60  ;;  %v161_v8 = vmul.f32 %v852_v1, %v505_v61  ;;  %v775_v58 = vld [vmem:[%s1176_s0 + $0x70] sm:$0xff]  }
  0x11   :  { %v288_v9 = vmax.f32 %v224_v0, 0.0  ;;  %v289_v10 = vmax.f32 %v225_v2, 0.0  ;;  %v228_v11 = vadd.f32 %v857_v4, %v160_v3  ;;  %v508_v12 = vunpack.c.l.bf16 %v769_v62 }
  0x12   :  { %v625_v14 = vpack.c.bf16 %v287_v5, %v286_v63  ;;  %v290_v15 = vmax.f32 %v226_v6, 0.0  ;;  %v291_v16 = vmax.f32 %v227_v7, 0.0  ;;  %v229_v17 = vadd.f32 %v857_v4, %v161_v8  ;;  %v776_v63 = vld [vmem:[%s1176_s0 + $0x78] sm:$0xff]  }
  0x13   :  { %v630_v19 = vpack.c.bf16 %v289_v10, %v288_v9  ;;  %v292_v20 = vmax.f32 %v228_v11, 0.0  ;;  %v509_v21 = vunpack.c.h.bf16 %v769_v62  ;;  %v162_v22 = vmul.f32 %v852_v1, %v508_v12 }
  0x14   :  { %796 = vst [vmem:[%s1179_s3 + $0x20] sm:$0xff] %v625_v14   ;;  %v635_v24 = vpack.c.bf16 %v291_v16, %v290_v15  ;;  %v293_v25 = vmax.f32 %v229_v17, 0.0  ;;  %v512_v26 = vunpack.c.l.bf16 %v770_v13  ;;  %v513_v27 = vunpack.c.h.bf16 %v770_v13  ;;  %v777_v14 = vld [vmem:[%s1176_s0 + $0x80] sm:$0xff]  }
  0x15   :  { %797 = vst [vmem:[%s1179_s3 + $0x28] sm:$0xff] %v630_v19   ;;  %v163_v28 = vmul.f32 %v852_v1, %v509_v21  ;;  %v230_v29 = vadd.f32 %v857_v4, %v162_v22  ;;  %v516_v30 = vunpack.c.l.bf16 %v771_v18  ;;  %v517_v31 = vunpack.c.h.bf16 %v771_v18 }
  0x16   :  { %798 = vst [vmem:[%s1179_s3 + $0x30] sm:$0xff] %v635_v24   ;;  %v640_v32 = vpack.c.bf16 %v293_v25, %v292_v20  ;;  %v164_v33 = vmul.f32 %v852_v1, %v512_v26  ;;  %v165_v34 = vmul.f32 %v852_v1, %v513_v27  ;;  %v520_v35 = vunpack.c.l.bf16 %v772_v23  ;;  %v778_v27 = vld [vmem:[%s1176_s0 + $0x88] sm:$0xff]  }
  0x17   :  { %v231_v37 = vadd.f32 %v857_v4, %v163_v28  ;;  %v294_v38 = vmax.f32 %v230_v29, 0.0  ;;  %v166_v39 = vmul.f32 %v852_v1, %v516_v30  ;;  %v167_v40 = vmul.f32 %v852_v1, %v517_v31 }
  0x18   :  { %799 = vst [vmem:[%s1179_s3 + $0x38] sm:$0xff] %v640_v32   ;;  %v232_v41 = vadd.f32 %v857_v4, %v164_v33  ;;  %v233_v42 = vadd.f32 %v857_v4, %v165_v34  ;;  %v521_v43 = vunpack.c.h.bf16 %v772_v23  ;;  %v168_v44 = vmul.f32 %v852_v1, %v520_v35 }
  0x19   :  { %v295_v45 = vmax.f32 %v231_v37, 0.0  ;;  %v234_v46 = vadd.f32 %v857_v4, %v166_v39  ;;  %v235_v47 = vadd.f32 %v857_v4, %v167_v40  ;;  %v524_v48 = vunpack.c.l.bf16 %v773_v36 }
  0x1a   :  { %v296_v49 = vmax.f32 %v232_v41, 0.0  ;;  %v297_v50 = vmax.f32 %v233_v42, 0.0  ;;  %v169_v51 = vmul.f32 %v852_v1, %v521_v43  ;;  %v236_v52 = vadd.f32 %v857_v4, %v168_v44  ;;  %v780_v41 = vld [vmem:[%s1176_s0 + $0x98] sm:$0xff]  }
  0x1b   :  { %v645_v54 = vpack.c.bf16 %v295_v45, %v294_v38  ;;  %v298_v55 = vmax.f32 %v234_v46, 0.0  ;;  %v299_v56 = vmax.f32 %v235_v47, 0.0  ;;  %v525_v57 = vunpack.c.h.bf16 %v773_v36  ;;  %v779_v36 = vld [vmem:[%s1176_s0 + $0x90] sm:$0xff]  }
  0x1c   :  { %v650_v59 = vpack.c.bf16 %v297_v50, %v296_v49  ;;  %v237_v60 = vadd.f32 %v857_v4, %v169_v51  ;;  %v300_v61 = vmax.f32 %v236_v52, 0.0  ;;  %v170_v62 = vmul.f32 %v852_v1, %v524_v48 }
  0x1d   :  { %800 = vst [vmem:[%s1179_s3 + $0x40] sm:$0xff] %v645_v54   ;;  %v655_v0 = vpack.c.bf16 %v299_v56, %v298_v55  ;;  %v171_v2 = vmul.f32 %v852_v1, %v525_v57  ;;  %v528_v3 = vunpack.c.l.bf16 %v774_v53  ;;  %v529_v5 = vunpack.c.h.bf16 %v774_v53  ;;  %v781_v54 = vld [vmem:[%s1176_s0 + $0xa0] sm:$0xff]  }
  0x1e   :  { %801 = vst [vmem:[%s1179_s3 + $0x48] sm:$0xff] %v650_v59   ;;  %v301_v6 = vmax.f32 %v237_v60, 0.0  ;;  %v238_v7 = vadd.f32 %v857_v4, %v170_v62  ;;  %v532_v8 = vunpack.c.l.bf16 %v775_v58  ;;  %v533_v9 = vunpack.c.h.bf16 %v775_v58 }
  0x1f   :  { %802 = vst [vmem:[%s1179_s3 + $0x50] sm:$0xff] %v655_v0   ;;  %v239_v10 = vadd.f32 %v857_v4, %v171_v2  ;;  %v172_v11 = vmul.f32 %v852_v1, %v528_v3  ;;  %v173_v12 = vmul.f32 %v852_v1, %v529_v5  ;;  %v536_v13 = vunpack.c.l.bf16 %v776_v63  ;;  %v782_v5 = vld [vmem:[%s1176_s0 + $0xa8] sm:$0xff]  }
  0x20   :  { %v660_v15 = vpack.c.bf16 %v301_v6, %v300_v61  ;;  %v302_v16 = vmax.f32 %v238_v7, 0.0  ;;  %v174_v17 = vmul.f32 %v852_v1, %v532_v8  ;;  %v175_v18 = vmul.f32 %v852_v1, %v533_v9 }
  0x21   :  { %v303_v19 = vmax.f32 %v239_v10, 0.0  ;;  %v240_v20 = vadd.f32 %v857_v4, %v172_v11  ;;  %v241_v21 = vadd.f32 %v857_v4, %v173_v12  ;;  %v537_v22 = vunpack.c.h.bf16 %v776_v63 }
  0x22   :  { %803 = vst [vmem:[%s1179_s3 + $0x58] sm:$0xff] %v660_v15   ;;  %v242_v23 = vadd.f32 %v857_v4, %v174_v17  ;;  %v243_v24 = vadd.f32 %v857_v4, %v175_v18  ;;  %v176_v25 = vmul.f32 %v852_v1, %v536_v13  ;;  %v540_v26 = vunpack.c.l.bf16 %v777_v14 }
  0x23   :  { %v665_v28 = vpack.c.bf16 %v303_v19, %v302_v16  ;;  %v304_v29 = vmax.f32 %v240_v20, 0.0  ;;  %v305_v30 = vmax.f32 %v241_v21, 0.0  ;;  %v177_v31 = vmul.f32 %v852_v1, %v537_v22 }
  0x24   :  { %v306_v32 = vmax.f32 %v242_v23, 0.0  ;;  %v307_v33 = vmax.f32 %v243_v24, 0.0  ;;  %v244_v34 = vadd.f32 %v857_v4, %v176_v25  ;;  %v541_v35 = vunpack.c.h.bf16 %v777_v14  ;;  %v783_v14 = vld [vmem:[%s1176_s0 + $0xb0] sm:$0xff]   ;;  %v784_v23 = vld [vmem:[%s1176_s0 + $0xb8] sm:$0xff]  }
  0x25   :  { %804 = vst [vmem:[%s1179_s3 + $0x60] sm:$0xff] %v665_v28   ;;  %v670_v37 = vpack.c.bf16 %v305_v30, %v304_v29  ;;  %v245_v38 = vadd.f32 %v857_v4, %v177_v31  ;;  %v178_v39 = vmul.f32 %v852_v1, %v540_v26  ;;  %v544_v40 = vunpack.c.l.bf16 %v778_v27 }
  0x26   :  { %v675_v42 = vpack.c.bf16 %v307_v33, %v306_v32  ;;  %v308_v43 = vmax.f32 %v244_v34, 0.0  ;;  %v179_v44 = vmul.f32 %v852_v1, %v541_v35  ;;  %v545_v45 = vunpack.c.h.bf16 %v778_v27  ;;  %v785_v32 = vld [vmem:[%s1176_s0 + $0xc0] sm:$0xff]  }
  0x27   :  { %805 = vst [vmem:[%s1179_s3 + $0x68] sm:$0xff] %v670_v37   ;;  %v309_v46 = vmax.f32 %v245_v38, 0.0  ;;  %v246_v47 = vadd.f32 %v857_v4, %v178_v39  ;;  %v180_v48 = vmul.f32 %v852_v1, %v544_v40  ;;  %v548_v49 = vunpack.c.l.bf16 %v779_v36 }
  0x28   :  { %806 = vst [vmem:[%s1179_s3 + $0x70] sm:$0xff] %v675_v42   ;;  %v247_v50 = vadd.f32 %v857_v4, %v179_v44  ;;  %v181_v51 = vmul.f32 %v852_v1, %v545_v45  ;;  %v549_v52 = vunpack.c.h.bf16 %v779_v36  ;;  %v552_v53 = vunpack.c.l.bf16 %v780_v41  ;;  %v786_v45 = vld [vmem:[%s1176_s0 + $0xc8] sm:$0xff]  }
  0x29   :  { %v680_v55 = vpack.c.bf16 %v309_v46, %v308_v43  ;;  %v310_v56 = vmax.f32 %v246_v47, 0.0  ;;  %v248_v57 = vadd.f32 %v857_v4, %v180_v48  ;;  %v182_v58 = vmul.f32 %v852_v1, %v548_v49 }
  0x2a   :  { %v311_v59 = vmax.f32 %v247_v50, 0.0  ;;  %v249_v60 = vadd.f32 %v857_v4, %v181_v51  ;;  %v183_v61 = vmul.f32 %v852_v1, %v549_v52  ;;  %v553_v62 = vunpack.c.h.bf16 %v780_v41 }
  0x2b   :  { %807 = vst [vmem:[%s1179_s3 + $0x78] sm:$0xff] %v680_v55   ;;  %v312_v63 = vmax.f32 %v248_v57, 0.0  ;;  %v250_v0 = vadd.f32 %v857_v4, %v182_v58  ;;  %v184_v2 = vmul.f32 %v852_v1, %v552_v53  ;;  %v556_v3 = vunpack.c.l.bf16 %v781_v54 }
  0x2c   :  { %v685_v6 = vpack.c.bf16 %v311_v59, %v310_v56  ;;  %v313_v7 = vmax.f32 %v249_v60, 0.0  ;;  %v251_v8 = vadd.f32 %v857_v4, %v183_v61  ;;  %v185_v9 = vmul.f32 %v852_v1, %v553_v62 }
  0x2d   :  { %v314_v10 = vmax.f32 %v250_v0, 0.0  ;;  %v252_v11 = vadd.f32 %v857_v4, %v184_v2  ;;  %v557_v12 = vunpack.c.h.bf16 %v781_v54  ;;  %v186_v13 = vmul.f32 %v852_v1, %v556_v3  ;;  %v787_v54 = vld [vmem:[%s1176_s0 + $0xd0] sm:$0xff]  }
  0x2e   :  { %808 = vst [vmem:[%s1179_s3 + $0x80] sm:$0xff] %v685_v6   ;;  %v690_v15 = vpack.c.bf16 %v313_v7, %v312_v63  ;;  %v315_v16 = vmax.f32 %v251_v8, 0.0  ;;  %v253_v17 = vadd.f32 %v857_v4, %v185_v9  ;;  %v560_v18 = vunpack.c.l.bf16 %v782_v5  ;;  %v788_v63 = vld [vmem:[%s1176_s0 + $0xd8] sm:$0xff]  }
  0x2f   :  { %v316_v19 = vmax.f32 %v252_v11, 0.0  ;;  %v187_v20 = vmul.f32 %v852_v1, %v557_v12  ;;  %v254_v21 = vadd.f32 %v857_v4, %v186_v13  ;;  %v561_v22 = vunpack.c.h.bf16 %v782_v5 }
  0x30   :  { %809 = vst [vmem:[%s1179_s3 + $0x88] sm:$0xff] %v690_v15   ;;  %v695_v24 = vpack.c.bf16 %v315_v16, %v314_v10  ;;  %v317_v25 = vmax.f32 %v253_v17, 0.0  ;;  %v188_v26 = vmul.f32 %v852_v1, %v560_v18  ;;  %v564_v27 = vunpack.c.l.bf16 %v783_v14  ;;  %v789_v10 = vld [vmem:[%s1176_s0 + $0xe0] sm:$0xff]  }
  0x31   :  { %v255_v28 = vadd.f32 %v857_v4, %v187_v20  ;;  %v318_v29 = vmax.f32 %v254_v21, 0.0  ;;  %v189_v30 = vmul.f32 %v852_v1, %v561_v22  ;;  %v565_v31 = vunpack.c.h.bf16 %v783_v14 }
  0x32   :  { %810 = vst [vmem:[%s1179_s3 + $0x90] sm:$0xff] %v695_v24   ;;  %v700_v33 = vpack.c.bf16 %v317_v25, %v316_v19  ;;  %v256_v34 = vadd.f32 %v857_v4, %v188_v26  ;;  %v190_v35 = vmul.f32 %v852_v1, %v564_v27  ;;  %v568_v36 = vunpack.c.l.bf16 %v784_v23 }
  0x33   :  { %v319_v37 = vmax.f32 %v255_v28, 0.0  ;;  %v257_v38 = vadd.f32 %v857_v4, %v189_v30  ;;  %v191_v39 = vmul.f32 %v852_v1, %v565_v31  ;;  %v569_v40 = vunpack.c.h.bf16 %v784_v23  ;;  %v790_v23 = vld [vmem:[%s1176_s0 + $0xe8] sm:$0xff]  }
  0x34   :  { %811 = vst [vmem:[%s1179_s3 + $0x98] sm:$0xff] %v700_v33   ;;  %v320_v41 = vmax.f32 %v256_v34, 0.0  ;;  %v258_v42 = vadd.f32 %v857_v4, %v190_v35  ;;  %v192_v43 = vmul.f32 %v852_v1, %v568_v36  ;;  %v572_v44 = vunpack.c.l.bf16 %v785_v32 }
  0x35   :  { %v705_v46 = vpack.c.bf16 %v319_v37, %v318_v29  ;;  %v321_v47 = vmax.f32 %v257_v38, 0.0  ;;  %v259_v48 = vadd.f32 %v857_v4, %v191_v39  ;;  %v193_v49 = vmul.f32 %v852_v1, %v569_v40 }
  0x36   :  { %v322_v50 = vmax.f32 %v258_v42, 0.0  ;;  %v260_v51 = vadd.f32 %v857_v4, %v192_v43  ;;  %v573_v52 = vunpack.c.h.bf16 %v785_v32  ;;  %v194_v53 = vmul.f32 %v852_v1, %v572_v44  ;;  %v791_v32 = vld [vmem:[%s1176_s0 + $0xf0] sm:$0xff]  }
  0x37   :  { %812 = vst [vmem:[%s1179_s3 + $0xa0] sm:$0xff] %v705_v46   ;;  %v710_v55 = vpack.c.bf16 %v321_v47, %v320_v41  ;;  %v323_v56 = vmax.f32 %v259_v48, 0.0  ;;  %v261_v57 = vadd.f32 %v857_v4, %v193_v49  ;;  %v576_v58 = vunpack.c.l.bf16 %v786_v45  ;;  %v792_v41 = vld [vmem:[%s1176_s0 + $0xf8] sm:$0xff]  }
  0x38   :  { %v324_v59 = vmax.f32 %v260_v51, 0.0  ;;  %v195_v60 = vmul.f32 %v852_v1, %v573_v52  ;;  %v262_v61 = vadd.f32 %v857_v4, %v194_v53  ;;  %v577_v62 = vunpack.c.h.bf16 %v786_v45 }
  0x39   :  { %813 = vst [vmem:[%s1179_s3 + $0xa8] sm:$0xff] %v710_v55   ;;  %v715_v0 = vpack.c.bf16 %v323_v56, %v322_v50  ;;  %v325_v2 = vmax.f32 %v261_v57, 0.0  ;;  %v196_v3 = vmul.f32 %v852_v1, %v576_v58  ;;  %v580_v5 = vunpack.c.l.bf16 %v787_v54 }
  0x3a   :  { %v263_v6 = vadd.f32 %v857_v4, %v195_v60  ;;  %v326_v7 = vmax.f32 %v262_v61, 0.0  ;;  %v197_v8 = vmul.f32 %v852_v1, %v577_v62  ;;  %v581_v9 = vunpack.c.h.bf16 %v787_v54 }
  0x3b   :  { %814 = vst [vmem:[%s1179_s3 + $0xb0] sm:$0xff] %v715_v0   ;;  %v720_v11 = vpack.c.bf16 %v325_v2, %v324_v59  ;;  %v264_v12 = vadd.f32 %v857_v4, %v196_v3  ;;  %v198_v13 = vmul.f32 %v852_v1, %v580_v5  ;;  %v584_v14 = vunpack.c.l.bf16 %v788_v63 }
  0x3c   :  { %v327_v15 = vmax.f32 %v263_v6, 0.0  ;;  %v265_v16 = vadd.f32 %v857_v4, %v197_v8  ;;  %v199_v17 = vmul.f32 %v852_v1, %v581_v9  ;;  %v585_v18 = vunpack.c.h.bf16 %v788_v63 }
  0x3d   :  { %815 = vst [vmem:[%s1179_s3 + $0xb8] sm:$0xff] %v720_v11   ;;  %v328_v19 = vmax.f32 %v264_v12, 0.0  ;;  %v266_v20 = vadd.f32 %v857_v4, %v198_v13  ;;  %v200_v21 = vmul.f32 %v852_v1, %v584_v14  ;;  %v588_v22 = vunpack.c.l.bf16 %v789_v10 }
  0x3e   :  { %v725_v24 = vpack.c.bf16 %v327_v15, %v326_v7  ;;  %v329_v25 = vmax.f32 %v265_v16, 0.0  ;;  %v267_v26 = vadd.f32 %v857_v4, %v199_v17  ;;  %v201_v27 = vmul.f32 %v852_v1, %v585_v18 }
  0x3f   :  { %v330_v28 = vmax.f32 %v266_v20, 0.0  ;;  %v268_v29 = vadd.f32 %v857_v4, %v200_v21  ;;  %v589_v30 = vunpack.c.h.bf16 %v789_v10  ;;  %v202_v31 = vmul.f32 %v852_v1, %v588_v22 }
  0x40   :  { %816 = vst [vmem:[%s1179_s3 + $0xc0] sm:$0xff] %v725_v24   ;;  %v730_v33 = vpack.c.bf16 %v329_v25, %v328_v19  ;;  %v331_v34 = vmax.f32 %v267_v26, 0.0  ;;  %v269_v35 = vadd.f32 %v857_v4, %v201_v27  ;;  %v592_v36 = vunpack.c.l.bf16 %v790_v23 }
  0x41   :  { %v332_v37 = vmax.f32 %v268_v29, 0.0  ;;  %v203_v38 = vmul.f32 %v852_v1, %v589_v30  ;;  %v270_v39 = vadd.f32 %v857_v4, %v202_v31  ;;  %v593_v40 = vunpack.c.h.bf16 %v790_v23 }
  0x42   :  { %817 = vst [vmem:[%s1179_s3 + $0xc8] sm:$0xff] %v730_v33   ;;  %v735_v42 = vpack.c.bf16 %v331_v34, %v330_v28  ;;  %v333_v43 = vmax.f32 %v269_v35, 0.0  ;;  %v204_v44 = vmul.f32 %v852_v1, %v592_v36  ;;  %v596_v45 = vunpack.c.l.bf16 %v791_v32 }
  0x43   :  { %v271_v46 = vadd.f32 %v857_v4, %v203_v38  ;;  %v334_v47 = vmax.f32 %v270_v39, 0.0  ;;  %v205_v48 = vmul.f32 %v852_v1, %v593_v40  ;;  %v597_v49 = vunpack.c.h.bf16 %v791_v32 }
  0x44   :  { %818 = vst [vmem:[%s1179_s3 + $0xd0] sm:$0xff] %v735_v42   ;;  %v740_v50 = vpack.c.bf16 %v333_v43, %v332_v37  ;;  %v272_v51 = vadd.f32 %v857_v4, %v204_v44  ;;  %v206_v52 = vmul.f32 %v852_v1, %v596_v45  ;;  %v600_v53 = vunpack.c.l.bf16 %v792_v41 }
  0x45   :  { %v335_v54 = vmax.f32 %v271_v46, 0.0  ;;  %v273_v55 = vadd.f32 %v857_v4, %v205_v48  ;;  %v207_v56 = vmul.f32 %v852_v1, %v597_v49  ;;  %v601_v57 = vunpack.c.h.bf16 %v792_v41 }
  0x46   :  { %819 = vst [vmem:[%s1179_s3 + $0xd8] sm:$0xff] %v740_v50   ;;  %v336_v58 = vmax.f32 %v272_v51, 0.0  ;;  %v274_v59 = vadd.f32 %v857_v4, %v206_v52  ;;  %v208_v60 = vmul.f32 %v852_v1, %v600_v53 }
  0x47   :  { %v745_v61 = vpack.c.bf16 %v335_v54, %v334_v47  ;;  %v337_v62 = vmax.f32 %v273_v55, 0.0  ;;  %v275_v63 = vadd.f32 %v857_v4, %v207_v56  ;;  %v209_v0 = vmul.f32 %v852_v1, %v601_v57 }
  0x48   :  { %v338_v2 = vmax.f32 %v274_v59, 0.0  ;;  %v276_v3 = vadd.f32 %v857_v4, %v208_v60 }
  0x49   :  { %820 = vst [vmem:[%s1179_s3 + $0xe0] sm:$0xff] %v745_v61   ;;  %v750_v5 = vpack.c.bf16 %v337_v62, %v336_v58  ;;  %v339_v6 = vmax.f32 %v275_v63, 0.0  ;;  %v277_v7 = vadd.f32 %v857_v4, %v209_v0 }
  0x4a   :  { %v340_v8 = vmax.f32 %v276_v3, 0.0 }
  0x4b   :  { %821 = vst [vmem:[%s1179_s3 + $0xe8] sm:$0xff] %v750_v5   ;;  %v755_v9 = vpack.c.bf16 %v339_v6, %v338_v2  ;;  %v341_v10 = vmax.f32 %v277_v7, 0.0 }
  0x4d   :  { %822 = vst [vmem:[%s1179_s3 + $0xf0] sm:$0xff] %v755_v9   ;;  %v760_v1 = vpack.c.bf16 %v341_v10, %v340_v8 }
  0x4f   :  { %823 = vst [vmem:[%s1179_s3 + $0xf8] sm:$0xff] %v760_v1  }

// kernel: font_unet_forward.43
= control target key start
LH: loop header
LB: loop body
LE: loop exit
PB: predicated region body
PF: predicated region fallthrough
CT: control target
= control target key end

     0   :  { %s1773_s12 = smov 0   ;;  %s1775_s13 = smov 0   ;;  %s2187_s0 = inlined_call_operand.vmem [shape: bf16[4,512,128], index: 0, kind: input, shape index: {}]   ;;  %s2188_s1 = inlined_call_operand.vmem [shape: bf16[4,128,128], index: 1, kind: input, shape index: {}]   ;;  %s2189_s2 = inlined_call_operand.vmem [shape: bf16[4,512,128], index: 2, kind: output, shape index: {0}]   ;;  %s2190_s3 = inlined_call_operand.vmem [shape: f32[4,1,8,128], index: 3, kind: output, shape index: {1}]  }
   0x1   :  { %s1777_s14 = smov 0  }
   0x2 LB: > { %s33_s15 = sadd.s32 1, %s1747_s13  ;;  %p1277_p0 = scmp.ge.s32.totalorder %s1751_s14, 1  ;;  %s1751_s14 = sphi %s1777_s14, %s14_s14   ;;  %s1747_s13 = sphi %s1775_s13, %s2192_s13   ;;  %s1743_s12 = sphi %s1773_s12, %s2191_s12  }
   0x3   : > { %p35_p1 = scmp.ge.s32.totalorder %s33_s15, 4  ;;  %p189_p2 = scmp.lt.s32.totalorder %s1751_s14, 5 }
   0x5   : > { %s2194_s15 = smov (%p35_p1, %s33_s15), 0  ;;  %p190_p3 = pnand %p1277_p0, %p189_p2 }
   0x6   : > { %p243_p4 = scmp.lt.s32.totalorder (!%p190_p3), %s1743_s12, 3 }
   0x7   : > { %193 = sbr.rel (%p190_p3) target bundleno = 406 (0x196), region = 28 }
   0xc   : > { %s2196_s12 = smov (!%p243_p4, %s1743_s12), 3 }
   0xd   : > { %s1448_s16 = sshll.u32 %s2196_s12, 6  ;;  %s1447_s20 = sshll.u32 %s2196_s12, 8 }
   0xe   : > { %s1797_s19 = scalar_lea.vmem %s2188_s1, %s1448_s16  ;;  %s1812_s23 = scalar_lea.vmem %s2187_s0, %s1447_s20 }
   0xf   : > { %v1489_v0 = vld [vmem:[%s1797_s19 + $0x38] sm:$0xff]  ;;  %v1488_v1 = vld [vmem:[%s1797_s19 + $0x30] sm:$0xff]  ;;  %v1487_v2 = vld [vmem:[%s1797_s19 + $0x28] sm:$0xff]  ;;  %s1852_s26 = scalar_lea.vmem %s2189_s2, %s1447_s20  ;;  %s1284_s27 = sshll.u32 %s2196_s12, 3 }
  0x10   : > { %603 = vmatpush.bf16.msra.mxu0 %v1489_v0  ;;  %1681 = vmatpush.bf16.msra.mxu1 %v1489_v0  ;;  %v1486_v3 = vld [vmem:[%s1797_s19 + $0x20] sm:$0xff]  ;;  %v1485_v4 = vld [vmem:[%s1797_s19 + $0x18] sm:$0xff]  ;;  %v1484_v5 = vld [vmem:[%s1797_s19 + $0x10] sm:$0xff]  ;;  %s282_s30 = scalar_lea.vmem %s2190_s3, %s1284_s27 }
  0x11   : > { %1682 = vmatpush.bf16.msra.mxu2 %v1489_v0  ;;  %1683 = vmatpush.bf16.msra.mxu3 %v1489_v0  ;;  %v1483_v6 = vld [vmem:[%s1797_s19 + $0x8] sm:$0xff]  ;;  %v1482_v7 = vld [vmem:[%s1797_s19] sm:$0xff]  ;;  %v1452_v13 = vld [vmem:[%s1812_s23 + $0x10] sm:$0xff] }
  0x12   : > { %v1450_v8 = vld [vmem:[%s1812_s23] sm:$0xff]  ;;  %v1451_v10 = vld [vmem:[%s1812_s23 + $0x8] sm:$0xff]  ;;  %v1460_v14 = vld [vmem:[%s1812_s23 + $0x50] sm:$0xff] }
  0x13   : > { %v1458_v9 = vld [vmem:[%s1812_s23 + $0x40] sm:$0xff]  ;;  %v1459_v11 = vld [vmem:[%s1812_s23 + $0x48] sm:$0xff]  ;;  %v1453_v16 = vld [vmem:[%s1812_s23 + $0x18] sm:$0xff] }
  0x14   : > { %604 = vmatpush.bf16.msra.mxu0 %v1488_v1  ;;  %1684 = vmatpush.bf16.msra.mxu1 %v1488_v1  ;;  %v1466_v12 = vld [vmem:[%s1812_s23 + $0x80] sm:$0xff]  ;;  %v1467_v15 = vld [vmem:[%s1812_s23 + $0x88] sm:$0xff]  ;;  %v1461_v17 = vld [vmem:[%s1812_s23 + $0x58] sm:$0xff] }
  0x15   : > { %1685 = vmatpush.bf16.msra.mxu2 %v1488_v1  ;;  %1686 = vmatpush.bf16.msra.mxu3 %v1488_v1  ;;  %v1468_v18 = vld [vmem:[%s1812_s23 + $0x90] sm:$0xff]  ;;  %v1474_v19 = vld [vmem:[%s1812_s23 + $0xc0] sm:$0xff]  ;;  %v1469_v22 = vld [vmem:[%s1812_s23 + $0x98] sm:$0xff] }
  0x16   : > { %v1454_v20 = vld [vmem:[%s1812_s23 + $0x20] sm:$0xff]  ;;  %v1475_v23 = vld [vmem:[%s1812_s23 + $0xc8] sm:$0xff]  ;;  %v1476_v27 = vld [vmem:[%s1812_s23 + $0xd0] sm:$0xff] }
  0x17   : > { %v1462_v21 = vld [vmem:[%s1812_s23 + $0x60] sm:$0xff]  ;;  %v1455_v24 = vld [vmem:[%s1812_s23 + $0x28] sm:$0xff]  ;;  %v1456_v28 = vld [vmem:[%s1812_s23 + $0x30] sm:$0xff] }
  0x18   : > { %605 = vmatpush.bf16.msra.mxu0 %v1487_v2  ;;  %1687 = vmatpush.bf16.msra.mxu1 %v1487_v2  ;;  %v1463_v25 = vld [vmem:[%s1812_s23 + $0x68] sm:$0xff]  ;;  %v1470_v26 = vld [vmem:[%s1812_s23 + $0xa0] sm:$0xff]  ;;  %v1464_v29 = vld [vmem:[%s1812_s23 + $0x70] sm:$0xff] }
  0x19   : > { %1688 = vmatpush.bf16.msra.mxu2 %v1487_v2  ;;  %1689 = vmatpush.bf16.msra.mxu3 %v1487_v2  ;;  %v1471_v30 = vld [vmem:[%s1812_s23 + $0xa8] sm:$0xff]  ;;  %v1477_v31 = vld [vmem:[%s1812_s23 + $0xd8] sm:$0xff]  ;;  %v1472_v34 = vld [vmem:[%s1812_s23 + $0xb0] sm:$0xff] }
  0x1a   : > { %v1457_v32 = vld [vmem:[%s1812_s23 + $0x38] sm:$0xff]  ;;  %v1478_v35 = vld [vmem:[%s1812_s23 + $0xe0] sm:$0xff]  ;;  %v1479_v39 = vld [vmem:[%s1812_s23 + $0xe8] sm:$0xff] }
  0x1b   : > { %v1465_v33 = vld [vmem:[%s1812_s23 + $0x78] sm:$0xff]  ;;  %v1480_v53 = vld [vmem:[%s1812_s23 + $0xf0] sm:$0xff] }
  0x1c   : > { %606 = vmatpush.bf16.msra.mxu0 %v1486_v3  ;;  %1690 = vmatpush.bf16.msra.mxu1 %v1486_v3  ;;  %v1473_v38 = vld [vmem:[%s1812_s23 + $0xb8] sm:$0xff] }
  0x1d   : > { %1691 = vmatpush.bf16.msra.mxu2 %v1486_v3  ;;  %1692 = vmatpush.bf16.msra.mxu3 %v1486_v3 }
  0x20   : > { %607 = vmatpush.bf16.msra.mxu0 %v1485_v4  ;;  %1693 = vmatpush.bf16.msra.mxu1 %v1485_v4 }
  0x21   : > { %1694 = vmatpush.bf16.msra.mxu2 %v1485_v4  ;;  %1695 = vmatpush.bf16.msra.mxu3 %v1485_v4 }
  0x24   : > { %608 = vmatpush.bf16.msra.mxu0 %v1484_v5  ;;  %1696 = vmatpush.bf16.msra.mxu1 %v1484_v5 }
  0x25   : > { %1697 = vmatpush.bf16.msra.mxu2 %v1484_v5  ;;  %1698 = vmatpush.bf16.msra.mxu3 %v1484_v5  ;;  %v1481_v5 = vld [vmem:[%s1812_s23 + $0xf8] sm:$0xff] }
  0x28   : > { %609 = vmatpush.bf16.msra.mxu0 %v1483_v6  ;;  %1699 = vmatpush.bf16.msra.mxu1 %v1483_v6 }
  0x29   : > { %1700 = vmatpush.bf16.msra.mxu2 %v1483_v6  ;;  %1701 = vmatpush.bf16.msra.mxu3 %v1483_v6 }
  0x2c   : > { %610 = vmatpush.bf16.msra.mxu0 %v1482_v7  ;;  %1702 = vmatpush.bf16.msra.mxu1 %v1482_v7 }
  0x2d   : > { %1703 = vmatpush.bf16.msra.mxu2 %v1482_v7  ;;  %1704 = vmatpush.bf16.msra.mxu3 %v1482_v7 }
  0x2f   : > { %611 = vmatmul.bf16.vlgmr.msra.gmra.mxu0 %v1450_v8  ;;  %651 = vmatmul.bf16.vlgmr.msra.gmra.mxu1 %v1458_v9 }
  0x30   : > { %691 = vmatmul.bf16.vlgmr.msra.gmra.mxu2 %v1466_v12  ;;  %731 = vmatmul.bf16.vlgmr.msra.gmra.mxu3 %v1474_v19 }
  0x3f   : > { %616 = vmatmul.bf16.gmra.mxu0 %v1451_v10  ;;  %656 = vmatmul.bf16.gmra.mxu1 %v1459_v11 }
  0x40   : > { %696 = vmatmul.bf16.gmra.mxu2 %v1467_v15  ;;  %736 = vmatmul.bf16.gmra.mxu3 %v1475_v23 }
  0x4f   : > { %621 = vmatmul.bf16.gmra.mxu0 %v1452_v13  ;;  %661 = vmatmul.bf16.gmra.mxu1 %v1460_v14 }
  0x50   : > { %701 = vmatmul.bf16.gmra.mxu2 %v1468_v18  ;;  %741 = vmatmul.bf16.gmra.mxu3 %v1476_v27 }
  0x5f   : > { %626 = vmatmul.bf16.gmra.mxu0 %v1453_v16  ;;  %666 = vmatmul.bf16.gmra.mxu1 %v1461_v17 }
  0x60   : > { %706 = vmatmul.bf16.gmra.mxu2 %v1469_v22  ;;  %746 = vmatmul.bf16.gmra.mxu3 %v1477_v31 }
  0x6f   : > { %631 = vmatmul.bf16.gmra.mxu0 %v1454_v20  ;;  %671 = vmatmul.bf16.gmra.mxu1 %v1462_v21 }
  0x70   : > { %711 = vmatmul.bf16.gmra.mxu2 %v1470_v26  ;;  %751 = vmatmul.bf16.gmra.mxu3 %v1478_v35 }
  0x7f   : > { %636 = vmatmul.bf16.gmra.mxu0 %v1455_v24  ;;  %676 = vmatmul.bf16.gmra.mxu1 %v1463_v25 }
  0x80   : > { %716 = vmatmul.bf16.gmra.mxu2 %v1471_v30  ;;  %756 = vmatmul.bf16.gmra.mxu3 %v1479_v39 }
  0x8f   : > { %641 = vmatmul.bf16.gmra.mxu0 %v1456_v28  ;;  %681 = vmatmul.bf16.gmra.mxu1 %v1464_v29 }
  0x90   : > { %721 = vmatmul.bf16.gmra.mxu2 %v1472_v34  ;;  %761 = vmatmul.bf16.gmra.mxu3 %v1480_v53 }
  0x9f   : > { %646 = vmatmul.bf16.gmra.mxu0 %v1457_v32  ;;  %686 = vmatmul.bf16.gmra.mxu1 %v1465_v33 }
  0xa0   : > { %726 = vmatmul.bf16.gmra.mxu2 %v1473_v38  ;;  %766 = vmatmul.bf16.gmra.mxu3 %v1481_v5 }
  0xac   : > { %v612_v36 = vpop.f32.mrf.mxu0  ;;  %v1843_v37 = vpop.f32.mrf.mxu1 }
  0xad   : > { %v970_v40 = vmul.f32 %v612_v36, %v612_v36 }
  0xb3   : > { %v1867_v60 = vpop.f32.mrf.mxu2  ;;  %v1904_v20 = vpop.f32.mrf.mxu3 }
  0xb4   : > { %v614_v41 = vpop.f32.mrf.mxu0  ;;  %v1854_v42 = vpop.f32.mrf.mxu1 }
  0xb5   : > { %v1493_v43 = vpack.c.bf16 %v614_v41, %v612_v36  ;;  %v900_v44 = vadd.f32 %v614_v41, %v612_v36  ;;  %v971_v45 = vmul.f32 %v614_v41, %v614_v41  ;;  %v1533_v46 = vpack.c.bf16 %v1854_v42, %v1843_v37 }
  0xb7   : > { %1494 = vst [vmem:[%s1852_s26] sm:$0xff] %v1493_v43   ;;  %v1034_v47 = vadd.f32 %v971_v45, %v970_v40 }
  0xb8   : > { %1657 = vst [vmem:[%s1852_s26 + $0x40] sm:$0xff] %v1533_v46  }
  0xbb   : > { %v1875_v2 = vpop.f32.mrf.mxu2  ;;  %v1912_v24 = vpop.f32.mrf.mxu3 }
  0xbc   : > { %v617_v48 = vpop.f32.mrf.mxu0  ;;  %v1860_v49 = vpop.f32.mrf.mxu1  ;;  %v1573_v3 = vpack.c.bf16 %v1875_v2, %v1867_v60  ;;  %v1613_v26 = vpack.c.bf16 %v1912_v24, %v1904_v20 }
  0xbd   : > { %v901_v50 = vadd.f32 %v900_v44, %v617_v48  ;;  %v972_v51 = vmul.f32 %v617_v48, %v617_v48 }
  0xbe   : > { %1665 = vst [vmem:[%s1852_s26 + $0x80] sm:$0xff] %v1573_v3  }
  0xbf   : > { %v1035_v52 = vadd.f32 %v1034_v47, %v972_v51  ;;  %1673 = vst [vmem:[%s1852_s26 + $0xc0] sm:$0xff] %v1613_v26  }
  0xc3   : > { %v1887_v10 = vpop.f32.mrf.mxu2  ;;  %v1926_v32 = vpop.f32.mrf.mxu3 }
  0xc4   : > { %v619_v54 = vpop.f32.mrf.mxu0  ;;  %v1863_v55 = vpop.f32.mrf.mxu1 }
  0xc5   : > { %v1498_v56 = vpack.c.bf16 %v619_v54, %v617_v48  ;;  %v902_v57 = vadd.f32 %v901_v50, %v619_v54  ;;  %v973_v58 = vmul.f32 %v619_v54, %v619_v54  ;;  %v1538_v59 = vpack.c.bf16 %v1863_v55, %v1860_v49 }
  0xc7   : > { %1650 = vst [vmem:[%s1852_s26 + $0x8] sm:$0xff] %v1498_v56   ;;  %v1036_v61 = vadd.f32 %v1035_v52, %v973_v58 }
  0xc8   : > { %1658 = vst [vmem:[%s1852_s26 + $0x48] sm:$0xff] %v1538_v59  }
  0xcb   : > { %v1893_v13 = vpop.f32.mrf.mxu2  ;;  %v1934_v36 = vpop.f32.mrf.mxu3 }
  0xcc   : > { %v622_v62 = vpop.f32.mrf.mxu0  ;;  %v1871_v63 = vpop.f32.mrf.mxu1  ;;  %v1578_v14 = vpack.c.bf16 %v1893_v13, %v1887_v10  ;;  %v1618_v39 = vpack.c.bf16 %v1934_v36, %v1926_v32 }
  0xcd   : > { %v1873_v0 = vadd.f32 %v902_v57, %v622_v62  ;;  %v974_v1 = vmul.f32 %v622_v62, %v622_v62 }
  0xce   : > { %1666 = vst [vmem:[%s1852_s26 + $0x88] sm:$0xff] %v1578_v14  }
  0xcf   : > { %v1879_v4 = vadd.f32 %v1036_v61, %v974_v1  ;;  %1674 = vst [vmem:[%s1852_s26 + $0xc8] sm:$0xff] %v1618_v39  }
  0xd3   : > { %v1902_v19 = vpop.f32.mrf.mxu2  ;;  %v1948_v46 = vpop.f32.mrf.mxu3 }
  0xd4   : > { %v624_v6 = vpop.f32.mrf.mxu0  ;;  %v1883_v7 = vpop.f32.mrf.mxu1 }
  0xd5   : > { %v1503_v8 = vpack.c.bf16 %v624_v6, %v622_v62  ;;  %v1543_v9 = vpack.c.bf16 %v1883_v7, %v1871_v63  ;;  %v975_v52 = vmul.f32 %v624_v6, %v624_v6  ;;  %v904_v57 = vadd.f32 %v1873_v0, %v624_v6 }
  0xd7   : > { %1651 = vst [vmem:[%s1852_s26 + $0x10] sm:$0xff] %v1503_v8   ;;  %v1038_v58 = vadd.f32 %v1879_v4, %v975_v52 }
  0xd8   : > { %1659 = vst [vmem:[%s1852_s26 + $0x50] sm:$0xff] %v1543_v9  }
  0xdb   : > { %v1910_v23 = vpop.f32.mrf.mxu2  ;;  %v1956_v51 = vpop.f32.mrf.mxu3 }
  0xdc   : > { %v627_v11 = vpop.f32.mrf.mxu0  ;;  %v1891_v12 = vpop.f32.mrf.mxu1  ;;  %v1583_v25 = vpack.c.bf16 %v1910_v23, %v1902_v19  ;;  %v1623_v54 = vpack.c.bf16 %v1956_v51, %v1948_v46 }
  0xdd   : > { %v976_v56 = vmul.f32 %v627_v11, %v627_v11  ;;  %v905_v61 = vadd.f32 %v904_v57, %v627_v11 }
  0xde   : > { %1667 = vst [vmem:[%s1852_s26 + $0x90] sm:$0xff] %v1583_v25  }
  0xdf   : > { %1675 = vst [vmem:[%s1852_s26 + $0xd0] sm:$0xff] %v1623_v54   ;;  %v1039_v62 = vadd.f32 %v1038_v58, %v976_v56 }
  0xe3   : > { %v1924_v31 = vpop.f32.mrf.mxu2  ;;  %v1972_v0 = vpop.f32.mrf.mxu3 }
  0xe4   : > { %v629_v15 = vpop.f32.mrf.mxu0  ;;  %v1898_v16 = vpop.f32.mrf.mxu1 }
  0xe5   : > { %v1508_v17 = vpack.c.bf16 %v629_v15, %v627_v11  ;;  %v1548_v18 = vpack.c.bf16 %v1898_v16, %v1891_v12  ;;  %v977_v59 = vmul.f32 %v629_v15, %v629_v15  ;;  %v906_v8 = vadd.f32 %v905_v61, %v629_v15 }
  0xe7   : > { %1652 = vst [vmem:[%s1852_s26 + $0x18] sm:$0xff] %v1508_v17   ;;  %v1040_v6 = vadd.f32 %v1039_v62, %v977_v59 }
  0xe8   : > { %1660 = vst [vmem:[%s1852_s26 + $0x58] sm:$0xff] %v1548_v18  }
  0xeb   : > { %v1932_v35 = vpop.f32.mrf.mxu2  ;;  %v1980_v54 = vpop.f32.mrf.mxu3 }
  0xec   : > { %v632_v21 = vpop.f32.mrf.mxu0  ;;  %v1908_v22 = vpop.f32.mrf.mxu1  ;;  %v1588_v38 = vpack.c.bf16 %v1932_v35, %v1924_v31  ;;  %v1628_v57 = vpack.c.bf16 %v1980_v54, %v1972_v0 }
  0xed   : > { %v978_v1 = vmul.f32 %v632_v21, %v632_v21  ;;  %v907_v4 = vadd.f32 %v906_v8, %v632_v21 }
  0xee   : > { %1668 = vst [vmem:[%s1852_s26 + $0x98] sm:$0xff] %v1588_v38  }
  0xef   : > { %v1041_v11 = vadd.f32 %v1040_v6, %v978_v1  ;;  %1676 = vst [vmem:[%s1852_s26 + $0xd8] sm:$0xff] %v1628_v57  }
  0xf3   : > { %v1946_v45 = vpop.f32.mrf.mxu2 }
  0xf4   : > { %v634_v27 = vpop.f32.mrf.mxu0  ;;  %v1920_v28 = vpop.f32.mrf.mxu1 }
  0xf5   : > { %v1513_v29 = vpack.c.bf16 %v634_v27, %v632_v21  ;;  %v1553_v30 = vpack.c.bf16 %v1920_v28, %v1908_v22  ;;  %v979_v18 = vmul.f32 %v634_v27, %v634_v27  ;;  %v908_v26 = vadd.f32 %v907_v4, %v634_v27 }
  0xf7   : > { %1653 = vst [vmem:[%s1852_s26 + $0x20] sm:$0xff] %v1513_v29   ;;  %v1042_v29 = vadd.f32 %v1041_v11, %v979_v18  ;;  %v1994_v11 = vpop.f32.mrf.mxu3 }
  0xf8   : > { %1661 = vst [vmem:[%s1852_s26 + $0x60] sm:$0xff] %v1553_v30  }
  0xfb   : > { %v1954_v50 = vpop.f32.mrf.mxu2 }
  0xfc   : > { %v637_v33 = vpop.f32.mrf.mxu0  ;;  %v1930_v34 = vpop.f32.mrf.mxu1  ;;  %v1593_v53 = vpack.c.bf16 %v1954_v50, %v1946_v45 }
  0xfd   : > { %v980_v25 = vmul.f32 %v637_v33, %v637_v33  ;;  %v909_v15 = vadd.f32 %v908_v26, %v637_v33 }
  0xfe   : > { %1669 = vst [vmem:[%s1852_s26 + $0xa0] sm:$0xff] %v1593_v53  }
  0xff   : > { %v1043_v38 = vadd.f32 %v1042_v29, %v980_v25  ;;  %v987_v29 = vmul.f32 %v1854_v42, %v1854_v42 }
 0x103   : > { %v1970_v17 = vpop.f32.mrf.mxu2 }
 0x104   : > { %v639_v40 = vpop.f32.mrf.mxu0  ;;  %v1942_v41 = vpop.f32.mrf.mxu1 }
 0x105   : > { %v1518_v43 = vpack.c.bf16 %v639_v40, %v637_v33  ;;  %v1558_v44 = vpack.c.bf16 %v1942_v41, %v1930_v34  ;;  %v981_v30 = vmul.f32 %v639_v40, %v639_v40  ;;  %v910_v52 = vadd.f32 %v909_v15, %v639_v40 }
 0x107   : > { %1654 = vst [vmem:[%s1852_s26 + $0x28] sm:$0xff] %v1518_v43   ;;  %v1044_v21 = vadd.f32 %v1043_v38, %v981_v30  ;;  %v988_v38 = vmul.f32 %v1860_v49, %v1860_v49 }
 0x108   : > { %1662 = vst [vmem:[%s1852_s26 + $0x68] sm:$0xff] %v1558_v44  }
 0x10b   : > { %v1978_v53 = vpop.f32.mrf.mxu2 }
 0x10c   : > { %v642_v47 = vpop.f32.mrf.mxu0  ;;  %v1952_v48 = vpop.f32.mrf.mxu1  ;;  %v1598_v27 = vpack.c.bf16 %v1978_v53, %v1970_v17 }
 0x10d   : > { %v982_v39 = vmul.f32 %v642_v47, %v642_v47  ;;  %v911_v33 = vadd.f32 %v910_v52, %v642_v47  ;;  %v989_v52 = vmul.f32 %v1863_v55, %v1863_v55 }
 0x10e   : > { %1670 = vst [vmem:[%s1852_s26 + $0xa8] sm:$0xff] %v1598_v27   ;;  %v2012_v27 = vpop.f32.mrf.mxu3 }
 0x10f   : > { %v1045_v58 = vadd.f32 %v1044_v21, %v982_v39  ;;  %v1633_v57 = vpack.c.bf16 %v2012_v27, %v1994_v11 }
 0x111   : > { %1677 = vst [vmem:[%s1852_s26 + $0xe0] sm:$0xff] %v1633_v57  }
 0x114   : > { %v644_v3 = vpop.f32.mrf.mxu0  ;;  %v1966_v5 = vpop.f32.mrf.mxu1 }
 0x115   : > { %v1523_v9 = vpack.c.bf16 %v644_v3, %v642_v47  ;;  %v1563_v14 = vpack.c.bf16 %v1966_v5, %v1952_v48  ;;  %v983_v56 = vmul.f32 %v644_v3, %v644_v3  ;;  %v912_v61 = vadd.f32 %v911_v33, %v644_v3  ;;  %v1992_v47 = vpop.f32.mrf.mxu2 }
 0x116   : > { %v986_v3 = vmul.f32 %v1843_v37, %v1843_v37  ;;  %v999_v57 = vmul.f32 %v1966_v5, %v1966_v5 }
 0x117   : > { %1655 = vst [vmem:[%s1852_s26 + $0x30] sm:$0xff] %v1523_v9   ;;  %v1046_v40 = vadd.f32 %v1045_v58, %v983_v56 }
 0x118   : > { %1663 = vst [vmem:[%s1852_s26 + $0x70] sm:$0xff] %v1563_v14  }
 0x11c   : > { %v647_v43 = vpop.f32.mrf.mxu0  ;;  %v1976_v44 = vpop.f32.mrf.mxu1 }
 0x11d   : > { %v984_v59 = vmul.f32 %v647_v43, %v647_v43  ;;  %v913_v62 = vadd.f32 %v912_v61, %v647_v43  ;;  %v2010_v56 = vpop.f32.mrf.mxu2 }
 0x11f   : > { %v1047_v1 = vadd.f32 %v1046_v40, %v984_v59  ;;  %v992_v40 = vmul.f32 %v1891_v12, %v1891_v12 }
 0x124   : > { %v649_v8 = vpop.f32.mrf.mxu0  ;;  %v1988_v9 = vpop.f32.mrf.mxu1 }
 0x125   : > { %v1528_v14 = vpack.c.bf16 %v649_v8, %v647_v43  ;;  %v914_v6 = vadd.f32 %v913_v62, %v649_v8  ;;  %v985_v18 = vmul.f32 %v649_v8, %v649_v8  ;;  %v1568_v4 = vpack.c.bf16 %v1988_v9, %v1976_v44 }
 0x126   : > { %v993_v8 = vmul.f32 %v1898_v16, %v1898_v16 }
 0x127   : > { %1656 = vst [vmem:[%s1852_s26 + $0x38] sm:$0xff] %v1528_v14   ;;  %v915_v25 = vadd.f32 %v914_v6, %v1843_v37  ;;  %v1048_v26 = vadd.f32 %v1047_v1, %v985_v18  ;;  %v2032_v6 = vpop.f32.mrf.mxu2  ;;  %v2034_v18 = vpop.f32.mrf.mxu3 }
 0x128   : > { %1664 = vst [vmem:[%s1852_s26 + $0x78] sm:$0xff] %v1568_v4  }
 0x129   : > { %v916_v30 = vadd.f32 %v915_v25, %v1854_v42  ;;  %v1049_v15 = vadd.f32 %v1048_v26, %v986_v3  ;;  %v1603_v42 = vpack.c.bf16 %v2010_v56, %v1992_v47  ;;  %v995_v25 = vmul.f32 %v1920_v28, %v1920_v28 }
 0x12b   : > { %v917_v39 = vadd.f32 %v916_v30, %v1860_v49  ;;  %v1050_v43 = vadd.f32 %v1049_v15, %v987_v29  ;;  %v990_v49 = vmul.f32 %v1871_v63, %v1871_v63  ;;  %1671 = vst [vmem:[%s1852_s26 + $0xb0] sm:$0xff] %v1603_v42   ;;  %v997_v15 = vmul.f32 %v1942_v41, %v1942_v41 }
 0x12d   : > { %v918_v37 = vadd.f32 %v917_v39, %v1863_v55  ;;  %v1051_v21 = vadd.f32 %v1050_v43, %v988_v38  ;;  %v991_v55 = vmul.f32 %v1883_v7, %v1883_v7 }
 0x12f   : > { %v919_v33 = vadd.f32 %v918_v37, %v1871_v63  ;;  %v1052_v58 = vadd.f32 %v1051_v21, %v989_v52  ;;  %v2048_v39 = vpop.f32.mrf.mxu2  ;;  %v2050_v43 = vpop.f32.mrf.mxu3  ;;  %v998_v37 = vmul.f32 %v1952_v48, %v1952_v48 }
 0x130   : > { %v1638_v52 = vpack.c.bf16 %v2050_v43, %v2034_v18 }
 0x131   : > { %v920_v59 = vadd.f32 %v919_v33, %v1883_v7  ;;  %v1053_v61 = vadd.f32 %v1052_v58, %v990_v49  ;;  %v994_v7 = vmul.f32 %v1908_v22, %v1908_v22  ;;  %v1000_v58 = vmul.f32 %v1976_v44, %v1976_v44 }
 0x132   : > { %1678 = vst [vmem:[%s1852_s26 + $0xe8] sm:$0xff] %v1638_v52   ;;  %v1010_v52 = vmul.f32 %v1946_v45, %v1946_v45 }
 0x133   : > { %v1054_v62 = vadd.f32 %v1053_v61, %v991_v55  ;;  %v921_v1 = vadd.f32 %v920_v59, %v1891_v12 }
 0x135   : > { %v922_v63 = vadd.f32 %v921_v1, %v1898_v16  ;;  %v1055_v14 = vadd.f32 %v1054_v62, %v992_v40  ;;  %v996_v16 = vmul.f32 %v1930_v34, %v1930_v34  ;;  %v1002_v40 = vmul.f32 %v1867_v60, %v1867_v60 }
 0x136   : > { %v1003_v1 = vmul.f32 %v1875_v2, %v1875_v2 }
 0x137   : > { %v923_v4 = vadd.f32 %v922_v63, %v1908_v22  ;;  %v1056_v3 = vadd.f32 %v1055_v14, %v993_v8  ;;  %v2070_v61 = vpop.f32.mrf.mxu3  ;;  %v1004_v63 = vmul.f32 %v1887_v10, %v1887_v10 }
 0x139   : > { %v924_v12 = vadd.f32 %v923_v4, %v1920_v28  ;;  %v1057_v26 = vadd.f32 %v1056_v3, %v994_v7  ;;  %v1608_v28 = vpack.c.bf16 %v2048_v39, %v2032_v6  ;;  %v1005_v7 = vmul.f32 %v1893_v13, %v1893_v13 }
 0x13b   : > { %v925_v29 = vadd.f32 %v924_v12, %v1930_v34  ;;  %v1058_v30 = vadd.f32 %v1057_v26, %v995_v25  ;;  %1672 = vst [vmem:[%s1852_s26 + $0xb8] sm:$0xff] %v1608_v28  }
 0x13d   : > { %v926_v22 = vadd.f32 %v925_v29, %v1942_v41  ;;  %v1059_v38 = vadd.f32 %v1058_v30, %v996_v16 }
 0x13f   : > { %v927_v34 = vadd.f32 %v926_v22, %v1952_v48  ;;  %v1060_v21 = vadd.f32 %v1059_v38, %v997_v15  ;;  %v1001_v48 = vmul.f32 %v1988_v9, %v1988_v9  ;;  %v2084_v3 = vpop.f32.mrf.mxu3  ;;  %v1009_v22 = vmul.f32 %v1932_v35, %v1932_v35 }
 0x140   : > { %v1643_v25 = vpack.c.bf16 %v2084_v3, %v2070_v61 }
 0x141   : > { %v1061_v42 = vadd.f32 %v1060_v21, %v998_v37  ;;  %v928_v41 = vadd.f32 %v927_v34, %v1966_v5  ;;  %v1011_v37 = vmul.f32 %v1954_v50, %v1954_v50 }
 0x142   : > { %1679 = vst [vmem:[%s1852_s26 + $0xf0] sm:$0xff] %v1643_v25  }
 0x143   : > { %v1062_v49 = vadd.f32 %v1061_v42, %v999_v57  ;;  %v929_v33 = vadd.f32 %v928_v41, %v1976_v44  ;;  %v1012_v42 = vmul.f32 %v1970_v17, %v1970_v17 }
 0x145   : > { %v1063_v55 = vadd.f32 %v1062_v49, %v1000_v58  ;;  %v930_v59 = vadd.f32 %v929_v33, %v1988_v9  ;;  %v1013_v49 = vmul.f32 %v1978_v53, %v1978_v53 }
 0x147   : > { %v931_v5 = vadd.f32 %v930_v59, %v1867_v60  ;;  %v1064_v62 = vadd.f32 %v1063_v55, %v1001_v48  ;;  %v2101_v28 = vpop.f32.mrf.mxu3 }
 0x149   : > { %v932_v44 = vadd.f32 %v931_v5, %v1875_v2  ;;  %v1065_v8 = vadd.f32 %v1064_v62, %v1002_v40  ;;  %v1006_v2 = vmul.f32 %v1902_v19, %v1902_v19  ;;  %v1015_v40 = vmul.f32 %v2010_v56, %v2010_v56 }
 0x14a   : > { %v1016_v62 = vmul.f32 %v2032_v6, %v2032_v6 }
 0x14b   : > { %v933_v9 = vadd.f32 %v932_v44, %v1887_v10  ;;  %v1066_v14 = vadd.f32 %v1065_v8, %v1003_v1  ;;  %v1007_v10 = vmul.f32 %v1910_v23, %v1910_v23  ;;  %v1017_v8 = vmul.f32 %v2048_v39, %v2048_v39 }
 0x14d   : > { %v934_v4 = vadd.f32 %v933_v9, %v1893_v13  ;;  %v1067_v60 = vadd.f32 %v1066_v14, %v1004_v63  ;;  %v1008_v13 = vmul.f32 %v1924_v31, %v1924_v31 }
 0x14f   : > { %v935_v12 = vadd.f32 %v934_v4, %v1902_v19  ;;  %v1068_v26 = vadd.f32 %v1067_v60, %v1005_v7  ;;  %v769_v33 = vpop.f32.mrf.mxu3 }
 0x150   : > { %v1648_v58 = vpack.c.bf16 %v769_v33, %v2101_v28 }
 0x151   : > { %v936_v16 = vadd.f32 %v935_v12, %v1910_v23  ;;  %v1069_v29 = vadd.f32 %v1068_v26, %v1006_v2 }
 0x152   : > { %1680 = vst [vmem:[%s1852_s26 + $0xf8] sm:$0xff] %v1648_v58   ;;  %v1033_v58 = vmul.f32 %v769_v33, %v769_v33 }
 0x153   : > { %v1070_v30 = vadd.f32 %v1069_v29, %v1007_v10  ;;  %v937_v15 = vadd.f32 %v936_v16, %v1924_v31 }
 0x155   : > { %v938_v38 = vadd.f32 %v937_v15, %v1932_v35  ;;  %v1071_v19 = vadd.f32 %v1070_v30, %v1008_v13 }
 0x157   : > { %v939_v23 = vadd.f32 %v938_v38, %v1946_v45  ;;  %v1072_v34 = vadd.f32 %v1071_v19, %v1009_v22 }
 0x159   : > { %v940_v31 = vadd.f32 %v939_v23, %v1954_v50  ;;  %v1073_v21 = vadd.f32 %v1072_v34, %v1010_v52  ;;  %v1014_v50 = vmul.f32 %v1992_v47, %v1992_v47 }
 0x15b   : > { %v941_v35 = vadd.f32 %v940_v31, %v1970_v17  ;;  %v1074_v41 = vadd.f32 %v1073_v21, %v1011_v37  ;;  %v1029_v37 = vmul.f32 %v2050_v43, %v2050_v43 }
 0x15d   : > { %v942_v57 = vadd.f32 %v941_v35, %v1978_v53  ;;  %v1075_v45 = vadd.f32 %v1074_v41, %v1012_v42  ;;  %v1030_v42 = vmul.f32 %v2070_v61, %v2070_v61 }
 0x15f   : > { %v1076_v55 = vadd.f32 %v1075_v45, %v1013_v49  ;;  %v943_v59 = vadd.f32 %v942_v57, %v1992_v47  ;;  %v1018_v47 = vmul.f32 %v1904_v20, %v1904_v20 }
 0x161   : > { %v1077_v48 = vadd.f32 %v1076_v55, %v1014_v50  ;;  %v944_v17 = vadd.f32 %v943_v59, %v2010_v56  ;;  %v1019_v56 = vmul.f32 %v1912_v24, %v1912_v24 }
 0x163   : > { %v1078_v5 = vadd.f32 %v1077_v48, %v1015_v40  ;;  %v945_v53 = vadd.f32 %v944_v17, %v2032_v6  ;;  %v1020_v6 = vmul.f32 %v1926_v32, %v1926_v32 }
 0x165   : > { %v1079_v1 = vadd.f32 %v1078_v5, %v1016_v62  ;;  %v946_v44 = vadd.f32 %v945_v53, %v2048_v39  ;;  %v1021_v39 = vmul.f32 %v1934_v36, %v1934_v36 }
 0x167   : > { %v947_v63 = vadd.f32 %v946_v44, %v1904_v20  ;;  %v1080_v9 = vadd.f32 %v1079_v1, %v1017_v8  ;;  %v1022_v20 = vmul.f32 %v1948_v46, %v1948_v46 }
 0x169   : > { %v948_v14 = vadd.f32 %v947_v63, %v1912_v24  ;;  %v1081_v7 = vadd.f32 %v1080_v9, %v1018_v47  ;;  %v1023_v24 = vmul.f32 %v1956_v51, %v1956_v51 }
 0x16b   : > { %v949_v4 = vadd.f32 %v948_v14, %v1926_v32  ;;  %v1082_v60 = vadd.f32 %v1081_v7, %v1019_v56  ;;  %v1024_v32 = vmul.f32 %v1972_v0, %v1972_v0 }
 0x16d   : > { %v950_v25 = vadd.f32 %v949_v4, %v1934_v36  ;;  %v1083_v2 = vadd.f32 %v1082_v60, %v1020_v6  ;;  %v1025_v36 = vmul.f32 %v1980_v54, %v1980_v54 }
 0x16f   : > { %v951_v12 = vadd.f32 %v950_v25, %v1948_v46  ;;  %v1084_v26 = vadd.f32 %v1083_v2, %v1021_v39  ;;  %v1026_v46 = vmul.f32 %v1994_v11, %v1994_v11 }
 0x171   : > { %v952_v10 = vadd.f32 %v951_v12, %v1956_v51  ;;  %v1085_v16 = vadd.f32 %v1084_v26, %v1022_v20  ;;  %v1027_v51 = vmul.f32 %v2012_v27, %v2012_v27 }
 0x173   : > { %v1086_v29 = vadd.f32 %v1085_v16, %v1023_v24  ;;  %v953_v13 = vadd.f32 %v952_v10, %v1972_v0  ;;  %v1028_v0 = vmul.f32 %v2034_v18, %v2034_v18 }
 0x175   : > { %v954_v30 = vadd.f32 %v953_v13, %v1980_v54  ;;  %v1087_v15 = vadd.f32 %v1086_v29, %v1024_v32 }
 0x177   : > { %v955_v22 = vadd.f32 %v954_v30, %v1994_v11  ;;  %v1088_v38 = vadd.f32 %v1087_v15, %v1025_v36 }
 0x179   : > { %v956_v19 = vadd.f32 %v955_v22, %v2012_v27  ;;  %v1089_v52 = vadd.f32 %v1088_v38, %v1026_v46 }
 0x17b   : > { %v957_v23 = vadd.f32 %v956_v19, %v2034_v18  ;;  %v1090_v34 = vadd.f32 %v1089_v52, %v1027_v51  ;;  %v1031_v18 = vmul.f32 %v2084_v3, %v2084_v3 }
 0x17d   : > { %v958_v54 = vadd.f32 %v957_v23, %v2050_v43  ;;  %v1091_v31 = vadd.f32 %v1090_v34, %v1028_v0  ;;  %v1032_v43 = vmul.f32 %v2101_v28, %v2101_v28 }
 0x17f   : > { %v1092_v11 = vadd.f32 %v1091_v31, %v1029_v37  ;;  %v959_v21 = vadd.f32 %v958_v54, %v2070_v61 }
 0x181   : > { %v1093_v27 = vadd.f32 %v1092_v11, %v1030_v42  ;;  %v960_v35 = vadd.f32 %v959_v21, %v2084_v3 }
 0x183   : > { %v1094_v41 = vadd.f32 %v1093_v27, %v1031_v18  ;;  %v961_v57 = vadd.f32 %v960_v35, %v2101_v28 }
 0x185   : > { %v1095_v49 = vadd.f32 %v1094_v41, %v1032_v43  ;;  %v962_v45 = vadd.f32 %v961_v57, %v769_v33 }
 0x187   : > { %v963_v55 = vrot.slane %v962_v45, 4  ;;  %v1096_v59 = vadd.f32 %v1095_v49, %v1033_v58 }
 0x189   : > { %v964_v50 = vadd.f32 %v963_v55, %v962_v45  ;;  %v1097_v61 = vrot.slane %v1096_v59, 4 }
 0x18b   : > { %v965_v48 = vrot.slane %v964_v50, 2  ;;  %v1098_v17 = vadd.f32 %v1097_v61, %v1096_v59 }
 0x18d   : > { %v966_v40 = vadd.f32 %v965_v48, %v964_v50  ;;  %v1099_v5 = vrot.slane %v1098_v17, 2 }
 0x18f   : > { %v967_v53 = vrot.slane %v966_v40, 1  ;;  %v1100_v3 = vadd.f32 %v1099_v5, %v1098_v17 }
 0x191   : > { %v968_v62 = vadd.f32 %v967_v53, %v966_v40  ;;  %v1101_v28 = vrot.slane %v1100_v3, 1 }
 0x193   : > { %969 = vst [vmem:[%s282_s30] sm:$0x1] %v968_v62  ;;  %v1102_v1 = vadd.f32 %v1101_v28, %v1100_v3 }
 0x195   : > { %1103 = vst [vmem:[%s282_s30 + $0x1] sm:$0x1] %v1102_v1 }
 0x196 PF: > { %s14_s14 = sadd.s32 1, %s1751_s14   ;;  %s2191_s12 = smov %s1747_s13 }
 0x197   : > { %p11_p5 = scmp.ge.s32.totalorder %s14_s14, 6   ;;  %s2192_s13 = smov %s2194_s15 }
 0x199   :  { %13 = sbr.rel (!%p11_p5) target bundleno = 2 (0x2), region = 73 }

// kernel: font_unet_forward.44
= control target key start
LH: loop header
LB: loop body
LE: loop exit
PB: predicated region body
PF: predicated region fallthrough
CT: control target
= control target key end

     0   :  { %s1085_s12 = smov 0   ;;  %s1315_s0 = inlined_call_operand.vmem [shape: bf16[2048,128], index: 0, kind: input, shape index: {}]   ;;  %s1316_s1 = inlined_call_operand.vmem [shape: f32[1,128], index: 1, kind: input, shape index: {}]   ;;  %s1317_s2 = inlined_call_operand.vmem [shape: f32[1,128], index: 2, kind: input, shape index: {}]   ;;  %s1318_s3 = inlined_call_operand.vmem [shape: bf16[2048,128], index: 3, kind: output, shape index: {}]  }
   0x1 LB: > { %s686_s13 = sadd.s32 4294967295, %s1063_s12   ;;  %p690_p0 = scmp.ge.s32.totalorder %s1063_s12, 1  ;;  %s1063_s12 = sphi %s1085_s12, %s13_s12  }
   0x2   : > { %p138_p1 = scmp.lt.s32.totalorder %s1063_s12, 5 }
   0x4   : > { %p139_p2 = pnand %p690_p0, %p138_p1 }
   0x5   : > { %s691_s14 = sshll.u32 (!%p139_p2), %s686_s13, 6 }
   0x6   : > { %142 = sbr.rel (%p139_p2) target bundleno = 93 (0x5d), region = 32  ;;  %p163_p3 = scmp.lt.s32.totalorder (!%p139_p2), %s691_s14, 255 }
   0xb   : > { %s1320_s14 = smov (!%p163_p3, %s691_s14), 255  ;;  %v1106_v0 = vld [vmem:[%s1316_s1] ss:$0 sm:$0xff] }
   0xc   : > { %s692_s15 = sshll.u32 %s1320_s14, 2  ;;  %v1114_v6 = vld [vmem:[%s1317_s2] ss:$0 sm:$0xff] }
   0xd   : > { %s1101_s18 = scalar_lea.vmem %s1315_s0, %s692_s15  ;;  %s1140_s25 = scalar_lea.vmem %s1318_s3, %s692_s15 }
   0xe   : > { %v698_v1 = vld [vmem:[%s1101_s18] sm:$0xff]   ;;  %v985_v2 = vld [vmem:[%s1101_s18 + $0x8] sm:$0xff]   ;;  %v986_v3 = vld [vmem:[%s1101_s18 + $0x10] sm:$0xff]  }
   0xf   : > { %v699_v4 = vunpack.c.l.bf16 %v698_v1  ;;  %v700_v5 = vunpack.c.h.bf16 %v698_v1  ;;  %v703_v7 = vunpack.c.l.bf16 %v985_v2  ;;  %v704_v8 = vunpack.c.h.bf16 %v985_v2  ;;  %v987_v9 = vld [vmem:[%s1101_s18 + $0x18] sm:$0xff]   ;;  %v988_v30 = vld [vmem:[%s1101_s18 + $0x20] sm:$0xff]   ;;  %v989_v35 = vld [vmem:[%s1101_s18 + $0x28] sm:$0xff]  }
  0x10   : > { %v707_v10 = vunpack.c.l.bf16 %v986_v3  ;;  %v708_v11 = vunpack.c.h.bf16 %v986_v3  ;;  %v711_v12 = vunpack.c.l.bf16 %v987_v9  ;;  %v712_v13 = vunpack.c.h.bf16 %v987_v9  ;;  %v990_v40 = vld [vmem:[%s1101_s18 + $0x30] sm:$0xff]   ;;  %v991_v45 = vld [vmem:[%s1101_s18 + $0x38] sm:$0xff]   ;;  %v992_v3 = vld [vmem:[%s1101_s18 + $0x40] sm:$0xff]  }
  0x11   : > { %v306_v14 = vmul.f32 %v1106_v0, %v699_v4  ;;  %v307_v15 = vmul.f32 %v1106_v0, %v700_v5  ;;  %v308_v16 = vmul.f32 %v1106_v0, %v703_v7  ;;  %v309_v17 = vmul.f32 %v1106_v0, %v704_v8 }
  0x12   : > { %v310_v18 = vmul.f32 %v1106_v0, %v707_v10  ;;  %v311_v19 = vmul.f32 %v1106_v0, %v708_v11  ;;  %v312_v20 = vmul.f32 %v1106_v0, %v711_v12  ;;  %v313_v21 = vmul.f32 %v1106_v0, %v712_v13  ;;  %v993_v13 = vld [vmem:[%s1101_s18 + $0x48] sm:$0xff]  }
  0x13   : > { %v374_v22 = vadd.f32 %v1114_v6, %v306_v14  ;;  %v375_v23 = vadd.f32 %v1114_v6, %v307_v15  ;;  %v376_v24 = vadd.f32 %v1114_v6, %v308_v16  ;;  %v377_v25 = vadd.f32 %v1114_v6, %v309_v17 }
  0x14   : > { %v378_v26 = vadd.f32 %v1114_v6, %v310_v18  ;;  %v379_v27 = vadd.f32 %v1114_v6, %v311_v19  ;;  %v380_v28 = vadd.f32 %v1114_v6, %v312_v20  ;;  %v381_v29 = vadd.f32 %v1114_v6, %v313_v21  ;;  %v994_v18 = vld [vmem:[%s1101_s18 + $0x50] sm:$0xff]  }
  0x15   : > { %v438_v31 = vmax.f32 %v374_v22, 0.0  ;;  %v439_v32 = vmax.f32 %v375_v23, 0.0  ;;  %v440_v33 = vmax.f32 %v376_v24, 0.0  ;;  %v441_v34 = vmax.f32 %v377_v25, 0.0  ;;  %v995_v23 = vld [vmem:[%s1101_s18 + $0x58] sm:$0xff]  }
  0x16   : > { %v442_v36 = vmax.f32 %v378_v26, 0.0  ;;  %v443_v37 = vmax.f32 %v379_v27, 0.0  ;;  %v444_v38 = vmax.f32 %v380_v28, 0.0  ;;  %v445_v39 = vmax.f32 %v381_v29, 0.0 }
  0x17   : > { %v828_v41 = vpack.c.bf16 %v439_v32, %v438_v31  ;;  %v833_v42 = vpack.c.bf16 %v441_v34, %v440_v33  ;;  %v715_v43 = vunpack.c.l.bf16 %v988_v30  ;;  %v716_v44 = vunpack.c.h.bf16 %v988_v30 }
  0x18   : > { %v838_v46 = vpack.c.bf16 %v443_v37, %v442_v36  ;;  %v843_v47 = vpack.c.bf16 %v445_v39, %v444_v38  ;;  %v719_v48 = vunpack.c.l.bf16 %v989_v35  ;;  %v720_v49 = vunpack.c.h.bf16 %v989_v35 }
  0x19   : > { %829 = vst [vmem:[%s1140_s25] sm:$0xff] %v828_v41   ;;  %v314_v50 = vmul.f32 %v1106_v0, %v715_v43  ;;  %v315_v51 = vmul.f32 %v1106_v0, %v716_v44  ;;  %v723_v52 = vunpack.c.l.bf16 %v990_v40  ;;  %v724_v53 = vunpack.c.h.bf16 %v990_v40  ;;  %v996_v40 = vld [vmem:[%s1101_s18 + $0x60] sm:$0xff]  }
  0x1a   : > { %1016 = vst [vmem:[%s1140_s25 + $0x8] sm:$0xff] %v833_v42   ;;  %v316_v54 = vmul.f32 %v1106_v0, %v719_v48  ;;  %v317_v55 = vmul.f32 %v1106_v0, %v720_v49  ;;  %v727_v56 = vunpack.c.l.bf16 %v991_v45  ;;  %v728_v57 = vunpack.c.h.bf16 %v991_v45 }
  0x1b   : > { %1017 = vst [vmem:[%s1140_s25 + $0x10] sm:$0xff] %v838_v46   ;;  %v382_v58 = vadd.f32 %v1114_v6, %v314_v50  ;;  %v383_v59 = vadd.f32 %v1114_v6, %v315_v51  ;;  %v318_v60 = vmul.f32 %v1106_v0, %v723_v52  ;;  %v319_v61 = vmul.f32 %v1106_v0, %v724_v53  ;;  %v997_v53 = vld [vmem:[%s1101_s18 + $0x68] sm:$0xff]  }
  0x1c   : > { %1018 = vst [vmem:[%s1140_s25 + $0x18] sm:$0xff] %v843_v47   ;;  %v384_v62 = vadd.f32 %v1114_v6, %v316_v54  ;;  %v385_v63 = vadd.f32 %v1114_v6, %v317_v55  ;;  %v320_v1 = vmul.f32 %v1106_v0, %v727_v56  ;;  %v321_v2 = vmul.f32 %v1106_v0, %v728_v57 }
  0x1d   : > { %v446_v4 = vmax.f32 %v382_v58, 0.0  ;;  %v447_v5 = vmax.f32 %v383_v59, 0.0  ;;  %v386_v7 = vadd.f32 %v1114_v6, %v318_v60  ;;  %v387_v8 = vadd.f32 %v1114_v6, %v319_v61  ;;  %v998_v58 = vld [vmem:[%s1101_s18 + $0x70] sm:$0xff]  }
  0x1e   : > { %v448_v9 = vmax.f32 %v384_v62, 0.0  ;;  %v449_v10 = vmax.f32 %v385_v63, 0.0  ;;  %v388_v11 = vadd.f32 %v1114_v6, %v320_v1  ;;  %v389_v12 = vadd.f32 %v1114_v6, %v321_v2  ;;  %v999_v63 = vld [vmem:[%s1101_s18 + $0x78] sm:$0xff]  }
  0x1f   : > { %v848_v14 = vpack.c.bf16 %v447_v5, %v446_v4  ;;  %v450_v15 = vmax.f32 %v386_v7, 0.0  ;;  %v451_v16 = vmax.f32 %v387_v8, 0.0  ;;  %v731_v17 = vunpack.c.l.bf16 %v992_v3 }
  0x20   : > { %v853_v19 = vpack.c.bf16 %v449_v10, %v448_v9  ;;  %v452_v20 = vmax.f32 %v388_v11, 0.0  ;;  %v453_v21 = vmax.f32 %v389_v12, 0.0  ;;  %v732_v22 = vunpack.c.h.bf16 %v992_v3 }
  0x21   : > { %1019 = vst [vmem:[%s1140_s25 + $0x20] sm:$0xff] %v848_v14   ;;  %v858_v24 = vpack.c.bf16 %v451_v16, %v450_v15  ;;  %v322_v25 = vmul.f32 %v1106_v0, %v731_v17  ;;  %v735_v26 = vunpack.c.l.bf16 %v993_v13  ;;  %v736_v27 = vunpack.c.h.bf16 %v993_v13  ;;  %v1000_v14 = vld [vmem:[%s1101_s18 + $0x80] sm:$0xff]  }
  0x22   : > { %1020 = vst [vmem:[%s1140_s25 + $0x28] sm:$0xff] %v853_v19   ;;  %v863_v28 = vpack.c.bf16 %v453_v21, %v452_v20  ;;  %v323_v29 = vmul.f32 %v1106_v0, %v732_v22  ;;  %v739_v30 = vunpack.c.l.bf16 %v994_v18  ;;  %v740_v31 = vunpack.c.h.bf16 %v994_v18 }
  0x23   : > { %1021 = vst [vmem:[%s1140_s25 + $0x30] sm:$0xff] %v858_v24   ;;  %v390_v32 = vadd.f32 %v1114_v6, %v322_v25  ;;  %v324_v33 = vmul.f32 %v1106_v0, %v735_v26  ;;  %v325_v34 = vmul.f32 %v1106_v0, %v736_v27  ;;  %v743_v35 = vunpack.c.l.bf16 %v995_v23 }
  0x24   : > { %1022 = vst [vmem:[%s1140_s25 + $0x38] sm:$0xff] %v863_v28   ;;  %v391_v36 = vadd.f32 %v1114_v6, %v323_v29  ;;  %v326_v37 = vmul.f32 %v1106_v0, %v739_v30  ;;  %v327_v38 = vmul.f32 %v1106_v0, %v740_v31  ;;  %v744_v39 = vunpack.c.h.bf16 %v995_v23  ;;  %v1001_v31 = vld [vmem:[%s1101_s18 + $0x88] sm:$0xff]  }
  0x25   : > { %v454_v41 = vmax.f32 %v390_v32, 0.0  ;;  %v392_v42 = vadd.f32 %v1114_v6, %v324_v33  ;;  %v393_v43 = vadd.f32 %v1114_v6, %v325_v34  ;;  %v328_v44 = vmul.f32 %v1106_v0, %v743_v35 }
  0x26   : > { %v455_v45 = vmax.f32 %v391_v36, 0.0  ;;  %v394_v46 = vadd.f32 %v1114_v6, %v326_v37  ;;  %v395_v47 = vadd.f32 %v1114_v6, %v327_v38  ;;  %v329_v48 = vmul.f32 %v1106_v0, %v744_v39  ;;  %v1002_v36 = vld [vmem:[%s1101_s18 + $0x90] sm:$0xff]  }
  0x27   : > { %v456_v49 = vmax.f32 %v392_v42, 0.0  ;;  %v457_v50 = vmax.f32 %v393_v43, 0.0  ;;  %v396_v51 = vadd.f32 %v1114_v6, %v328_v44  ;;  %v747_v52 = vunpack.c.l.bf16 %v996_v40 }
  0x28   : > { %v868_v54 = vpack.c.bf16 %v455_v45, %v454_v41  ;;  %v458_v55 = vmax.f32 %v394_v46, 0.0  ;;  %v459_v56 = vmax.f32 %v395_v47, 0.0  ;;  %v397_v57 = vadd.f32 %v1114_v6, %v329_v48  ;;  %v1003_v41 = vld [vmem:[%s1101_s18 + $0x98] sm:$0xff]  }
  0x29   : > { %v873_v59 = vpack.c.bf16 %v457_v50, %v456_v49  ;;  %v460_v60 = vmax.f32 %v396_v51, 0.0  ;;  %v748_v61 = vunpack.c.h.bf16 %v996_v40  ;;  %v330_v62 = vmul.f32 %v1106_v0, %v747_v52 }
  0x2a   : > { %1023 = vst [vmem:[%s1140_s25 + $0x40] sm:$0xff] %v868_v54   ;;  %v878_v1 = vpack.c.bf16 %v459_v56, %v458_v55  ;;  %v461_v2 = vmax.f32 %v397_v57, 0.0  ;;  %v751_v3 = vunpack.c.l.bf16 %v997_v53  ;;  %v752_v4 = vunpack.c.h.bf16 %v997_v53  ;;  %v1004_v54 = vld [vmem:[%s1101_s18 + $0xa0] sm:$0xff]  }
  0x2b   : > { %1024 = vst [vmem:[%s1140_s25 + $0x48] sm:$0xff] %v873_v59   ;;  %v331_v5 = vmul.f32 %v1106_v0, %v748_v61  ;;  %v398_v7 = vadd.f32 %v1114_v6, %v330_v62  ;;  %v755_v8 = vunpack.c.l.bf16 %v998_v58  ;;  %v756_v9 = vunpack.c.h.bf16 %v998_v58 }
  0x2c   : > { %1025 = vst [vmem:[%s1140_s25 + $0x50] sm:$0xff] %v878_v1   ;;  %v883_v10 = vpack.c.bf16 %v461_v2, %v460_v60  ;;  %v332_v11 = vmul.f32 %v1106_v0, %v751_v3  ;;  %v333_v12 = vmul.f32 %v1106_v0, %v752_v4  ;;  %v759_v13 = vunpack.c.l.bf16 %v999_v63  ;;  %v1005_v4 = vld [vmem:[%s1101_s18 + $0xa8] sm:$0xff]  }
  0x2d   : > { %v399_v15 = vadd.f32 %v1114_v6, %v331_v5  ;;  %v462_v16 = vmax.f32 %v398_v7, 0.0  ;;  %v334_v17 = vmul.f32 %v1106_v0, %v755_v8  ;;  %v335_v18 = vmul.f32 %v1106_v0, %v756_v9 }
  0x2e   : > { %1026 = vst [vmem:[%s1140_s25 + $0x58] sm:$0xff] %v883_v10   ;;  %v400_v19 = vadd.f32 %v1114_v6, %v332_v11  ;;  %v401_v20 = vadd.f32 %v1114_v6, %v333_v12  ;;  %v760_v21 = vunpack.c.h.bf16 %v999_v63  ;;  %v336_v22 = vmul.f32 %v1106_v0, %v759_v13 }
  0x2f   : > { %v463_v23 = vmax.f32 %v399_v15, 0.0  ;;  %v402_v24 = vadd.f32 %v1114_v6, %v334_v17  ;;  %v403_v25 = vadd.f32 %v1114_v6, %v335_v18  ;;  %v763_v26 = vunpack.c.l.bf16 %v1000_v14 }
  0x30   : > { %v464_v27 = vmax.f32 %v400_v19, 0.0  ;;  %v465_v28 = vmax.f32 %v401_v20, 0.0  ;;  %v337_v29 = vmul.f32 %v1106_v0, %v760_v21  ;;  %v404_v30 = vadd.f32 %v1114_v6, %v336_v22  ;;  %v1007_v19 = vld [vmem:[%s1101_s18 + $0xb8] sm:$0xff]  }
  0x31   : > { %v888_v32 = vpack.c.bf16 %v463_v23, %v462_v16  ;;  %v466_v33 = vmax.f32 %v402_v24, 0.0  ;;  %v467_v34 = vmax.f32 %v403_v25, 0.0  ;;  %v764_v35 = vunpack.c.h.bf16 %v1000_v14  ;;  %v1006_v14 = vld [vmem:[%s1101_s18 + $0xb0] sm:$0xff]  }
  0x32   : > { %v893_v37 = vpack.c.bf16 %v465_v28, %v464_v27  ;;  %v405_v38 = vadd.f32 %v1114_v6, %v337_v29  ;;  %v468_v39 = vmax.f32 %v404_v30, 0.0  ;;  %v338_v40 = vmul.f32 %v1106_v0, %v763_v26 }
  0x33   : > { %1027 = vst [vmem:[%s1140_s25 + $0x60] sm:$0xff] %v888_v32   ;;  %v898_v42 = vpack.c.bf16 %v467_v34, %v466_v33  ;;  %v339_v43 = vmul.f32 %v1106_v0, %v764_v35  ;;  %v767_v44 = vunpack.c.l.bf16 %v1001_v31  ;;  %v768_v45 = vunpack.c.h.bf16 %v1001_v31  ;;  %v1008_v32 = vld [vmem:[%s1101_s18 + $0xc0] sm:$0xff]  }
  0x34   : > { %1028 = vst [vmem:[%s1140_s25 + $0x68] sm:$0xff] %v893_v37   ;;  %v469_v46 = vmax.f32 %v405_v38, 0.0  ;;  %v406_v47 = vadd.f32 %v1114_v6, %v338_v40  ;;  %v771_v48 = vunpack.c.l.bf16 %v1002_v36  ;;  %v772_v49 = vunpack.c.h.bf16 %v1002_v36 }
  0x35   : > { %1029 = vst [vmem:[%s1140_s25 + $0x70] sm:$0xff] %v898_v42   ;;  %v407_v50 = vadd.f32 %v1114_v6, %v339_v43  ;;  %v340_v51 = vmul.f32 %v1106_v0, %v767_v44  ;;  %v341_v52 = vmul.f32 %v1106_v0, %v768_v45  ;;  %v775_v53 = vunpack.c.l.bf16 %v1003_v41  ;;  %v1009_v45 = vld [vmem:[%s1101_s18 + $0xc8] sm:$0xff]  }
  0x36   : > { %v903_v55 = vpack.c.bf16 %v469_v46, %v468_v39  ;;  %v470_v56 = vmax.f32 %v406_v47, 0.0  ;;  %v342_v57 = vmul.f32 %v1106_v0, %v771_v48  ;;  %v343_v58 = vmul.f32 %v1106_v0, %v772_v49 }
  0x37   : > { %v471_v59 = vmax.f32 %v407_v50, 0.0  ;;  %v408_v60 = vadd.f32 %v1114_v6, %v340_v51  ;;  %v409_v61 = vadd.f32 %v1114_v6, %v341_v52  ;;  %v776_v62 = vunpack.c.h.bf16 %v1003_v41 }
  0x38   : > { %1030 = vst [vmem:[%s1140_s25 + $0x78] sm:$0xff] %v903_v55   ;;  %v410_v63 = vadd.f32 %v1114_v6, %v342_v57  ;;  %v411_v1 = vadd.f32 %v1114_v6, %v343_v58  ;;  %v344_v2 = vmul.f32 %v1106_v0, %v775_v53  ;;  %v779_v3 = vunpack.c.l.bf16 %v1004_v54 }
  0x39   : > { %v908_v5 = vpack.c.bf16 %v471_v59, %v470_v56  ;;  %v472_v7 = vmax.f32 %v408_v60, 0.0  ;;  %v473_v8 = vmax.f32 %v409_v61, 0.0  ;;  %v345_v9 = vmul.f32 %v1106_v0, %v776_v62 }
  0x3a   : > { %v474_v10 = vmax.f32 %v410_v63, 0.0  ;;  %v475_v11 = vmax.f32 %v411_v1, 0.0  ;;  %v412_v12 = vadd.f32 %v1114_v6, %v344_v2  ;;  %v780_v13 = vunpack.c.h.bf16 %v1004_v54  ;;  %v1010_v54 = vld [vmem:[%s1101_s18 + $0xd0] sm:$0xff]   ;;  %v1011_v63 = vld [vmem:[%s1101_s18 + $0xd8] sm:$0xff]  }
  0x3b   : > { %1031 = vst [vmem:[%s1140_s25 + $0x80] sm:$0xff] %v908_v5   ;;  %v913_v15 = vpack.c.bf16 %v473_v8, %v472_v7  ;;  %v413_v16 = vadd.f32 %v1114_v6, %v345_v9  ;;  %v346_v17 = vmul.f32 %v1106_v0, %v779_v3  ;;  %v783_v18 = vunpack.c.l.bf16 %v1005_v4 }
  0x3c   : > { %v918_v20 = vpack.c.bf16 %v475_v11, %v474_v10  ;;  %v476_v21 = vmax.f32 %v412_v12, 0.0  ;;  %v347_v22 = vmul.f32 %v1106_v0, %v780_v13  ;;  %v784_v23 = vunpack.c.h.bf16 %v1005_v4  ;;  %v1012_v10 = vld [vmem:[%s1101_s18 + $0xe0] sm:$0xff]  }
  0x3d   : > { %1032 = vst [vmem:[%s1140_s25 + $0x88] sm:$0xff] %v913_v15   ;;  %v477_v24 = vmax.f32 %v413_v16, 0.0  ;;  %v414_v25 = vadd.f32 %v1114_v6, %v346_v17  ;;  %v348_v26 = vmul.f32 %v1106_v0, %v783_v18  ;;  %v787_v27 = vunpack.c.l.bf16 %v1006_v14 }
  0x3e   : > { %1033 = vst [vmem:[%s1140_s25 + $0x90] sm:$0xff] %v918_v20   ;;  %v415_v28 = vadd.f32 %v1114_v6, %v347_v22  ;;  %v349_v29 = vmul.f32 %v1106_v0, %v784_v23  ;;  %v788_v30 = vunpack.c.h.bf16 %v1006_v14  ;;  %v791_v31 = vunpack.c.l.bf16 %v1007_v19  ;;  %v1013_v23 = vld [vmem:[%s1101_s18 + $0xe8] sm:$0xff]  }
  0x3f   : > { %v923_v33 = vpack.c.bf16 %v477_v24, %v476_v21  ;;  %v478_v34 = vmax.f32 %v414_v25, 0.0  ;;  %v416_v35 = vadd.f32 %v1114_v6, %v348_v26  ;;  %v350_v36 = vmul.f32 %v1106_v0, %v787_v27 }
  0x40   : > { %v479_v37 = vmax.f32 %v415_v28, 0.0  ;;  %v417_v38 = vadd.f32 %v1114_v6, %v349_v29  ;;  %v351_v39 = vmul.f32 %v1106_v0, %v788_v30  ;;  %v792_v40 = vunpack.c.h.bf16 %v1007_v19 }
  0x41   : > { %1034 = vst [vmem:[%s1140_s25 + $0x98] sm:$0xff] %v923_v33   ;;  %v480_v41 = vmax.f32 %v416_v35, 0.0  ;;  %v418_v42 = vadd.f32 %v1114_v6, %v350_v36  ;;  %v352_v43 = vmul.f32 %v1106_v0, %v791_v31  ;;  %v795_v44 = vunpack.c.l.bf16 %v1008_v32 }
  0x42   : > { %v928_v46 = vpack.c.bf16 %v479_v37, %v478_v34  ;;  %v481_v47 = vmax.f32 %v417_v38, 0.0  ;;  %v419_v48 = vadd.f32 %v1114_v6, %v351_v39  ;;  %v353_v49 = vmul.f32 %v1106_v0, %v792_v40 }
  0x43   : > { %v482_v50 = vmax.f32 %v418_v42, 0.0  ;;  %v420_v51 = vadd.f32 %v1114_v6, %v352_v43  ;;  %v796_v52 = vunpack.c.h.bf16 %v1008_v32  ;;  %v354_v53 = vmul.f32 %v1106_v0, %v795_v44  ;;  %v1014_v32 = vld [vmem:[%s1101_s18 + $0xf0] sm:$0xff]  }
  0x44   : > { %1035 = vst [vmem:[%s1140_s25 + $0xa0] sm:$0xff] %v928_v46   ;;  %v933_v55 = vpack.c.bf16 %v481_v47, %v480_v41  ;;  %v483_v56 = vmax.f32 %v419_v48, 0.0  ;;  %v421_v57 = vadd.f32 %v1114_v6, %v353_v49  ;;  %v799_v58 = vunpack.c.l.bf16 %v1009_v45  ;;  %v1015_v41 = vld [vmem:[%s1101_s18 + $0xf8] sm:$0xff]  }
  0x45   : > { %v484_v59 = vmax.f32 %v420_v51, 0.0  ;;  %v355_v60 = vmul.f32 %v1106_v0, %v796_v52  ;;  %v422_v61 = vadd.f32 %v1114_v6, %v354_v53  ;;  %v800_v62 = vunpack.c.h.bf16 %v1009_v45 }
  0x46   : > { %1036 = vst [vmem:[%s1140_s25 + $0xa8] sm:$0xff] %v933_v55   ;;  %v938_v1 = vpack.c.bf16 %v483_v56, %v482_v50  ;;  %v485_v2 = vmax.f32 %v421_v57, 0.0  ;;  %v356_v3 = vmul.f32 %v1106_v0, %v799_v58  ;;  %v803_v4 = vunpack.c.l.bf16 %v1010_v54 }
  0x47   : > { %v423_v5 = vadd.f32 %v1114_v6, %v355_v60  ;;  %v486_v7 = vmax.f32 %v422_v61, 0.0  ;;  %v357_v8 = vmul.f32 %v1106_v0, %v800_v62  ;;  %v804_v9 = vunpack.c.h.bf16 %v1010_v54 }
  0x48   : > { %1037 = vst [vmem:[%s1140_s25 + $0xb0] sm:$0xff] %v938_v1   ;;  %v943_v11 = vpack.c.bf16 %v485_v2, %v484_v59  ;;  %v424_v12 = vadd.f32 %v1114_v6, %v356_v3  ;;  %v358_v13 = vmul.f32 %v1106_v0, %v803_v4  ;;  %v807_v14 = vunpack.c.l.bf16 %v1011_v63 }
  0x49   : > { %v487_v15 = vmax.f32 %v423_v5, 0.0  ;;  %v425_v16 = vadd.f32 %v1114_v6, %v357_v8  ;;  %v359_v17 = vmul.f32 %v1106_v0, %v804_v9  ;;  %v808_v18 = vunpack.c.h.bf16 %v1011_v63 }
  0x4a   : > { %1038 = vst [vmem:[%s1140_s25 + $0xb8] sm:$0xff] %v943_v11   ;;  %v488_v19 = vmax.f32 %v424_v12, 0.0  ;;  %v426_v20 = vadd.f32 %v1114_v6, %v358_v13  ;;  %v360_v21 = vmul.f32 %v1106_v0, %v807_v14  ;;  %v811_v22 = vunpack.c.l.bf16 %v1012_v10 }
  0x4b   : > { %v948_v24 = vpack.c.bf16 %v487_v15, %v486_v7  ;;  %v489_v25 = vmax.f32 %v425_v16, 0.0  ;;  %v427_v26 = vadd.f32 %v1114_v6, %v359_v17  ;;  %v361_v27 = vmul.f32 %v1106_v0, %v808_v18 }
  0x4c   : > { %v490_v28 = vmax.f32 %v426_v20, 0.0  ;;  %v428_v29 = vadd.f32 %v1114_v6, %v360_v21  ;;  %v812_v30 = vunpack.c.h.bf16 %v1012_v10  ;;  %v362_v31 = vmul.f32 %v1106_v0, %v811_v22 }
  0x4d   : > { %1039 = vst [vmem:[%s1140_s25 + $0xc0] sm:$0xff] %v948_v24   ;;  %v953_v33 = vpack.c.bf16 %v489_v25, %v488_v19  ;;  %v491_v34 = vmax.f32 %v427_v26, 0.0  ;;  %v429_v35 = vadd.f32 %v1114_v6, %v361_v27  ;;  %v815_v36 = vunpack.c.l.bf16 %v1013_v23 }
  0x4e   : > { %v492_v37 = vmax.f32 %v428_v29, 0.0  ;;  %v363_v38 = vmul.f32 %v1106_v0, %v812_v30  ;;  %v430_v39 = vadd.f32 %v1114_v6, %v362_v31  ;;  %v816_v40 = vunpack.c.h.bf16 %v1013_v23 }
  0x4f   : > { %1040 = vst [vmem:[%s1140_s25 + $0xc8] sm:$0xff] %v953_v33   ;;  %v958_v42 = vpack.c.bf16 %v491_v34, %v490_v28  ;;  %v493_v43 = vmax.f32 %v429_v35, 0.0  ;;  %v364_v44 = vmul.f32 %v1106_v0, %v815_v36  ;;  %v819_v45 = vunpack.c.l.bf16 %v1014_v32 }
  0x50   : > { %v431_v46 = vadd.f32 %v1114_v6, %v363_v38  ;;  %v494_v47 = vmax.f32 %v430_v39, 0.0  ;;  %v365_v48 = vmul.f32 %v1106_v0, %v816_v40  ;;  %v820_v49 = vunpack.c.h.bf16 %v1014_v32 }
  0x51   : > { %1041 = vst [vmem:[%s1140_s25 + $0xd0] sm:$0xff] %v958_v42   ;;  %v963_v50 = vpack.c.bf16 %v493_v43, %v492_v37  ;;  %v432_v51 = vadd.f32 %v1114_v6, %v364_v44  ;;  %v366_v52 = vmul.f32 %v1106_v0, %v819_v45  ;;  %v823_v53 = vunpack.c.l.bf16 %v1015_v41 }
  0x52   : > { %v495_v54 = vmax.f32 %v431_v46, 0.0  ;;  %v433_v55 = vadd.f32 %v1114_v6, %v365_v48  ;;  %v367_v56 = vmul.f32 %v1106_v0, %v820_v49  ;;  %v824_v57 = vunpack.c.h.bf16 %v1015_v41 }
  0x53   : > { %1042 = vst [vmem:[%s1140_s25 + $0xd8] sm:$0xff] %v963_v50   ;;  %v496_v58 = vmax.f32 %v432_v51, 0.0  ;;  %v434_v59 = vadd.f32 %v1114_v6, %v366_v52  ;;  %v368_v60 = vmul.f32 %v1106_v0, %v823_v53 }
  0x54   : > { %v968_v61 = vpack.c.bf16 %v495_v54, %v494_v47  ;;  %v497_v62 = vmax.f32 %v433_v55, 0.0  ;;  %v435_v63 = vadd.f32 %v1114_v6, %v367_v56  ;;  %v369_v1 = vmul.f32 %v1106_v0, %v824_v57 }
  0x55   : > { %v498_v2 = vmax.f32 %v434_v59, 0.0  ;;  %v436_v3 = vadd.f32 %v1114_v6, %v368_v60 }
  0x56   : > { %1043 = vst [vmem:[%s1140_s25 + $0xe0] sm:$0xff] %v968_v61   ;;  %v973_v4 = vpack.c.bf16 %v497_v62, %v496_v58  ;;  %v499_v5 = vmax.f32 %v435_v63, 0.0  ;;  %v437_v7 = vadd.f32 %v1114_v6, %v369_v1 }
  0x57   : > { %v500_v8 = vmax.f32 %v436_v3, 0.0 }
  0x58   : > { %1044 = vst [vmem:[%s1140_s25 + $0xe8] sm:$0xff] %v973_v4   ;;  %v978_v9 = vpack.c.bf16 %v499_v5, %v498_v2  ;;  %v501_v10 = vmax.f32 %v437_v7, 0.0 }
  0x5a   : > { %1045 = vst [vmem:[%s1140_s25 + $0xf0] sm:$0xff] %v978_v9   ;;  %v983_v11 = vpack.c.bf16 %v501_v10, %v500_v8 }
  0x5c   : > { %1046 = vst [vmem:[%s1140_s25 + $0xf8] sm:$0xff] %v983_v11  }
  0x5d PF: > { %s13_s12 = sadd.s32 1, %s1063_s12  }
  0x5e   : > { %p10_p4 = scmp.ge.s32.totalorder %s13_s12, 6  }
  0x60   :  { %12 = sbr.rel (!%p10_p4) target bundleno = 1 (0x1), region = 62 }

// kernel: font_unet_forward.45
= control target key start
LH: loop header
LB: loop body
LE: loop exit
PB: predicated region body
PF: predicated region fallthrough
CT: control target
= control target key end

     0   :  { %s1749_s12 = smov 0   ;;  %s1751_s13 = smov 0   ;;  %s1964_s0 = inlined_call_operand.vmem [shape: bf16[4,2048,128], index: 0, kind: input, shape index: {}]   ;;  %s1965_s1 = inlined_call_operand.vmem [shape: bf16[4,128,128], index: 1, kind: input, shape index: {}]   ;;  %s1966_s2 = inlined_call_operand.vmem [shape: f32[1,128], index: 2, kind: input, shape index: {}]   ;;  %s1967_s3 = inlined_call_operand.vmem [shape: bf16[4,2048,128], index: 3, kind: output, shape index: {}]  }
   0x1   :  { %s1753_s14 = smov 0   ;;  %s1755_s15 = smov 0  }
   0x2   :  { %s1757_s16 = smov 0  }
   0x3 LB: > { %s28_s17 = sadd.s32 1, %s1719_s14  ;;  %s32_s18 = sadd.s32 1, %s1723_s15  ;;  %s1727_s16 = sphi %s1757_s16, %s13_s16   ;;  %s1723_s15 = sphi %s1755_s15, %s1971_s15   ;;  %s1719_s14 = sphi %s1753_s14, %s1970_s14   ;;  %s1715_s13 = sphi %s1751_s13, %s1969_s13   ;;  %s1711_s12 = sphi %s1749_s12, %s1968_s12  }
   0x4   : > { %p30_p0 = scmp.ge.s32.totalorder %s28_s17, 4  ;;  %p1093_p1 = scmp.ge.s32.totalorder %s1727_s16, 1 }
   0x5   : > { %p190_p2 = scmp.lt.s32.totalorder %s1727_s16, 17 }
   0x6   : > { %s1973_s17 = smov (%p30_p0, %s28_s17), 0  ;;  %s1975_s18 = smov (!%p30_p0, %s32_s18), %s1723_s15 }
   0x7   : > { %p191_p3 = pnand %p1093_p1, %p190_p2  ;;  %p34_p4 = scmp.ge.s32.totalorder %s1975_s18, 4 }
   0x8   : > { %p237_p5 = scmp.lt.s32.totalorder (!%p191_p3), %s1715_s13, 3  ;;  %s1094_s23 = sshll.u32 (!%p191_p3), %s1711_s12, 6 }
   0x9   : > { %s1977_s18 = smov (%p34_p4, %s1975_s18), 0  ;;  %194 = sbr.rel (%p191_p3) target bundleno = 315 (0x13b), region = 32 }
   0xa   : > { %p239_p6 = scmp.lt.s32.totalorder (!%p191_p3), %s1094_s23, 255 }
   0xe   : > { %s1979_s13 = smov (!%p237_p5, %s1715_s13), 3  ;;  %s1981_s23 = smov (!%p239_p6, %s1094_s23), 255  ;;  %v1844_v42 = vld [vmem:[%s1966_s2] ss:$0 sm:$0xff] }
   0xf   : > { %s1264_s19 = sshll.u32 %s1979_s13, 6  ;;  %s1095_s24 = sshll.u32 %s1979_s13, 8 }
  0x10   : > { %s1787_s22 = scalar_lea.vmem %s1965_s1, %s1264_s19  ;;  %s1797_s25 = sadd.s32 %s1095_s24, %s1981_s23 }
  0x11   : > { %v1304_v0 = vld [vmem:[%s1787_s22 + $0x38] sm:$0xff]  ;;  %v1303_v1 = vld [vmem:[%s1787_s22 + $0x30] sm:$0xff]  ;;  %v1302_v2 = vld [vmem:[%s1787_s22 + $0x28] sm:$0xff]  ;;  %s1096_s26 = sshll.u32 %s1797_s25, 2 }
  0x12   : > { %594 = vmatpush.bf16.msra.mxu0 %v1304_v0  ;;  %1496 = vmatpush.bf16.msra.mxu1 %v1304_v0  ;;  %v1301_v3 = vld [vmem:[%s1787_s22 + $0x20] sm:$0xff]  ;;  %v1300_v4 = vld [vmem:[%s1787_s22 + $0x18] sm:$0xff]  ;;  %v1299_v5 = vld [vmem:[%s1787_s22 + $0x10] sm:$0xff]  ;;  %s1806_s29 = scalar_lea.vmem %s1964_s0, %s1096_s26  ;;  %s1859_s7 = scalar_lea.vmem %s1967_s3, %s1096_s26 }
  0x13   : > { %1497 = vmatpush.bf16.msra.mxu2 %v1304_v0  ;;  %1498 = vmatpush.bf16.msra.mxu3 %v1304_v0  ;;  %v1298_v6 = vld [vmem:[%s1787_s22 + $0x8] sm:$0xff]  ;;  %v1297_v7 = vld [vmem:[%s1787_s22] sm:$0xff]  ;;  %v1267_v16 = vld [vmem:[%s1806_s29 + $0x10] sm:$0xff] }
  0x14   : > { %v1265_v8 = vld [vmem:[%s1806_s29] sm:$0xff]  ;;  %v1266_v12 = vld [vmem:[%s1806_s29 + $0x8] sm:$0xff]  ;;  %v1275_v17 = vld [vmem:[%s1806_s29 + $0x50] sm:$0xff] }
  0x15   : > { %v1273_v9 = vld [vmem:[%s1806_s29 + $0x40] sm:$0xff]  ;;  %v1274_v13 = vld [vmem:[%s1806_s29 + $0x48] sm:$0xff]  ;;  %v1283_v18 = vld [vmem:[%s1806_s29 + $0x90] sm:$0xff] }
  0x16   : > { %595 = vmatpush.bf16.msra.mxu0 %v1303_v1  ;;  %1499 = vmatpush.bf16.msra.mxu1 %v1303_v1  ;;  %v1281_v10 = vld [vmem:[%s1806_s29 + $0x80] sm:$0xff]  ;;  %v1282_v14 = vld [vmem:[%s1806_s29 + $0x88] sm:$0xff]  ;;  %v1291_v19 = vld [vmem:[%s1806_s29 + $0xd0] sm:$0xff] }
  0x17   : > { %1500 = vmatpush.bf16.msra.mxu2 %v1303_v1  ;;  %1501 = vmatpush.bf16.msra.mxu3 %v1303_v1  ;;  %v1289_v11 = vld [vmem:[%s1806_s29 + $0xc0] sm:$0xff]  ;;  %v1290_v15 = vld [vmem:[%s1806_s29 + $0xc8] sm:$0xff]  ;;  %v1268_v20 = vld [vmem:[%s1806_s29 + $0x18] sm:$0xff] }
  0x18   : > { %v1276_v21 = vld [vmem:[%s1806_s29 + $0x58] sm:$0xff]  ;;  %v1269_v24 = vld [vmem:[%s1806_s29 + $0x20] sm:$0xff]  ;;  %v1270_v28 = vld [vmem:[%s1806_s29 + $0x28] sm:$0xff] }
  0x19   : > { %v1284_v22 = vld [vmem:[%s1806_s29 + $0x98] sm:$0xff]  ;;  %v1277_v25 = vld [vmem:[%s1806_s29 + $0x60] sm:$0xff]  ;;  %v1278_v29 = vld [vmem:[%s1806_s29 + $0x68] sm:$0xff] }
  0x1a   : > { %596 = vmatpush.bf16.msra.mxu0 %v1302_v2  ;;  %1502 = vmatpush.bf16.msra.mxu1 %v1302_v2  ;;  %v1292_v23 = vld [vmem:[%s1806_s29 + $0xd8] sm:$0xff]  ;;  %v1285_v26 = vld [vmem:[%s1806_s29 + $0xa0] sm:$0xff]  ;;  %v1286_v30 = vld [vmem:[%s1806_s29 + $0xa8] sm:$0xff] }
  0x1b   : > { %1503 = vmatpush.bf16.msra.mxu2 %v1302_v2  ;;  %1504 = vmatpush.bf16.msra.mxu3 %v1302_v2  ;;  %v1293_v27 = vld [vmem:[%s1806_s29 + $0xe0] sm:$0xff]  ;;  %v1294_v31 = vld [vmem:[%s1806_s29 + $0xe8] sm:$0xff]  ;;  %v1271_v32 = vld [vmem:[%s1806_s29 + $0x30] sm:$0xff] }
  0x1c   : > { %v1279_v33 = vld [vmem:[%s1806_s29 + $0x70] sm:$0xff]  ;;  %v1272_v36 = vld [vmem:[%s1806_s29 + $0x38] sm:$0xff] }
  0x1d   : > { %v1287_v34 = vld [vmem:[%s1806_s29 + $0xb0] sm:$0xff]  ;;  %v1280_v37 = vld [vmem:[%s1806_s29 + $0x78] sm:$0xff] }
  0x1e   : > { %597 = vmatpush.bf16.msra.mxu0 %v1301_v3  ;;  %1505 = vmatpush.bf16.msra.mxu1 %v1301_v3  ;;  %v1295_v35 = vld [vmem:[%s1806_s29 + $0xf0] sm:$0xff]  ;;  %v1288_v38 = vld [vmem:[%s1806_s29 + $0xb8] sm:$0xff] }
  0x1f   : > { %1506 = vmatpush.bf16.msra.mxu2 %v1301_v3  ;;  %1507 = vmatpush.bf16.msra.mxu3 %v1301_v3  ;;  %v1296_v39 = vld [vmem:[%s1806_s29 + $0xf8] sm:$0xff] }
  0x22   : > { %598 = vmatpush.bf16.msra.mxu0 %v1300_v4  ;;  %1508 = vmatpush.bf16.msra.mxu1 %v1300_v4 }
  0x23   : > { %1509 = vmatpush.bf16.msra.mxu2 %v1300_v4  ;;  %1510 = vmatpush.bf16.msra.mxu3 %v1300_v4 }
  0x26   : > { %599 = vmatpush.bf16.msra.mxu0 %v1299_v5  ;;  %1511 = vmatpush.bf16.msra.mxu1 %v1299_v5 }
  0x27   : > { %1512 = vmatpush.bf16.msra.mxu2 %v1299_v5  ;;  %1513 = vmatpush.bf16.msra.mxu3 %v1299_v5 }
  0x2a   : > { %600 = vmatpush.bf16.msra.mxu0 %v1298_v6  ;;  %1514 = vmatpush.bf16.msra.mxu1 %v1298_v6 }
  0x2b   : > { %1515 = vmatpush.bf16.msra.mxu2 %v1298_v6  ;;  %1516 = vmatpush.bf16.msra.mxu3 %v1298_v6 }
  0x2e   : > { %601 = vmatpush.bf16.msra.mxu0 %v1297_v7  ;;  %1517 = vmatpush.bf16.msra.mxu1 %v1297_v7 }
  0x2f   : > { %1518 = vmatpush.bf16.msra.mxu2 %v1297_v7  ;;  %1519 = vmatpush.bf16.msra.mxu3 %v1297_v7 }
  0x31   : > { %602 = vmatmul.bf16.vlgmr.msra.gmra.mxu0 %v1265_v8  ;;  %642 = vmatmul.bf16.vlgmr.msra.gmra.mxu1 %v1273_v9 }
  0x32   : > { %682 = vmatmul.bf16.vlgmr.msra.gmra.mxu2 %v1281_v10  ;;  %722 = vmatmul.bf16.vlgmr.msra.gmra.mxu3 %v1289_v11 }
  0x41   : > { %607 = vmatmul.bf16.gmra.mxu0 %v1266_v12  ;;  %647 = vmatmul.bf16.gmra.mxu1 %v1274_v13 }
  0x42   : > { %687 = vmatmul.bf16.gmra.mxu2 %v1282_v14  ;;  %727 = vmatmul.bf16.gmra.mxu3 %v1290_v15 }
  0x51   : > { %612 = vmatmul.bf16.gmra.mxu0 %v1267_v16  ;;  %652 = vmatmul.bf16.gmra.mxu1 %v1275_v17 }
  0x52   : > { %692 = vmatmul.bf16.gmra.mxu2 %v1283_v18  ;;  %732 = vmatmul.bf16.gmra.mxu3 %v1291_v19 }
  0x61   : > { %617 = vmatmul.bf16.gmra.mxu0 %v1268_v20  ;;  %657 = vmatmul.bf16.gmra.mxu1 %v1276_v21 }
  0x62   : > { %697 = vmatmul.bf16.gmra.mxu2 %v1284_v22  ;;  %737 = vmatmul.bf16.gmra.mxu3 %v1292_v23 }
  0x71   : > { %622 = vmatmul.bf16.gmra.mxu0 %v1269_v24  ;;  %662 = vmatmul.bf16.gmra.mxu1 %v1277_v25 }
  0x72   : > { %702 = vmatmul.bf16.gmra.mxu2 %v1285_v26  ;;  %742 = vmatmul.bf16.gmra.mxu3 %v1293_v27 }
  0x81   : > { %627 = vmatmul.bf16.gmra.mxu0 %v1270_v28  ;;  %667 = vmatmul.bf16.gmra.mxu1 %v1278_v29 }
  0x82   : > { %707 = vmatmul.bf16.gmra.mxu2 %v1286_v30  ;;  %747 = vmatmul.bf16.gmra.mxu3 %v1294_v31 }
  0x91   : > { %632 = vmatmul.bf16.gmra.mxu0 %v1271_v32  ;;  %672 = vmatmul.bf16.gmra.mxu1 %v1279_v33 }
  0x92   : > { %712 = vmatmul.bf16.gmra.mxu2 %v1287_v34  ;;  %752 = vmatmul.bf16.gmra.mxu3 %v1295_v35 }
  0xa1   : > { %637 = vmatmul.bf16.gmra.mxu0 %v1272_v36  ;;  %677 = vmatmul.bf16.gmra.mxu1 %v1280_v37 }
  0xa2   : > { %717 = vmatmul.bf16.gmra.mxu2 %v1288_v38  ;;  %757 = vmatmul.bf16.gmra.mxu3 %v1296_v39 }
  0xae   : > { %v603_v40 = vpop.f32.mrf.mxu0  ;;  %v643_v41 = vpop.f32.mrf.mxu1 }
  0xaf   : > { %v604_v43 = vadd.f32 %v1844_v42, %v603_v40  ;;  %v644_v44 = vadd.f32 %v1844_v42, %v643_v41 }
  0xb1   : > { %1561 = vtanh.f32 %v604_v43 }
  0xb2   : > { %1563 = vtanh.f32 %v644_v44 }
  0xb5   : > { %v683_v45 = vpop.f32.mrf.mxu2  ;;  %v723_v46 = vpop.f32.mrf.mxu3 }
  0xb6   : > { %v605_v47 = vpop.f32.mrf.mxu0  ;;  %v645_v48 = vpop.f32.mrf.mxu1  ;;  %v684_v51 = vadd.f32 %v1844_v42, %v683_v45  ;;  %v724_v52 = vadd.f32 %v1844_v42, %v723_v46 }
  0xb7   : > { %v606_v49 = vadd.f32 %v1844_v42, %v605_v47  ;;  %v646_v50 = vadd.f32 %v1844_v42, %v645_v48  ;;  %v1562_v55 = vpop.eup %1561 }
  0xb8   : > { %v1564_v60 = vpop.eup %1563 }
  0xb9   : > { %1565 = vtanh.f32 %v606_v49 }
  0xba   : > { %1567 = vtanh.f32 %v646_v50 }
  0xbb   : > { %1569 = vtanh.f32 %v684_v51 }
  0xbc   : > { %1571 = vtanh.f32 %v724_v52 }
  0xbd   : > { %v685_v53 = vpop.f32.mrf.mxu2  ;;  %v725_v54 = vpop.f32.mrf.mxu3 }
  0xbe   : > { %v686_v56 = vadd.f32 %v1844_v42, %v685_v53  ;;  %v726_v57 = vadd.f32 %v1844_v42, %v725_v54  ;;  %v608_v58 = vpop.f32.mrf.mxu0  ;;  %v648_v59 = vpop.f32.mrf.mxu1 }
  0xbf   : > { %v1566_v61 = vpop.eup %1565  ;;  %v609_v2 = vadd.f32 %v1844_v42, %v608_v58  ;;  %v649_v4 = vadd.f32 %v1844_v42, %v648_v59 }
  0xc0   : > { %1573 = vtanh.f32 %v686_v56  ;;  %v1568_v62 = vpop.eup %1567  ;;  %v1308_v63 = vpack.c.bf16 %v1566_v61, %v1562_v55 }
  0xc1   : > { %1575 = vtanh.f32 %v726_v57  ;;  %v1348_v0 = vpack.c.bf16 %v1568_v62, %v1564_v60  ;;  %v1570_v1 = vpop.eup %1569 }
  0xc2   : > { %1309 = vst [vmem:[%s1859_s7] sm:$0xff] %v1308_v63   ;;  %v1572_v3 = vpop.eup %1571  ;;  %1577 = vtanh.f32 %v609_v2 }
  0xc3   : > { %1472 = vst [vmem:[%s1859_s7 + $0x40] sm:$0xff] %v1348_v0   ;;  %1579 = vtanh.f32 %v649_v4 }
  0xc5   : > { %v688_v5 = vpop.f32.mrf.mxu2  ;;  %v728_v6 = vpop.f32.mrf.mxu3 }
  0xc6   : > { %v1574_v7 = vpop.eup %1573  ;;  %v610_v8 = vpop.f32.mrf.mxu0  ;;  %v689_v15 = vadd.f32 %v1844_v42, %v688_v5  ;;  %v729_v16 = vadd.f32 %v1844_v42, %v728_v6 }
  0xc7   : > { %v650_v9 = vpop.f32.mrf.mxu1  ;;  %v1576_v10 = vpop.eup %1575  ;;  %v1388_v11 = vpack.c.bf16 %v1574_v7, %v1570_v1  ;;  %v611_v12 = vadd.f32 %v1844_v42, %v610_v8 }
  0xc8   : > { %v651_v13 = vadd.f32 %v1844_v42, %v650_v9  ;;  %v1428_v14 = vpack.c.bf16 %v1576_v10, %v1572_v3  ;;  %v1578_v19 = vpop.eup %1577 }
  0xc9   : > { %1480 = vst [vmem:[%s1859_s7 + $0x80] sm:$0xff] %v1388_v11   ;;  %1581 = vtanh.f32 %v611_v12  ;;  %v1580_v24 = vpop.eup %1579 }
  0xca   : > { %1488 = vst [vmem:[%s1859_s7 + $0xc0] sm:$0xff] %v1428_v14   ;;  %1583 = vtanh.f32 %v651_v13 }
  0xcb   : > { %1585 = vtanh.f32 %v689_v15 }
  0xcc   : > { %1587 = vtanh.f32 %v729_v16 }
  0xcd   : > { %v690_v17 = vpop.f32.mrf.mxu2  ;;  %v730_v18 = vpop.f32.mrf.mxu3 }
  0xce   : > { %v691_v20 = vadd.f32 %v1844_v42, %v690_v17  ;;  %v731_v21 = vadd.f32 %v1844_v42, %v730_v18  ;;  %v613_v22 = vpop.f32.mrf.mxu0 }
  0xcf   : > { %v653_v23 = vpop.f32.mrf.mxu1  ;;  %v1582_v25 = vpop.eup %1581  ;;  %v614_v30 = vadd.f32 %v1844_v42, %v613_v22 }
  0xd0   : > { %1589 = vtanh.f32 %v691_v20  ;;  %v1584_v26 = vpop.eup %1583  ;;  %v1313_v27 = vpack.c.bf16 %v1582_v25, %v1578_v19  ;;  %v654_v32 = vadd.f32 %v1844_v42, %v653_v23 }
  0xd1   : > { %1591 = vtanh.f32 %v731_v21  ;;  %v1353_v28 = vpack.c.bf16 %v1584_v26, %v1580_v24  ;;  %v1586_v29 = vpop.eup %1585 }
  0xd2   : > { %1465 = vst [vmem:[%s1859_s7 + $0x8] sm:$0xff] %v1313_v27   ;;  %v1588_v31 = vpop.eup %1587  ;;  %1593 = vtanh.f32 %v614_v30 }
  0xd3   : > { %1473 = vst [vmem:[%s1859_s7 + $0x48] sm:$0xff] %v1353_v28   ;;  %1595 = vtanh.f32 %v654_v32 }
  0xd5   : > { %v693_v33 = vpop.f32.mrf.mxu2  ;;  %v733_v34 = vpop.f32.mrf.mxu3 }
  0xd6   : > { %v1590_v35 = vpop.eup %1589  ;;  %v615_v36 = vpop.f32.mrf.mxu0  ;;  %v694_v44 = vadd.f32 %v1844_v42, %v693_v33  ;;  %v734_v45 = vadd.f32 %v1844_v42, %v733_v34 }
  0xd7   : > { %v655_v37 = vpop.f32.mrf.mxu1  ;;  %v1592_v38 = vpop.eup %1591  ;;  %v1393_v39 = vpack.c.bf16 %v1590_v35, %v1586_v29  ;;  %v616_v40 = vadd.f32 %v1844_v42, %v615_v36 }
  0xd8   : > { %v656_v41 = vadd.f32 %v1844_v42, %v655_v37  ;;  %v1433_v43 = vpack.c.bf16 %v1592_v38, %v1588_v31  ;;  %v1594_v48 = vpop.eup %1593 }
  0xd9   : > { %1481 = vst [vmem:[%s1859_s7 + $0x88] sm:$0xff] %v1393_v39   ;;  %1597 = vtanh.f32 %v616_v40  ;;  %v1596_v53 = vpop.eup %1595 }
  0xda   : > { %1489 = vst [vmem:[%s1859_s7 + $0xc8] sm:$0xff] %v1433_v43   ;;  %1599 = vtanh.f32 %v656_v41 }
  0xdb   : > { %1601 = vtanh.f32 %v694_v44 }
  0xdc   : > { %1603 = vtanh.f32 %v734_v45 }
  0xdd   : > { %v695_v46 = vpop.f32.mrf.mxu2  ;;  %v735_v47 = vpop.f32.mrf.mxu3 }
  0xde   : > { %v696_v49 = vadd.f32 %v1844_v42, %v695_v46  ;;  %v736_v50 = vadd.f32 %v1844_v42, %v735_v47  ;;  %v618_v51 = vpop.f32.mrf.mxu0 }
  0xdf   : > { %v658_v52 = vpop.f32.mrf.mxu1  ;;  %v1598_v54 = vpop.eup %1597  ;;  %v619_v59 = vadd.f32 %v1844_v42, %v618_v51 }
  0xe0   : > { %1605 = vtanh.f32 %v696_v49  ;;  %v1600_v55 = vpop.eup %1599  ;;  %v1318_v56 = vpack.c.bf16 %v1598_v54, %v1594_v48  ;;  %v659_v61 = vadd.f32 %v1844_v42, %v658_v52 }
  0xe1   : > { %1607 = vtanh.f32 %v736_v50  ;;  %v1358_v57 = vpack.c.bf16 %v1600_v55, %v1596_v53  ;;  %v1602_v58 = vpop.eup %1601 }
  0xe2   : > { %1466 = vst [vmem:[%s1859_s7 + $0x10] sm:$0xff] %v1318_v56   ;;  %v1604_v60 = vpop.eup %1603  ;;  %1609 = vtanh.f32 %v619_v59 }
  0xe3   : > { %1474 = vst [vmem:[%s1859_s7 + $0x50] sm:$0xff] %v1358_v57   ;;  %1611 = vtanh.f32 %v659_v61 }
  0xe5   : > { %v698_v62 = vpop.f32.mrf.mxu2  ;;  %v738_v63 = vpop.f32.mrf.mxu3 }
  0xe6   : > { %v1606_v0 = vpop.eup %1605  ;;  %v620_v1 = vpop.f32.mrf.mxu0  ;;  %v699_v8 = vadd.f32 %v1844_v42, %v698_v62  ;;  %v739_v9 = vadd.f32 %v1844_v42, %v738_v63 }
  0xe7   : > { %v660_v2 = vpop.f32.mrf.mxu1  ;;  %v1608_v3 = vpop.eup %1607  ;;  %v1398_v4 = vpack.c.bf16 %v1606_v0, %v1602_v58  ;;  %v621_v5 = vadd.f32 %v1844_v42, %v620_v1 }
  0xe8   : > { %v661_v6 = vadd.f32 %v1844_v42, %v660_v2  ;;  %v1438_v7 = vpack.c.bf16 %v1608_v3, %v1604_v60  ;;  %v1610_v12 = vpop.eup %1609 }
  0xe9   : > { %1482 = vst [vmem:[%s1859_s7 + $0x90] sm:$0xff] %v1398_v4   ;;  %1613 = vtanh.f32 %v621_v5  ;;  %v1612_v17 = vpop.eup %1611 }
  0xea   : > { %1490 = vst [vmem:[%s1859_s7 + $0xd0] sm:$0xff] %v1438_v7   ;;  %1615 = vtanh.f32 %v661_v6 }
  0xeb   : > { %1617 = vtanh.f32 %v699_v8 }
  0xec   : > { %1619 = vtanh.f32 %v739_v9 }
  0xed   : > { %v700_v10 = vpop.f32.mrf.mxu2  ;;  %v740_v11 = vpop.f32.mrf.mxu3 }
  0xee   : > { %v701_v13 = vadd.f32 %v1844_v42, %v700_v10  ;;  %v741_v14 = vadd.f32 %v1844_v42, %v740_v11  ;;  %v623_v15 = vpop.f32.mrf.mxu0 }
  0xef   : > { %v663_v16 = vpop.f32.mrf.mxu1  ;;  %v1614_v18 = vpop.eup %1613  ;;  %v624_v23 = vadd.f32 %v1844_v42, %v623_v15 }
  0xf0   : > { %1621 = vtanh.f32 %v701_v13  ;;  %v1616_v19 = vpop.eup %1615  ;;  %v1323_v20 = vpack.c.bf16 %v1614_v18, %v1610_v12  ;;  %v664_v25 = vadd.f32 %v1844_v42, %v663_v16 }
  0xf1   : > { %1623 = vtanh.f32 %v741_v14  ;;  %v1363_v21 = vpack.c.bf16 %v1616_v19, %v1612_v17  ;;  %v1618_v22 = vpop.eup %1617 }
  0xf2   : > { %1467 = vst [vmem:[%s1859_s7 + $0x18] sm:$0xff] %v1323_v20   ;;  %v1620_v24 = vpop.eup %1619  ;;  %1625 = vtanh.f32 %v624_v23 }
  0xf3   : > { %1475 = vst [vmem:[%s1859_s7 + $0x58] sm:$0xff] %v1363_v21   ;;  %1627 = vtanh.f32 %v664_v25 }
  0xf5   : > { %v703_v26 = vpop.f32.mrf.mxu2  ;;  %v743_v27 = vpop.f32.mrf.mxu3 }
  0xf6   : > { %v1622_v28 = vpop.eup %1621  ;;  %v625_v29 = vpop.f32.mrf.mxu0  ;;  %v704_v36 = vadd.f32 %v1844_v42, %v703_v26  ;;  %v744_v37 = vadd.f32 %v1844_v42, %v743_v27 }
  0xf7   : > { %v665_v30 = vpop.f32.mrf.mxu1  ;;  %v1624_v31 = vpop.eup %1623  ;;  %v1403_v32 = vpack.c.bf16 %v1622_v28, %v1618_v22  ;;  %v626_v33 = vadd.f32 %v1844_v42, %v625_v29 }
  0xf8   : > { %v666_v34 = vadd.f32 %v1844_v42, %v665_v30  ;;  %v1443_v35 = vpack.c.bf16 %v1624_v31, %v1620_v24  ;;  %v1626_v40 = vpop.eup %1625 }
  0xf9   : > { %1483 = vst [vmem:[%s1859_s7 + $0x98] sm:$0xff] %v1403_v32   ;;  %1629 = vtanh.f32 %v626_v33  ;;  %v1628_v46 = vpop.eup %1627 }
  0xfa   : > { %1491 = vst [vmem:[%s1859_s7 + $0xd8] sm:$0xff] %v1443_v35   ;;  %1631 = vtanh.f32 %v666_v34 }
  0xfb   : > { %1633 = vtanh.f32 %v704_v36 }
  0xfc   : > { %1635 = vtanh.f32 %v744_v37 }
  0xfd   : > { %v705_v38 = vpop.f32.mrf.mxu2  ;;  %v745_v39 = vpop.f32.mrf.mxu3 }
  0xfe   : > { %v706_v41 = vadd.f32 %v1844_v42, %v705_v38  ;;  %v746_v43 = vadd.f32 %v1844_v42, %v745_v39  ;;  %v628_v44 = vpop.f32.mrf.mxu0 }
  0xff   : > { %v668_v45 = vpop.f32.mrf.mxu1  ;;  %v1630_v47 = vpop.eup %1629  ;;  %v629_v52 = vadd.f32 %v1844_v42, %v628_v44 }
 0x100   : > { %1637 = vtanh.f32 %v706_v41  ;;  %v1632_v48 = vpop.eup %1631  ;;  %v1328_v49 = vpack.c.bf16 %v1630_v47, %v1626_v40  ;;  %v669_v54 = vadd.f32 %v1844_v42, %v668_v45 }
 0x101   : > { %1639 = vtanh.f32 %v746_v43  ;;  %v1368_v50 = vpack.c.bf16 %v1632_v48, %v1628_v46  ;;  %v1634_v51 = vpop.eup %1633 }
 0x102   : > { %1468 = vst [vmem:[%s1859_s7 + $0x20] sm:$0xff] %v1328_v49   ;;  %v1636_v53 = vpop.eup %1635  ;;  %1641 = vtanh.f32 %v629_v52 }
 0x103   : > { %1476 = vst [vmem:[%s1859_s7 + $0x60] sm:$0xff] %v1368_v50   ;;  %1643 = vtanh.f32 %v669_v54 }
 0x105   : > { %v708_v55 = vpop.f32.mrf.mxu2  ;;  %v748_v56 = vpop.f32.mrf.mxu3 }
 0x106   : > { %v1638_v57 = vpop.eup %1637  ;;  %v630_v58 = vpop.f32.mrf.mxu0  ;;  %v709_v1 = vadd.f32 %v1844_v42, %v708_v55  ;;  %v749_v2 = vadd.f32 %v1844_v42, %v748_v56 }
 0x107   : > { %v670_v59 = vpop.f32.mrf.mxu1  ;;  %v1640_v60 = vpop.eup %1639  ;;  %v1408_v61 = vpack.c.bf16 %v1638_v57, %v1634_v51  ;;  %v631_v62 = vadd.f32 %v1844_v42, %v630_v58 }
 0x108   : > { %v671_v63 = vadd.f32 %v1844_v42, %v670_v59  ;;  %v1448_v0 = vpack.c.bf16 %v1640_v60, %v1636_v53  ;;  %v1642_v5 = vpop.eup %1641 }
 0x109   : > { %1484 = vst [vmem:[%s1859_s7 + $0xa0] sm:$0xff] %v1408_v61   ;;  %1645 = vtanh.f32 %v631_v62  ;;  %v1644_v10 = vpop.eup %1643 }
 0x10a   : > { %1492 = vst [vmem:[%s1859_s7 + $0xe0] sm:$0xff] %v1448_v0   ;;  %1647 = vtanh.f32 %v671_v63 }
 0x10b   : > { %1649 = vtanh.f32 %v709_v1 }
 0x10c   : > { %1651 = vtanh.f32 %v749_v2 }
 0x10d   : > { %v710_v3 = vpop.f32.mrf.mxu2  ;;  %v750_v4 = vpop.f32.mrf.mxu3 }
 0x10e   : > { %v711_v6 = vadd.f32 %v1844_v42, %v710_v3  ;;  %v751_v7 = vadd.f32 %v1844_v42, %v750_v4  ;;  %v633_v8 = vpop.f32.mrf.mxu0 }
 0x10f   : > { %v673_v9 = vpop.f32.mrf.mxu1  ;;  %v1646_v11 = vpop.eup %1645  ;;  %v634_v16 = vadd.f32 %v1844_v42, %v633_v8 }
 0x110   : > { %1653 = vtanh.f32 %v711_v6  ;;  %v1648_v12 = vpop.eup %1647  ;;  %v1333_v13 = vpack.c.bf16 %v1646_v11, %v1642_v5  ;;  %v674_v18 = vadd.f32 %v1844_v42, %v673_v9 }
 0x111   : > { %1655 = vtanh.f32 %v751_v7  ;;  %v1373_v14 = vpack.c.bf16 %v1648_v12, %v1644_v10  ;;  %v1650_v15 = vpop.eup %1649 }
 0x112   : > { %1469 = vst [vmem:[%s1859_s7 + $0x28] sm:$0xff] %v1333_v13   ;;  %v1652_v17 = vpop.eup %1651  ;;  %1657 = vtanh.f32 %v634_v16 }
 0x113   : > { %1477 = vst [vmem:[%s1859_s7 + $0x68] sm:$0xff] %v1373_v14   ;;  %1659 = vtanh.f32 %v674_v18 }
 0x115   : > { %v713_v19 = vpop.f32.mrf.mxu2  ;;  %v753_v20 = vpop.f32.mrf.mxu3 }
 0x116   : > { %v1654_v21 = vpop.eup %1653  ;;  %v635_v22 = vpop.f32.mrf.mxu0  ;;  %v714_v29 = vadd.f32 %v1844_v42, %v713_v19  ;;  %v754_v30 = vadd.f32 %v1844_v42, %v753_v20 }
 0x117   : > { %v675_v23 = vpop.f32.mrf.mxu1  ;;  %v1656_v24 = vpop.eup %1655  ;;  %v1413_v25 = vpack.c.bf16 %v1654_v21, %v1650_v15  ;;  %v636_v26 = vadd.f32 %v1844_v42, %v635_v22 }
 0x118   : > { %v676_v27 = vadd.f32 %v1844_v42, %v675_v23  ;;  %v1453_v28 = vpack.c.bf16 %v1656_v24, %v1652_v17  ;;  %v1658_v33 = vpop.eup %1657 }
 0x119   : > { %1485 = vst [vmem:[%s1859_s7 + $0xa8] sm:$0xff] %v1413_v25   ;;  %1661 = vtanh.f32 %v636_v26  ;;  %v1660_v38 = vpop.eup %1659 }
 0x11a   : > { %1493 = vst [vmem:[%s1859_s7 + $0xe8] sm:$0xff] %v1453_v28   ;;  %1663 = vtanh.f32 %v676_v27 }
 0x11b   : > { %1665 = vtanh.f32 %v714_v29 }
 0x11c   : > { %1667 = vtanh.f32 %v754_v30 }
 0x11d   : > { %v715_v31 = vpop.f32.mrf.mxu2  ;;  %v755_v32 = vpop.f32.mrf.mxu3 }
 0x11e   : > { %v716_v34 = vadd.f32 %v1844_v42, %v715_v31  ;;  %v756_v35 = vadd.f32 %v1844_v42, %v755_v32  ;;  %v638_v36 = vpop.f32.mrf.mxu0 }
 0x11f   : > { %v678_v37 = vpop.f32.mrf.mxu1  ;;  %v1662_v39 = vpop.eup %1661  ;;  %v639_v45 = vadd.f32 %v1844_v42, %v638_v36 }
 0x120   : > { %1669 = vtanh.f32 %v716_v34  ;;  %v1664_v40 = vpop.eup %1663  ;;  %v1338_v41 = vpack.c.bf16 %v1662_v39, %v1658_v33  ;;  %v679_v47 = vadd.f32 %v1844_v42, %v678_v37 }
 0x121   : > { %1671 = vtanh.f32 %v756_v35  ;;  %v1378_v43 = vpack.c.bf16 %v1664_v40, %v1660_v38  ;;  %v1666_v44 = vpop.eup %1665 }
 0x122   : > { %1470 = vst [vmem:[%s1859_s7 + $0x30] sm:$0xff] %v1338_v41   ;;  %v1668_v46 = vpop.eup %1667  ;;  %1673 = vtanh.f32 %v639_v45 }
 0x123   : > { %1478 = vst [vmem:[%s1859_s7 + $0x70] sm:$0xff] %v1378_v43   ;;  %1675 = vtanh.f32 %v679_v47 }
 0x125   : > { %v718_v48 = vpop.f32.mrf.mxu2  ;;  %v758_v49 = vpop.f32.mrf.mxu3 }
 0x126   : > { %v1670_v50 = vpop.eup %1669  ;;  %v640_v51 = vpop.f32.mrf.mxu0  ;;  %v719_v58 = vadd.f32 %v1844_v42, %v718_v48  ;;  %v759_v59 = vadd.f32 %v1844_v42, %v758_v49 }
 0x127   : > { %v680_v52 = vpop.f32.mrf.mxu1  ;;  %v1672_v53 = vpop.eup %1671  ;;  %v1418_v54 = vpack.c.bf16 %v1670_v50, %v1666_v44  ;;  %v641_v55 = vadd.f32 %v1844_v42, %v640_v51 }
 0x128   : > { %v681_v56 = vadd.f32 %v1844_v42, %v680_v52  ;;  %v1458_v57 = vpack.c.bf16 %v1672_v53, %v1668_v46  ;;  %v1674_v62 = vpop.eup %1673 }
 0x129   : > { %1486 = vst [vmem:[%s1859_s7 + $0xb0] sm:$0xff] %v1418_v54   ;;  %1677 = vtanh.f32 %v641_v55  ;;  %v1676_v1 = vpop.eup %1675 }
 0x12a   : > { %1494 = vst [vmem:[%s1859_s7 + $0xf0] sm:$0xff] %v1458_v57   ;;  %1679 = vtanh.f32 %v681_v56 }
 0x12b   : > { %1681 = vtanh.f32 %v719_v58 }
 0x12c   : > { %1683 = vtanh.f32 %v759_v59 }
 0x12d   : > { %v720_v60 = vpop.f32.mrf.mxu2  ;;  %v760_v61 = vpop.f32.mrf.mxu3 }
 0x12e   : > { %v721_v63 = vadd.f32 %v1844_v42, %v720_v60  ;;  %v761_v0 = vadd.f32 %v1844_v42, %v760_v61 }
 0x12f   : > { %v1678_v2 = vpop.eup %1677 }
 0x130   : > { %1685 = vtanh.f32 %v721_v63  ;;  %v1680_v3 = vpop.eup %1679  ;;  %v1343_v4 = vpack.c.bf16 %v1678_v2, %v1674_v62 }
 0x131   : > { %1687 = vtanh.f32 %v761_v0  ;;  %v1383_v5 = vpack.c.bf16 %v1680_v3, %v1676_v1  ;;  %v1682_v6 = vpop.eup %1681 }
 0x132   : > { %1471 = vst [vmem:[%s1859_s7 + $0x38] sm:$0xff] %v1343_v4   ;;  %v1684_v7 = vpop.eup %1683 }
 0x133   : > { %1479 = vst [vmem:[%s1859_s7 + $0x78] sm:$0xff] %v1383_v5  }
 0x136   : > { %v1686_v8 = vpop.eup %1685 }
 0x137   : > { %v1688_v9 = vpop.eup %1687  ;;  %v1423_v10 = vpack.c.bf16 %v1686_v8, %v1682_v6 }
 0x138   : > { %v1463_v11 = vpack.c.bf16 %v1688_v9, %v1684_v7 }
 0x139   : > { %1487 = vst [vmem:[%s1859_s7 + $0xb8] sm:$0xff] %v1423_v10  }
 0x13a   : > { %1495 = vst [vmem:[%s1859_s7 + $0xf8] sm:$0xff] %v1463_v11  }
 0x13b PF: > { %s13_s16 = sadd.s32 1, %s1727_s16   ;;  %s1968_s12 = smov %s1719_s14 }
 0x13c   : > { %p10_p7 = scmp.ge.s32.totalorder %s13_s16, 18   ;;  %s1969_s13 = smov %s1723_s15 }
 0x13d   : > { %s1970_s14 = smov %s1973_s17  ;;  %s1971_s15 = smov %s1977_s18 }
 0x13e   :  { %12 = sbr.rel (!%p10_p7) target bundleno = 3 (0x3), region = 68 }

</bundles_post_ra>
